<compile_context>
chip_gen: v7x
topology: tpu7x:2x2x1
jax: 0.10.0
libtpu: 0.0.40
codegen_flags: <defaults>
</compile_context>

<pallas_src>
import functools

import numpy as np
import jax
import jax.numpy as jnp
from jax.experimental import pallas as pl
from jax.experimental.pallas import tpu as pltpu

CP = 128                      # every channel axis padded to one 128-lane tile
F32 = jnp.float32
BF16 = jnp.bfloat16

_VMEM = pl.BlockSpec(memory_space=pltpu.MemorySpace.VMEM)


def _round_up(x, m):
    return (x + m - 1) // m * m


def _cparams(**kw):
    # Buffers here are < 2 MiB per call; 32 MiB is within every generation's cap.
    return pltpu.CompilerParams(vmem_limit_bytes=32 * 1024 * 1024, **kw)


# ---------------------------------------------------------------------------
# Pallas kernels
# ---------------------------------------------------------------------------
def _stem_kernel(x_ref, w_ref, b_ref, o_ref):
    """conv-as-matmul (bf16 MXU), BN1 scale folded into w, + bias + ReLU."""
    y = jnp.dot(x_ref[...], w_ref[...], preferred_element_type=F32)
    o_ref[...] = jnp.maximum(y + b_ref[...], 0.0)


def _maxpool_kernel(x_ref, o_ref, *, wp_in, hp_out, wp_out):
    """3x3 stride-2 max-pool; writes the decimated, ring-padded slab directly.
    x_ref: [rows, CP] f32 = zero-padded stem output (per image, row-major).
    o_ref: [hp_out*wp_out, CP] f32 slab with a zero ring around the interior."""
    o_ref[...] = jnp.zeros_like(o_ref)
    ow = wp_out - 2
    for i in range(hp_out - 2):
        m = None
        for di in range(3):
            for dj in range(3):
                start = (2 * i + di) * wp_in + dj
                t = x_ref[pl.ds(start, ow, stride=2), :]
                m = t if m is None else jnp.maximum(m, t)
        row = (i + 1) * wp_out + 1
        o_ref[row:row + ow, :] = m


def _dense_block_kernel(x_ref, mask_ref, s1_ref, b1_ref, w1_ref, b2_ref, w2_ref,
                        o_ref, scr_ref, *, wp, mp, halo):
    """One bottleneck layer per grid step; the slab (o_ref) stays VMEM-resident
    across the layer axis.  BN1+ReLU -> 1x1 conv (bn2 scale folded) -> +b2+ReLU
    -> 3x3 conv (9 row-shifted matmuls from a zero-haloed scratch) -> concat
    (exact add of disjoint lanes)."""
    l = pl.program_id(1)

    @pl.when(l == 0)
    def _():
        o_ref[...] = x_ref[...].astype(o_ref.dtype)

    mask = mask_ref[...]                                   # [mp, 1], 1.0 on interior rows
    x = o_ref[...].astype(F32)
    a1 = jnp.maximum(x * s1_ref[...] + b1_ref[...], 0.0)
    h1 = jnp.dot(a1.astype(BF16), w1_ref[...], preferred_element_type=F32)
    a2 = jnp.maximum(h1 + b2_ref[...], 0.0) * mask

    scr_ref[0:halo, :] = jnp.zeros((halo, CP), F32)
    scr_ref[halo:halo + mp, :] = a2
    scr_ref[halo + mp:mp + 2 * halo, :] = jnp.zeros((halo, CP), F32)

    acc = jnp.zeros((mp, CP), F32)
    for t in range(9):
        di, dj = t // 3, t % 3
        off = halo + (di - 1) * wp + (dj - 1)
        tap = scr_ref[off:off + mp, :].astype(BF16)
        acc = acc + jnp.dot(tap, w2_ref[t], preferred_element_type=F32)

    # growth channels live at lanes [cin, cin+growth): concat == add
    o_ref[...] = (acc * mask + x).astype(o_ref.dtype)


def _transition_kernel(x_ref, w_ref, b_ref, o_ref, scr_ref, *, wp_in, hp_out, wp_out):
    """1x1 conv with BN fully folded (w' = diag(s)w, b' = b@w; no ReLU in the
    reference transition) then 2x2 stride-2 avg-pool, written directly as the
    decimated, ring-padded slab for the next block."""
    y = jnp.dot(x_ref[...], w_ref[...], preferred_element_type=F32) + b_ref[...]
    scr_ref[...] = y
    o_ref[...] = jnp.zeros_like(o_ref)
    ow = wp_out - 2
    for i in range(hp_out - 2):
        acc = None
        for di in range(2):
            for dj in range(2):
                start = (2 * i + di + 1) * wp_in + (dj + 1)
                t = scr_ref[pl.ds(start, ow, stride=2), :]
                acc = t if acc is None else acc + t
        row = (i + 1) * wp_out + 1
        o_ref[row:row + ow, :] = acc * 0.25


def _head_kernel(x_ref, mask_ref, s_ref, b_ref, w_ref, fb_ref, o_ref, *, inv_area):
    """BN2 + ReLU + global 7x7 avg pool + FC (bf16 MXU)."""
    a = jnp.maximum(x_ref[...].astype(F32) * s_ref[...] + b_ref[...], 0.0) * mask_ref[...]
    pooled = jnp.sum(a, axis=1) * inv_area                 # [N, CP]
    o_ref[...] = jnp.dot(pooled.astype(BF16), w_ref[...],
                         preferred_element_type=F32) + fb_ref[...]


# ---------------------------------------------------------------------------
# Pallas wrappers
# ---------------------------------------------------------------------------
def stem_conv(patches, w_bf16, bias):
    m, kp = patches.shape
    tm = min(1024, _round_up(max(8, (m + 1) // 2), 8))     # grid >= 2 (megacore split)
    mp = _round_up(m, tm)
    if mp != m:
        patches = jnp.pad(patches, ((0, mp - m), (0, 0)))
    out = pl.pallas_call(
        _stem_kernel,
        grid=(mp // tm,),
        in_specs=[pl.BlockSpec((tm, kp), lambda i: (i, 0)),
                  pl.BlockSpec((kp, CP), lambda i: (0, 0)),
                  pl.BlockSpec((1, CP), lambda i: (0, 0))],
        out_specs=pl.BlockSpec((tm, CP), lambda i: (i, 0)),
        out_shape=jax.ShapeDtypeStruct((mp, CP), F32),
        compiler_params=_cparams(dimension_semantics=("parallel",)),
    )(patches, w_bf16, bias)
    return out[:m] if mp != m else out


def maxpool3x3s2(x_pad, wp_in, hp_out, wp_out):
    n, rows, _ = x_pad.shape
    mp_out = hp_out * wp_out
    return pl.pallas_call(
        functools.partial(_maxpool_kernel, wp_in=wp_in, hp_out=hp_out, wp_out=wp_out),
        grid=(n,),
        in_specs=[pl.BlockSpec((None, rows, CP), lambda b: (b, 0, 0))],
        out_specs=pl.BlockSpec((None, mp_out, CP), lambda b: (b, 0, 0)),
        out_shape=jax.ShapeDtypeStruct((n, mp_out, CP), F32),
        compiler_params=_cparams(dimension_semantics=("parallel",)),
    )(x_pad)


def dense_block(feat, layers, mask, wp):
    n, mp, _ = feat.shape
    num_layers = layers["w1"].shape[0]
    halo = _round_up(wp + 2, 8)
    return pl.pallas_call(
        functools.partial(_dense_block_kernel, wp=wp, mp=mp, halo=halo),
        grid=(n, num_layers),
        in_specs=[
            pl.BlockSpec((None, mp, CP), lambda b, l: (b, 0, 0)),      # feat (f32 in)
            pl.BlockSpec((mp, 1), lambda b, l: (0, 0)),                # interior mask
            pl.BlockSpec((None, 1, CP), lambda b, l: (l, 0, 0)),       # bn1 scale
            pl.BlockSpec((None, 1, CP), lambda b, l: (l, 0, 0)),       # bn1 bias
            pl.BlockSpec((None, CP, CP), lambda b, l: (l, 0, 0)),      # w1 (bn2 scale folded)
            pl.BlockSpec((None, 1, CP), lambda b, l: (l, 0, 0)),       # bn2 bias
            pl.BlockSpec((None, 9, CP, CP), lambda b, l: (l, 0, 0, 0)),  # 3x3 taps
        ],
        out_specs=pl.BlockSpec((None, mp, CP), lambda b, l: (b, 0, 0)),  # resident slab
        out_shape=jax.ShapeDtypeStruct((n, mp, CP), BF16),
        scratch_shapes=[pltpu.VMEM((mp + 2 * halo, CP), F32)],
        compiler_params=_cparams(dimension_semantics=("parallel", "arbitrary")),
    )(feat, mask, layers["s1"], layers["b1"], layers["w1"], layers["b2"], layers["w2"])


def transition(feat, tparams, wp_in, hp_out, wp_out):
    n, mp_in, _ = feat.shape
    mp_out = _round_up(hp_out * wp_out, 8)
    return pl.pallas_call(
        functools.partial(_transition_kernel, wp_in=wp_in, hp_out=hp_out, wp_out=wp_out),
        grid=(n,),
        in_specs=[
            pl.BlockSpec((None, mp_in, CP), lambda b: (b, 0, 0)),
            pl.BlockSpec((CP, CP), lambda b: (0, 0)),
            pl.BlockSpec((1, CP), lambda b: (0, 0)),
        ],
        out_specs=pl.BlockSpec((None, mp_out, CP), lambda b: (b, 0, 0)),
        out_shape=jax.ShapeDtypeStruct((n, mp_out, CP), F32),
        scratch_shapes=[pltpu.VMEM((mp_in, CP), F32)],
        compiler_params=_cparams(dimension_semantics=("parallel",)),
    )(feat, tparams["w"], tparams["b"])


def head(feat, mask, hparams, *, inv_area):
    n = feat.shape[0]
    return pl.pallas_call(
        functools.partial(_head_kernel, inv_area=inv_area),
        out_shape=jax.ShapeDtypeStruct((n, CP), F32),
        in_specs=[_VMEM] * 6,
        out_specs=_VMEM,
        compiler_params=_cparams(),
    )(feat, mask, hparams["s"], hparams["b"], hparams["fc_w"], hparams["fc_b"])


# ---------------------------------------------------------------------------
# JAX glue (layout only)
# ---------------------------------------------------------------------------
def im2col(x, kh, kw, stride, pad):
    """x: [N,H,W,C] -> patches [N*OH*OW, kh*kw*C] (tap-major, channel-minor)."""
    n, h, w, c = x.shape
    xp = jnp.pad(x, ((0, 0), (pad, pad), (pad, pad), (0, 0)))
    oh = (h + 2 * pad - kh) // stride + 1
    ow = (w + 2 * pad - kw) // stride + 1
    cols = []
    for i in range(kh):
        for j in range(kw):
            cols.append(xp[:, i:i + stride * oh:stride, j:j + stride * ow:stride, :])
    patches = jnp.concatenate(cols, axis=-1)
    return patches.reshape(n * oh * ow, kh * kw * c), n, oh, ow


def interior_mask(hp, wp, mp):
    """[mp,1] f32 mask: 1.0 on interior rows of an hp x wp ring-padded slab."""
    m = np.zeros((mp, 1), np.float32)
    for h in range(1, hp - 1):
        base = h * wp
        m[base + 1:base + wp - 1, 0] = 1.0
    return jnp.asarray(m)


# ---------------------------------------------------------------------------
# Parameters (deterministic, pre-folded BN, lane-padded, bf16 matmul weights)
# ---------------------------------------------------------------------------
def _bn_fold(key, c, eps=1e-5):
    k1, k2, k3, k4 = jax.random.split(key, 4)
    gamma = 1.0 + 0.1 * jax.random.normal(k1, (c,), F32)
    beta = 0.1 * jax.random.normal(k2, (c,), F32)
    mean = 0.1 * jax.random.normal(k3, (c,), F32)
    var = 1.0 + 0.1 * jnp.abs(jax.random.normal(k4, (c,), F32))
    scale = gamma / jnp.sqrt(var + eps)
    bias = beta - mean * scale
    s = jnp.zeros((1, CP), F32).at[0, :c].set(scale)
    b = jnp.zeros((1, CP), F32).at[0, :c].set(bias)
    return s, b


def _conv1x1_w(key, cin, cout):
    w = jax.random.normal(key, (cin, cout), F32) / jnp.sqrt(float(cin))
    return jnp.zeros((CP, CP), F32).at[:cin, :cout].set(w)


def _conv3x3_w(key, cin, cout, out_off):
    """9-tap 3x3 weight; output columns placed at lanes [out_off, out_off+cout)."""
    w = jax.random.normal(key, (3, 3, cin, cout), F32) / jnp.sqrt(9.0 * cin)
    wp_ = jnp.zeros((9, CP, CP), F32)
    wp_ = wp_.at[:, :cin, out_off:out_off + cout].set(w.reshape(9, cin, cout))
    return wp_.astype(BF16)


def init_params(key, num_blocks, growth_rate, num_classes):
    keys = iter(jax.random.split(key, 256))
    c0 = 2 * growth_rate

    # stem: 7x7 conv, K padded to 256, BN1 scale folded into output columns
    kdim = 7 * 7 * 3
    kp = _round_up(kdim, 128)
    sw = jax.random.normal(next(keys), (7, 7, 3, c0), F32) / jnp.sqrt(float(kdim))
    s1, b1 = _bn_fold(next(keys), c0)
    stem_w = jnp.zeros((kp, CP), F32).at[:kdim, :c0].set(sw.reshape(kdim, c0))
    stem = dict(w=(stem_w * s1).astype(BF16), b=b1)

    stages = []
    in_c = c0
    for i, num_layers in enumerate(num_blocks):
        s1s, b1s, w1s, b2s, w2s = [], [], [], [], []
        for l in range(num_layers):
            lc = in_c + l * growth_rate
            ls1, lb1 = _bn_fold(next(keys), lc)
            w1 = _conv1x1_w(next(keys), lc, 4 * growth_rate)
            ls2, lb2 = _bn_fold(next(keys), 4 * growth_rate)
            w1 = (w1 * ls2).astype(BF16)                 # fold BN2 scale into w1 columns
            w2 = _conv3x3_w(next(keys), 4 * growth_rate, growth_rate, out_off=lc)
            s1s.append(ls1); b1s.append(lb1); w1s.append(w1)
            b2s.append(lb2); w2s.append(w2)
        layers = dict(s1=jnp.stack(s1s), b1=jnp.stack(b1s), w1=jnp.stack(w1s),
                      b2=jnp.stack(b2s), w2=jnp.stack(w2s))
        in_c += num_layers * growth_rate
        trans = None
        if i != len(num_blocks) - 1:
            out_c = in_c // 2
            ts, tb = _bn_fold(next(keys), in_c)
            tw = _conv1x1_w(next(keys), in_c, out_c)
            trans = dict(w=(ts[0][:, None] * tw).astype(BF16),   # diag(s) @ w
                         b=jnp.matmul(tb, tw))                   # b @ w
            in_c = out_c
        stages.append(dict(layers=layers, trans=trans))

    hs, hb = _bn_fold(next(keys), in_c)
    fc = jax.random.normal(next(keys), (in_c, num_classes), F32) / jnp.sqrt(float(in_c))
    fc_w = jnp.zeros((CP, CP), F32).at[:in_c, :num_classes].set(fc).astype(BF16)
    fb = 0.01 * jax.random.normal(next(keys), (num_classes,), F32)
    fc_b = jnp.zeros((1, CP), F32).at[0, :num_classes].set(fb)
    head_p = dict(s=hs.reshape(1, 1, CP), b=hb.reshape(1, 1, CP), fc_w=fc_w, fc_b=fc_b)

    return dict(stem=stem, stages=stages, head=head_p)


# ---------------------------------------------------------------------------
# Forward pass
# ---------------------------------------------------------------------------
def densenet_forward(x_nchw, params, *, num_classes):
    x = jnp.transpose(x_nchw, (0, 2, 3, 1)).astype(F32)   # NCHW -> NHWC

    # ---- stem: conv 7x7 s2 p3 (+folded BN1, ReLU), bf16 patches, K padded ----
    patches, n, oh, ow = im2col(x, 7, 7, 2, 3)
    kp = _round_up(patches.shape[1], 128)
    patches = jnp.pad(patches, ((0, 0), (0, kp - patches.shape[1]))).astype(BF16)
    y = stem_conv(patches, params["stem"]["w"], params["stem"]["b"])
    y = y.reshape(n, oh, ow, CP)

    # ---- maxpool 3x3 s2 p1, decimated + ring-padded slab written directly ----
    assert oh % 2 == 0 and ow % 2 == 0
    hp_in, wp_in = oh + 2, ow + 2
    h_sp, w_sp = oh // 2, ow // 2
    hp, wp = h_sp + 2, w_sp + 2
    rows = _round_up(hp_in * wp_in, 8)
    ypad = jnp.pad(y, ((0, 0), (1, 1), (1, 1), (0, 0))).reshape(n, hp_in * wp_in, CP)
    ypad = jnp.pad(ypad, ((0, 0), (0, rows - hp_in * wp_in), (0, 0)))
    feat = maxpool3x3s2(ypad, wp_in, hp, wp)               # [n, hp*wp, CP] f32

    # ---- dense blocks / transitions ------------------------------------------
    for stage in params["stages"]:
        mp = feat.shape[1]
        mask = interior_mask(hp, wp, mp)
        feat = dense_block(feat, stage["layers"], mask, wp)      # bf16 slab
        if stage["trans"] is not None:
            assert h_sp % 2 == 0 and w_sp % 2 == 0
            h_sp, w_sp = h_sp // 2, w_sp // 2
            hp_o, wp_o = h_sp + 2, w_sp + 2
            feat = transition(feat, stage["trans"], wp, hp_o, wp_o)
            hp, wp = hp_o, wp_o

    # ---- head: BN2 + ReLU + AvgPool2d(7) + flatten + FC -----------------------
    assert h_sp == 7 and w_sp == 7, "final spatial must be 7x7 for AvgPool2d(7)"
    mp = feat.shape[1]
    mask = interior_mask(hp, wp, mp)
    logits = head(feat, mask, params["head"], inv_area=1.0 / float(h_sp * w_sp))
    return logits[:, :num_classes]


# ---------------------------------------------------------------------------
if __name__ == "__main__":
    num_blocks = (2, 2)
    growth_rate = 4
    num_classes = 5

    key = jax.random.PRNGKey(0)
    pkey, xkey = jax.random.split(key)
    params = init_params(pkey, num_blocks, growth_rate, num_classes)

    # 56x56 input: conv s2 -> 28, maxpool -> 14, transition -> 7, AvgPool2d(7) -> 1x1.
    x = jax.random.normal(xkey, (2, 3, 56, 56), F32)

    fwd = jax.jit(functools.partial(densenet_forward, num_classes=num_classes))
    out = jax.block_until_ready(fwd(x, params))
    assert out.shape == (2, num_classes)
    assert bool(jnp.all(jnp.isfinite(out)))
    print("KERNEL_OK")
</pallas_src>

<mosaic_0001>
module attributes {stable_mosaic.version = 11 : i64} {
  func.func @_stem_kernel(%arg0: i32, %arg1: memref<784x256xbf16, #tpu.memory_space<vmem>>, %arg2: memref<256x128xbf16, #tpu.memory_space<vmem>>, %arg3: memref<1x128xf32, #tpu.memory_space<vmem>>, %arg4: memref<784x128xf32, #tpu.memory_space<vmem>>) attributes {dimension_semantics = [#tpu.dimension_semantics<parallel>], iteration_bounds = array<i64: 2>, scalar_prefetch = 0 : i64, scratch_operands = 0 : i64, tpu.core_type = #tpu.core_type<tc>, window_params = [{transform_indices = @transform_0, window_bounds = array<i64: 784, 256>}, {pipeline_mode = #tpu.pipeline_mode<synchronous>, transform_indices = @transform_1, window_bounds = array<i64: 256, 128>}, {pipeline_mode = #tpu.pipeline_mode<synchronous>, transform_indices = @transform_2, window_bounds = array<i64: 1, 128>}, {transform_indices = @transform_3, window_bounds = array<i64: 784, 128>}]} {
    %c0 = arith.constant 0 : index
    %c0_0 = arith.constant 0 : index
    %0 = vector.load %arg1[%c0, %c0_0] : memref<784x256xbf16, #tpu.memory_space<vmem>>, vector<784x256xbf16>
    %c0_1 = arith.constant 0 : index
    %c0_2 = arith.constant 0 : index
    %1 = vector.load %arg2[%c0_1, %c0_2] : memref<256x128xbf16, #tpu.memory_space<vmem>>, vector<256x128xbf16>
    %cst = arith.constant dense<0.000000e+00> : vector<784x128xf32>
    %2 = tpu.matmul %0, %1, %cst {dimension_numbers = #tpu.dot_dimension_numbers<[1], [0], [0], [1], [0, 0, 1, 1], [], []>} : vector<784x256xbf16>, vector<256x128xbf16>, vector<784x128xf32> -> vector<784x128xf32>
    %c0_3 = arith.constant 0 : index
    %c0_4 = arith.constant 0 : index
    %3 = vector.load %arg3[%c0_3, %c0_4] : memref<1x128xf32, #tpu.memory_space<vmem>>, vector<1x128xf32>
    %4 = vector.broadcast %3 : vector<1x128xf32> to vector<784x128xf32>
    %5 = arith.addf %2, %4 : vector<784x128xf32>
    %cst_5 = arith.constant 0.000000e+00 : f32
    %6 = vector.broadcast %cst_5 : f32 to vector<784x128xf32>
    %7 = arith.maximumf %5, %6 : vector<784x128xf32>
    %c0_6 = arith.constant 0 : index
    %c0_7 = arith.constant 0 : index
    %8 = vector.load %arg4[%c0_6, %c0_7] : memref<784x128xf32, #tpu.memory_space<vmem>>, vector<784x128xf32>
    tpu.vector_store %arg4[%c0_6, %c0_7], %7 {strides = array<i32>} : memref<784x128xf32, #tpu.memory_space<vmem>>, vector<784x128xf32>,
    return
  }
  func.func @transform_0(%arg0: i32) -> (i32, i32) {
    %c0_i32 = arith.constant 0 : i32
    %c0_i32_0 = arith.constant 0 : i32
    return %arg0, %c0_i32 : i32, i32
  }
  func.func @transform_1(%arg0: i32) -> (i32, i32) {
    %c0_i32 = arith.constant 0 : i32
    %c0_i32_0 = arith.constant 0 : i32
    %c0_i32_1 = arith.constant 0 : i32
    return %c0_i32, %c0_i32_0 : i32, i32
  }
  func.func @transform_2(%arg0: i32) -> (i32, i32) {
    %c0_i32 = arith.constant 0 : i32
    %c0_i32_0 = arith.constant 0 : i32
    %c0_i32_1 = arith.constant 0 : i32
    return %c0_i32, %c0_i32_0 : i32, i32
  }
  func.func @transform_3(%arg0: i32) -> (i32, i32) {
    %c0_i32 = arith.constant 0 : i32
    %c0_i32_0 = arith.constant 0 : i32
    return %arg0, %c0_i32 : i32, i32
  }
}

module attributes {stable_mosaic.version = 11 : i64} {
  func.func @_maxpool_kernel(%arg0: i32, %arg1: memref<1x904x128xf32, #tpu.memory_space<vmem>>, %arg2: memref<1x256x128xf32, #tpu.memory_space<vmem>>) attributes {dimension_semantics = [#tpu.dimension_semantics<parallel>], iteration_bounds = array<i64: 2>, scalar_prefetch = 0 : i64, scratch_operands = 0 : i64, tpu.core_type = #tpu.core_type<tc>, window_params = [{transform_indices = @transform_0, window_bounds = array<i64: 1, 904, 128>}, {transform_indices = @transform_1, window_bounds = array<i64: 1, 256, 128>}]} {
    %cst = arith.constant 0.000000e+00 : f32
    %0 = vector.broadcast %cst : f32 to vector<256x128xf32>
    %c0 = arith.constant 0 : index
    %c0_0 = arith.constant 0 : index
    %c0_1 = arith.constant 0 : index
    %1 = vector.load %arg2[%c0, %c0_0, %c0_1] : memref<1x256x128xf32, #tpu.memory_space<vmem>>, vector<1x256x128xf32>
    %2 = vector.shape_cast %1 : vector<1x256x128xf32> to vector<256x128xf32>
    %3 = vector.shape_cast %0 : vector<256x128xf32> to vector<1x256x128xf32>
    tpu.vector_store %arg2[%c0, %c0_0, %c0_1], %3 {strides = array<i32>} : memref<1x256x128xf32, #tpu.memory_space<vmem>>, vector<1x256x128xf32>,
    %c0_2 = arith.constant 0 : index
    %c0_3 = arith.constant 0 : index
    %c0_4 = arith.constant 0 : index
    %4 = tpu.strided_load %arg1[%c0_2, %c0_3, %c0_4] {strides = array<i32: 1, 2, 1>} : memref<1x904x128xf32, #tpu.memory_space<vmem>>, vector<1x14x128xf32>
    %5 = vector.shape_cast %4 : vector<1x14x128xf32> to vector<14x128xf32>
    %c0_5 = arith.constant 0 : index
    %c1 = arith.constant 1 : index
    %c0_6 = arith.constant 0 : index
    %6 = tpu.strided_load %arg1[%c0_5, %c1, %c0_6] {strides = array<i32: 1, 2, 1>} : memref<1x904x128xf32, #tpu.memory_space<vmem>>, vector<1x14x128xf32>
    %7 = vector.shape_cast %6 : vector<1x14x128xf32> to vector<14x128xf32>
    %8 = arith.maximumf %5, %7 : vector<14x128xf32>
    %c0_7 = arith.constant 0 : index
    %c2 = arith.constant 2 : index
    %c0_8 = arith.constant 0 : index
    %9 = tpu.strided_load %arg1[%c0_7, %c2, %c0_8] {strides = array<i32: 1, 2, 1>} : memref<1x904x128xf32, #tpu.memory_space<vmem>>, vector<1x14x128xf32>
    %10 = vector.shape_cast %9 : vector<1x14x128xf32> to vector<14x128xf32>
    %11 = arith.maximumf %8, %10 : vector<14x128xf32>
    %c0_9 = arith.constant 0 : index
    %c30 = arith.constant 30 : index
    %c0_10 = arith.constant 0 : index
    %12 = tpu.strided_load %arg1[%c0_9, %c30, %c0_10] {strides = array<i32: 1, 2, 1>} : memref<1x904x128xf32, #tpu.memory_space<vmem>>, vector<1x14x128xf32>
    %13 = vector.shape_cast %12 : vector<1x14x128xf32> to vector<14x128xf32>
    %14 = arith.maximumf %11, %13 : vector<14x128xf32>
    %c0_11 = arith.constant 0 : index
    %c31 = arith.constant 31 : index
    %c0_12 = arith.constant 0 : index
    %15 = tpu.strided_load %arg1[%c0_11, %c31, %c0_12] {strides = array<i32: 1, 2, 1>} : memref<1x904x128xf32, #tpu.memory_space<vmem>>, vector<1x14x128xf32>
    %16 = vector.shape_cast %15 : vector<1x14x128xf32> to vector<14x128xf32>
    %17 = arith.maximumf %14, %16 : vector<14x128xf32>
    %c0_13 = arith.constant 0 : index
    %c32 = arith.constant 32 : index
    %c0_14 = arith.constant 0 : index
    %18 = tpu.strided_load %arg1[%c0_13, %c32, %c0_14] {strides = array<i32: 1, 2, 1>} : memref<1x904x128xf32, #tpu.memory_space<vmem>>, vector<1x14x128xf32>
    %19 = vector.shape_cast %18 : vector<1x14x128xf32> to vector<14x128xf32>
    %20 = arith.maximumf %17, %19 : vector<14x128xf32>
    %c0_15 = arith.constant 0 : index
    %c60 = arith.constant 60 : index
    %c0_16 = arith.constant 0 : index
    %21 = tpu.strided_load %arg1[%c0_15, %c60, %c0_16] {strides = array<i32: 1, 2, 1>} : memref<1x904x128xf32, #tpu.memory_space<vmem>>, vector<1x14x128xf32>
    %22 = vector.shape_cast %21 : vector<1x14x128xf32> to vector<14x128xf32>
    %23 = arith.maximumf %20, %22 : vector<14x128xf32>
    %c0_17 = arith.constant 0 : index
    %c61 = arith.constant 61 : index
    %c0_18 = arith.constant 0 : index
    %24 = tpu.strided_load %arg1[%c0_17, %c61, %c0_18] {strides = array<i32: 1, 2, 1>} : memref<1x904x128xf32, #tpu.memory_space<vmem>>, vector<1x14x128xf32>
    %25 = vector.shape_cast %24 : vector<1x14x128xf32> to vector<14x128xf32>
    %26 = arith.maximumf %23, %25 : vector<14x128xf32>
    %c0_19 = arith.constant 0 : index
    %c62 = arith.constant 62 : index
    %c0_20 = arith.constant 0 : index
    %27 = tpu.strided_load %arg1[%c0_19, %c62, %c0_20] {strides = array<i32: 1, 2, 1>} : memref<1x904x128xf32, #tpu.memory_space<vmem>>, vector<1x14x128xf32>
    %28 = vector.shape_cast %27 : vector<1x14x128xf32> to vector<14x128xf32>
    %29 = arith.maximumf %26, %28 : vector<14x128xf32>
    %c0_21 = arith.constant 0 : index
    %c17 = arith.constant 17 : index
    %c0_22 = arith.constant 0 : index
    %30 = vector.load %arg2[%c0_21, %c17, %c0_22] : memref<1x256x128xf32, #tpu.memory_space<vmem>>, vector<1x14x128xf32>
    %31 = vector.shape_cast %30 : vector<1x14x128xf32> to vector<14x128xf32>
    %32 = vector.shape_cast %29 : vector<14x128xf32> to vector<1x14x128xf32>
    tpu.vector_store %arg2[%c0_21, %c17, %c0_22], %32 {strides = array<i32>} : memref<1x256x128xf32, #tpu.memory_space<vmem>>, vector<1x14x128xf32>,
    %c0_23 = arith.constant 0 : index
    %c60_24 = arith.constant 60 : index
    %c0_25 = arith.constant 0 : index
    %33 = tpu.strided_load %arg1[%c0_23, %c60_24, %c0_25] {strides = array<i32: 1, 2, 1>} : memref<1x904x128xf32, #tpu.memory_space<vmem>>, vector<1x14x128xf32>
    %34 = vector.shape_cast %33 : vector<1x14x128xf32> to vector<14x128xf32>
    %c0_26 = arith.constant 0 : index
    %c61_27 = arith.constant 61 : index
    %c0_28 = arith.constant 0 : index
    %35 = tpu.strided_load %arg1[%c0_26, %c61_27, %c0_28] {strides = array<i32: 1, 2, 1>} : memref<1x904x128xf32, #tpu.memory_space<vmem>>, vector<1x14x128xf32>
    %36 = vector.shape_cast %35 : vector<1x14x128xf32> to vector<14x128xf32>
    %37 = arith.maximumf %34, %36 : vector<14x128xf32>
    %c0_29 = arith.constant 0 : index
    %c62_30 = arith.constant 62 : index
    %c0_31 = arith.constant 0 : index
    %38 = tpu.strided_load %arg1[%c0_29, %c62_30, %c0_31] {strides = array<i32: 1, 2, 1>} : memref<1x904x128xf32, #tpu.memory_space<vmem>>, vector<1x14x128xf32>
    %39 = vector.shape_cast %38 : vector<1x14x128xf32> to vector<14x128xf32>
    %40 = arith.maximumf %37, %39 : vector<14x128xf32>
    %c0_32 = arith.constant 0 : index
    %c90 = arith.constant 90 : index
    %c0_33 = arith.constant 0 : index
    %41 = tpu.strided_load %arg1[%c0_32, %c90, %c0_33] {strides = array<i32: 1, 2, 1>} : memref<1x904x128xf32, #tpu.memory_space<vmem>>, vector<1x14x128xf32>
    %42 = vector.shape_cast %41 : vector<1x14x128xf32> to vector<14x128xf32>
    %43 = arith.maximumf %40, %42 : vector<14x128xf32>
    %c0_34 = arith.constant 0 : index
    %c91 = arith.constant 91 : index
    %c0_35 = arith.constant 0 : index
    %44 = tpu.strided_load %arg1[%c0_34, %c91, %c0_35] {strides = array<i32: 1, 2, 1>} : memref<1x904x128xf32, #tpu.memory_space<vmem>>, vector<1x14x128xf32>
    %45 = vector.shape_cast %44 : vector<1x14x128xf32> to vector<14x128xf32>
    %46 = arith.maximumf %43, %45 : vector<14x128xf32>
    %c0_36 = arith.constant 0 : index
    %c92 = arith.constant 92 : index
    %c0_37 = arith.constant 0 : index
    %47 = tpu.strided_load %arg1[%c0_36, %c92, %c0_37] {strides = array<i32: 1, 2, 1>} : memref<1x904x128xf32, #tpu.memory_space<vmem>>, vector<1x14x128xf32>
    %48 = vector.shape_cast %47 : vector<1x14x128xf32> to vector<14x128xf32>
    %49 = arith.maximumf %46, %48 : vector<14x128xf32>
    %c0_38 = arith.constant 0 : index
    %c120 = arith.constant 120 : index
    %c0_39 = arith.constant 0 : index
    %50 = tpu.strided_load %arg1[%c0_38, %c120, %c0_39] {strides = array<i32: 1, 2, 1>} : memref<1x904x128xf32, #tpu.memory_space<vmem>>, vector<1x14x128xf32>
    %51 = vector.shape_cast %50 : vector<1x14x128xf32> to vector<14x128xf32>
    %52 = arith.maximumf %49, %51 : vector<14x128xf32>
    %c0_40 = arith.constant 0 : index
    %c121 = arith.constant 121 : index
    %c0_41 = arith.constant 0 : index
    %53 = tpu.strided_load %arg1[%c0_40, %c121, %c0_41] {strides = array<i32: 1, 2, 1>} : memref<1x904x128xf32, #tpu.memory_space<vmem>>, vector<1x14x128xf32>
    %54 = vector.shape_cast %53 : vector<1x14x128xf32> to vector<14x128xf32>
    %55 = arith.maximumf %52, %54 : vector<14x128xf32>
    %c0_42 = arith.constant 0 : index
    %c122 = arith.constant 122 : index
    %c0_43 = arith.constant 0 : index
    %56 = tpu.strided_load %arg1[%c0_42, %c122, %c0_43] {strides = array<i32: 1, 2, 1>} : memref<1x904x128xf32, #tpu.memory_space<vmem>>, vector<1x14x128xf32>
    %57 = vector.shape_cast %56 : vector<1x14x128xf32> to vector<14x128xf32>
    %58 = arith.maximumf %55, %57 : vector<14x128xf32>
    %c0_44 = arith.constant 0 : index
    %c33 = arith.constant 33 : index
    %c0_45 = arith.constant 0 : index
    %59 = vector.load %arg2[%c0_44, %c33, %c0_45] : memref<1x256x128xf32, #tpu.memory_space<vmem>>, vector<1x14x128xf32>
    %60 = vector.shape_cast %59 : vector<1x14x128xf32> to vector<14x128xf32>
    %61 = vector.shape_cast %58 : vector<14x128xf32> to vector<1x14x128xf32>
    tpu.vector_store %arg2[%c0_44, %c33, %c0_45], %61 {strides = array<i32>} : memref<1x256x128xf32, #tpu.memory_space<vmem>>, vector<1x14x128xf32>,
    %c0_46 = arith.constant 0 : index
    %c120_47 = arith.constant 120 : index
    %c0_48 = arith.constant 0 : index
    %62 = tpu.strided_load %arg1[%c0_46, %c120_47, %c0_48] {strides = array<i32: 1, 2, 1>} : memref<1x904x128xf32, #tpu.memory_space<vmem>>, vector<1x14x128xf32>
    %63 = vector.shape_cast %62 : vector<1x14x128xf32> to vector<14x128xf32>
    %c0_49 = arith.constant 0 : index
    %c121_50 = arith.constant 121 : index
    %c0_51 = arith.constant 0 : index
    %64 = tpu.strided_load %arg1[%c0_49, %c121_50, %c0_51] {strides = array<i32: 1, 2, 1>} : memref<1x904x128xf32, #tpu.memory_space<vmem>>, vector<1x14x128xf32>
    %65 = vector.shape_cast %64 : vector<1x14x128xf32> to vector<14x128xf32>
    %66 = arith.maximumf %63, %65 : vector<14x128xf32>
    %c0_52 = arith.constant 0 : index
    %c122_53 = arith.constant 122 : index
    %c0_54 = arith.constant 0 : index
    %67 = tpu.strided_load %arg1[%c0_52, %c122_53, %c0_54] {strides = array<i32: 1, 2, 1>} : memref<1x904x128xf32, #tpu.memory_space<vmem>>, vector<1x14x128xf32>
    %68 = vector.shape_cast %67 : vector<1x14x128xf32> to vector<14x128xf32>
    %69 = arith.maximumf %66, %68 : vector<14x128xf32>
    %c0_55 = arith.constant 0 : index
    %c150 = arith.constant 150 : index
    %c0_56 = arith.constant 0 : index
    %70 = tpu.strided_load %arg1[%c0_55, %c150, %c0_56] {strides = array<i32: 1, 2, 1>} : memref<1x904x128xf32, #tpu.memory_space<vmem>>, vector<1x14x128xf32>
    %71 = vector.shape_cast %70 : vector<1x14x128xf32> to vector<14x128xf32>
    %72 = arith.maximumf %69, %71 : vector<14x128xf32>
    %c0_57 = arith.constant 0 : index
    %c151 = arith.constant 151 : index
    %c0_58 = arith.constant 0 : index
    %73 = tpu.strided_load %arg1[%c0_57, %c151, %c0_58] {strides = array<i32: 1, 2, 1>} : memref<1x904x128xf32, #tpu.memory_space<vmem>>, vector<1x14x128xf32>
    %74 = vector.shape_cast %73 : vector<1x14x128xf32> to vector<14x128xf32>
    %75 = arith.maximumf %72, %74 : vector<14x128xf32>
    %c0_59 = arith.constant 0 : index
    %c152 = arith.constant 152 : index
    %c0_60 = arith.constant 0 : index
    %76 = tpu.strided_load %arg1[%c0_59, %c152, %c0_60] {strides = array<i32: 1, 2, 1>} : memref<1x904x128xf32, #tpu.memory_space<vmem>>, vector<1x14x128xf32>
    %77 = vector.shape_cast %76 : vector<1x14x128xf32> to vector<14x128xf32>
    %78 = arith.maximumf %75, %77 : vector<14x128xf32>
    %c0_61 = arith.constant 0 : index
    %c180 = arith.constant 180 : index
    %c0_62 = arith.constant 0 : index
    %79 = tpu.strided_load %arg1[%c0_61, %c180, %c0_62] {strides = array<i32: 1, 2, 1>} : memref<1x904x128xf32, #tpu.memory_space<vmem>>, vector<1x14x128xf32>
    %80 = vector.shape_cast %79 : vector<1x14x128xf32> to vector<14x128xf32>
    %81 = arith.maximumf %78, %80 : vector<14x128xf32>
    %c0_63 = arith.constant 0 : index
    %c181 = arith.constant 181 : index
    %c0_64 = arith.constant 0 : index
    %82 = tpu.strided_load %arg1[%c0_63, %c181, %c0_64] {strides = array<i32: 1, 2, 1>} : memref<1x904x128xf32, #tpu.memory_space<vmem>>, vector<1x14x128xf32>
    %83 = vector.shape_cast %82 : vector<1x14x128xf32> to vector<14x128xf32>
    %84 = arith.maximumf %81, %83 : vector<14x128xf32>
    %c0_65 = arith.constant 0 : index
    %c182 = arith.constant 182 : index
    %c0_66 = arith.constant 0 : index
    %85 = tpu.strided_load %arg1[%c0_65, %c182, %c0_66] {strides = array<i32: 1, 2, 1>} : memref<1x904x128xf32, #tpu.memory_space<vmem>>, vector<1x14x128xf32>
    %86 = vector.shape_cast %85 : vector<1x14x128xf32> to vector<14x128xf32>
    %87 = arith.maximumf %84, %86 : vector<14x128xf32>
    %c0_67 = arith.constant 0 : index
    %c49 = arith.constant 49 : index
    %c0_68 = arith.constant 0 : index
    %88 = vector.load %arg2[%c0_67, %c49, %c0_68] : memref<1x256x128xf32, #tpu.memory_space<vmem>>, vector<1x14x128xf32>
    %89 = vector.shape_cast %88 : vector<1x14x128xf32> to vector<14x128xf32>
    %90 = vector.shape_cast %87 : vector<14x128xf32> to vector<1x14x128xf32>
    tpu.vector_store %arg2[%c0_67, %c49, %c0_68], %90 {strides = array<i32>} : memref<1x256x128xf32, #tpu.memory_space<vmem>>, vector<1x14x128xf32>,
    %c0_69 = arith.constant 0 : index
    %c180_70 = arith.constant 180 : index
    %c0_71 = arith.constant 0 : index
    %91 = tpu.strided_load %arg1[%c0_69, %c180_70, %c0_71] {strides = array<i32: 1, 2, 1>} : memref<1x904x128xf32, #tpu.memory_space<vmem>>, vector<1x14x128xf32>
    %92 = vector.shape_cast %91 : vector<1x14x128xf32> to vector<14x128xf32>
    %c0_72 = arith.constant 0 : index
    %c181_73 = arith.constant 181 : index
    %c0_74 = arith.constant 0 : index
    %93 = tpu.strided_load %arg1[%c0_72, %c181_73, %c0_74] {strides = array<i32: 1, 2, 1>} : memref<1x904x128xf32, #tpu.memory_space<vmem>>, vector<1x14x128xf32>
    %94 = vector.shape_cast %93 : vector<1x14x128xf32> to vector<14x128xf32>
    %95 = arith.maximumf %92, %94 : vector<14x128xf32>
    %c0_75 = arith.constant 0 : index
    %c182_76 = arith.constant 182 : index
    %c0_77 = arith.constant 0 : index
    %96 = tpu.strided_load %arg1[%c0_75, %c182_76, %c0_77] {strides = array<i32: 1, 2, 1>} : memref<1x904x128xf32, #tpu.memory_space<vmem>>, vector<1x14x128xf32>
    %97 = vector.shape_cast %96 : vector<1x14x128xf32> to vector<14x128xf32>
    %98 = arith.maximumf %95, %97 : vector<14x128xf32>
    %c0_78 = arith.constant 0 : index
    %c210 = arith.constant 210 : index
    %c0_79 = arith.constant 0 : index
    %99 = tpu.strided_load %arg1[%c0_78, %c210, %c0_79] {strides = array<i32: 1, 2, 1>} : memref<1x904x128xf32, #tpu.memory_space<vmem>>, vector<1x14x128xf32>
    %100 = vector.shape_cast %99 : vector<1x14x128xf32> to vector<14x128xf32>
    %101 = arith.maximumf %98, %100 : vector<14x128xf32>
    %c0_80 = arith.constant 0 : index
    %c211 = arith.constant 211 : index
    %c0_81 = arith.constant 0 : index
    %102 = tpu.strided_load %arg1[%c0_80, %c211, %c0_81] {strides = array<i32: 1, 2, 1>} : memref<1x904x128xf32, #tpu.memory_space<vmem>>, vector<1x14x128xf32>
    %103 = vector.shape_cast %102 : vector<1x14x128xf32> to vector<14x128xf32>
    %104 = arith.maximumf %101, %103 : vector<14x128xf32>
    %c0_82 = arith.constant 0 : index
    %c212 = arith.constant 212 : index
    %c0_83 = arith.constant 0 : index
    %105 = tpu.strided_load %arg1[%c0_82, %c212, %c0_83] {strides = array<i32: 1, 2, 1>} : memref<1x904x128xf32, #tpu.memory_space<vmem>>, vector<1x14x128xf32>
    %106 = vector.shape_cast %105 : vector<1x14x128xf32> to vector<14x128xf32>
    %107 = arith.maximumf %104, %106 : vector<14x128xf32>
    %c0_84 = arith.constant 0 : index
    %c240 = arith.constant 240 : index
    %c0_85 = arith.constant 0 : index
    %108 = tpu.strided_load %arg1[%c0_84, %c240, %c0_85] {strides = array<i32: 1, 2, 1>} : memref<1x904x128xf32, #tpu.memory_space<vmem>>, vector<1x14x128xf32>
    %109 = vector.shape_cast %108 : vector<1x14x128xf32> to vector<14x128xf32>
    %110 = arith.maximumf %107, %109 : vector<14x128xf32>
    %c0_86 = arith.constant 0 : index
    %c241 = arith.constant 241 : index
    %c0_87 = arith.constant 0 : index
    %111 = tpu.strided_load %arg1[%c0_86, %c241, %c0_87] {strides = array<i32: 1, 2, 1>} : memref<1x904x128xf32, #tpu.memory_space<vmem>>, vector<1x14x128xf32>
    %112 = vector.shape_cast %111 : vector<1x14x128xf32> to vector<14x128xf32>
    %113 = arith.maximumf %110, %112 : vector<14x128xf32>
    %c0_88 = arith.constant 0 : index
    %c242 = arith.constant 242 : index
    %c0_89 = arith.constant 0 : index
    %114 = tpu.strided_load %arg1[%c0_88, %c242, %c0_89] {strides = array<i32: 1, 2, 1>} : memref<1x904x128xf32, #tpu.memory_space<vmem>>, vector<1x14x128xf32>
    %115 = vector.shape_cast %114 : vector<1x14x128xf32> to vector<14x128xf32>
    %116 = arith.maximumf %113, %115 : vector<14x128xf32>
    %c0_90 = arith.constant 0 : index
    %c65 = arith.constant 65 : index
    %c0_91 = arith.constant 0 : index
    %117 = vector.load %arg2[%c0_90, %c65, %c0_91] : memref<1x256x128xf32, #tpu.memory_space<vmem>>, vector<1x14x128xf32>
    %118 = vector.shape_cast %117 : vector<1x14x128xf32> to vector<14x128xf32>
    %119 = vector.shape_cast %116 : vector<14x128xf32> to vector<1x14x128xf32>
    tpu.vector_store %arg2[%c0_90, %c65, %c0_91], %119 {strides = array<i32>} : memref<1x256x128xf32, #tpu.memory_space<vmem>>, vector<1x14x128xf32>,
    %c0_92 = arith.constant 0 : index
    %c240_93 = arith.constant 240 : index
    %c0_94 = arith.constant 0 : index
    %120 = tpu.strided_load %arg1[%c0_92, %c240_93, %c0_94] {strides = array<i32: 1, 2, 1>} : memref<1x904x128xf32, #tpu.memory_space<vmem>>, vector<1x14x128xf32>
    %121 = vector.shape_cast %120 : vector<1x14x128xf32> to vector<14x128xf32>
    %c0_95 = arith.constant 0 : index
    %c241_96 = arith.constant 241 : index
    %c0_97 = arith.constant 0 : index
    %122 = tpu.strided_load %arg1[%c0_95, %c241_96, %c0_97] {strides = array<i32: 1, 2, 1>} : memref<1x904x128xf32, #tpu.memory_space<vmem>>, vector<1x14x128xf32>
    %123 = vector.shape_cast %122 : vector<1x14x128xf32> to vector<14x128xf32>
    %124 = arith.maximumf %121, %123 : vector<14x128xf32>
    %c0_98 = arith.constant 0 : index
    %c242_99 = arith.constant 242 : index
    %c0_100 = arith.constant 0 : index
    %125 = tpu.strided_load %arg1[%c0_98, %c242_99, %c0_100] {strides = array<i32: 1, 2, 1>} : memref<1x904x128xf32, #tpu.memory_space<vmem>>, vector<1x14x128xf32>
    %126 = vector.shape_cast %125 : vector<1x14x128xf32> to vector<14x128xf32>
    %127 = arith.maximumf %124, %126 : vector<14x128xf32>
    %c0_101 = arith.constant 0 : index
    %c270 = arith.constant 270 : index
    %c0_102 = arith.constant 0 : index
    %128 = tpu.strided_load %arg1[%c0_101, %c270, %c0_102] {strides = array<i32: 1, 2, 1>} : memref<1x904x128xf32, #tpu.memory_space<vmem>>, vector<1x14x128xf32>
    %129 = vector.shape_cast %128 : vector<1x14x128xf32> to vector<14x128xf32>
    %130 = arith.maximumf %127, %129 : vector<14x128xf32>
    %c0_103 = arith.constant 0 : index
    %c271 = arith.constant 271 : index
    %c0_104 = arith.constant 0 : index
    %131 = tpu.strided_load %arg1[%c0_103, %c271, %c0_104] {strides = array<i32: 1, 2, 1>} : memref<1x904x128xf32, #tpu.memory_space<vmem>>, vector<1x14x128xf32>
    %132 = vector.shape_cast %131 : vector<1x14x128xf32> to vector<14x128xf32>
    %133 = arith.maximumf %130, %132 : vector<14x128xf32>
    %c0_105 = arith.constant 0 : index
    %c272 = arith.constant 272 : index
    %c0_106 = arith.constant 0 : index
    %134 = tpu.strided_load %arg1[%c0_105, %c272, %c0_106] {strides = array<i32: 1, 2, 1>} : memref<1x904x128xf32, #tpu.memory_space<vmem>>, vector<1x14x128xf32>
    %135 = vector.shape_cast %134 : vector<1x14x128xf32> to vector<14x128xf32>
    %136 = arith.maximumf %133, %135 : vector<14x128xf32>
    %c0_107 = arith.constant 0 : index
    %c300 = arith.constant 300 : index
    %c0_108 = arith.constant 0 : index
    %137 = tpu.strided_load %arg1[%c0_107, %c300, %c0_108] {strides = array<i32: 1, 2, 1>} : memref<1x904x128xf32, #tpu.memory_space<vmem>>, vector<1x14x128xf32>
    %138 = vector.shape_cast %137 : vector<1x14x128xf32> to vector<14x128xf32>
    %139 = arith.maximumf %136, %138 : vector<14x128xf32>
    %c0_109 = arith.constant 0 : index
    %c301 = arith.constant 301 : index
    %c0_110 = arith.constant 0 : index
    %140 = tpu.strided_load %arg1[%c0_109, %c301, %c0_110] {strides = array<i32: 1, 2, 1>} : memref<1x904x128xf32, #tpu.memory_space<vmem>>, vector<1x14x128xf32>
    %141 = vector.shape_cast %140 : vector<1x14x128xf32> to vector<14x128xf32>
    %142 = arith.maximumf %139, %141 : vector<14x128xf32>
    %c0_111 = arith.constant 0 : index
    %c302 = arith.constant 302 : index
    %c0_112 = arith.constant 0 : index
    %143 = tpu.strided_load %arg1[%c0_111, %c302, %c0_112] {strides = array<i32: 1, 2, 1>} : memref<1x904x128xf32, #tpu.memory_space<vmem>>, vector<1x14x128xf32>
    %144 = vector.shape_cast %143 : vector<1x14x128xf32> to vector<14x128xf32>
    %145 = arith.maximumf %142, %144 : vector<14x128xf32>
    %c0_113 = arith.constant 0 : index
    %c81 = arith.constant 81 : index
    %c0_114 = arith.constant 0 : index
    %146 = vector.load %arg2[%c0_113, %c81, %c0_114] : memref<1x256x128xf32, #tpu.memory_space<vmem>>, vector<1x14x128xf32>
    %147 = vector.shape_cast %146 : vector<1x14x128xf32> to vector<14x128xf32>
    %148 = vector.shape_cast %145 : vector<14x128xf32> to vector<1x14x128xf32>
    tpu.vector_store %arg2[%c0_113, %c81, %c0_114], %148 {strides = array<i32>} : memref<1x256x128xf32, #tpu.memory_space<vmem>>, vector<1x14x128xf32>,
    %c0_115 = arith.constant 0 : index
    %c300_116 = arith.constant 300 : index
    %c0_117 = arith.constant 0 : index
    %149 = tpu.strided_load %arg1[%c0_115, %c300_116, %c0_117] {strides = array<i32: 1, 2, 1>} : memref<1x904x128xf32, #tpu.memory_space<vmem>>, vector<1x14x128xf32>
    %150 = vector.shape_cast %149 : vector<1x14x128xf32> to vector<14x128xf32>
    %c0_118 = arith.constant 0 : index
    %c301_119 = arith.constant 301 : index
    %c0_120 = arith.constant 0 : index
    %151 = tpu.strided_load %arg1[%c0_118, %c301_119, %c0_120] {strides = array<i32: 1, 2, 1>} : memref<1x904x128xf32, #tpu.memory_space<vmem>>, vector<1x14x128xf32>
    %152 = vector.shape_cast %151 : vector<1x14x128xf32> to vector<14x128xf32>
    %153 = arith.maximumf %150, %152 : vector<14x128xf32>
    %c0_121 = arith.constant 0 : index
    %c302_122 = arith.constant 302 : index
    %c0_123 = arith.constant 0 : index
    %154 = tpu.strided_load %arg1[%c0_121, %c302_122, %c0_123] {strides = array<i32: 1, 2, 1>} : memref<1x904x128xf32, #tpu.memory_space<vmem>>, vector<1x14x128xf32>
    %155 = vector.shape_cast %154 : vector<1x14x128xf32> to vector<14x128xf32>
    %156 = arith.maximumf %153, %155 : vector<14x128xf32>
    %c0_124 = arith.constant 0 : index
    %c330 = arith.constant 330 : index
    %c0_125 = arith.constant 0 : index
    %157 = tpu.strided_load %arg1[%c0_124, %c330, %c0_125] {strides = array<i32: 1, 2, 1>} : memref<1x904x128xf32, #tpu.memory_space<vmem>>, vector<1x14x128xf32>
    %158 = vector.shape_cast %157 : vector<1x14x128xf32> to vector<14x128xf32>
    %159 = arith.maximumf %156, %158 : vector<14x128xf32>
    %c0_126 = arith.constant 0 : index
    %c331 = arith.constant 331 : index
    %c0_127 = arith.constant 0 : index
    %160 = tpu.strided_load %arg1[%c0_126, %c331, %c0_127] {strides = array<i32: 1, 2, 1>} : memref<1x904x128xf32, #tpu.memory_space<vmem>>, vector<1x14x128xf32>
    %161 = vector.shape_cast %160 : vector<1x14x128xf32> to vector<14x128xf32>
    %162 = arith.maximumf %159, %161 : vector<14x128xf32>
    %c0_128 = arith.constant 0 : index
    %c332 = arith.constant 332 : index
    %c0_129 = arith.constant 0 : index
    %163 = tpu.strided_load %arg1[%c0_128, %c332, %c0_129] {strides = array<i32: 1, 2, 1>} : memref<1x904x128xf32, #tpu.memory_space<vmem>>, vector<1x14x128xf32>
    %164 = vector.shape_cast %163 : vector<1x14x128xf32> to vector<14x128xf32>
    %165 = arith.maximumf %162, %164 : vector<14x128xf32>
    %c0_130 = arith.constant 0 : index
    %c360 = arith.constant 360 : index
    %c0_131 = arith.constant 0 : index
    %166 = tpu.strided_load %arg1[%c0_130, %c360, %c0_131] {strides = array<i32: 1, 2, 1>} : memref<1x904x128xf32, #tpu.memory_space<vmem>>, vector<1x14x128xf32>
    %167 = vector.shape_cast %166 : vector<1x14x128xf32> to vector<14x128xf32>
    %168 = arith.maximumf %165, %167 : vector<14x128xf32>
    %c0_132 = arith.constant 0 : index
    %c361 = arith.constant 361 : index
    %c0_133 = arith.constant 0 : index
    %169 = tpu.strided_load %arg1[%c0_132, %c361, %c0_133] {strides = array<i32: 1, 2, 1>} : memref<1x904x128xf32, #tpu.memory_space<vmem>>, vector<1x14x128xf32>
    %170 = vector.shape_cast %169 : vector<1x14x128xf32> to vector<14x128xf32>
    %171 = arith.maximumf %168, %170 : vector<14x128xf32>
    %c0_134 = arith.constant 0 : index
    %c362 = arith.constant 362 : index
    %c0_135 = arith.constant 0 : index
    %172 = tpu.strided_load %arg1[%c0_134, %c362, %c0_135] {strides = array<i32: 1, 2, 1>} : memref<1x904x128xf32, #tpu.memory_space<vmem>>, vector<1x14x128xf32>
    %173 = vector.shape_cast %172 : vector<1x14x128xf32> to vector<14x128xf32>
    %174 = arith.maximumf %171, %173 : vector<14x128xf32>
    %c0_136 = arith.constant 0 : index
    %c97 = arith.constant 97 : index
    %c0_137 = arith.constant 0 : index
    %175 = vector.load %arg2[%c0_136, %c97, %c0_137] : memref<1x256x128xf32, #tpu.memory_space<vmem>>, vector<1x14x128xf32>
    %176 = vector.shape_cast %175 : vector<1x14x128xf32> to vector<14x128xf32>
    %177 = vector.shape_cast %174 : vector<14x128xf32> to vector<1x14x128xf32>
    tpu.vector_store %arg2[%c0_136, %c97, %c0_137], %177 {strides = array<i32>} : memref<1x256x128xf32, #tpu.memory_space<vmem>>, vector<1x14x128xf32>,
    %c0_138 = arith.constant 0 : index
    %c360_139 = arith.constant 360 : index
    %c0_140 = arith.constant 0 : index
    %178 = tpu.strided_load %arg1[%c0_138, %c360_139, %c0_140] {strides = array<i32: 1, 2, 1>} : memref<1x904x128xf32, #tpu.memory_space<vmem>>, vector<1x14x128xf32>
    %179 = vector.shape_cast %178 : vector<1x14x128xf32> to vector<14x128xf32>
    %c0_141 = arith.constant 0 : index
    %c361_142 = arith.constant 361 : index
    %c0_143 = arith.constant 0 : index
    %180 = tpu.strided_load %arg1[%c0_141, %c361_142, %c0_143] {strides = array<i32: 1, 2, 1>} : memref<1x904x128xf32, #tpu.memory_space<vmem>>, vector<1x14x128xf32>
    %181 = vector.shape_cast %180 : vector<1x14x128xf32> to vector<14x128xf32>
    %182 = arith.maximumf %179, %181 : vector<14x128xf32>
    %c0_144 = arith.constant 0 : index
    %c362_145 = arith.constant 362 : index
    %c0_146 = arith.constant 0 : index
    %183 = tpu.strided_load %arg1[%c0_144, %c362_145, %c0_146] {strides = array<i32: 1, 2, 1>} : memref<1x904x128xf32, #tpu.memory_space<vmem>>, vector<1x14x128xf32>
    %184 = vector.shape_cast %183 : vector<1x14x128xf32> to vector<14x128xf32>
    %185 = arith.maximumf %182, %184 : vector<14x128xf32>
    %c0_147 = arith.constant 0 : index
    %c390 = arith.constant 390 : index
    %c0_148 = arith.constant 0 : index
    %186 = tpu.strided_load %arg1[%c0_147, %c390, %c0_148] {strides = array<i32: 1, 2, 1>} : memref<1x904x128xf32, #tpu.memory_space<vmem>>, vector<1x14x128xf32>
    %187 = vector.shape_cast %186 : vector<1x14x128xf32> to vector<14x128xf32>
    %188 = arith.maximumf %185, %187 : vector<14x128xf32>
    %c0_149 = arith.constant 0 : index
    %c391 = arith.constant 391 : index
    %c0_150 = arith.constant 0 : index
    %189 = tpu.strided_load %arg1[%c0_149, %c391, %c0_150] {strides = array<i32: 1, 2, 1>} : memref<1x904x128xf32, #tpu.memory_space<vmem>>, vector<1x14x128xf32>
    %190 = vector.shape_cast %189 : vector<1x14x128xf32> to vector<14x128xf32>
    %191 = arith.maximumf %188, %190 : vector<14x128xf32>
    %c0_151 = arith.constant 0 : index
    %c392 = arith.constant 392 : index
    %c0_152 = arith.constant 0 : index
    %192 = tpu.strided_load %arg1[%c0_151, %c392, %c0_152] {strides = array<i32: 1, 2, 1>} : memref<1x904x128xf32, #tpu.memory_space<vmem>>, vector<1x14x128xf32>
    %193 = vector.shape_cast %192 : vector<1x14x128xf32> to vector<14x128xf32>
    %194 = arith.maximumf %191, %193 : vector<14x128xf32>
    %c0_153 = arith.constant 0 : index
    %c420 = arith.constant 420 : index
    %c0_154 = arith.constant 0 : index
    %195 = tpu.strided_load %arg1[%c0_153, %c420, %c0_154] {strides = array<i32: 1, 2, 1>} : memref<1x904x128xf32, #tpu.memory_space<vmem>>, vector<1x14x128xf32>
    %196 = vector.shape_cast %195 : vector<1x14x128xf32> to vector<14x128xf32>
    %197 = arith.maximumf %194, %196 : vector<14x128xf32>
    %c0_155 = arith.constant 0 : index
    %c421 = arith.constant 421 : index
    %c0_156 = arith.constant 0 : index
    %198 = tpu.strided_load %arg1[%c0_155, %c421, %c0_156] {strides = array<i32: 1, 2, 1>} : memref<1x904x128xf32, #tpu.memory_space<vmem>>, vector<1x14x128xf32>
    %199 = vector.shape_cast %198 : vector<1x14x128xf32> to vector<14x128xf32>
    %200 = arith.maximumf %197, %199 : vector<14x128xf32>
    %c0_157 = arith.constant 0 : index
    %c422 = arith.constant 422 : index
    %c0_158 = arith.constant 0 : index
    %201 = tpu.strided_load %arg1[%c0_157, %c422, %c0_158] {strides = array<i32: 1, 2, 1>} : memref<1x904x128xf32, #tpu.memory_space<vmem>>, vector<1x14x128xf32>
    %202 = vector.shape_cast %201 : vector<1x14x128xf32> to vector<14x128xf32>
    %203 = arith.maximumf %200, %202 : vector<14x128xf32>
    %c0_159 = arith.constant 0 : index
    %c113 = arith.constant 113 : index
    %c0_160 = arith.constant 0 : index
    %204 = vector.load %arg2[%c0_159, %c113, %c0_160] : memref<1x256x128xf32, #tpu.memory_space<vmem>>, vector<1x14x128xf32>
    %205 = vector.shape_cast %204 : vector<1x14x128xf32> to vector<14x128xf32>
    %206 = vector.shape_cast %203 : vector<14x128xf32> to vector<1x14x128xf32>
    tpu.vector_store %arg2[%c0_159, %c113, %c0_160], %206 {strides = array<i32>} : memref<1x256x128xf32, #tpu.memory_space<vmem>>, vector<1x14x128xf32>,
    %c0_161 = arith.constant 0 : index
    %c420_162 = arith.constant 420 : index
    %c0_163 = arith.constant 0 : index
    %207 = tpu.strided_load %arg1[%c0_161, %c420_162, %c0_163] {strides = array<i32: 1, 2, 1>} : memref<1x904x128xf32, #tpu.memory_space<vmem>>, vector<1x14x128xf32>
    %208 = vector.shape_cast %207 : vector<1x14x128xf32> to vector<14x128xf32>
    %c0_164 = arith.constant 0 : index
    %c421_165 = arith.constant 421 : index
    %c0_166 = arith.constant 0 : index
    %209 = tpu.strided_load %arg1[%c0_164, %c421_165, %c0_166] {strides = array<i32: 1, 2, 1>} : memref<1x904x128xf32, #tpu.memory_space<vmem>>, vector<1x14x128xf32>
    %210 = vector.shape_cast %209 : vector<1x14x128xf32> to vector<14x128xf32>
    %211 = arith.maximumf %208, %210 : vector<14x128xf32>
    %c0_167 = arith.constant 0 : index
    %c422_168 = arith.constant 422 : index
    %c0_169 = arith.constant 0 : index
    %212 = tpu.strided_load %arg1[%c0_167, %c422_168, %c0_169] {strides = array<i32: 1, 2, 1>} : memref<1x904x128xf32, #tpu.memory_space<vmem>>, vector<1x14x128xf32>
    %213 = vector.shape_cast %212 : vector<1x14x128xf32> to vector<14x128xf32>
    %214 = arith.maximumf %211, %213 : vector<14x128xf32>
    %c0_170 = arith.constant 0 : index
    %c450 = arith.constant 450 : index
    %c0_171 = arith.constant 0 : index
    %215 = tpu.strided_load %arg1[%c0_170, %c450, %c0_171] {strides = array<i32: 1, 2, 1>} : memref<1x904x128xf32, #tpu.memory_space<vmem>>, vector<1x14x128xf32>
    %216 = vector.shape_cast %215 : vector<1x14x128xf32> to vector<14x128xf32>
    %217 = arith.maximumf %214, %216 : vector<14x128xf32>
    %c0_172 = arith.constant 0 : index
    %c451 = arith.constant 451 : index
    %c0_173 = arith.constant 0 : index
    %218 = tpu.strided_load %arg1[%c0_172, %c451, %c0_173] {strides = array<i32: 1, 2, 1>} : memref<1x904x128xf32, #tpu.memory_space<vmem>>, vector<1x14x128xf32>
    %219 = vector.shape_cast %218 : vector<1x14x128xf32> to vector<14x128xf32>
    %220 = arith.maximumf %217, %219 : vector<14x128xf32>
    %c0_174 = arith.constant 0 : index
    %c452 = arith.constant 452 : index
    %c0_175 = arith.constant 0 : index
    %221 = tpu.strided_load %arg1[%c0_174, %c452, %c0_175] {strides = array<i32: 1, 2, 1>} : memref<1x904x128xf32, #tpu.memory_space<vmem>>, vector<1x14x128xf32>
    %222 = vector.shape_cast %221 : vector<1x14x128xf32> to vector<14x128xf32>
    %223 = arith.maximumf %220, %222 : vector<14x128xf32>
    %c0_176 = arith.constant 0 : index
    %c480 = arith.constant 480 : index
    %c0_177 = arith.constant 0 : index
    %224 = tpu.strided_load %arg1[%c0_176, %c480, %c0_177] {strides = array<i32: 1, 2, 1>} : memref<1x904x128xf32, #tpu.memory_space<vmem>>, vector<1x14x128xf32>
    %225 = vector.shape_cast %224 : vector<1x14x128xf32> to vector<14x128xf32>
    %226 = arith.maximumf %223, %225 : vector<14x128xf32>
    %c0_178 = arith.constant 0 : index
    %c481 = arith.constant 481 : index
    %c0_179 = arith.constant 0 : index
    %227 = tpu.strided_load %arg1[%c0_178, %c481, %c0_179] {strides = array<i32: 1, 2, 1>} : memref<1x904x128xf32, #tpu.memory_space<vmem>>, vector<1x14x128xf32>
    %228 = vector.shape_cast %227 : vector<1x14x128xf32> to vector<14x128xf32>
    %229 = arith.maximumf %226, %228 : vector<14x128xf32>
    %c0_180 = arith.constant 0 : index
    %c482 = arith.constant 482 : index
    %c0_181 = arith.constant 0 : index
    %230 = tpu.strided_load %arg1[%c0_180, %c482, %c0_181] {strides = array<i32: 1, 2, 1>} : memref<1x904x128xf32, #tpu.memory_space<vmem>>, vector<1x14x128xf32>
    %231 = vector.shape_cast %230 : vector<1x14x128xf32> to vector<14x128xf32>
    %232 = arith.maximumf %229, %231 : vector<14x128xf32>
    %c0_182 = arith.constant 0 : index
    %c129 = arith.constant 129 : index
    %c0_183 = arith.constant 0 : index
    %233 = vector.load %arg2[%c0_182, %c129, %c0_183] : memref<1x256x128xf32, #tpu.memory_space<vmem>>, vector<1x14x128xf32>
    %234 = vector.shape_cast %233 : vector<1x14x128xf32> to vector<14x128xf32>
    %235 = vector.shape_cast %232 : vector<14x128xf32> to vector<1x14x128xf32>
    tpu.vector_store %arg2[%c0_182, %c129, %c0_183], %235 {strides = array<i32>} : memref<1x256x128xf32, #tpu.memory_space<vmem>>, vector<1x14x128xf32>,
    %c0_184 = arith.constant 0 : index
    %c480_185 = arith.constant 480 : index
    %c0_186 = arith.constant 0 : index
    %236 = tpu.strided_load %arg1[%c0_184, %c480_185, %c0_186] {strides = array<i32: 1, 2, 1>} : memref<1x904x128xf32, #tpu.memory_space<vmem>>, vector<1x14x128xf32>
    %237 = vector.shape_cast %236 : vector<1x14x128xf32> to vector<14x128xf32>
    %c0_187 = arith.constant 0 : index
    %c481_188 = arith.constant 481 : index
    %c0_189 = arith.constant 0 : index
    %238 = tpu.strided_load %arg1[%c0_187, %c481_188, %c0_189] {strides = array<i32: 1, 2, 1>} : memref<1x904x128xf32, #tpu.memory_space<vmem>>, vector<1x14x128xf32>
    %239 = vector.shape_cast %238 : vector<1x14x128xf32> to vector<14x128xf32>
    %240 = arith.maximumf %237, %239 : vector<14x128xf32>
    %c0_190 = arith.constant 0 : index
    %c482_191 = arith.constant 482 : index
    %c0_192 = arith.constant 0 : index
    %241 = tpu.strided_load %arg1[%c0_190, %c482_191, %c0_192] {strides = array<i32: 1, 2, 1>} : memref<1x904x128xf32, #tpu.memory_space<vmem>>, vector<1x14x128xf32>
    %242 = vector.shape_cast %241 : vector<1x14x128xf32> to vector<14x128xf32>
    %243 = arith.maximumf %240, %242 : vector<14x128xf32>
    %c0_193 = arith.constant 0 : index
    %c510 = arith.constant 510 : index
    %c0_194 = arith.constant 0 : index
    %244 = tpu.strided_load %arg1[%c0_193, %c510, %c0_194] {strides = array<i32: 1, 2, 1>} : memref<1x904x128xf32, #tpu.memory_space<vmem>>, vector<1x14x128xf32>
    %245 = vector.shape_cast %244 : vector<1x14x128xf32> to vector<14x128xf32>
    %246 = arith.maximumf %243, %245 : vector<14x128xf32>
    %c0_195 = arith.constant 0 : index
    %c511 = arith.constant 511 : index
    %c0_196 = arith.constant 0 : index
    %247 = tpu.strided_load %arg1[%c0_195, %c511, %c0_196] {strides = array<i32: 1, 2, 1>} : memref<1x904x128xf32, #tpu.memory_space<vmem>>, vector<1x14x128xf32>
    %248 = vector.shape_cast %247 : vector<1x14x128xf32> to vector<14x128xf32>
    %249 = arith.maximumf %246, %248 : vector<14x128xf32>
    %c0_197 = arith.constant 0 : index
    %c512 = arith.constant 512 : index
    %c0_198 = arith.constant 0 : index
    %250 = tpu.strided_load %arg1[%c0_197, %c512, %c0_198] {strides = array<i32: 1, 2, 1>} : memref<1x904x128xf32, #tpu.memory_space<vmem>>, vector<1x14x128xf32>
    %251 = vector.shape_cast %250 : vector<1x14x128xf32> to vector<14x128xf32>
    %252 = arith.maximumf %249, %251 : vector<14x128xf32>
    %c0_199 = arith.constant 0 : index
    %c540 = arith.constant 540 : index
    %c0_200 = arith.constant 0 : index
    %253 = tpu.strided_load %arg1[%c0_199, %c540, %c0_200] {strides = array<i32: 1, 2, 1>} : memref<1x904x128xf32, #tpu.memory_space<vmem>>, vector<1x14x128xf32>
    %254 = vector.shape_cast %253 : vector<1x14x128xf32> to vector<14x128xf32>
    %255 = arith.maximumf %252, %254 : vector<14x128xf32>
    %c0_201 = arith.constant 0 : index
    %c541 = arith.constant 541 : index
    %c0_202 = arith.constant 0 : index
    %256 = tpu.strided_load %arg1[%c0_201, %c541, %c0_202] {strides = array<i32: 1, 2, 1>} : memref<1x904x128xf32, #tpu.memory_space<vmem>>, vector<1x14x128xf32>
    %257 = vector.shape_cast %256 : vector<1x14x128xf32> to vector<14x128xf32>
    %258 = arith.maximumf %255, %257 : vector<14x128xf32>
    %c0_203 = arith.constant 0 : index
    %c542 = arith.constant 542 : index
    %c0_204 = arith.constant 0 : index
    %259 = tpu.strided_load %arg1[%c0_203, %c542, %c0_204] {strides = array<i32: 1, 2, 1>} : memref<1x904x128xf32, #tpu.memory_space<vmem>>, vector<1x14x128xf32>
    %260 = vector.shape_cast %259 : vector<1x14x128xf32> to vector<14x128xf32>
    %261 = arith.maximumf %258, %260 : vector<14x128xf32>
    %c0_205 = arith.constant 0 : index
    %c145 = arith.constant 145 : index
    %c0_206 = arith.constant 0 : index
    %262 = vector.load %arg2[%c0_205, %c145, %c0_206] : memref<1x256x128xf32, #tpu.memory_space<vmem>>, vector<1x14x128xf32>
    %263 = vector.shape_cast %262 : vector<1x14x128xf32> to vector<14x128xf32>
    %264 = vector.shape_cast %261 : vector<14x128xf32> to vector<1x14x128xf32>
    tpu.vector_store %arg2[%c0_205, %c145, %c0_206], %264 {strides = array<i32>} : memref<1x256x128xf32, #tpu.memory_space<vmem>>, vector<1x14x128xf32>,
    %c0_207 = arith.constant 0 : index
    %c540_208 = arith.constant 540 : index
    %c0_209 = arith.constant 0 : index
    %265 = tpu.strided_load %arg1[%c0_207, %c540_208, %c0_209] {strides = array<i32: 1, 2, 1>} : memref<1x904x128xf32, #tpu.memory_space<vmem>>, vector<1x14x128xf32>
    %266 = vector.shape_cast %265 : vector<1x14x128xf32> to vector<14x128xf32>
    %c0_210 = arith.constant 0 : index
    %c541_211 = arith.constant 541 : index
    %c0_212 = arith.constant 0 : index
    %267 = tpu.strided_load %arg1[%c0_210, %c541_211, %c0_212] {strides = array<i32: 1, 2, 1>} : memref<1x904x128xf32, #tpu.memory_space<vmem>>, vector<1x14x128xf32>
    %268 = vector.shape_cast %267 : vector<1x14x128xf32> to vector<14x128xf32>
    %269 = arith.maximumf %266, %268 : vector<14x128xf32>
    %c0_213 = arith.constant 0 : index
    %c542_214 = arith.constant 542 : index
    %c0_215 = arith.constant 0 : index
    %270 = tpu.strided_load %arg1[%c0_213, %c542_214, %c0_215] {strides = array<i32: 1, 2, 1>} : memref<1x904x128xf32, #tpu.memory_space<vmem>>, vector<1x14x128xf32>
    %271 = vector.shape_cast %270 : vector<1x14x128xf32> to vector<14x128xf32>
    %272 = arith.maximumf %269, %271 : vector<14x128xf32>
    %c0_216 = arith.constant 0 : index
    %c570 = arith.constant 570 : index
    %c0_217 = arith.constant 0 : index
    %273 = tpu.strided_load %arg1[%c0_216, %c570, %c0_217] {strides = array<i32: 1, 2, 1>} : memref<1x904x128xf32, #tpu.memory_space<vmem>>, vector<1x14x128xf32>
    %274 = vector.shape_cast %273 : vector<1x14x128xf32> to vector<14x128xf32>
    %275 = arith.maximumf %272, %274 : vector<14x128xf32>
    %c0_218 = arith.constant 0 : index
    %c571 = arith.constant 571 : index
    %c0_219 = arith.constant 0 : index
    %276 = tpu.strided_load %arg1[%c0_218, %c571, %c0_219] {strides = array<i32: 1, 2, 1>} : memref<1x904x128xf32, #tpu.memory_space<vmem>>, vector<1x14x128xf32>
    %277 = vector.shape_cast %276 : vector<1x14x128xf32> to vector<14x128xf32>
    %278 = arith.maximumf %275, %277 : vector<14x128xf32>
    %c0_220 = arith.constant 0 : index
    %c572 = arith.constant 572 : index
    %c0_221 = arith.constant 0 : index
    %279 = tpu.strided_load %arg1[%c0_220, %c572, %c0_221] {strides = array<i32: 1, 2, 1>} : memref<1x904x128xf32, #tpu.memory_space<vmem>>, vector<1x14x128xf32>
    %280 = vector.shape_cast %279 : vector<1x14x128xf32> to vector<14x128xf32>
    %281 = arith.maximumf %278, %280 : vector<14x128xf32>
    %c0_222 = arith.constant 0 : index
    %c600 = arith.constant 600 : index
    %c0_223 = arith.constant 0 : index
    %282 = tpu.strided_load %arg1[%c0_222, %c600, %c0_223] {strides = array<i32: 1, 2, 1>} : memref<1x904x128xf32, #tpu.memory_space<vmem>>, vector<1x14x128xf32>
    %283 = vector.shape_cast %282 : vector<1x14x128xf32> to vector<14x128xf32>
    %284 = arith.maximumf %281, %283 : vector<14x128xf32>
    %c0_224 = arith.constant 0 : index
    %c601 = arith.constant 601 : index
    %c0_225 = arith.constant 0 : index
    %285 = tpu.strided_load %arg1[%c0_224, %c601, %c0_225] {strides = array<i32: 1, 2, 1>} : memref<1x904x128xf32, #tpu.memory_space<vmem>>, vector<1x14x128xf32>
    %286 = vector.shape_cast %285 : vector<1x14x128xf32> to vector<14x128xf32>
    %287 = arith.maximumf %284, %286 : vector<14x128xf32>
    %c0_226 = arith.constant 0 : index
    %c602 = arith.constant 602 : index
    %c0_227 = arith.constant 0 : index
    %288 = tpu.strided_load %arg1[%c0_226, %c602, %c0_227] {strides = array<i32: 1, 2, 1>} : memref<1x904x128xf32, #tpu.memory_space<vmem>>, vector<1x14x128xf32>
    %289 = vector.shape_cast %288 : vector<1x14x128xf32> to vector<14x128xf32>
    %290 = arith.maximumf %287, %289 : vector<14x128xf32>
    %c0_228 = arith.constant 0 : index
    %c161 = arith.constant 161 : index
    %c0_229 = arith.constant 0 : index
    %291 = vector.load %arg2[%c0_228, %c161, %c0_229] : memref<1x256x128xf32, #tpu.memory_space<vmem>>, vector<1x14x128xf32>
    %292 = vector.shape_cast %291 : vector<1x14x128xf32> to vector<14x128xf32>
    %293 = vector.shape_cast %290 : vector<14x128xf32> to vector<1x14x128xf32>
    tpu.vector_store %arg2[%c0_228, %c161, %c0_229], %293 {strides = array<i32>} : memref<1x256x128xf32, #tpu.memory_space<vmem>>, vector<1x14x128xf32>,
    %c0_230 = arith.constant 0 : index
    %c600_231 = arith.constant 600 : index
    %c0_232 = arith.constant 0 : index
    %294 = tpu.strided_load %arg1[%c0_230, %c600_231, %c0_232] {strides = array<i32: 1, 2, 1>} : memref<1x904x128xf32, #tpu.memory_space<vmem>>, vector<1x14x128xf32>
    %295 = vector.shape_cast %294 : vector<1x14x128xf32> to vector<14x128xf32>
    %c0_233 = arith.constant 0 : index
    %c601_234 = arith.constant 601 : index
    %c0_235 = arith.constant 0 : index
    %296 = tpu.strided_load %arg1[%c0_233, %c601_234, %c0_235] {strides = array<i32: 1, 2, 1>} : memref<1x904x128xf32, #tpu.memory_space<vmem>>, vector<1x14x128xf32>
    %297 = vector.shape_cast %296 : vector<1x14x128xf32> to vector<14x128xf32>
    %298 = arith.maximumf %295, %297 : vector<14x128xf32>
    %c0_236 = arith.constant 0 : index
    %c602_237 = arith.constant 602 : index
    %c0_238 = arith.constant 0 : index
    %299 = tpu.strided_load %arg1[%c0_236, %c602_237, %c0_238] {strides = array<i32: 1, 2, 1>} : memref<1x904x128xf32, #tpu.memory_space<vmem>>, vector<1x14x128xf32>
    %300 = vector.shape_cast %299 : vector<1x14x128xf32> to vector<14x128xf32>
    %301 = arith.maximumf %298, %300 : vector<14x128xf32>
    %c0_239 = arith.constant 0 : index
    %c630 = arith.constant 630 : index
    %c0_240 = arith.constant 0 : index
    %302 = tpu.strided_load %arg1[%c0_239, %c630, %c0_240] {strides = array<i32: 1, 2, 1>} : memref<1x904x128xf32, #tpu.memory_space<vmem>>, vector<1x14x128xf32>
    %303 = vector.shape_cast %302 : vector<1x14x128xf32> to vector<14x128xf32>
    %304 = arith.maximumf %301, %303 : vector<14x128xf32>
    %c0_241 = arith.constant 0 : index
    %c631 = arith.constant 631 : index
    %c0_242 = arith.constant 0 : index
    %305 = tpu.strided_load %arg1[%c0_241, %c631, %c0_242] {strides = array<i32: 1, 2, 1>} : memref<1x904x128xf32, #tpu.memory_space<vmem>>, vector<1x14x128xf32>
    %306 = vector.shape_cast %305 : vector<1x14x128xf32> to vector<14x128xf32>
    %307 = arith.maximumf %304, %306 : vector<14x128xf32>
    %c0_243 = arith.constant 0 : index
    %c632 = arith.constant 632 : index
    %c0_244 = arith.constant 0 : index
    %308 = tpu.strided_load %arg1[%c0_243, %c632, %c0_244] {strides = array<i32: 1, 2, 1>} : memref<1x904x128xf32, #tpu.memory_space<vmem>>, vector<1x14x128xf32>
    %309 = vector.shape_cast %308 : vector<1x14x128xf32> to vector<14x128xf32>
    %310 = arith.maximumf %307, %309 : vector<14x128xf32>
    %c0_245 = arith.constant 0 : index
    %c660 = arith.constant 660 : index
    %c0_246 = arith.constant 0 : index
    %311 = tpu.strided_load %arg1[%c0_245, %c660, %c0_246] {strides = array<i32: 1, 2, 1>} : memref<1x904x128xf32, #tpu.memory_space<vmem>>, vector<1x14x128xf32>
    %312 = vector.shape_cast %311 : vector<1x14x128xf32> to vector<14x128xf32>
    %313 = arith.maximumf %310, %312 : vector<14x128xf32>
    %c0_247 = arith.constant 0 : index
    %c661 = arith.constant 661 : index
    %c0_248 = arith.constant 0 : index
    %314 = tpu.strided_load %arg1[%c0_247, %c661, %c0_248] {strides = array<i32: 1, 2, 1>} : memref<1x904x128xf32, #tpu.memory_space<vmem>>, vector<1x14x128xf32>
    %315 = vector.shape_cast %314 : vector<1x14x128xf32> to vector<14x128xf32>
    %316 = arith.maximumf %313, %315 : vector<14x128xf32>
    %c0_249 = arith.constant 0 : index
    %c662 = arith.constant 662 : index
    %c0_250 = arith.constant 0 : index
    %317 = tpu.strided_load %arg1[%c0_249, %c662, %c0_250] {strides = array<i32: 1, 2, 1>} : memref<1x904x128xf32, #tpu.memory_space<vmem>>, vector<1x14x128xf32>
    %318 = vector.shape_cast %317 : vector<1x14x128xf32> to vector<14x128xf32>
    %319 = arith.maximumf %316, %318 : vector<14x128xf32>
    %c0_251 = arith.constant 0 : index
    %c177 = arith.constant 177 : index
    %c0_252 = arith.constant 0 : index
    %320 = vector.load %arg2[%c0_251, %c177, %c0_252] : memref<1x256x128xf32, #tpu.memory_space<vmem>>, vector<1x14x128xf32>
    %321 = vector.shape_cast %320 : vector<1x14x128xf32> to vector<14x128xf32>
    %322 = vector.shape_cast %319 : vector<14x128xf32> to vector<1x14x128xf32>
    tpu.vector_store %arg2[%c0_251, %c177, %c0_252], %322 {strides = array<i32>} : memref<1x256x128xf32, #tpu.memory_space<vmem>>, vector<1x14x128xf32>,
    %c0_253 = arith.constant 0 : index
    %c660_254 = arith.constant 660 : index
    %c0_255 = arith.constant 0 : index
    %323 = tpu.strided_load %arg1[%c0_253, %c660_254, %c0_255] {strides = array<i32: 1, 2, 1>} : memref<1x904x128xf32, #tpu.memory_space<vmem>>, vector<1x14x128xf32>
    %324 = vector.shape_cast %323 : vector<1x14x128xf32> to vector<14x128xf32>
    %c0_256 = arith.constant 0 : index
    %c661_257 = arith.constant 661 : index
    %c0_258 = arith.constant 0 : index
    %325 = tpu.strided_load %arg1[%c0_256, %c661_257, %c0_258] {strides = array<i32: 1, 2, 1>} : memref<1x904x128xf32, #tpu.memory_space<vmem>>, vector<1x14x128xf32>
    %326 = vector.shape_cast %325 : vector<1x14x128xf32> to vector<14x128xf32>
    %327 = arith.maximumf %324, %326 : vector<14x128xf32>
    %c0_259 = arith.constant 0 : index
    %c662_260 = arith.constant 662 : index
    %c0_261 = arith.constant 0 : index
    %328 = tpu.strided_load %arg1[%c0_259, %c662_260, %c0_261] {strides = array<i32: 1, 2, 1>} : memref<1x904x128xf32, #tpu.memory_space<vmem>>, vector<1x14x128xf32>
    %329 = vector.shape_cast %328 : vector<1x14x128xf32> to vector<14x128xf32>
    %330 = arith.maximumf %327, %329 : vector<14x128xf32>
    %c0_262 = arith.constant 0 : index
    %c690 = arith.constant 690 : index
    %c0_263 = arith.constant 0 : index
    %331 = tpu.strided_load %arg1[%c0_262, %c690, %c0_263] {strides = array<i32: 1, 2, 1>} : memref<1x904x128xf32, #tpu.memory_space<vmem>>, vector<1x14x128xf32>
    %332 = vector.shape_cast %331 : vector<1x14x128xf32> to vector<14x128xf32>
    %333 = arith.maximumf %330, %332 : vector<14x128xf32>
    %c0_264 = arith.constant 0 : index
    %c691 = arith.constant 691 : index
    %c0_265 = arith.constant 0 : index
    %334 = tpu.strided_load %arg1[%c0_264, %c691, %c0_265] {strides = array<i32: 1, 2, 1>} : memref<1x904x128xf32, #tpu.memory_space<vmem>>, vector<1x14x128xf32>
    %335 = vector.shape_cast %334 : vector<1x14x128xf32> to vector<14x128xf32>
    %336 = arith.maximumf %333, %335 : vector<14x128xf32>
    %c0_266 = arith.constant 0 : index
    %c692 = arith.constant 692 : index
    %c0_267 = arith.constant 0 : index
    %337 = tpu.strided_load %arg1[%c0_266, %c692, %c0_267] {strides = array<i32: 1, 2, 1>} : memref<1x904x128xf32, #tpu.memory_space<vmem>>, vector<1x14x128xf32>
    %338 = vector.shape_cast %337 : vector<1x14x128xf32> to vector<14x128xf32>
    %339 = arith.maximumf %336, %338 : vector<14x128xf32>
    %c0_268 = arith.constant 0 : index
    %c720 = arith.constant 720 : index
    %c0_269 = arith.constant 0 : index
    %340 = tpu.strided_load %arg1[%c0_268, %c720, %c0_269] {strides = array<i32: 1, 2, 1>} : memref<1x904x128xf32, #tpu.memory_space<vmem>>, vector<1x14x128xf32>
    %341 = vector.shape_cast %340 : vector<1x14x128xf32> to vector<14x128xf32>
    %342 = arith.maximumf %339, %341 : vector<14x128xf32>
    %c0_270 = arith.constant 0 : index
    %c721 = arith.constant 721 : index
    %c0_271 = arith.constant 0 : index
    %343 = tpu.strided_load %arg1[%c0_270, %c721, %c0_271] {strides = array<i32: 1, 2, 1>} : memref<1x904x128xf32, #tpu.memory_space<vmem>>, vector<1x14x128xf32>
    %344 = vector.shape_cast %343 : vector<1x14x128xf32> to vector<14x128xf32>
    %345 = arith.maximumf %342, %344 : vector<14x128xf32>
    %c0_272 = arith.constant 0 : index
    %c722 = arith.constant 722 : index
    %c0_273 = arith.constant 0 : index
    %346 = tpu.strided_load %arg1[%c0_272, %c722, %c0_273] {strides = array<i32: 1, 2, 1>} : memref<1x904x128xf32, #tpu.memory_space<vmem>>, vector<1x14x128xf32>
    %347 = vector.shape_cast %346 : vector<1x14x128xf32> to vector<14x128xf32>
    %348 = arith.maximumf %345, %347 : vector<14x128xf32>
    %c0_274 = arith.constant 0 : index
    %c193 = arith.constant 193 : index
    %c0_275 = arith.constant 0 : index
    %349 = vector.load %arg2[%c0_274, %c193, %c0_275] : memref<1x256x128xf32, #tpu.memory_space<vmem>>, vector<1x14x128xf32>
    %350 = vector.shape_cast %349 : vector<1x14x128xf32> to vector<14x128xf32>
    %351 = vector.shape_cast %348 : vector<14x128xf32> to vector<1x14x128xf32>
    tpu.vector_store %arg2[%c0_274, %c193, %c0_275], %351 {strides = array<i32>} : memref<1x256x128xf32, #tpu.memory_space<vmem>>, vector<1x14x128xf32>,
    %c0_276 = arith.constant 0 : index
    %c720_277 = arith.constant 720 : index
    %c0_278 = arith.constant 0 : index
    %352 = tpu.strided_load %arg1[%c0_276, %c720_277, %c0_278] {strides = array<i32: 1, 2, 1>} : memref<1x904x128xf32, #tpu.memory_space<vmem>>, vector<1x14x128xf32>
    %353 = vector.shape_cast %352 : vector<1x14x128xf32> to vector<14x128xf32>
    %c0_279 = arith.constant 0 : index
    %c721_280 = arith.constant 721 : index
    %c0_281 = arith.constant 0 : index
    %354 = tpu.strided_load %arg1[%c0_279, %c721_280, %c0_281] {strides = array<i32: 1, 2, 1>} : memref<1x904x128xf32, #tpu.memory_space<vmem>>, vector<1x14x128xf32>
    %355 = vector.shape_cast %354 : vector<1x14x128xf32> to vector<14x128xf32>
    %356 = arith.maximumf %353, %355 : vector<14x128xf32>
    %c0_282 = arith.constant 0 : index
    %c722_283 = arith.constant 722 : index
    %c0_284 = arith.constant 0 : index
    %357 = tpu.strided_load %arg1[%c0_282, %c722_283, %c0_284] {strides = array<i32: 1, 2, 1>} : memref<1x904x128xf32, #tpu.memory_space<vmem>>, vector<1x14x128xf32>
    %358 = vector.shape_cast %357 : vector<1x14x128xf32> to vector<14x128xf32>
    %359 = arith.maximumf %356, %358 : vector<14x128xf32>
    %c0_285 = arith.constant 0 : index
    %c750 = arith.constant 750 : index
    %c0_286 = arith.constant 0 : index
    %360 = tpu.strided_load %arg1[%c0_285, %c750, %c0_286] {strides = array<i32: 1, 2, 1>} : memref<1x904x128xf32, #tpu.memory_space<vmem>>, vector<1x14x128xf32>
    %361 = vector.shape_cast %360 : vector<1x14x128xf32> to vector<14x128xf32>
    %362 = arith.maximumf %359, %361 : vector<14x128xf32>
    %c0_287 = arith.constant 0 : index
    %c751 = arith.constant 751 : index
    %c0_288 = arith.constant 0 : index
    %363 = tpu.strided_load %arg1[%c0_287, %c751, %c0_288] {strides = array<i32: 1, 2, 1>} : memref<1x904x128xf32, #tpu.memory_space<vmem>>, vector<1x14x128xf32>
    %364 = vector.shape_cast %363 : vector<1x14x128xf32> to vector<14x128xf32>
    %365 = arith.maximumf %362, %364 : vector<14x128xf32>
    %c0_289 = arith.constant 0 : index
    %c752 = arith.constant 752 : index
    %c0_290 = arith.constant 0 : index
    %366 = tpu.strided_load %arg1[%c0_289, %c752, %c0_290] {strides = array<i32: 1, 2, 1>} : memref<1x904x128xf32, #tpu.memory_space<vmem>>, vector<1x14x128xf32>
    %367 = vector.shape_cast %366 : vector<1x14x128xf32> to vector<14x128xf32>
    %368 = arith.maximumf %365, %367 : vector<14x128xf32>
    %c0_291 = arith.constant 0 : index
    %c780 = arith.constant 780 : index
    %c0_292 = arith.constant 0 : index
    %369 = tpu.strided_load %arg1[%c0_291, %c780, %c0_292] {strides = array<i32: 1, 2, 1>} : memref<1x904x128xf32, #tpu.memory_space<vmem>>, vector<1x14x128xf32>
    %370 = vector.shape_cast %369 : vector<1x14x128xf32> to vector<14x128xf32>
    %371 = arith.maximumf %368, %370 : vector<14x128xf32>
    %c0_293 = arith.constant 0 : index
    %c781 = arith.constant 781 : index
    %c0_294 = arith.constant 0 : index
    %372 = tpu.strided_load %arg1[%c0_293, %c781, %c0_294] {strides = array<i32: 1, 2, 1>} : memref<1x904x128xf32, #tpu.memory_space<vmem>>, vector<1x14x128xf32>
    %373 = vector.shape_cast %372 : vector<1x14x128xf32> to vector<14x128xf32>
    %374 = arith.maximumf %371, %373 : vector<14x128xf32>
    %c0_295 = arith.constant 0 : index
    %c782 = arith.constant 782 : index
    %c0_296 = arith.constant 0 : index
    %375 = tpu.strided_load %arg1[%c0_295, %c782, %c0_296] {strides = array<i32: 1, 2, 1>} : memref<1x904x128xf32, #tpu.memory_space<vmem>>, vector<1x14x128xf32>
    %376 = vector.shape_cast %375 : vector<1x14x128xf32> to vector<14x128xf32>
    %377 = arith.maximumf %374, %376 : vector<14x128xf32>
    %c0_297 = arith.constant 0 : index
    %c209 = arith.constant 209 : index
    %c0_298 = arith.constant 0 : index
    %378 = vector.load %arg2[%c0_297, %c209, %c0_298] : memref<1x256x128xf32, #tpu.memory_space<vmem>>, vector<1x14x128xf32>
    %379 = vector.shape_cast %378 : vector<1x14x128xf32> to vector<14x128xf32>
    %380 = vector.shape_cast %377 : vector<14x128xf32> to vector<1x14x128xf32>
    tpu.vector_store %arg2[%c0_297, %c209, %c0_298], %380 {strides = array<i32>} : memref<1x256x128xf32, #tpu.memory_space<vmem>>, vector<1x14x128xf32>,
    %c0_299 = arith.constant 0 : index
    %c780_300 = arith.constant 780 : index
    %c0_301 = arith.constant 0 : index
    %381 = tpu.strided_load %arg1[%c0_299, %c780_300, %c0_301] {strides = array<i32: 1, 2, 1>} : memref<1x904x128xf32, #tpu.memory_space<vmem>>, vector<1x14x128xf32>
    %382 = vector.shape_cast %381 : vector<1x14x128xf32> to vector<14x128xf32>
    %c0_302 = arith.constant 0 : index
    %c781_303 = arith.constant 781 : index
    %c0_304 = arith.constant 0 : index
    %383 = tpu.strided_load %arg1[%c0_302, %c781_303, %c0_304] {strides = array<i32: 1, 2, 1>} : memref<1x904x128xf32, #tpu.memory_space<vmem>>, vector<1x14x128xf32>
    %384 = vector.shape_cast %383 : vector<1x14x128xf32> to vector<14x128xf32>
    %385 = arith.maximumf %382, %384 : vector<14x128xf32>
    %c0_305 = arith.constant 0 : index
    %c782_306 = arith.constant 782 : index
    %c0_307 = arith.constant 0 : index
    %386 = tpu.strided_load %arg1[%c0_305, %c782_306, %c0_307] {strides = array<i32: 1, 2, 1>} : memref<1x904x128xf32, #tpu.memory_space<vmem>>, vector<1x14x128xf32>
    %387 = vector.shape_cast %386 : vector<1x14x128xf32> to vector<14x128xf32>
    %388 = arith.maximumf %385, %387 : vector<14x128xf32>
    %c0_308 = arith.constant 0 : index
    %c810 = arith.constant 810 : index
    %c0_309 = arith.constant 0 : index
    %389 = tpu.strided_load %arg1[%c0_308, %c810, %c0_309] {strides = array<i32: 1, 2, 1>} : memref<1x904x128xf32, #tpu.memory_space<vmem>>, vector<1x14x128xf32>
    %390 = vector.shape_cast %389 : vector<1x14x128xf32> to vector<14x128xf32>
    %391 = arith.maximumf %388, %390 : vector<14x128xf32>
    %c0_310 = arith.constant 0 : index
    %c811 = arith.constant 811 : index
    %c0_311 = arith.constant 0 : index
    %392 = tpu.strided_load %arg1[%c0_310, %c811, %c0_311] {strides = array<i32: 1, 2, 1>} : memref<1x904x128xf32, #tpu.memory_space<vmem>>, vector<1x14x128xf32>
    %393 = vector.shape_cast %392 : vector<1x14x128xf32> to vector<14x128xf32>
    %394 = arith.maximumf %391, %393 : vector<14x128xf32>
    %c0_312 = arith.constant 0 : index
    %c812 = arith.constant 812 : index
    %c0_313 = arith.constant 0 : index
    %395 = tpu.strided_load %arg1[%c0_312, %c812, %c0_313] {strides = array<i32: 1, 2, 1>} : memref<1x904x128xf32, #tpu.memory_space<vmem>>, vector<1x14x128xf32>
    %396 = vector.shape_cast %395 : vector<1x14x128xf32> to vector<14x128xf32>
    %397 = arith.maximumf %394, %396 : vector<14x128xf32>
    %c0_314 = arith.constant 0 : index
    %c840 = arith.constant 840 : index
    %c0_315 = arith.constant 0 : index
    %398 = tpu.strided_load %arg1[%c0_314, %c840, %c0_315] {strides = array<i32: 1, 2, 1>} : memref<1x904x128xf32, #tpu.memory_space<vmem>>, vector<1x14x128xf32>
    %399 = vector.shape_cast %398 : vector<1x14x128xf32> to vector<14x128xf32>
    %400 = arith.maximumf %397, %399 : vector<14x128xf32>
    %c0_316 = arith.constant 0 : index
    %c841 = arith.constant 841 : index
    %c0_317 = arith.constant 0 : index
    %401 = tpu.strided_load %arg1[%c0_316, %c841, %c0_317] {strides = array<i32: 1, 2, 1>} : memref<1x904x128xf32, #tpu.memory_space<vmem>>, vector<1x14x128xf32>
    %402 = vector.shape_cast %401 : vector<1x14x128xf32> to vector<14x128xf32>
    %403 = arith.maximumf %400, %402 : vector<14x128xf32>
    %c0_318 = arith.constant 0 : index
    %c842 = arith.constant 842 : index
    %c0_319 = arith.constant 0 : index
    %404 = tpu.strided_load %arg1[%c0_318, %c842, %c0_319] {strides = array<i32: 1, 2, 1>} : memref<1x904x128xf32, #tpu.memory_space<vmem>>, vector<1x14x128xf32>
    %405 = vector.shape_cast %404 : vector<1x14x128xf32> to vector<14x128xf32>
    %406 = arith.maximumf %403, %405 : vector<14x128xf32>
    %c0_320 = arith.constant 0 : index
    %c225 = arith.constant 225 : index
    %c0_321 = arith.constant 0 : index
    %407 = vector.load %arg2[%c0_320, %c225, %c0_321] : memref<1x256x128xf32, #tpu.memory_space<vmem>>, vector<1x14x128xf32>
    %408 = vector.shape_cast %407 : vector<1x14x128xf32> to vector<14x128xf32>
    %409 = vector.shape_cast %406 : vector<14x128xf32> to vector<1x14x128xf32>
    tpu.vector_store %arg2[%c0_320, %c225, %c0_321], %409 {strides = array<i32>} : memref<1x256x128xf32, #tpu.memory_space<vmem>>, vector<1x14x128xf32>,
    return
  }
  func.func @transform_0(%arg0: i32) -> (i32, i32, i32) {
    %c0_i32 = arith.constant 0 : i32
    %c0_i32_0 = arith.constant 0 : i32
    %c0_i32_1 = arith.constant 0 : i32
    return %arg0, %c0_i32, %c0_i32_0 : i32, i32, i32
  }
  func.func @transform_1(%arg0: i32) -> (i32, i32, i32) {
    %c0_i32 = arith.constant 0 : i32
    %c0_i32_0 = arith.constant 0 : i32
    %c0_i32_1 = arith.constant 0 : i32
    return %arg0, %c0_i32, %c0_i32_0 : i32, i32, i32
  }
}

module attributes {stable_mosaic.version = 11 : i64} {
  func.func @_dense_block_kernel(%arg0: i32, %arg1: i32, %arg2: memref<1x256x128xf32, #tpu.memory_space<vmem>>, %arg3: memref<256x1xf32, #tpu.memory_space<vmem>>, %arg4: memref<1x1x128xf32, #tpu.memory_space<vmem>>, %arg5: memref<1x1x128xf32, #tpu.memory_space<vmem>>, %arg6: memref<1x128x128xbf16, #tpu.memory_space<vmem>>, %arg7: memref<1x1x128xf32, #tpu.memory_space<vmem>>, %arg8: memref<1x9x128x128xbf16, #tpu.memory_space<vmem>>, %arg9: memref<1x256x128xbf16, #tpu.memory_space<vmem>>, %arg10: memref<304x128xf32, #tpu.memory_space<vmem>>) attributes {dimension_semantics = [#tpu.dimension_semantics<parallel>, #tpu.dimension_semantics<arbitrary>], iteration_bounds = array<i64: 2, 2>, scalar_prefetch = 0 : i64, scratch_operands = 1 : i64, tpu.core_type = #tpu.core_type<tc>, window_params = [{transform_indices = @transform_0, window_bounds = array<i64: 1, 256, 128>}, {pipeline_mode = #tpu.pipeline_mode<synchronous>, transform_indices = @transform_1, window_bounds = array<i64: 256, 1>}, {transform_indices = @transform_2, window_bounds = array<i64: 1, 1, 128>}, {transform_indices = @transform_3, window_bounds = array<i64: 1, 1, 128>}, {transform_indices = @transform_4, window_bounds = array<i64: 1, 128, 128>}, {transform_indices = @transform_5, window_bounds = array<i64: 1, 1, 128>}, {transform_indices = @transform_6, window_bounds = array<i64: 1, 9, 128, 128>}, {transform_indices = @transform_7, window_bounds = array<i64: 1, 256, 128>}]} {
    %c0_i32 = arith.constant 0 : i32
    %0 = arith.cmpi eq, %arg1, %c0_i32 : i32
    %1 = arith.extui %0 : i1 to i32
    %c0_i32_0 = arith.constant 0 : i32
    %2 = arith.cmpi ne, %1, %c0_i32_0 : i32
    scf.if %2 {
      %c0_78 = arith.constant 0 : index
      %c0_79 = arith.constant 0 : index
      %c0_80 = arith.constant 0 : index
      %96 = vector.load %arg2[%c0_78, %c0_79, %c0_80] : memref<1x256x128xf32, #tpu.memory_space<vmem>>, vector<1x256x128xf32>
      %97 = vector.shape_cast %96 : vector<1x256x128xf32> to vector<256x128xf32>
      %98 = arith.truncf %97 : vector<256x128xf32> to vector<256x128xbf16>
      %c0_81 = arith.constant 0 : index
      %c0_82 = arith.constant 0 : index
      %c0_83 = arith.constant 0 : index
      %99 = vector.load %arg9[%c0_81, %c0_82, %c0_83] : memref<1x256x128xbf16, #tpu.memory_space<vmem>>, vector<1x256x128xbf16>
      %100 = vector.shape_cast %99 : vector<1x256x128xbf16> to vector<256x128xbf16>
      %101 = vector.shape_cast %98 : vector<256x128xbf16> to vector<1x256x128xbf16>
      tpu.vector_store %arg9[%c0_81, %c0_82, %c0_83], %101 {strides = array<i32>} : memref<1x256x128xbf16, #tpu.memory_space<vmem>>, vector<1x256x128xbf16>,
    } else {
    }
    %c0 = arith.constant 0 : index
    %c0_1 = arith.constant 0 : index
    %3 = vector.load %arg3[%c0, %c0_1] : memref<256x1xf32, #tpu.memory_space<vmem>>, vector<256x1xf32>
    %c0_2 = arith.constant 0 : index
    %c0_3 = arith.constant 0 : index
    %c0_4 = arith.constant 0 : index
    %4 = vector.load %arg9[%c0_2, %c0_3, %c0_4] : memref<1x256x128xbf16, #tpu.memory_space<vmem>>, vector<1x256x128xbf16>
    %5 = vector.shape_cast %4 : vector<1x256x128xbf16> to vector<256x128xbf16>
    %6 = arith.extf %5 : vector<256x128xbf16> to vector<256x128xf32>
    %c0_5 = arith.constant 0 : index
    %c0_6 = arith.constant 0 : index
    %c0_7 = arith.constant 0 : index
    %7 = vector.load %arg4[%c0_5, %c0_6, %c0_7] : memref<1x1x128xf32, #tpu.memory_space<vmem>>, vector<1x1x128xf32>
    %8 = vector.shape_cast %7 : vector<1x1x128xf32> to vector<1x128xf32>
    %9 = vector.broadcast %8 : vector<1x128xf32> to vector<256x128xf32>
    %10 = arith.mulf %6, %9 : vector<256x128xf32>
    %c0_8 = arith.constant 0 : index
    %c0_9 = arith.constant 0 : index
    %c0_10 = arith.constant 0 : index
    %11 = vector.load %arg5[%c0_8, %c0_9, %c0_10] : memref<1x1x128xf32, #tpu.memory_space<vmem>>, vector<1x1x128xf32>
    %12 = vector.shape_cast %11 : vector<1x1x128xf32> to vector<1x128xf32>
    %13 = vector.broadcast %12 : vector<1x128xf32> to vector<256x128xf32>
    %14 = arith.addf %10, %13 : vector<256x128xf32>
    %cst = arith.constant 0.000000e+00 : f32
    %15 = vector.broadcast %cst : f32 to vector<256x128xf32>
    %16 = arith.maximumf %14, %15 : vector<256x128xf32>
    %17 = arith.truncf %16 : vector<256x128xf32> to vector<256x128xbf16>
    %c0_11 = arith.constant 0 : index
    %c0_12 = arith.constant 0 : index
    %c0_13 = arith.constant 0 : index
    %18 = vector.load %arg6[%c0_11, %c0_12, %c0_13] : memref<1x128x128xbf16, #tpu.memory_space<vmem>>, vector<1x128x128xbf16>
    %19 = vector.shape_cast %18 : vector<1x128x128xbf16> to vector<128x128xbf16>
    %cst_14 = arith.constant dense<0.000000e+00> : vector<256x128xf32>
    %20 = tpu.matmul %17, %19, %cst_14 {dimension_numbers = #tpu.dot_dimension_numbers<[1], [0], [0], [1], [0, 0, 1, 1], [], []>} : vector<256x128xbf16>, vector<128x128xbf16>, vector<256x128xf32> -> vector<256x128xf32>
    %c0_15 = arith.constant 0 : index
    %c0_16 = arith.constant 0 : index
    %c0_17 = arith.constant 0 : index
    %21 = vector.load %arg7[%c0_15, %c0_16, %c0_17] : memref<1x1x128xf32, #tpu.memory_space<vmem>>, vector<1x1x128xf32>
    %22 = vector.shape_cast %21 : vector<1x1x128xf32> to vector<1x128xf32>
    %23 = vector.broadcast %22 : vector<1x128xf32> to vector<256x128xf32>
    %24 = arith.addf %20, %23 : vector<256x128xf32>
    %cst_18 = arith.constant 0.000000e+00 : f32
    %25 = vector.broadcast %cst_18 : f32 to vector<256x128xf32>
    %26 = arith.maximumf %24, %25 : vector<256x128xf32>
    %27 = vector.broadcast %3 : vector<256x1xf32> to vector<256x128xf32>
    %28 = arith.mulf %26, %27 : vector<256x128xf32>
    %cst_19 = arith.constant 0.000000e+00 : f32
    %29 = vector.broadcast %cst_19 : f32 to vector<24x128xf32>
    %c0_20 = arith.constant 0 : index
    %c0_21 = arith.constant 0 : index
    %30 = vector.load %arg10[%c0_20, %c0_21] : memref<304x128xf32, #tpu.memory_space<vmem>>, vector<24x128xf32>
    tpu.vector_store %arg10[%c0_20, %c0_21], %29 {strides = array<i32>} : memref<304x128xf32, #tpu.memory_space<vmem>>, vector<24x128xf32>,
    %c24 = arith.constant 24 : index
    %c0_22 = arith.constant 0 : index
    %31 = vector.load %arg10[%c24, %c0_22] : memref<304x128xf32, #tpu.memory_space<vmem>>, vector<256x128xf32>
    tpu.vector_store %arg10[%c24, %c0_22], %28 {strides = array<i32>} : memref<304x128xf32, #tpu.memory_space<vmem>>, vector<256x128xf32>,
    %cst_23 = arith.constant 0.000000e+00 : f32
    %32 = vector.broadcast %cst_23 : f32 to vector<24x128xf32>
    %c280 = arith.constant 280 : index
    %c0_24 = arith.constant 0 : index
    %33 = vector.load %arg10[%c280, %c0_24] : memref<304x128xf32, #tpu.memory_space<vmem>>, vector<24x128xf32>
    tpu.vector_store %arg10[%c280, %c0_24], %32 {strides = array<i32>} : memref<304x128xf32, #tpu.memory_space<vmem>>, vector<24x128xf32>,
    %cst_25 = arith.constant 0.000000e+00 : f32
    %34 = vector.broadcast %cst_25 : f32 to vector<256x128xf32>
    %c7 = arith.constant 7 : index
    %c0_26 = arith.constant 0 : index
    %35 = vector.load %arg10[%c7, %c0_26] : memref<304x128xf32, #tpu.memory_space<vmem>>, vector<256x128xf32>
    %36 = arith.truncf %35 : vector<256x128xf32> to vector<256x128xbf16>
    %c0_27 = arith.constant 0 : index
    %c0_28 = arith.constant 0 : index
    %c0_29 = arith.constant 0 : index
    %c0_30 = arith.constant 0 : index
    %37 = vector.load %arg8[%c0_27, %c0_28, %c0_29, %c0_30] : memref<1x9x128x128xbf16, #tpu.memory_space<vmem>>, vector<1x1x128x128xbf16>
    %38 = vector.shape_cast %37 : vector<1x1x128x128xbf16> to vector<128x128xbf16>
    %cst_31 = arith.constant dense<0.000000e+00> : vector<256x128xf32>
    %39 = tpu.matmul %36, %38, %cst_31 {dimension_numbers = #tpu.dot_dimension_numbers<[1], [0], [0], [1], [0, 0, 1, 1], [], []>} : vector<256x128xbf16>, vector<128x128xbf16>, vector<256x128xf32> -> vector<256x128xf32>
    %40 = arith.addf %34, %39 : vector<256x128xf32>
    %c8 = arith.constant 8 : index
    %c0_32 = arith.constant 0 : index
    %41 = vector.load %arg10[%c8, %c0_32] : memref<304x128xf32, #tpu.memory_space<vmem>>, vector<256x128xf32>
    %42 = arith.truncf %41 : vector<256x128xf32> to vector<256x128xbf16>
    %c0_33 = arith.constant 0 : index
    %c1 = arith.constant 1 : index
    %c0_34 = arith.constant 0 : index
    %c0_35 = arith.constant 0 : index
    %43 = vector.load %arg8[%c0_33, %c1, %c0_34, %c0_35] : memref<1x9x128x128xbf16, #tpu.memory_space<vmem>>, vector<1x1x128x128xbf16>
    %44 = vector.shape_cast %43 : vector<1x1x128x128xbf16> to vector<128x128xbf16>
    %cst_36 = arith.constant dense<0.000000e+00> : vector<256x128xf32>
    %45 = tpu.matmul %42, %44, %cst_36 {dimension_numbers = #tpu.dot_dimension_numbers<[1], [0], [0], [1], [0, 0, 1, 1], [], []>} : vector<256x128xbf16>, vector<128x128xbf16>, vector<256x128xf32> -> vector<256x128xf32>
    %46 = arith.addf %40, %45 : vector<256x128xf32>
    %c9 = arith.constant 9 : index
    %c0_37 = arith.constant 0 : index
    %47 = vector.load %arg10[%c9, %c0_37] : memref<304x128xf32, #tpu.memory_space<vmem>>, vector<256x128xf32>
    %48 = arith.truncf %47 : vector<256x128xf32> to vector<256x128xbf16>
    %c0_38 = arith.constant 0 : index
    %c2 = arith.constant 2 : index
    %c0_39 = arith.constant 0 : index
    %c0_40 = arith.constant 0 : index
    %49 = vector.load %arg8[%c0_38, %c2, %c0_39, %c0_40] : memref<1x9x128x128xbf16, #tpu.memory_space<vmem>>, vector<1x1x128x128xbf16>
    %50 = vector.shape_cast %49 : vector<1x1x128x128xbf16> to vector<128x128xbf16>
    %cst_41 = arith.constant dense<0.000000e+00> : vector<256x128xf32>
    %51 = tpu.matmul %48, %50, %cst_41 {dimension_numbers = #tpu.dot_dimension_numbers<[1], [0], [0], [1], [0, 0, 1, 1], [], []>} : vector<256x128xbf16>, vector<128x128xbf16>, vector<256x128xf32> -> vector<256x128xf32>
    %52 = arith.addf %46, %51 : vector<256x128xf32>
    %c23 = arith.constant 23 : index
    %c0_42 = arith.constant 0 : index
    %53 = vector.load %arg10[%c23, %c0_42] : memref<304x128xf32, #tpu.memory_space<vmem>>, vector<256x128xf32>
    %54 = arith.truncf %53 : vector<256x128xf32> to vector<256x128xbf16>
    %c0_43 = arith.constant 0 : index
    %c3 = arith.constant 3 : index
    %c0_44 = arith.constant 0 : index
    %c0_45 = arith.constant 0 : index
    %55 = vector.load %arg8[%c0_43, %c3, %c0_44, %c0_45] : memref<1x9x128x128xbf16, #tpu.memory_space<vmem>>, vector<1x1x128x128xbf16>
    %56 = vector.shape_cast %55 : vector<1x1x128x128xbf16> to vector<128x128xbf16>
    %cst_46 = arith.constant dense<0.000000e+00> : vector<256x128xf32>
    %57 = tpu.matmul %54, %56, %cst_46 {dimension_numbers = #tpu.dot_dimension_numbers<[1], [0], [0], [1], [0, 0, 1, 1], [], []>} : vector<256x128xbf16>, vector<128x128xbf16>, vector<256x128xf32> -> vector<256x128xf32>
    %58 = arith.addf %52, %57 : vector<256x128xf32>
    %c24_47 = arith.constant 24 : index
    %c0_48 = arith.constant 0 : index
    %59 = vector.load %arg10[%c24_47, %c0_48] : memref<304x128xf32, #tpu.memory_space<vmem>>, vector<256x128xf32>
    %60 = arith.truncf %59 : vector<256x128xf32> to vector<256x128xbf16>
    %c0_49 = arith.constant 0 : index
    %c4 = arith.constant 4 : index
    %c0_50 = arith.constant 0 : index
    %c0_51 = arith.constant 0 : index
    %61 = vector.load %arg8[%c0_49, %c4, %c0_50, %c0_51] : memref<1x9x128x128xbf16, #tpu.memory_space<vmem>>, vector<1x1x128x128xbf16>
    %62 = vector.shape_cast %61 : vector<1x1x128x128xbf16> to vector<128x128xbf16>
    %cst_52 = arith.constant dense<0.000000e+00> : vector<256x128xf32>
    %63 = tpu.matmul %60, %62, %cst_52 {dimension_numbers = #tpu.dot_dimension_numbers<[1], [0], [0], [1], [0, 0, 1, 1], [], []>} : vector<256x128xbf16>, vector<128x128xbf16>, vector<256x128xf32> -> vector<256x128xf32>
    %64 = arith.addf %58, %63 : vector<256x128xf32>
    %c25 = arith.constant 25 : index
    %c0_53 = arith.constant 0 : index
    %65 = vector.load %arg10[%c25, %c0_53] : memref<304x128xf32, #tpu.memory_space<vmem>>, vector<256x128xf32>
    %66 = arith.truncf %65 : vector<256x128xf32> to vector<256x128xbf16>
    %c0_54 = arith.constant 0 : index
    %c5 = arith.constant 5 : index
    %c0_55 = arith.constant 0 : index
    %c0_56 = arith.constant 0 : index
    %67 = vector.load %arg8[%c0_54, %c5, %c0_55, %c0_56] : memref<1x9x128x128xbf16, #tpu.memory_space<vmem>>, vector<1x1x128x128xbf16>
    %68 = vector.shape_cast %67 : vector<1x1x128x128xbf16> to vector<128x128xbf16>
    %cst_57 = arith.constant dense<0.000000e+00> : vector<256x128xf32>
    %69 = tpu.matmul %66, %68, %cst_57 {dimension_numbers = #tpu.dot_dimension_numbers<[1], [0], [0], [1], [0, 0, 1, 1], [], []>} : vector<256x128xbf16>, vector<128x128xbf16>, vector<256x128xf32> -> vector<256x128xf32>
    %70 = arith.addf %64, %69 : vector<256x128xf32>
    %c39 = arith.constant 39 : index
    %c0_58 = arith.constant 0 : index
    %71 = vector.load %arg10[%c39, %c0_58] : memref<304x128xf32, #tpu.memory_space<vmem>>, vector<256x128xf32>
    %72 = arith.truncf %71 : vector<256x128xf32> to vector<256x128xbf16>
    %c0_59 = arith.constant 0 : index
    %c6 = arith.constant 6 : index
    %c0_60 = arith.constant 0 : index
    %c0_61 = arith.constant 0 : index
    %73 = vector.load %arg8[%c0_59, %c6, %c0_60, %c0_61] : memref<1x9x128x128xbf16, #tpu.memory_space<vmem>>, vector<1x1x128x128xbf16>
    %74 = vector.shape_cast %73 : vector<1x1x128x128xbf16> to vector<128x128xbf16>
    %cst_62 = arith.constant dense<0.000000e+00> : vector<256x128xf32>
    %75 = tpu.matmul %72, %74, %cst_62 {dimension_numbers = #tpu.dot_dimension_numbers<[1], [0], [0], [1], [0, 0, 1, 1], [], []>} : vector<256x128xbf16>, vector<128x128xbf16>, vector<256x128xf32> -> vector<256x128xf32>
    %76 = arith.addf %70, %75 : vector<256x128xf32>
    %c40 = arith.constant 40 : index
    %c0_63 = arith.constant 0 : index
    %77 = vector.load %arg10[%c40, %c0_63] : memref<304x128xf32, #tpu.memory_space<vmem>>, vector<256x128xf32>
    %78 = arith.truncf %77 : vector<256x128xf32> to vector<256x128xbf16>
    %c0_64 = arith.constant 0 : index
    %c7_65 = arith.constant 7 : index
    %c0_66 = arith.constant 0 : index
    %c0_67 = arith.constant 0 : index
    %79 = vector.load %arg8[%c0_64, %c7_65, %c0_66, %c0_67] : memref<1x9x128x128xbf16, #tpu.memory_space<vmem>>, vector<1x1x128x128xbf16>
    %80 = vector.shape_cast %79 : vector<1x1x128x128xbf16> to vector<128x128xbf16>
    %cst_68 = arith.constant dense<0.000000e+00> : vector<256x128xf32>
    %81 = tpu.matmul %78, %80, %cst_68 {dimension_numbers = #tpu.dot_dimension_numbers<[1], [0], [0], [1], [0, 0, 1, 1], [], []>} : vector<256x128xbf16>, vector<128x128xbf16>, vector<256x128xf32> -> vector<256x128xf32>
    %82 = arith.addf %76, %81 : vector<256x128xf32>
    %c41 = arith.constant 41 : index
    %c0_69 = arith.constant 0 : index
    %83 = vector.load %arg10[%c41, %c0_69] : memref<304x128xf32, #tpu.memory_space<vmem>>, vector<256x128xf32>
    %84 = arith.truncf %83 : vector<256x128xf32> to vector<256x128xbf16>
    %c0_70 = arith.constant 0 : index
    %c8_71 = arith.constant 8 : index
    %c0_72 = arith.constant 0 : index
    %c0_73 = arith.constant 0 : index
    %85 = vector.load %arg8[%c0_70, %c8_71, %c0_72, %c0_73] : memref<1x9x128x128xbf16, #tpu.memory_space<vmem>>, vector<1x1x128x128xbf16>
    %86 = vector.shape_cast %85 : vector<1x1x128x128xbf16> to vector<128x128xbf16>
    %cst_74 = arith.constant dense<0.000000e+00> : vector<256x128xf32>
    %87 = tpu.matmul %84, %86, %cst_74 {dimension_numbers = #tpu.dot_dimension_numbers<[1], [0], [0], [1], [0, 0, 1, 1], [], []>} : vector<256x128xbf16>, vector<128x128xbf16>, vector<256x128xf32> -> vector<256x128xf32>
    %88 = arith.addf %82, %87 : vector<256x128xf32>
    %89 = vector.broadcast %3 : vector<256x1xf32> to vector<256x128xf32>
    %90 = arith.mulf %88, %89 : vector<256x128xf32>
    %91 = arith.addf %90, %6 : vector<256x128xf32>
    %92 = arith.truncf %91 : vector<256x128xf32> to vector<256x128xbf16>
    %c0_75 = arith.constant 0 : index
    %c0_76 = arith.constant 0 : index
    %c0_77 = arith.constant 0 : index
    %93 = vector.load %arg9[%c0_75, %c0_76, %c0_77] : memref<1x256x128xbf16, #tpu.memory_space<vmem>>, vector<1x256x128xbf16>
    %94 = vector.shape_cast %93 : vector<1x256x128xbf16> to vector<256x128xbf16>
    %95 = vector.shape_cast %92 : vector<256x128xbf16> to vector<1x256x128xbf16>
    tpu.vector_store %arg9[%c0_75, %c0_76, %c0_77], %95 {strides = array<i32>} : memref<1x256x128xbf16, #tpu.memory_space<vmem>>, vector<1x256x128xbf16>,
    return
  }
  func.func @transform_0(%arg0: i32, %arg1: i32) -> (i32, i32, i32) {
    %c0_i32 = arith.constant 0 : i32
    %c0_i32_0 = arith.constant 0 : i32
    %c0_i32_1 = arith.constant 0 : i32
    return %arg0, %c0_i32, %c0_i32_0 : i32, i32, i32
  }
  func.func @transform_1(%arg0: i32, %arg1: i32) -> (i32, i32) {
    %c0_i32 = arith.constant 0 : i32
    %c0_i32_0 = arith.constant 0 : i32
    %c0_i32_1 = arith.constant 0 : i32
    return %c0_i32, %c0_i32_0 : i32, i32
  }
  func.func @transform_2(%arg0: i32, %arg1: i32) -> (i32, i32, i32) {
    %c0_i32 = arith.constant 0 : i32
    %c0_i32_0 = arith.constant 0 : i32
    %c0_i32_1 = arith.constant 0 : i32
    return %arg1, %c0_i32, %c0_i32_0 : i32, i32, i32
  }
  func.func @transform_3(%arg0: i32, %arg1: i32) -> (i32, i32, i32) {
    %c0_i32 = arith.constant 0 : i32
    %c0_i32_0 = arith.constant 0 : i32
    %c0_i32_1 = arith.constant 0 : i32
    return %arg1, %c0_i32, %c0_i32_0 : i32, i32, i32
  }
  func.func @transform_4(%arg0: i32, %arg1: i32) -> (i32, i32, i32) {
    %c0_i32 = arith.constant 0 : i32
    %c0_i32_0 = arith.constant 0 : i32
    %c0_i32_1 = arith.constant 0 : i32
    return %arg1, %c0_i32, %c0_i32_0 : i32, i32, i32
  }
  func.func @transform_5(%arg0: i32, %arg1: i32) -> (i32, i32, i32) {
    %c0_i32 = arith.constant 0 : i32
    %c0_i32_0 = arith.constant 0 : i32
    %c0_i32_1 = arith.constant 0 : i32
    return %arg1, %c0_i32, %c0_i32_0 : i32, i32, i32
  }
  func.func @transform_6(%arg0: i32, %arg1: i32) -> (i32, i32, i32, i32) {
    %c0_i32 = arith.constant 0 : i32
    %c0_i32_0 = arith.constant 0 : i32
    %c0_i32_1 = arith.constant 0 : i32
    %c0_i32_2 = arith.constant 0 : i32
    return %arg1, %c0_i32, %c0_i32_0, %c0_i32_1 : i32, i32, i32, i32
  }
  func.func @transform_7(%arg0: i32, %arg1: i32) -> (i32, i32, i32) {
    %c0_i32 = arith.constant 0 : i32
    %c0_i32_0 = arith.constant 0 : i32
    %c0_i32_1 = arith.constant 0 : i32
    return %arg0, %c0_i32, %c0_i32_0 : i32, i32, i32
  }
}

module attributes {stable_mosaic.version = 11 : i64} {
  func.func @_transition_kernel(%arg0: i32, %arg1: memref<1x256x128xbf16, #tpu.memory_space<vmem>>, %arg2: memref<128x128xbf16, #tpu.memory_space<vmem>>, %arg3: memref<1x128xf32, #tpu.memory_space<vmem>>, %arg4: memref<1x88x128xf32, #tpu.memory_space<vmem>>, %arg5: memref<256x128xf32, #tpu.memory_space<vmem>>) attributes {dimension_semantics = [#tpu.dimension_semantics<parallel>], iteration_bounds = array<i64: 2>, scalar_prefetch = 0 : i64, scratch_operands = 1 : i64, tpu.core_type = #tpu.core_type<tc>, window_params = [{transform_indices = @transform_0, window_bounds = array<i64: 1, 256, 128>}, {pipeline_mode = #tpu.pipeline_mode<synchronous>, transform_indices = @transform_1, window_bounds = array<i64: 128, 128>}, {pipeline_mode = #tpu.pipeline_mode<synchronous>, transform_indices = @transform_2, window_bounds = array<i64: 1, 128>}, {transform_indices = @transform_3, window_bounds = array<i64: 1, 88, 128>}]} {
    %c0 = arith.constant 0 : index
    %c0_0 = arith.constant 0 : index
    %c0_1 = arith.constant 0 : index
    %0 = vector.load %arg1[%c0, %c0_0, %c0_1] : memref<1x256x128xbf16, #tpu.memory_space<vmem>>, vector<1x256x128xbf16>
    %1 = vector.shape_cast %0 : vector<1x256x128xbf16> to vector<256x128xbf16>
    %c0_2 = arith.constant 0 : index
    %c0_3 = arith.constant 0 : index
    %2 = vector.load %arg2[%c0_2, %c0_3] : memref<128x128xbf16, #tpu.memory_space<vmem>>, vector<128x128xbf16>
    %cst = arith.constant dense<0.000000e+00> : vector<256x128xf32>
    %3 = tpu.matmul %1, %2, %cst {dimension_numbers = #tpu.dot_dimension_numbers<[1], [0], [0], [1], [0, 0, 1, 1], [], []>} : vector<256x128xbf16>, vector<128x128xbf16>, vector<256x128xf32> -> vector<256x128xf32>
    %c0_4 = arith.constant 0 : index
    %c0_5 = arith.constant 0 : index
    %4 = vector.load %arg3[%c0_4, %c0_5] : memref<1x128xf32, #tpu.memory_space<vmem>>, vector<1x128xf32>
    %5 = vector.broadcast %4 : vector<1x128xf32> to vector<256x128xf32>
    %6 = arith.addf %3, %5 : vector<256x128xf32>
    %c0_6 = arith.constant 0 : index
    %c0_7 = arith.constant 0 : index
    %7 = vector.load %arg5[%c0_6, %c0_7] : memref<256x128xf32, #tpu.memory_space<vmem>>, vector<256x128xf32>
    tpu.vector_store %arg5[%c0_6, %c0_7], %6 {strides = array<i32>} : memref<256x128xf32, #tpu.memory_space<vmem>>, vector<256x128xf32>,
    %cst_8 = arith.constant 0.000000e+00 : f32
    %8 = vector.broadcast %cst_8 : f32 to vector<88x128xf32>
    %c0_9 = arith.constant 0 : index
    %c0_10 = arith.constant 0 : index
    %c0_11 = arith.constant 0 : index
    %9 = vector.load %arg4[%c0_9, %c0_10, %c0_11] : memref<1x88x128xf32, #tpu.memory_space<vmem>>, vector<1x88x128xf32>
    %10 = vector.shape_cast %9 : vector<1x88x128xf32> to vector<88x128xf32>
    %11 = vector.shape_cast %8 : vector<88x128xf32> to vector<1x88x128xf32>
    tpu.vector_store %arg4[%c0_9, %c0_10, %c0_11], %11 {strides = array<i32>} : memref<1x88x128xf32, #tpu.memory_space<vmem>>, vector<1x88x128xf32>,
    %c17 = arith.constant 17 : index
    %c0_12 = arith.constant 0 : index
    %12 = tpu.strided_load %arg5[%c17, %c0_12] {strides = array<i32: 2, 1>} : memref<256x128xf32, #tpu.memory_space<vmem>>, vector<7x128xf32>
    %c18 = arith.constant 18 : index
    %c0_13 = arith.constant 0 : index
    %13 = tpu.strided_load %arg5[%c18, %c0_13] {strides = array<i32: 2, 1>} : memref<256x128xf32, #tpu.memory_space<vmem>>, vector<7x128xf32>
    %14 = arith.addf %12, %13 : vector<7x128xf32>
    %c33 = arith.constant 33 : index
    %c0_14 = arith.constant 0 : index
    %15 = tpu.strided_load %arg5[%c33, %c0_14] {strides = array<i32: 2, 1>} : memref<256x128xf32, #tpu.memory_space<vmem>>, vector<7x128xf32>
    %16 = arith.addf %14, %15 : vector<7x128xf32>
    %c34 = arith.constant 34 : index
    %c0_15 = arith.constant 0 : index
    %17 = tpu.strided_load %arg5[%c34, %c0_15] {strides = array<i32: 2, 1>} : memref<256x128xf32, #tpu.memory_space<vmem>>, vector<7x128xf32>
    %18 = arith.addf %16, %17 : vector<7x128xf32>
    %cst_16 = arith.constant 2.500000e-01 : f32
    %19 = vector.broadcast %cst_16 : f32 to vector<7x128xf32>
    %20 = arith.mulf %18, %19 : vector<7x128xf32>
    %c0_17 = arith.constant 0 : index
    %c10 = arith.constant 10 : index
    %c0_18 = arith.constant 0 : index
    %21 = vector.load %arg4[%c0_17, %c10, %c0_18] : memref<1x88x128xf32, #tpu.memory_space<vmem>>, vector<1x7x128xf32>
    %22 = vector.shape_cast %21 : vector<1x7x128xf32> to vector<7x128xf32>
    %23 = vector.shape_cast %20 : vector<7x128xf32> to vector<1x7x128xf32>
    tpu.vector_store %arg4[%c0_17, %c10, %c0_18], %23 {strides = array<i32>} : memref<1x88x128xf32, #tpu.memory_space<vmem>>, vector<1x7x128xf32>,
    %c49 = arith.constant 49 : index
    %c0_19 = arith.constant 0 : index
    %24 = tpu.strided_load %arg5[%c49, %c0_19] {strides = array<i32: 2, 1>} : memref<256x128xf32, #tpu.memory_space<vmem>>, vector<7x128xf32>
    %c50 = arith.constant 50 : index
    %c0_20 = arith.constant 0 : index
    %25 = tpu.strided_load %arg5[%c50, %c0_20] {strides = array<i32: 2, 1>} : memref<256x128xf32, #tpu.memory_space<vmem>>, vector<7x128xf32>
    %26 = arith.addf %24, %25 : vector<7x128xf32>
    %c65 = arith.constant 65 : index
    %c0_21 = arith.constant 0 : index
    %27 = tpu.strided_load %arg5[%c65, %c0_21] {strides = array<i32: 2, 1>} : memref<256x128xf32, #tpu.memory_space<vmem>>, vector<7x128xf32>
    %28 = arith.addf %26, %27 : vector<7x128xf32>
    %c66 = arith.constant 66 : index
    %c0_22 = arith.constant 0 : index
    %29 = tpu.strided_load %arg5[%c66, %c0_22] {strides = array<i32: 2, 1>} : memref<256x128xf32, #tpu.memory_space<vmem>>, vector<7x128xf32>
    %30 = arith.addf %28, %29 : vector<7x128xf32>
    %cst_23 = arith.constant 2.500000e-01 : f32
    %31 = vector.broadcast %cst_23 : f32 to vector<7x128xf32>
    %32 = arith.mulf %30, %31 : vector<7x128xf32>
    %c0_24 = arith.constant 0 : index
    %c19 = arith.constant 19 : index
    %c0_25 = arith.constant 0 : index
    %33 = vector.load %arg4[%c0_24, %c19, %c0_25] : memref<1x88x128xf32, #tpu.memory_space<vmem>>, vector<1x7x128xf32>
    %34 = vector.shape_cast %33 : vector<1x7x128xf32> to vector<7x128xf32>
    %35 = vector.shape_cast %32 : vector<7x128xf32> to vector<1x7x128xf32>
    tpu.vector_store %arg4[%c0_24, %c19, %c0_25], %35 {strides = array<i32>} : memref<1x88x128xf32, #tpu.memory_space<vmem>>, vector<1x7x128xf32>,
    %c81 = arith.constant 81 : index
    %c0_26 = arith.constant 0 : index
    %36 = tpu.strided_load %arg5[%c81, %c0_26] {strides = array<i32: 2, 1>} : memref<256x128xf32, #tpu.memory_space<vmem>>, vector<7x128xf32>
    %c82 = arith.constant 82 : index
    %c0_27 = arith.constant 0 : index
    %37 = tpu.strided_load %arg5[%c82, %c0_27] {strides = array<i32: 2, 1>} : memref<256x128xf32, #tpu.memory_space<vmem>>, vector<7x128xf32>
    %38 = arith.addf %36, %37 : vector<7x128xf32>
    %c97 = arith.constant 97 : index
    %c0_28 = arith.constant 0 : index
    %39 = tpu.strided_load %arg5[%c97, %c0_28] {strides = array<i32: 2, 1>} : memref<256x128xf32, #tpu.memory_space<vmem>>, vector<7x128xf32>
    %40 = arith.addf %38, %39 : vector<7x128xf32>
    %c98 = arith.constant 98 : index
    %c0_29 = arith.constant 0 : index
    %41 = tpu.strided_load %arg5[%c98, %c0_29] {strides = array<i32: 2, 1>} : memref<256x128xf32, #tpu.memory_space<vmem>>, vector<7x128xf32>
    %42 = arith.addf %40, %41 : vector<7x128xf32>
    %cst_30 = arith.constant 2.500000e-01 : f32
    %43 = vector.broadcast %cst_30 : f32 to vector<7x128xf32>
    %44 = arith.mulf %42, %43 : vector<7x128xf32>
    %c0_31 = arith.constant 0 : index
    %c28 = arith.constant 28 : index
    %c0_32 = arith.constant 0 : index
    %45 = vector.load %arg4[%c0_31, %c28, %c0_32] : memref<1x88x128xf32, #tpu.memory_space<vmem>>, vector<1x7x128xf32>
    %46 = vector.shape_cast %45 : vector<1x7x128xf32> to vector<7x128xf32>
    %47 = vector.shape_cast %44 : vector<7x128xf32> to vector<1x7x128xf32>
    tpu.vector_store %arg4[%c0_31, %c28, %c0_32], %47 {strides = array<i32>} : memref<1x88x128xf32, #tpu.memory_space<vmem>>, vector<1x7x128xf32>,
    %c113 = arith.constant 113 : index
    %c0_33 = arith.constant 0 : index
    %48 = tpu.strided_load %arg5[%c113, %c0_33] {strides = array<i32: 2, 1>} : memref<256x128xf32, #tpu.memory_space<vmem>>, vector<7x128xf32>
    %c114 = arith.constant 114 : index
    %c0_34 = arith.constant 0 : index
    %49 = tpu.strided_load %arg5[%c114, %c0_34] {strides = array<i32: 2, 1>} : memref<256x128xf32, #tpu.memory_space<vmem>>, vector<7x128xf32>
    %50 = arith.addf %48, %49 : vector<7x128xf32>
    %c129 = arith.constant 129 : index
    %c0_35 = arith.constant 0 : index
    %51 = tpu.strided_load %arg5[%c129, %c0_35] {strides = array<i32: 2, 1>} : memref<256x128xf32, #tpu.memory_space<vmem>>, vector<7x128xf32>
    %52 = arith.addf %50, %51 : vector<7x128xf32>
    %c130 = arith.constant 130 : index
    %c0_36 = arith.constant 0 : index
    %53 = tpu.strided_load %arg5[%c130, %c0_36] {strides = array<i32: 2, 1>} : memref<256x128xf32, #tpu.memory_space<vmem>>, vector<7x128xf32>
    %54 = arith.addf %52, %53 : vector<7x128xf32>
    %cst_37 = arith.constant 2.500000e-01 : f32
    %55 = vector.broadcast %cst_37 : f32 to vector<7x128xf32>
    %56 = arith.mulf %54, %55 : vector<7x128xf32>
    %c0_38 = arith.constant 0 : index
    %c37 = arith.constant 37 : index
    %c0_39 = arith.constant 0 : index
    %57 = vector.load %arg4[%c0_38, %c37, %c0_39] : memref<1x88x128xf32, #tpu.memory_space<vmem>>, vector<1x7x128xf32>
    %58 = vector.shape_cast %57 : vector<1x7x128xf32> to vector<7x128xf32>
    %59 = vector.shape_cast %56 : vector<7x128xf32> to vector<1x7x128xf32>
    tpu.vector_store %arg4[%c0_38, %c37, %c0_39], %59 {strides = array<i32>} : memref<1x88x128xf32, #tpu.memory_space<vmem>>, vector<1x7x128xf32>,
    %c145 = arith.constant 145 : index
    %c0_40 = arith.constant 0 : index
    %60 = tpu.strided_load %arg5[%c145, %c0_40] {strides = array<i32: 2, 1>} : memref<256x128xf32, #tpu.memory_space<vmem>>, vector<7x128xf32>
    %c146 = arith.constant 146 : index
    %c0_41 = arith.constant 0 : index
    %61 = tpu.strided_load %arg5[%c146, %c0_41] {strides = array<i32: 2, 1>} : memref<256x128xf32, #tpu.memory_space<vmem>>, vector<7x128xf32>
    %62 = arith.addf %60, %61 : vector<7x128xf32>
    %c161 = arith.constant 161 : index
    %c0_42 = arith.constant 0 : index
    %63 = tpu.strided_load %arg5[%c161, %c0_42] {strides = array<i32: 2, 1>} : memref<256x128xf32, #tpu.memory_space<vmem>>, vector<7x128xf32>
    %64 = arith.addf %62, %63 : vector<7x128xf32>
    %c162 = arith.constant 162 : index
    %c0_43 = arith.constant 0 : index
    %65 = tpu.strided_load %arg5[%c162, %c0_43] {strides = array<i32: 2, 1>} : memref<256x128xf32, #tpu.memory_space<vmem>>, vector<7x128xf32>
    %66 = arith.addf %64, %65 : vector<7x128xf32>
    %cst_44 = arith.constant 2.500000e-01 : f32
    %67 = vector.broadcast %cst_44 : f32 to vector<7x128xf32>
    %68 = arith.mulf %66, %67 : vector<7x128xf32>
    %c0_45 = arith.constant 0 : index
    %c46 = arith.constant 46 : index
    %c0_46 = arith.constant 0 : index
    %69 = vector.load %arg4[%c0_45, %c46, %c0_46] : memref<1x88x128xf32, #tpu.memory_space<vmem>>, vector<1x7x128xf32>
    %70 = vector.shape_cast %69 : vector<1x7x128xf32> to vector<7x128xf32>
    %71 = vector.shape_cast %68 : vector<7x128xf32> to vector<1x7x128xf32>
    tpu.vector_store %arg4[%c0_45, %c46, %c0_46], %71 {strides = array<i32>} : memref<1x88x128xf32, #tpu.memory_space<vmem>>, vector<1x7x128xf32>,
    %c177 = arith.constant 177 : index
    %c0_47 = arith.constant 0 : index
    %72 = tpu.strided_load %arg5[%c177, %c0_47] {strides = array<i32: 2, 1>} : memref<256x128xf32, #tpu.memory_space<vmem>>, vector<7x128xf32>
    %c178 = arith.constant 178 : index
    %c0_48 = arith.constant 0 : index
    %73 = tpu.strided_load %arg5[%c178, %c0_48] {strides = array<i32: 2, 1>} : memref<256x128xf32, #tpu.memory_space<vmem>>, vector<7x128xf32>
    %74 = arith.addf %72, %73 : vector<7x128xf32>
    %c193 = arith.constant 193 : index
    %c0_49 = arith.constant 0 : index
    %75 = tpu.strided_load %arg5[%c193, %c0_49] {strides = array<i32: 2, 1>} : memref<256x128xf32, #tpu.memory_space<vmem>>, vector<7x128xf32>
    %76 = arith.addf %74, %75 : vector<7x128xf32>
    %c194 = arith.constant 194 : index
    %c0_50 = arith.constant 0 : index
    %77 = tpu.strided_load %arg5[%c194, %c0_50] {strides = array<i32: 2, 1>} : memref<256x128xf32, #tpu.memory_space<vmem>>, vector<7x128xf32>
    %78 = arith.addf %76, %77 : vector<7x128xf32>
    %cst_51 = arith.constant 2.500000e-01 : f32
    %79 = vector.broadcast %cst_51 : f32 to vector<7x128xf32>
    %80 = arith.mulf %78, %79 : vector<7x128xf32>
    %c0_52 = arith.constant 0 : index
    %c55 = arith.constant 55 : index
    %c0_53 = arith.constant 0 : index
    %81 = vector.load %arg4[%c0_52, %c55, %c0_53] : memref<1x88x128xf32, #tpu.memory_space<vmem>>, vector<1x7x128xf32>
    %82 = vector.shape_cast %81 : vector<1x7x128xf32> to vector<7x128xf32>
    %83 = vector.shape_cast %80 : vector<7x128xf32> to vector<1x7x128xf32>
    tpu.vector_store %arg4[%c0_52, %c55, %c0_53], %83 {strides = array<i32>} : memref<1x88x128xf32, #tpu.memory_space<vmem>>, vector<1x7x128xf32>,
    %c209 = arith.constant 209 : index
    %c0_54 = arith.constant 0 : index
    %84 = tpu.strided_load %arg5[%c209, %c0_54] {strides = array<i32: 2, 1>} : memref<256x128xf32, #tpu.memory_space<vmem>>, vector<7x128xf32>
    %c210 = arith.constant 210 : index
    %c0_55 = arith.constant 0 : index
    %85 = tpu.strided_load %arg5[%c210, %c0_55] {strides = array<i32: 2, 1>} : memref<256x128xf32, #tpu.memory_space<vmem>>, vector<7x128xf32>
    %86 = arith.addf %84, %85 : vector<7x128xf32>
    %c225 = arith.constant 225 : index
    %c0_56 = arith.constant 0 : index
    %87 = tpu.strided_load %arg5[%c225, %c0_56] {strides = array<i32: 2, 1>} : memref<256x128xf32, #tpu.memory_space<vmem>>, vector<7x128xf32>
    %88 = arith.addf %86, %87 : vector<7x128xf32>
    %c226 = arith.constant 226 : index
    %c0_57 = arith.constant 0 : index
    %89 = tpu.strided_load %arg5[%c226, %c0_57] {strides = array<i32: 2, 1>} : memref<256x128xf32, #tpu.memory_space<vmem>>, vector<7x128xf32>
    %90 = arith.addf %88, %89 : vector<7x128xf32>
    %cst_58 = arith.constant 2.500000e-01 : f32
    %91 = vector.broadcast %cst_58 : f32 to vector<7x128xf32>
    %92 = arith.mulf %90, %91 : vector<7x128xf32>
    %c0_59 = arith.constant 0 : index
    %c64 = arith.constant 64 : index
    %c0_60 = arith.constant 0 : index
    %93 = vector.load %arg4[%c0_59, %c64, %c0_60] : memref<1x88x128xf32, #tpu.memory_space<vmem>>, vector<1x7x128xf32>
    %94 = vector.shape_cast %93 : vector<1x7x128xf32> to vector<7x128xf32>
    %95 = vector.shape_cast %92 : vector<7x128xf32> to vector<1x7x128xf32>
    tpu.vector_store %arg4[%c0_59, %c64, %c0_60], %95 {strides = array<i32>} : memref<1x88x128xf32, #tpu.memory_space<vmem>>, vector<1x7x128xf32>,
    return
  }
  func.func @transform_0(%arg0: i32) -> (i32, i32, i32) {
    %c0_i32 = arith.constant 0 : i32
    %c0_i32_0 = arith.constant 0 : i32
    %c0_i32_1 = arith.constant 0 : i32
    return %arg0, %c0_i32, %c0_i32_0 : i32, i32, i32
  }
  func.func @transform_1(%arg0: i32) -> (i32, i32) {
    %c0_i32 = arith.constant 0 : i32
    %c0_i32_0 = arith.constant 0 : i32
    %c0_i32_1 = arith.constant 0 : i32
    return %c0_i32, %c0_i32_0 : i32, i32
  }
  func.func @transform_2(%arg0: i32) -> (i32, i32) {
    %c0_i32 = arith.constant 0 : i32
    %c0_i32_0 = arith.constant 0 : i32
    %c0_i32_1 = arith.constant 0 : i32
    return %c0_i32, %c0_i32_0 : i32, i32
  }
  func.func @transform_3(%arg0: i32) -> (i32, i32, i32) {
    %c0_i32 = arith.constant 0 : i32
    %c0_i32_0 = arith.constant 0 : i32
    %c0_i32_1 = arith.constant 0 : i32
    return %arg0, %c0_i32, %c0_i32_0 : i32, i32, i32
  }
}

module attributes {stable_mosaic.version = 11 : i64} {
  func.func @_dense_block_kernel(%arg0: i32, %arg1: i32, %arg2: memref<1x88x128xf32, #tpu.memory_space<vmem>>, %arg3: memref<88x1xf32, #tpu.memory_space<vmem>>, %arg4: memref<1x1x128xf32, #tpu.memory_space<vmem>>, %arg5: memref<1x1x128xf32, #tpu.memory_space<vmem>>, %arg6: memref<1x128x128xbf16, #tpu.memory_space<vmem>>, %arg7: memref<1x1x128xf32, #tpu.memory_space<vmem>>, %arg8: memref<1x9x128x128xbf16, #tpu.memory_space<vmem>>, %arg9: memref<1x88x128xbf16, #tpu.memory_space<vmem>>, %arg10: memref<120x128xf32, #tpu.memory_space<vmem>>) attributes {dimension_semantics = [#tpu.dimension_semantics<parallel>, #tpu.dimension_semantics<arbitrary>], iteration_bounds = array<i64: 2, 2>, scalar_prefetch = 0 : i64, scratch_operands = 1 : i64, tpu.core_type = #tpu.core_type<tc>, window_params = [{transform_indices = @transform_0, window_bounds = array<i64: 1, 88, 128>}, {pipeline_mode = #tpu.pipeline_mode<synchronous>, transform_indices = @transform_1, window_bounds = array<i64: 88, 1>}, {transform_indices = @transform_2, window_bounds = array<i64: 1, 1, 128>}, {transform_indices = @transform_3, window_bounds = array<i64: 1, 1, 128>}, {transform_indices = @transform_4, window_bounds = array<i64: 1, 128, 128>}, {transform_indices = @transform_5, window_bounds = array<i64: 1, 1, 128>}, {transform_indices = @transform_6, window_bounds = array<i64: 1, 9, 128, 128>}, {transform_indices = @transform_7, window_bounds = array<i64: 1, 88, 128>}]} {
    %c0_i32 = arith.constant 0 : i32
    %0 = arith.cmpi eq, %arg1, %c0_i32 : i32
    %1 = arith.extui %0 : i1 to i32
    %c0_i32_0 = arith.constant 0 : i32
    %2 = arith.cmpi ne, %1, %c0_i32_0 : i32
    scf.if %2 {
      %c0_79 = arith.constant 0 : index
      %c0_80 = arith.constant 0 : index
      %c0_81 = arith.constant 0 : index
      %96 = vector.load %arg2[%c0_79, %c0_80, %c0_81] : memref<1x88x128xf32, #tpu.memory_space<vmem>>, vector<1x88x128xf32>
      %97 = vector.shape_cast %96 : vector<1x88x128xf32> to vector<88x128xf32>
      %98 = arith.truncf %97 : vector<88x128xf32> to vector<88x128xbf16>
      %c0_82 = arith.constant 0 : index
      %c0_83 = arith.constant 0 : index
      %c0_84 = arith.constant 0 : index
      %99 = vector.load %arg9[%c0_82, %c0_83, %c0_84] : memref<1x88x128xbf16, #tpu.memory_space<vmem>>, vector<1x88x128xbf16>
      %100 = vector.shape_cast %99 : vector<1x88x128xbf16> to vector<88x128xbf16>
      %101 = vector.shape_cast %98 : vector<88x128xbf16> to vector<1x88x128xbf16>
      tpu.vector_store %arg9[%c0_82, %c0_83, %c0_84], %101 {strides = array<i32>} : memref<1x88x128xbf16, #tpu.memory_space<vmem>>, vector<1x88x128xbf16>,
    } else {
    }
    %c0 = arith.constant 0 : index
    %c0_1 = arith.constant 0 : index
    %3 = vector.load %arg3[%c0, %c0_1] : memref<88x1xf32, #tpu.memory_space<vmem>>, vector<88x1xf32>
    %c0_2 = arith.constant 0 : index
    %c0_3 = arith.constant 0 : index
    %c0_4 = arith.constant 0 : index
    %4 = vector.load %arg9[%c0_2, %c0_3, %c0_4] : memref<1x88x128xbf16, #tpu.memory_space<vmem>>, vector<1x88x128xbf16>
    %5 = vector.shape_cast %4 : vector<1x88x128xbf16> to vector<88x128xbf16>
    %6 = arith.extf %5 : vector<88x128xbf16> to vector<88x128xf32>
    %c0_5 = arith.constant 0 : index
    %c0_6 = arith.constant 0 : index
    %c0_7 = arith.constant 0 : index
    %7 = vector.load %arg4[%c0_5, %c0_6, %c0_7] : memref<1x1x128xf32, #tpu.memory_space<vmem>>, vector<1x1x128xf32>
    %8 = vector.shape_cast %7 : vector<1x1x128xf32> to vector<1x128xf32>
    %9 = vector.broadcast %8 : vector<1x128xf32> to vector<88x128xf32>
    %10 = arith.mulf %6, %9 : vector<88x128xf32>
    %c0_8 = arith.constant 0 : index
    %c0_9 = arith.constant 0 : index
    %c0_10 = arith.constant 0 : index
    %11 = vector.load %arg5[%c0_8, %c0_9, %c0_10] : memref<1x1x128xf32, #tpu.memory_space<vmem>>, vector<1x1x128xf32>
    %12 = vector.shape_cast %11 : vector<1x1x128xf32> to vector<1x128xf32>
    %13 = vector.broadcast %12 : vector<1x128xf32> to vector<88x128xf32>
    %14 = arith.addf %10, %13 : vector<88x128xf32>
    %cst = arith.constant 0.000000e+00 : f32
    %15 = vector.broadcast %cst : f32 to vector<88x128xf32>
    %16 = arith.maximumf %14, %15 : vector<88x128xf32>
    %17 = arith.truncf %16 : vector<88x128xf32> to vector<88x128xbf16>
    %c0_11 = arith.constant 0 : index
    %c0_12 = arith.constant 0 : index
    %c0_13 = arith.constant 0 : index
    %18 = vector.load %arg6[%c0_11, %c0_12, %c0_13] : memref<1x128x128xbf16, #tpu.memory_space<vmem>>, vector<1x128x128xbf16>
    %19 = vector.shape_cast %18 : vector<1x128x128xbf16> to vector<128x128xbf16>
    %cst_14 = arith.constant dense<0.000000e+00> : vector<88x128xf32>
    %20 = tpu.matmul %17, %19, %cst_14 {dimension_numbers = #tpu.dot_dimension_numbers<[1], [0], [0], [1], [0, 0, 1, 1], [], []>} : vector<88x128xbf16>, vector<128x128xbf16>, vector<88x128xf32> -> vector<88x128xf32>
    %c0_15 = arith.constant 0 : index
    %c0_16 = arith.constant 0 : index
    %c0_17 = arith.constant 0 : index
    %21 = vector.load %arg7[%c0_15, %c0_16, %c0_17] : memref<1x1x128xf32, #tpu.memory_space<vmem>>, vector<1x1x128xf32>
    %22 = vector.shape_cast %21 : vector<1x1x128xf32> to vector<1x128xf32>
    %23 = vector.broadcast %22 : vector<1x128xf32> to vector<88x128xf32>
    %24 = arith.addf %20, %23 : vector<88x128xf32>
    %cst_18 = arith.constant 0.000000e+00 : f32
    %25 = vector.broadcast %cst_18 : f32 to vector<88x128xf32>
    %26 = arith.maximumf %24, %25 : vector<88x128xf32>
    %27 = vector.broadcast %3 : vector<88x1xf32> to vector<88x128xf32>
    %28 = arith.mulf %26, %27 : vector<88x128xf32>
    %cst_19 = arith.constant 0.000000e+00 : f32
    %29 = vector.broadcast %cst_19 : f32 to vector<16x128xf32>
    %c0_20 = arith.constant 0 : index
    %c0_21 = arith.constant 0 : index
    %30 = vector.load %arg10[%c0_20, %c0_21] : memref<120x128xf32, #tpu.memory_space<vmem>>, vector<16x128xf32>
    tpu.vector_store %arg10[%c0_20, %c0_21], %29 {strides = array<i32>} : memref<120x128xf32, #tpu.memory_space<vmem>>, vector<16x128xf32>,
    %c16 = arith.constant 16 : index
    %c0_22 = arith.constant 0 : index
    %31 = vector.load %arg10[%c16, %c0_22] : memref<120x128xf32, #tpu.memory_space<vmem>>, vector<88x128xf32>
    tpu.vector_store %arg10[%c16, %c0_22], %28 {strides = array<i32>} : memref<120x128xf32, #tpu.memory_space<vmem>>, vector<88x128xf32>,
    %cst_23 = arith.constant 0.000000e+00 : f32
    %32 = vector.broadcast %cst_23 : f32 to vector<16x128xf32>
    %c104 = arith.constant 104 : index
    %c0_24 = arith.constant 0 : index
    %33 = vector.load %arg10[%c104, %c0_24] : memref<120x128xf32, #tpu.memory_space<vmem>>, vector<16x128xf32>
    tpu.vector_store %arg10[%c104, %c0_24], %32 {strides = array<i32>} : memref<120x128xf32, #tpu.memory_space<vmem>>, vector<16x128xf32>,
    %cst_25 = arith.constant 0.000000e+00 : f32
    %34 = vector.broadcast %cst_25 : f32 to vector<88x128xf32>
    %c6 = arith.constant 6 : index
    %c0_26 = arith.constant 0 : index
    %35 = vector.load %arg10[%c6, %c0_26] : memref<120x128xf32, #tpu.memory_space<vmem>>, vector<88x128xf32>
    %36 = arith.truncf %35 : vector<88x128xf32> to vector<88x128xbf16>
    %c0_27 = arith.constant 0 : index
    %c0_28 = arith.constant 0 : index
    %c0_29 = arith.constant 0 : index
    %c0_30 = arith.constant 0 : index
    %37 = vector.load %arg8[%c0_27, %c0_28, %c0_29, %c0_30] : memref<1x9x128x128xbf16, #tpu.memory_space<vmem>>, vector<1x1x128x128xbf16>
    %38 = vector.shape_cast %37 : vector<1x1x128x128xbf16> to vector<128x128xbf16>
    %cst_31 = arith.constant dense<0.000000e+00> : vector<88x128xf32>
    %39 = tpu.matmul %36, %38, %cst_31 {dimension_numbers = #tpu.dot_dimension_numbers<[1], [0], [0], [1], [0, 0, 1, 1], [], []>} : vector<88x128xbf16>, vector<128x128xbf16>, vector<88x128xf32> -> vector<88x128xf32>
    %40 = arith.addf %34, %39 : vector<88x128xf32>
    %c7 = arith.constant 7 : index
    %c0_32 = arith.constant 0 : index
    %41 = vector.load %arg10[%c7, %c0_32] : memref<120x128xf32, #tpu.memory_space<vmem>>, vector<88x128xf32>
    %42 = arith.truncf %41 : vector<88x128xf32> to vector<88x128xbf16>
    %c0_33 = arith.constant 0 : index
    %c1 = arith.constant 1 : index
    %c0_34 = arith.constant 0 : index
    %c0_35 = arith.constant 0 : index
    %43 = vector.load %arg8[%c0_33, %c1, %c0_34, %c0_35] : memref<1x9x128x128xbf16, #tpu.memory_space<vmem>>, vector<1x1x128x128xbf16>
    %44 = vector.shape_cast %43 : vector<1x1x128x128xbf16> to vector<128x128xbf16>
    %cst_36 = arith.constant dense<0.000000e+00> : vector<88x128xf32>
    %45 = tpu.matmul %42, %44, %cst_36 {dimension_numbers = #tpu.dot_dimension_numbers<[1], [0], [0], [1], [0, 0, 1, 1], [], []>} : vector<88x128xbf16>, vector<128x128xbf16>, vector<88x128xf32> -> vector<88x128xf32>
    %46 = arith.addf %40, %45 : vector<88x128xf32>
    %c8 = arith.constant 8 : index
    %c0_37 = arith.constant 0 : index
    %47 = vector.load %arg10[%c8, %c0_37] : memref<120x128xf32, #tpu.memory_space<vmem>>, vector<88x128xf32>
    %48 = arith.truncf %47 : vector<88x128xf32> to vector<88x128xbf16>
    %c0_38 = arith.constant 0 : index
    %c2 = arith.constant 2 : index
    %c0_39 = arith.constant 0 : index
    %c0_40 = arith.constant 0 : index
    %49 = vector.load %arg8[%c0_38, %c2, %c0_39, %c0_40] : memref<1x9x128x128xbf16, #tpu.memory_space<vmem>>, vector<1x1x128x128xbf16>
    %50 = vector.shape_cast %49 : vector<1x1x128x128xbf16> to vector<128x128xbf16>
    %cst_41 = arith.constant dense<0.000000e+00> : vector<88x128xf32>
    %51 = tpu.matmul %48, %50, %cst_41 {dimension_numbers = #tpu.dot_dimension_numbers<[1], [0], [0], [1], [0, 0, 1, 1], [], []>} : vector<88x128xbf16>, vector<128x128xbf16>, vector<88x128xf32> -> vector<88x128xf32>
    %52 = arith.addf %46, %51 : vector<88x128xf32>
    %c15 = arith.constant 15 : index
    %c0_42 = arith.constant 0 : index
    %53 = vector.load %arg10[%c15, %c0_42] : memref<120x128xf32, #tpu.memory_space<vmem>>, vector<88x128xf32>
    %54 = arith.truncf %53 : vector<88x128xf32> to vector<88x128xbf16>
    %c0_43 = arith.constant 0 : index
    %c3 = arith.constant 3 : index
    %c0_44 = arith.constant 0 : index
    %c0_45 = arith.constant 0 : index
    %55 = vector.load %arg8[%c0_43, %c3, %c0_44, %c0_45] : memref<1x9x128x128xbf16, #tpu.memory_space<vmem>>, vector<1x1x128x128xbf16>
    %56 = vector.shape_cast %55 : vector<1x1x128x128xbf16> to vector<128x128xbf16>
    %cst_46 = arith.constant dense<0.000000e+00> : vector<88x128xf32>
    %57 = tpu.matmul %54, %56, %cst_46 {dimension_numbers = #tpu.dot_dimension_numbers<[1], [0], [0], [1], [0, 0, 1, 1], [], []>} : vector<88x128xbf16>, vector<128x128xbf16>, vector<88x128xf32> -> vector<88x128xf32>
    %58 = arith.addf %52, %57 : vector<88x128xf32>
    %c16_47 = arith.constant 16 : index
    %c0_48 = arith.constant 0 : index
    %59 = vector.load %arg10[%c16_47, %c0_48] : memref<120x128xf32, #tpu.memory_space<vmem>>, vector<88x128xf32>
    %60 = arith.truncf %59 : vector<88x128xf32> to vector<88x128xbf16>
    %c0_49 = arith.constant 0 : index
    %c4 = arith.constant 4 : index
    %c0_50 = arith.constant 0 : index
    %c0_51 = arith.constant 0 : index
    %61 = vector.load %arg8[%c0_49, %c4, %c0_50, %c0_51] : memref<1x9x128x128xbf16, #tpu.memory_space<vmem>>, vector<1x1x128x128xbf16>
    %62 = vector.shape_cast %61 : vector<1x1x128x128xbf16> to vector<128x128xbf16>
    %cst_52 = arith.constant dense<0.000000e+00> : vector<88x128xf32>
    %63 = tpu.matmul %60, %62, %cst_52 {dimension_numbers = #tpu.dot_dimension_numbers<[1], [0], [0], [1], [0, 0, 1, 1], [], []>} : vector<88x128xbf16>, vector<128x128xbf16>, vector<88x128xf32> -> vector<88x128xf32>
    %64 = arith.addf %58, %63 : vector<88x128xf32>
    %c17 = arith.constant 17 : index
    %c0_53 = arith.constant 0 : index
    %65 = vector.load %arg10[%c17, %c0_53] : memref<120x128xf32, #tpu.memory_space<vmem>>, vector<88x128xf32>
    %66 = arith.truncf %65 : vector<88x128xf32> to vector<88x128xbf16>
    %c0_54 = arith.constant 0 : index
    %c5 = arith.constant 5 : index
    %c0_55 = arith.constant 0 : index
    %c0_56 = arith.constant 0 : index
    %67 = vector.load %arg8[%c0_54, %c5, %c0_55, %c0_56] : memref<1x9x128x128xbf16, #tpu.memory_space<vmem>>, vector<1x1x128x128xbf16>
    %68 = vector.shape_cast %67 : vector<1x1x128x128xbf16> to vector<128x128xbf16>
    %cst_57 = arith.constant dense<0.000000e+00> : vector<88x128xf32>
    %69 = tpu.matmul %66, %68, %cst_57 {dimension_numbers = #tpu.dot_dimension_numbers<[1], [0], [0], [1], [0, 0, 1, 1], [], []>} : vector<88x128xbf16>, vector<128x128xbf16>, vector<88x128xf32> -> vector<88x128xf32>
    %70 = arith.addf %64, %69 : vector<88x128xf32>
    %c24 = arith.constant 24 : index
    %c0_58 = arith.constant 0 : index
    %71 = vector.load %arg10[%c24, %c0_58] : memref<120x128xf32, #tpu.memory_space<vmem>>, vector<88x128xf32>
    %72 = arith.truncf %71 : vector<88x128xf32> to vector<88x128xbf16>
    %c0_59 = arith.constant 0 : index
    %c6_60 = arith.constant 6 : index
    %c0_61 = arith.constant 0 : index
    %c0_62 = arith.constant 0 : index
    %73 = vector.load %arg8[%c0_59, %c6_60, %c0_61, %c0_62] : memref<1x9x128x128xbf16, #tpu.memory_space<vmem>>, vector<1x1x128x128xbf16>
    %74 = vector.shape_cast %73 : vector<1x1x128x128xbf16> to vector<128x128xbf16>
    %cst_63 = arith.constant dense<0.000000e+00> : vector<88x128xf32>
    %75 = tpu.matmul %72, %74, %cst_63 {dimension_numbers = #tpu.dot_dimension_numbers<[1], [0], [0], [1], [0, 0, 1, 1], [], []>} : vector<88x128xbf16>, vector<128x128xbf16>, vector<88x128xf32> -> vector<88x128xf32>
    %76 = arith.addf %70, %75 : vector<88x128xf32>
    %c25 = arith.constant 25 : index
    %c0_64 = arith.constant 0 : index
    %77 = vector.load %arg10[%c25, %c0_64] : memref<120x128xf32, #tpu.memory_space<vmem>>, vector<88x128xf32>
    %78 = arith.truncf %77 : vector<88x128xf32> to vector<88x128xbf16>
    %c0_65 = arith.constant 0 : index
    %c7_66 = arith.constant 7 : index
    %c0_67 = arith.constant 0 : index
    %c0_68 = arith.constant 0 : index
    %79 = vector.load %arg8[%c0_65, %c7_66, %c0_67, %c0_68] : memref<1x9x128x128xbf16, #tpu.memory_space<vmem>>, vector<1x1x128x128xbf16>
    %80 = vector.shape_cast %79 : vector<1x1x128x128xbf16> to vector<128x128xbf16>
    %cst_69 = arith.constant dense<0.000000e+00> : vector<88x128xf32>
    %81 = tpu.matmul %78, %80, %cst_69 {dimension_numbers = #tpu.dot_dimension_numbers<[1], [0], [0], [1], [0, 0, 1, 1], [], []>} : vector<88x128xbf16>, vector<128x128xbf16>, vector<88x128xf32> -> vector<88x128xf32>
    %82 = arith.addf %76, %81 : vector<88x128xf32>
    %c26 = arith.constant 26 : index
    %c0_70 = arith.constant 0 : index
    %83 = vector.load %arg10[%c26, %c0_70] : memref<120x128xf32, #tpu.memory_space<vmem>>, vector<88x128xf32>
    %84 = arith.truncf %83 : vector<88x128xf32> to vector<88x128xbf16>
    %c0_71 = arith.constant 0 : index
    %c8_72 = arith.constant 8 : index
    %c0_73 = arith.constant 0 : index
    %c0_74 = arith.constant 0 : index
    %85 = vector.load %arg8[%c0_71, %c8_72, %c0_73, %c0_74] : memref<1x9x128x128xbf16, #tpu.memory_space<vmem>>, vector<1x1x128x128xbf16>
    %86 = vector.shape_cast %85 : vector<1x1x128x128xbf16> to vector<128x128xbf16>
    %cst_75 = arith.constant dense<0.000000e+00> : vector<88x128xf32>
    %87 = tpu.matmul %84, %86, %cst_75 {dimension_numbers = #tpu.dot_dimension_numbers<[1], [0], [0], [1], [0, 0, 1, 1], [], []>} : vector<88x128xbf16>, vector<128x128xbf16>, vector<88x128xf32> -> vector<88x128xf32>
    %88 = arith.addf %82, %87 : vector<88x128xf32>
    %89 = vector.broadcast %3 : vector<88x1xf32> to vector<88x128xf32>
    %90 = arith.mulf %88, %89 : vector<88x128xf32>
    %91 = arith.addf %90, %6 : vector<88x128xf32>
    %92 = arith.truncf %91 : vector<88x128xf32> to vector<88x128xbf16>
    %c0_76 = arith.constant 0 : index
    %c0_77 = arith.constant 0 : index
    %c0_78 = arith.constant 0 : index
    %93 = vector.load %arg9[%c0_76, %c0_77, %c0_78] : memref<1x88x128xbf16, #tpu.memory_space<vmem>>, vector<1x88x128xbf16>
    %94 = vector.shape_cast %93 : vector<1x88x128xbf16> to vector<88x128xbf16>
    %95 = vector.shape_cast %92 : vector<88x128xbf16> to vector<1x88x128xbf16>
    tpu.vector_store %arg9[%c0_76, %c0_77, %c0_78], %95 {strides = array<i32>} : memref<1x88x128xbf16, #tpu.memory_space<vmem>>, vector<1x88x128xbf16>,
    return
  }
  func.func @transform_0(%arg0: i32, %arg1: i32) -> (i32, i32, i32) {
    %c0_i32 = arith.constant 0 : i32
    %c0_i32_0 = arith.constant 0 : i32
    %c0_i32_1 = arith.constant 0 : i32
    return %arg0, %c0_i32, %c0_i32_0 : i32, i32, i32
  }
  func.func @transform_1(%arg0: i32, %arg1: i32) -> (i32, i32) {
    %c0_i32 = arith.constant 0 : i32
    %c0_i32_0 = arith.constant 0 : i32
    %c0_i32_1 = arith.constant 0 : i32
    return %c0_i32, %c0_i32_0 : i32, i32
  }
  func.func @transform_2(%arg0: i32, %arg1: i32) -> (i32, i32, i32) {
    %c0_i32 = arith.constant 0 : i32
    %c0_i32_0 = arith.constant 0 : i32
    %c0_i32_1 = arith.constant 0 : i32
    return %arg1, %c0_i32, %c0_i32_0 : i32, i32, i32
  }
  func.func @transform_3(%arg0: i32, %arg1: i32) -> (i32, i32, i32) {
    %c0_i32 = arith.constant 0 : i32
    %c0_i32_0 = arith.constant 0 : i32
    %c0_i32_1 = arith.constant 0 : i32
    return %arg1, %c0_i32, %c0_i32_0 : i32, i32, i32
  }
  func.func @transform_4(%arg0: i32, %arg1: i32) -> (i32, i32, i32) {
    %c0_i32 = arith.constant 0 : i32
    %c0_i32_0 = arith.constant 0 : i32
    %c0_i32_1 = arith.constant 0 : i32
    return %arg1, %c0_i32, %c0_i32_0 : i32, i32, i32
  }
  func.func @transform_5(%arg0: i32, %arg1: i32) -> (i32, i32, i32) {
    %c0_i32 = arith.constant 0 : i32
    %c0_i32_0 = arith.constant 0 : i32
    %c0_i32_1 = arith.constant 0 : i32
    return %arg1, %c0_i32, %c0_i32_0 : i32, i32, i32
  }
  func.func @transform_6(%arg0: i32, %arg1: i32) -> (i32, i32, i32, i32) {
    %c0_i32 = arith.constant 0 : i32
    %c0_i32_0 = arith.constant 0 : i32
    %c0_i32_1 = arith.constant 0 : i32
    %c0_i32_2 = arith.constant 0 : i32
    return %arg1, %c0_i32, %c0_i32_0, %c0_i32_1 : i32, i32, i32, i32
  }
  func.func @transform_7(%arg0: i32, %arg1: i32) -> (i32, i32, i32) {
    %c0_i32 = arith.constant 0 : i32
    %c0_i32_0 = arith.constant 0 : i32
    %c0_i32_1 = arith.constant 0 : i32
    return %arg0, %c0_i32, %c0_i32_0 : i32, i32, i32
  }
}

module attributes {stable_mosaic.version = 11 : i64} {
  func.func @_head_kernel(%arg0: memref<2x88x128xbf16, #tpu.memory_space<vmem>>, %arg1: memref<88x1xf32, #tpu.memory_space<vmem>>, %arg2: memref<1x1x128xf32, #tpu.memory_space<vmem>>, %arg3: memref<1x1x128xf32, #tpu.memory_space<vmem>>, %arg4: memref<128x128xbf16, #tpu.memory_space<vmem>>, %arg5: memref<1x128xf32, #tpu.memory_space<vmem>>, %arg6: memref<2x128xf32, #tpu.memory_space<vmem>>) attributes {dimension_semantics = [], scalar_prefetch = 0 : i64, scratch_operands = 0 : i64, tpu.core_type = #tpu.core_type<tc>} {
    %c0 = arith.constant 0 : index
    %c0_0 = arith.constant 0 : index
    %c0_1 = arith.constant 0 : index
    %0 = vector.load %arg0[%c0, %c0_0, %c0_1] : memref<2x88x128xbf16, #tpu.memory_space<vmem>>, vector<2x88x128xbf16>
    %1 = arith.extf %0 : vector<2x88x128xbf16> to vector<2x88x128xf32>
    %c0_2 = arith.constant 0 : index
    %c0_3 = arith.constant 0 : index
    %c0_4 = arith.constant 0 : index
    %2 = vector.load %arg2[%c0_2, %c0_3, %c0_4] : memref<1x1x128xf32, #tpu.memory_space<vmem>>, vector<1x1x128xf32>
    %3 = vector.broadcast %2 : vector<1x1x128xf32> to vector<2x88x128xf32>
    %4 = arith.mulf %1, %3 : vector<2x88x128xf32>
    %c0_5 = arith.constant 0 : index
    %c0_6 = arith.constant 0 : index
    %c0_7 = arith.constant 0 : index
    %5 = vector.load %arg3[%c0_5, %c0_6, %c0_7] : memref<1x1x128xf32, #tpu.memory_space<vmem>>, vector<1x1x128xf32>
    %6 = vector.broadcast %5 : vector<1x1x128xf32> to vector<2x88x128xf32>
    %7 = arith.addf %4, %6 : vector<2x88x128xf32>
    %cst = arith.constant 0.000000e+00 : f32
    %8 = vector.broadcast %cst : f32 to vector<2x88x128xf32>
    %9 = arith.maximumf %7, %8 : vector<2x88x128xf32>
    %c0_8 = arith.constant 0 : index
    %c0_9 = arith.constant 0 : index
    %10 = vector.load %arg1[%c0_8, %c0_9] : memref<88x1xf32, #tpu.memory_space<vmem>>, vector<88x1xf32>
    %11 = vector.shape_cast %10 : vector<88x1xf32> to vector<1x88x1xf32>
    %12 = vector.broadcast %11 : vector<1x88x1xf32> to vector<2x88x128xf32>
    %13 = arith.mulf %9, %12 : vector<2x88x128xf32>
    %cst_10 = arith.constant dense<0.000000e+00> : vector<2x128xf32>
    %14 = vector.multi_reduction <add>, %13, %cst_10 [1] : vector<2x88x128xf32> to vector<2x128xf32>
    %cst_11 = arith.constant 0.0204081628 : f32
    %15 = vector.broadcast %cst_11 : f32 to vector<2x128xf32>
    %16 = arith.mulf %14, %15 : vector<2x128xf32>
    %17 = arith.truncf %16 : vector<2x128xf32> to vector<2x128xbf16>
    %c0_12 = arith.constant 0 : index
    %c0_13 = arith.constant 0 : index
    %18 = vector.load %arg4[%c0_12, %c0_13] : memref<128x128xbf16, #tpu.memory_space<vmem>>, vector<128x128xbf16>
    %cst_14 = arith.constant dense<0.000000e+00> : vector<2x128xf32>
    %19 = tpu.matmul %17, %18, %cst_14 {dimension_numbers = #tpu.dot_dimension_numbers<[1], [0], [0], [1], [0, 0, 1, 1], [], []>} : vector<2x128xbf16>, vector<128x128xbf16>, vector<2x128xf32> -> vector<2x128xf32>
    %c0_15 = arith.constant 0 : index
    %c0_16 = arith.constant 0 : index
    %20 = vector.load %arg5[%c0_15, %c0_16] : memref<1x128xf32, #tpu.memory_space<vmem>>, vector<1x128xf32>
    %21 = vector.broadcast %20 : vector<1x128xf32> to vector<2x128xf32>
    %22 = arith.addf %19, %21 : vector<2x128xf32>
    %c0_17 = arith.constant 0 : index
    %c0_18 = arith.constant 0 : index
    %23 = vector.load %arg6[%c0_17, %c0_18] : memref<2x128xf32, #tpu.memory_space<vmem>>, vector<2x128xf32>
    tpu.vector_store %arg6[%c0_17, %c0_18], %22 {strides = array<i32>} : memref<2x128xf32, #tpu.memory_space<vmem>>, vector<2x128xf32>,
    return
  }
}

</mosaic_0001>

<bundles_post_ra>
// kernel: densenet_forward.6
= control target key start
LH: loop header
LB: loop body
LE: loop exit
PB: predicated region body
PF: predicated region fallthrough
CT: control target
= control target key end

     0   :  { %s1937_s12 = smov 0   ;;  %s2344_s0 = inlined_call_operand.vmem [shape: bf16[1568,256], index: 0, kind: input, shape index: {}]   ;;  %s2345_s1 = inlined_call_operand.vmem [shape: bf16[256,128], index: 1, kind: input, shape index: {}]   ;;  %s2346_s2 = inlined_call_operand.vmem [shape: f32[1,128], index: 2, kind: input, shape index: {}]   ;;  %s2347_s3 = inlined_call_operand.vmem [shape: f32[1568,128], index: 3, kind: output, shape index: {}]  }
   0x1 LB: > { %s1578_s13 = sadd.s32 4294967295, %s1914_s12   ;;  %p1582_p0 = scmp.ge.s32.totalorder %s1914_s12, 1  ;;  %s1914_s12 = sphi %s1937_s12, %s13_s12  }
   0x2   : > { %p139_p1 = scmp.lt.s32.totalorder %s1914_s12, 3 }
   0x4   : > { %p140_p2 = pnand %p1582_p0, %p139_p1 }
   0x5   : > { %v1745_v0 = vld [vmem:[%s2345_s1] sm:$0xff] (!%p140_p2)   ;;  %v1916_v1 = vmov (!%p140_p2), 0   ;;  %s164_s16 = smul.u32 (!%p140_p2), 98, %s1578_s13  ;;  %v1746_v2 = vld [vmem:[%s2345_s1 + $0x8] sm:$0xff] (!%p140_p2)   ;;  %v1747_v3 = vld [vmem:[%s2345_s1 + $0x10] sm:$0xff] (!%p140_p2)  }
   0x6   : > { %143 = sbr.rel (%p140_p2) target bundleno = 481 (0x1e1), region = 32  ;;  %901 = vmatprep.subr.bf16.mxu0 (!%p140_p2), %v1916_v1  ;;  %1704 = vmatprep.subr.bf16.mxu1 (!%p140_p2), %v1916_v1  ;;  %v1748_v4 = vld [vmem:[%s2345_s1 + $0x18] sm:$0xff] (!%p140_p2)   ;;  %v1749_v5 = vld [vmem:[%s2345_s1 + $0x20] sm:$0xff] (!%p140_p2)   ;;  %v1750_v7 = vld [vmem:[%s2345_s1 + $0x28] sm:$0xff] (!%p140_p2)  }
   0x7   : > { %902 = vmatpush1.bf16.msra.mxu0 (!%p140_p2), %v1745_v0  ;;  %1720 = vmatpush1.bf16.msra.mxu1 (!%p140_p2), %v1745_v0  ;;  %p165_p3 = scmp.lt.s32.totalorder (!%p140_p2), %s164_s16, 195  ;;  %v1751_v9 = vld [vmem:[%s2345_s1 + $0x30] sm:$0xff] (!%p140_p2)   ;;  %v1752_v10 = vld [vmem:[%s2345_s1 + $0x38] sm:$0xff] (!%p140_p2)   ;;  %v1753_v11 = vld [vmem:[%s2345_s1 + $0x40] sm:$0xff] (!%p140_p2)  }
   0x8   : > { %903 = vmatprep.subr.bf16.mxu0 (!%p140_p2), %v1916_v1  ;;  %1705 = vmatprep.subr.bf16.mxu1 (!%p140_p2), %v1916_v1  ;;  %v1754_v12 = vld [vmem:[%s2345_s1 + $0x48] sm:$0xff] (!%p140_p2)   ;;  %v1755_v13 = vld [vmem:[%s2345_s1 + $0x50] sm:$0xff] (!%p140_p2)   ;;  %v1756_v14 = vld [vmem:[%s2345_s1 + $0x58] sm:$0xff] (!%p140_p2)  }
   0x9   : > { %v1757_v15 = vld [vmem:[%s2345_s1 + $0x60] sm:$0xff] (!%p140_p2)   ;;  %v1758_v16 = vld [vmem:[%s2345_s1 + $0x68] sm:$0xff] (!%p140_p2)   ;;  %v1759_v17 = vld [vmem:[%s2345_s1 + $0x70] sm:$0xff] (!%p140_p2)  }
   0xa   : > { %v1760_v18 = vld [vmem:[%s2345_s1 + $0x78] sm:$0xff] (!%p140_p2)  }
   0xb   : > { %904 = vmatpush1.bf16.msra.mxu0 (!%p140_p2), %v1746_v2  ;;  %1721 = vmatpush1.bf16.msra.mxu1 (!%p140_p2), %v1746_v2 }
   0xc   : > { %905 = vmatprep.subr.bf16.mxu0 (!%p140_p2), %v1916_v1  ;;  %1706 = vmatprep.subr.bf16.mxu1 (!%p140_p2), %v1916_v1 }
   0xd   : > { %s2349_s16 = smov (!%p165_p3, %s164_s16), 195 }
   0xe   : > { %s1703_s23 = sshll.u32 %s2349_s16, 3 }
   0xf   : > { %906 = vmatpush1.bf16.msra.mxu0 %v1747_v3  ;;  %1722 = vmatpush1.bf16.msra.mxu1 %v1747_v3  ;;  %s1976_s28 = scalar_lea.vmem %s2344_s0, %s1703_s23  ;;  %s2145_s5 = scalar_lea.vmem %s2347_s3, %s1703_s23 }
  0x10   : > { %907 = vmatprep.subr.bf16.mxu0 %v1916_v1  ;;  %1707 = vmatprep.subr.bf16.mxu1 %v1916_v1  ;;  %v1763_v6 = vld [vmem:[%s1976_s28 + $0x4] ss:$8 sps:$4 sm:$0xff]   ;;  %v1766_v8 = vld [vmem:[%s1976_s28 + $0x194] ss:$8 sps:$4 sm:$0xff]   ;;  %v1761_v19 = vld [vmem:[%s1976_s28] ss:$8 sps:$4 sm:$0xff]  }
  0x11   : > { %933 = vmatprep.mubr.bf16.mxu0 %v1763_v6  ;;  %1133 = vmatprep.mubr.bf16.mxu1 %v1766_v8  ;;  %v1764_v20 = vld [vmem:[%s1976_s28 + $0x190] ss:$8 sps:$4 sm:$0xff]   ;;  %v1767_v21 = vld [vmem:[%s1976_s28 + $0x14] ss:$8 sps:$4 sm:$0xff]   ;;  %v1770_v22 = vld [vmem:[%s1976_s28 + $0x1a4] ss:$8 sps:$4 sm:$0xff]  }
  0x12   : > { %v1769_v23 = vld [vmem:[%s1976_s28 + $0x10] ss:$8 sps:$4 sm:$0xff]   ;;  %v1772_v24 = vld [vmem:[%s1976_s28 + $0x1a0] ss:$8 sps:$4 sm:$0xff]   ;;  %v1773_v25 = vld [vmem:[%s1976_s28 + $0x24] ss:$8 sps:$4 sm:$0xff]  }
  0x13   : > { %908 = vmatpush1.bf16.msra.mxu0 %v1748_v4  ;;  %1723 = vmatpush1.bf16.msra.mxu1 %v1748_v4  ;;  %v1776_v26 = vld [vmem:[%s1976_s28 + $0x1b4] ss:$8 sps:$4 sm:$0xff]   ;;  %v1775_v27 = vld [vmem:[%s1976_s28 + $0x20] ss:$8 sps:$4 sm:$0xff]   ;;  %v1778_v28 = vld [vmem:[%s1976_s28 + $0x1b0] ss:$8 sps:$4 sm:$0xff]  }
  0x14   : > { %909 = vmatprep.subr.bf16.mxu0 %v1916_v1  ;;  %1708 = vmatprep.subr.bf16.mxu1 %v1916_v1  ;;  %v1779_v29 = vld [vmem:[%s1976_s28 + $0x34] ss:$8 sps:$4 sm:$0xff]   ;;  %v1782_v30 = vld [vmem:[%s1976_s28 + $0x1c4] ss:$8 sps:$4 sm:$0xff]   ;;  %v1781_v31 = vld [vmem:[%s1976_s28 + $0x30] ss:$8 sps:$4 sm:$0xff]  }
  0x15   : > { %v1784_v32 = vld [vmem:[%s1976_s28 + $0x1c0] ss:$8 sps:$4 sm:$0xff]   ;;  %v1785_v33 = vld [vmem:[%s1976_s28 + $0x44] ss:$8 sps:$4 sm:$0xff]   ;;  %v1788_v34 = vld [vmem:[%s1976_s28 + $0x1d4] ss:$8 sps:$4 sm:$0xff]  }
  0x16   : > { %v1787_v35 = vld [vmem:[%s1976_s28 + $0x40] ss:$8 sps:$4 sm:$0xff]   ;;  %v1790_v36 = vld [vmem:[%s1976_s28 + $0x1d0] ss:$8 sps:$4 sm:$0xff]   ;;  %v1791_v37 = vld [vmem:[%s1976_s28 + $0x54] ss:$8 sps:$4 sm:$0xff]  }
  0x17   : > { %910 = vmatpush1.bf16.msra.mxu0 %v1749_v5  ;;  %1724 = vmatpush1.bf16.msra.mxu1 %v1749_v5  ;;  %v1794_v38 = vld [vmem:[%s1976_s28 + $0x1e4] ss:$8 sps:$4 sm:$0xff]   ;;  %v1793_v39 = vld [vmem:[%s1976_s28 + $0x50] ss:$8 sps:$4 sm:$0xff]   ;;  %v1796_v40 = vld [vmem:[%s1976_s28 + $0x1e0] ss:$8 sps:$4 sm:$0xff]  }
  0x18   : > { %911 = vmatprep.subr.bf16.mxu0 %v1916_v1  ;;  %1709 = vmatprep.subr.bf16.mxu1 %v1916_v1  ;;  %v1797_v41 = vld [vmem:[%s1976_s28 + $0x64] ss:$8 sps:$4 sm:$0xff]   ;;  %v1800_v42 = vld [vmem:[%s1976_s28 + $0x1f4] ss:$8 sps:$4 sm:$0xff]   ;;  %v1799_v43 = vld [vmem:[%s1976_s28 + $0x60] ss:$8 sps:$4 sm:$0xff]  }
  0x19   : > { %v1802_v44 = vld [vmem:[%s1976_s28 + $0x1f0] ss:$8 sps:$4 sm:$0xff]   ;;  %v1803_v45 = vld [vmem:[%s1976_s28 + $0x74] ss:$8 sps:$4 sm:$0xff]   ;;  %v1806_v46 = vld [vmem:[%s1976_s28 + $0x204] ss:$8 sps:$4 sm:$0xff]  }
  0x1a   : > { %v1805_v47 = vld [vmem:[%s1976_s28 + $0x70] ss:$8 sps:$4 sm:$0xff]   ;;  %v1808_v48 = vld [vmem:[%s1976_s28 + $0x200] ss:$8 sps:$4 sm:$0xff]   ;;  %v1809_v49 = vld [vmem:[%s1976_s28 + $0x84] ss:$8 sps:$4 sm:$0xff]  }
  0x1b   : > { %912 = vmatpush1.bf16.msra.mxu0 %v1750_v7  ;;  %1725 = vmatpush1.bf16.msra.mxu1 %v1750_v7  ;;  %v1812_v50 = vld [vmem:[%s1976_s28 + $0x214] ss:$8 sps:$4 sm:$0xff]   ;;  %v1811_v51 = vld [vmem:[%s1976_s28 + $0x80] ss:$8 sps:$4 sm:$0xff]   ;;  %v1814_v52 = vld [vmem:[%s1976_s28 + $0x210] ss:$8 sps:$4 sm:$0xff]  }
  0x1c   : > { %913 = vmatprep.subr.bf16.mxu0 %v1916_v1  ;;  %1710 = vmatprep.subr.bf16.mxu1 %v1916_v1  ;;  %v1815_v53 = vld [vmem:[%s1976_s28 + $0x94] ss:$8 sps:$4 sm:$0xff]   ;;  %v1818_v54 = vld [vmem:[%s1976_s28 + $0x224] ss:$8 sps:$4 sm:$0xff]   ;;  %v1817_v55 = vld [vmem:[%s1976_s28 + $0x90] ss:$8 sps:$4 sm:$0xff]  }
  0x1d   : > { %v1820_v56 = vld [vmem:[%s1976_s28 + $0x220] ss:$8 sps:$4 sm:$0xff]   ;;  %v1821_v57 = vld [vmem:[%s1976_s28 + $0xa4] ss:$8 sps:$4 sm:$0xff]   ;;  %v1824_v58 = vld [vmem:[%s1976_s28 + $0x234] ss:$8 sps:$4 sm:$0xff]  }
  0x1e   : > { %v1823_v59 = vld [vmem:[%s1976_s28 + $0xa0] ss:$8 sps:$4 sm:$0xff]   ;;  %v1826_v60 = vld [vmem:[%s1976_s28 + $0x230] ss:$8 sps:$4 sm:$0xff]   ;;  %v1827_v61 = vld [vmem:[%s1976_s28 + $0xb4] ss:$8 sps:$4 sm:$0xff]  }
  0x1f   : > { %914 = vmatpush1.bf16.msra.mxu0 %v1751_v9  ;;  %1726 = vmatpush1.bf16.msra.mxu1 %v1751_v9  ;;  %v1830_v62 = vld [vmem:[%s1976_s28 + $0x244] ss:$8 sps:$4 sm:$0xff]   ;;  %v1829_v63 = vld [vmem:[%s1976_s28 + $0xb0] ss:$8 sps:$4 sm:$0xff]   ;;  %v1832_v0 = vld [vmem:[%s1976_s28 + $0x240] ss:$8 sps:$4 sm:$0xff]  }
  0x20   : > { %915 = vmatprep.subr.bf16.mxu0 %v1916_v1  ;;  %1711 = vmatprep.subr.bf16.mxu1 %v1916_v1  ;;  %v1836_v2 = vld [vmem:[%s1976_s28 + $0x254] ss:$8 sps:$4 sm:$0xff]   ;;  %v1835_v3 = vld [vmem:[%s1976_s28 + $0xc0] ss:$8 sps:$4 sm:$0xff]   ;;  %v1838_v4 = vld [vmem:[%s1976_s28 + $0x250] ss:$8 sps:$4 sm:$0xff]  }
  0x21   : > { %v1839_v5 = vld [vmem:[%s1976_s28 + $0xd4] ss:$8 sps:$4 sm:$0xff]   ;;  %v1842_v6 = vld [vmem:[%s1976_s28 + $0x264] ss:$8 sps:$4 sm:$0xff]   ;;  %v1841_v7 = vld [vmem:[%s1976_s28 + $0xd0] ss:$8 sps:$4 sm:$0xff]  }
  0x22   : > { %v1844_v8 = vld [vmem:[%s1976_s28 + $0x260] ss:$8 sps:$4 sm:$0xff]   ;;  %v1845_v9 = vld [vmem:[%s1976_s28 + $0xe4] ss:$8 sps:$4 sm:$0xff]  }
  0x23   : > { %916 = vmatpush1.bf16.msra.mxu0 %v1752_v10  ;;  %1727 = vmatpush1.bf16.msra.mxu1 %v1752_v10  ;;  %v1848_v10 = vld [vmem:[%s1976_s28 + $0x274] ss:$8 sps:$4 sm:$0xff]  }
  0x24   : > { %917 = vmatprep.subr.bf16.mxu0 %v1916_v1  ;;  %1712 = vmatprep.subr.bf16.mxu1 %v1916_v1 }
  0x27   : > { %918 = vmatpush1.bf16.msra.mxu0 %v1753_v11  ;;  %1728 = vmatpush1.bf16.msra.mxu1 %v1753_v11  ;;  %v1847_v11 = vld [vmem:[%s1976_s28 + $0xe0] ss:$8 sps:$4 sm:$0xff]  }
  0x28   : > { %919 = vmatprep.subr.bf16.mxu0 %v1916_v1  ;;  %1713 = vmatprep.subr.bf16.mxu1 %v1916_v1 }
  0x2b   : > { %920 = vmatpush1.bf16.msra.mxu0 %v1754_v12  ;;  %1729 = vmatpush1.bf16.msra.mxu1 %v1754_v12  ;;  %v1850_v12 = vld [vmem:[%s1976_s28 + $0x270] ss:$8 sps:$4 sm:$0xff]  }
  0x2c   : > { %921 = vmatprep.subr.bf16.mxu0 %v1916_v1  ;;  %1714 = vmatprep.subr.bf16.mxu1 %v1916_v1 }
  0x2f   : > { %922 = vmatpush1.bf16.msra.mxu0 %v1755_v13  ;;  %1730 = vmatpush1.bf16.msra.mxu1 %v1755_v13  ;;  %v1851_v13 = vld [vmem:[%s1976_s28 + $0xf4] ss:$8 sps:$4 sm:$0xff]  }
  0x30   : > { %923 = vmatprep.subr.bf16.mxu0 %v1916_v1  ;;  %1715 = vmatprep.subr.bf16.mxu1 %v1916_v1 }
  0x33   : > { %924 = vmatpush1.bf16.msra.mxu0 %v1756_v14  ;;  %1731 = vmatpush1.bf16.msra.mxu1 %v1756_v14  ;;  %v1854_v14 = vld [vmem:[%s1976_s28 + $0x284] ss:$8 sps:$4 sm:$0xff]  }
  0x34   : > { %925 = vmatprep.subr.bf16.mxu0 %v1916_v1  ;;  %1716 = vmatprep.subr.bf16.mxu1 %v1916_v1 }
  0x37   : > { %926 = vmatpush1.bf16.msra.mxu0 %v1757_v15  ;;  %1732 = vmatpush1.bf16.msra.mxu1 %v1757_v15  ;;  %v1853_v15 = vld [vmem:[%s1976_s28 + $0xf0] ss:$8 sps:$4 sm:$0xff]  }
  0x38   : > { %927 = vmatprep.subr.bf16.mxu0 %v1916_v1  ;;  %1717 = vmatprep.subr.bf16.mxu1 %v1916_v1 }
  0x3b   : > { %928 = vmatpush1.bf16.msra.mxu0 %v1758_v16  ;;  %1733 = vmatpush1.bf16.msra.mxu1 %v1758_v16  ;;  %v1856_v16 = vld [vmem:[%s1976_s28 + $0x280] ss:$8 sps:$4 sm:$0xff]  }
  0x3c   : > { %929 = vmatprep.subr.bf16.mxu0 %v1916_v1  ;;  %1718 = vmatprep.subr.bf16.mxu1 %v1916_v1 }
  0x3f   : > { %930 = vmatpush1.bf16.msra.mxu0 %v1759_v17  ;;  %1734 = vmatpush1.bf16.msra.mxu1 %v1759_v17  ;;  %v1857_v17 = vld [vmem:[%s1976_s28 + $0x104] ss:$8 sps:$4 sm:$0xff]  }
  0x40   : > { %931 = vmatprep.subr.bf16.mxu0 %v1916_v1  ;;  %1719 = vmatprep.subr.bf16.mxu1 %v1916_v1  ;;  %v1833_v1 = vld [vmem:[%s1976_s28 + $0xc4] ss:$8 sps:$4 sm:$0xff]  }
  0x43   : > { %932 = vmatpush1.bf16.msra.mxu0 %v1760_v18  ;;  %1735 = vmatpush1.bf16.msra.mxu1 %v1760_v18  ;;  %v1860_v18 = vld [vmem:[%s1976_s28 + $0x294] ss:$8 sps:$4 sm:$0xff]  }
  0x46   : > { %934 = vmatmul.mubr.bf16.vlgmr.msra.gmra.mrb[0].mxu0 %v1761_v19  ;;  %1134 = vmatmul.mubr.bf16.vlgmr.msra.gmra.mrb[0].mxu1 %v1764_v20  ;;  %v1859_v19 = vld [vmem:[%s1976_s28 + $0x100] ss:$8 sps:$4 sm:$0xff]   ;;  %v1862_v20 = vld [vmem:[%s1976_s28 + $0x290] ss:$8 sps:$4 sm:$0xff]  }
  0x47   : > { %941 = vmatprep.mubr.bf16.mxu0 %v1767_v21  ;;  %1141 = vmatprep.mubr.bf16.mxu1 %v1770_v22  ;;  %v1863_v21 = vld [vmem:[%s1976_s28 + $0x114] ss:$8 sps:$4 sm:$0xff]   ;;  %v1866_v22 = vld [vmem:[%s1976_s28 + $0x2a4] ss:$8 sps:$4 sm:$0xff]  }
  0x4e   : > { %942 = vmatmul.mubr.bf16.gmra.mrb[4].mxu0 %v1769_v23  ;;  %1142 = vmatmul.mubr.bf16.gmra.mrb[4].mxu1 %v1772_v24  ;;  %v1865_v23 = vld [vmem:[%s1976_s28 + $0x110] ss:$8 sps:$4 sm:$0xff]   ;;  %v1868_v24 = vld [vmem:[%s1976_s28 + $0x2a0] ss:$8 sps:$4 sm:$0xff]  }
  0x4f   : > { %949 = vmatprep.mubr.bf16.mxu0 %v1773_v25  ;;  %1149 = vmatprep.mubr.bf16.mxu1 %v1776_v26  ;;  %v1869_v25 = vld [vmem:[%s1976_s28 + $0x124] ss:$8 sps:$4 sm:$0xff]   ;;  %v1872_v26 = vld [vmem:[%s1976_s28 + $0x2b4] ss:$8 sps:$4 sm:$0xff]  }
  0x56   : > { %950 = vmatmul.mubr.bf16.gmra.mrb[8].mxu0 %v1775_v27  ;;  %1150 = vmatmul.mubr.bf16.gmra.mrb[8].mxu1 %v1778_v28  ;;  %v1871_v27 = vld [vmem:[%s1976_s28 + $0x120] ss:$8 sps:$4 sm:$0xff]   ;;  %v1874_v28 = vld [vmem:[%s1976_s28 + $0x2b0] ss:$8 sps:$4 sm:$0xff]  }
  0x57   : > { %957 = vmatprep.mubr.bf16.mxu0 %v1779_v29  ;;  %1157 = vmatprep.mubr.bf16.mxu1 %v1782_v30  ;;  %v1875_v29 = vld [vmem:[%s1976_s28 + $0x134] ss:$8 sps:$4 sm:$0xff]   ;;  %v1878_v30 = vld [vmem:[%s1976_s28 + $0x2c4] ss:$8 sps:$4 sm:$0xff]  }
  0x5e   : > { %958 = vmatmul.mubr.bf16.gmra.mrb[12].mxu0 %v1781_v31  ;;  %1158 = vmatmul.mubr.bf16.gmra.mrb[12].mxu1 %v1784_v32  ;;  %v1877_v31 = vld [vmem:[%s1976_s28 + $0x130] ss:$8 sps:$4 sm:$0xff]   ;;  %v1880_v32 = vld [vmem:[%s1976_s28 + $0x2c0] ss:$8 sps:$4 sm:$0xff]  }
  0x5f   : > { %965 = vmatprep.mubr.bf16.mxu0 %v1785_v33  ;;  %1165 = vmatprep.mubr.bf16.mxu1 %v1788_v34  ;;  %v1881_v33 = vld [vmem:[%s1976_s28 + $0x144] ss:$8 sps:$4 sm:$0xff]   ;;  %v1884_v34 = vld [vmem:[%s1976_s28 + $0x2d4] ss:$8 sps:$4 sm:$0xff]  }
  0x66   : > { %966 = vmatmul.mubr.bf16.gmra.mrb[16].mxu0 %v1787_v35  ;;  %1166 = vmatmul.mubr.bf16.gmra.mrb[16].mxu1 %v1790_v36  ;;  %v1883_v35 = vld [vmem:[%s1976_s28 + $0x140] ss:$8 sps:$4 sm:$0xff]   ;;  %v1886_v36 = vld [vmem:[%s1976_s28 + $0x2d0] ss:$8 sps:$4 sm:$0xff]  }
  0x67   : > { %973 = vmatprep.mubr.bf16.mxu0 %v1791_v37  ;;  %1173 = vmatprep.mubr.bf16.mxu1 %v1794_v38  ;;  %v1887_v37 = vld [vmem:[%s1976_s28 + $0x154] ss:$8 sps:$4 sm:$0xff]   ;;  %v1890_v38 = vld [vmem:[%s1976_s28 + $0x2e4] ss:$8 sps:$4 sm:$0xff]  }
  0x6e   : > { %974 = vmatmul.mubr.bf16.gmra.mrb[20].mxu0 %v1793_v39  ;;  %1174 = vmatmul.mubr.bf16.gmra.mrb[20].mxu1 %v1796_v40  ;;  %v1889_v39 = vld [vmem:[%s1976_s28 + $0x150] ss:$8 sps:$4 sm:$0xff]   ;;  %v1892_v40 = vld [vmem:[%s1976_s28 + $0x2e0] ss:$8 sps:$4 sm:$0xff]  }
  0x6f   : > { %981 = vmatprep.mubr.bf16.mxu0 %v1797_v41  ;;  %1181 = vmatprep.mubr.bf16.mxu1 %v1800_v42  ;;  %v1893_v41 = vld [vmem:[%s1976_s28 + $0x164] ss:$8 sps:$4 sm:$0xff]   ;;  %v1896_v42 = vld [vmem:[%s1976_s28 + $0x2f4] ss:$8 sps:$4 sm:$0xff]  }
  0x76   : > { %982 = vmatmul.mubr.bf16.gmra.mrb[24].mxu0 %v1799_v43  ;;  %1182 = vmatmul.mubr.bf16.gmra.mrb[24].mxu1 %v1802_v44  ;;  %v1895_v43 = vld [vmem:[%s1976_s28 + $0x160] ss:$8 sps:$4 sm:$0xff]   ;;  %v1898_v44 = vld [vmem:[%s1976_s28 + $0x2f0] ss:$8 sps:$4 sm:$0xff]  }
  0x77   : > { %989 = vmatprep.mubr.bf16.mxu0 %v1803_v45  ;;  %1189 = vmatprep.mubr.bf16.mxu1 %v1806_v46  ;;  %v1899_v45 = vld [vmem:[%s1976_s28 + $0x174] ss:$8 sps:$4 sm:$0xff]   ;;  %v1902_v46 = vld [vmem:[%s1976_s28 + $0x304] ss:$8 sps:$4 sm:$0xff]  }
  0x7e   : > { %990 = vmatmul.mubr.bf16.gmra.mrb[28].mxu0 %v1805_v47  ;;  %1190 = vmatmul.mubr.bf16.gmra.mrb[28].mxu1 %v1808_v48  ;;  %v1901_v47 = vld [vmem:[%s1976_s28 + $0x170] ss:$8 sps:$4 sm:$0xff]   ;;  %v1904_v48 = vld [vmem:[%s1976_s28 + $0x300] ss:$8 sps:$4 sm:$0xff]  }
  0x7f   : > { %997 = vmatprep.mubr.bf16.mxu0 %v1809_v49  ;;  %1197 = vmatprep.mubr.bf16.mxu1 %v1812_v50  ;;  %v1905_v49 = vld [vmem:[%s1976_s28 + $0x184] ss:$8 sps:$4 sm:$0xff]   ;;  %v1907_v50 = vld [vmem:[%s1976_s28 + $0x180] ss:$8 sps:$4 sm:$0xff]  }
  0x86   : > { %998 = vmatmul.mubr.bf16.gmra.mrb[32].mxu0 %v1811_v51  ;;  %1198 = vmatmul.mubr.bf16.gmra.mrb[32].mxu1 %v1814_v52  ;;  %v2136_v51 = vld [vmem:[%s2346_s2] ss:$0 sm:$0xff] }
  0x87   : > { %1005 = vmatprep.mubr.bf16.mxu0 %v1815_v53  ;;  %1205 = vmatprep.mubr.bf16.mxu1 %v1818_v54 }
  0x8e   : > { %1006 = vmatmul.mubr.bf16.gmra.mrb[36].mxu0 %v1817_v55  ;;  %1206 = vmatmul.mubr.bf16.gmra.mrb[36].mxu1 %v1820_v56 }
  0x8f   : > { %1013 = vmatprep.mubr.bf16.mxu0 %v1821_v57  ;;  %1213 = vmatprep.mubr.bf16.mxu1 %v1824_v58 }
  0x96   : > { %1014 = vmatmul.mubr.bf16.gmra.mrb[40].mxu0 %v1823_v59  ;;  %1214 = vmatmul.mubr.bf16.gmra.mrb[40].mxu1 %v1826_v60 }
  0x97   : > { %1021 = vmatprep.mubr.bf16.mxu0 %v1827_v61  ;;  %1221 = vmatprep.mubr.bf16.mxu1 %v1830_v62 }
  0x9e   : > { %1022 = vmatmul.mubr.bf16.gmra.mrb[44].mxu0 %v1829_v63  ;;  %1222 = vmatmul.mubr.bf16.gmra.mrb[44].mxu1 %v1832_v0 }
  0x9f   : > { %1029 = vmatprep.mubr.bf16.mxu0 %v1833_v1  ;;  %1229 = vmatprep.mubr.bf16.mxu1 %v1836_v2 }
  0xa6   : > { %1030 = vmatmul.mubr.bf16.gmra.mrb[48].mxu0 %v1835_v3  ;;  %1230 = vmatmul.mubr.bf16.gmra.mrb[48].mxu1 %v1838_v4 }
  0xa7   : > { %1037 = vmatprep.mubr.bf16.mxu0 %v1839_v5  ;;  %1237 = vmatprep.mubr.bf16.mxu1 %v1842_v6 }
  0xae   : > { %1038 = vmatmul.mubr.bf16.gmra.mrb[52].mxu0 %v1841_v7  ;;  %1238 = vmatmul.mubr.bf16.gmra.mrb[52].mxu1 %v1844_v8 }
  0xaf   : > { %1045 = vmatprep.mubr.bf16.mxu0 %v1845_v9  ;;  %1245 = vmatprep.mubr.bf16.mxu1 %v1848_v10 }
  0xb6   : > { %1046 = vmatmul.mubr.bf16.gmra.mrb[56].mxu0 %v1847_v11  ;;  %1246 = vmatmul.mubr.bf16.gmra.mrb[56].mxu1 %v1850_v12 }
  0xb7   : > { %1053 = vmatprep.mubr.bf16.mxu0 %v1851_v13  ;;  %1253 = vmatprep.mubr.bf16.mxu1 %v1854_v14 }
  0xbe   : > { %1054 = vmatmul.mubr.bf16.gmra.mrb[60].mxu0 %v1853_v15  ;;  %1254 = vmatmul.mubr.bf16.gmra.mrb[60].mxu1 %v1856_v16 }
  0xbf   : > { %1061 = vmatprep.mubr.bf16.mxu0 %v1857_v17  ;;  %1261 = vmatprep.mubr.bf16.mxu1 %v1860_v18 }
  0xc6   : > { %1062 = vmatmul.mubr.bf16.gmra.mrb[64].mxu0 %v1859_v19  ;;  %1262 = vmatmul.mubr.bf16.gmra.mrb[64].mxu1 %v1862_v20 }
  0xc7   : > { %1069 = vmatprep.mubr.bf16.mxu0 %v1863_v21  ;;  %1269 = vmatprep.mubr.bf16.mxu1 %v1866_v22 }
  0xce   : > { %1070 = vmatmul.mubr.bf16.gmra.mrb[68].mxu0 %v1865_v23  ;;  %1270 = vmatmul.mubr.bf16.gmra.mrb[68].mxu1 %v1868_v24 }
  0xcf   : > { %1077 = vmatprep.mubr.bf16.mxu0 %v1869_v25  ;;  %1277 = vmatprep.mubr.bf16.mxu1 %v1872_v26 }
  0xd6   : > { %1078 = vmatmul.mubr.bf16.gmra.mrb[72].mxu0 %v1871_v27  ;;  %1278 = vmatmul.mubr.bf16.gmra.mrb[72].mxu1 %v1874_v28 }
  0xd7   : > { %1085 = vmatprep.mubr.bf16.mxu0 %v1875_v29  ;;  %1285 = vmatprep.mubr.bf16.mxu1 %v1878_v30 }
  0xde   : > { %1086 = vmatmul.mubr.bf16.gmra.mrb[76].mxu0 %v1877_v31  ;;  %1286 = vmatmul.mubr.bf16.gmra.mrb[76].mxu1 %v1880_v32 }
  0xdf   : > { %1093 = vmatprep.mubr.bf16.mxu0 %v1881_v33  ;;  %1293 = vmatprep.mubr.bf16.mxu1 %v1884_v34 }
  0xe6   : > { %1094 = vmatmul.mubr.bf16.gmra.mrb[80].mxu0 %v1883_v35  ;;  %1294 = vmatmul.mubr.bf16.gmra.mrb[80].mxu1 %v1886_v36 }
  0xe7   : > { %1101 = vmatprep.mubr.bf16.mxu0 %v1887_v37  ;;  %1301 = vmatprep.mubr.bf16.mxu1 %v1890_v38 }
  0xee   : > { %1102 = vmatmul.mubr.bf16.gmra.mrb[84].mxu0 %v1889_v39  ;;  %1302 = vmatmul.mubr.bf16.gmra.mrb[84].mxu1 %v1892_v40 }
  0xef   : > { %1109 = vmatprep.mubr.bf16.mxu0 %v1893_v41  ;;  %1309 = vmatprep.mubr.bf16.mxu1 %v1896_v42 }
  0xf6   : > { %1110 = vmatmul.mubr.bf16.gmra.mrb[88].mxu0 %v1895_v43  ;;  %1310 = vmatmul.mubr.bf16.gmra.mrb[88].mxu1 %v1898_v44 }
  0xf7   : > { %1117 = vmatprep.mubr.bf16.mxu0 %v1899_v45  ;;  %1317 = vmatprep.mubr.bf16.mxu1 %v1902_v46 }
  0xfe   : > { %1118 = vmatmul.mubr.bf16.gmra.mrb[92].mxu0 %v1901_v47  ;;  %1318 = vmatmul.mubr.bf16.gmra.mrb[92].mxu1 %v1904_v48 }
  0xff   : > { %1125 = vmatprep.mubr.bf16.mxu0 %v1905_v49 }
 0x106   : > { %1126 = vmatmul.mubr.bf16.gmra.mrb[96].mxu0 %v1907_v50 }
 0x119   : > { %v935_v52 = vpop.f32.mrb[0].mxu0  ;;  %v1135_v53 = vpop.f32.mrb[0].mxu1 }
 0x11a   : > { %v936_v54 = vadd.f32 %v2136_v51, %v935_v52  ;;  %v937_v55 = vpop.f32.mrb[1].mxu0  ;;  %v1136_v56 = vadd.f32 %v2136_v51, %v1135_v53  ;;  %v1137_v57 = vpop.f32.mrb[1].mxu1 }
 0x11b   : > { %v938_v58 = vpop.f32.mrb[2].mxu0  ;;  %v1138_v59 = vpop.f32.mrb[2].mxu1 }
 0x11c   : > { %v1326_v60 = vmax.f32 %v936_v54, 0.0  ;;  %v939_v61 = vadd.f32 %v2136_v51, %v938_v58  ;;  %v940_v62 = vpop.f32.mrb[3].mxu0  ;;  %v1376_v63 = vmax.f32 %v1136_v56, 0.0  ;;  %v1139_v0 = vadd.f32 %v2136_v51, %v1138_v59  ;;  %v1140_v1 = vpop.f32.mrb[3].mxu1 }
 0x11e   : > { %1424 = vst [vmem:[%s2145_s5] sm:$0xff] %v1326_v60  ;;  %v1327_v2 = vmax.f32 %v939_v61, 0.0  ;;  %1474 = vst [vmem:[%s2145_s5 + $0x190] sm:$0xff] %v1376_v63  ;;  %v1377_v3 = vmax.f32 %v1139_v0, 0.0 }
 0x120   : > { %1425 = vst [vmem:[%s2145_s5 + $0x8] sm:$0xff] %v1327_v2  ;;  %1475 = vst [vmem:[%s2145_s5 + $0x198] sm:$0xff] %v1377_v3 }
 0x121   : > { %v943_v4 = vpop.f32.mrb[4].mxu0  ;;  %v1143_v5 = vpop.f32.mrb[4].mxu1 }
 0x122   : > { %v944_v6 = vadd.f32 %v2136_v51, %v943_v4  ;;  %v945_v7 = vpop.f32.mrb[5].mxu0  ;;  %v1144_v8 = vadd.f32 %v2136_v51, %v1143_v5  ;;  %v1145_v9 = vpop.f32.mrb[5].mxu1 }
 0x123   : > { %v946_v10 = vpop.f32.mrb[6].mxu0  ;;  %v1146_v11 = vpop.f32.mrb[6].mxu1 }
 0x124   : > { %v1328_v12 = vmax.f32 %v944_v6, 0.0  ;;  %v947_v13 = vadd.f32 %v2136_v51, %v946_v10  ;;  %v948_v14 = vpop.f32.mrb[7].mxu0  ;;  %v1378_v15 = vmax.f32 %v1144_v8, 0.0  ;;  %v1147_v16 = vadd.f32 %v2136_v51, %v1146_v11  ;;  %v1148_v17 = vpop.f32.mrb[7].mxu1 }
 0x126   : > { %1426 = vst [vmem:[%s2145_s5 + $0x10] sm:$0xff] %v1328_v12  ;;  %v1329_v18 = vmax.f32 %v947_v13, 0.0  ;;  %1476 = vst [vmem:[%s2145_s5 + $0x1a0] sm:$0xff] %v1378_v15  ;;  %v1379_v19 = vmax.f32 %v1147_v16, 0.0 }
 0x128   : > { %1427 = vst [vmem:[%s2145_s5 + $0x18] sm:$0xff] %v1329_v18  ;;  %1477 = vst [vmem:[%s2145_s5 + $0x1a8] sm:$0xff] %v1379_v19 }
 0x129   : > { %v951_v20 = vpop.f32.mrb[8].mxu0  ;;  %v1151_v21 = vpop.f32.mrb[8].mxu1 }
 0x12a   : > { %v952_v22 = vadd.f32 %v2136_v51, %v951_v20  ;;  %v953_v23 = vpop.f32.mrb[9].mxu0  ;;  %v1152_v24 = vadd.f32 %v2136_v51, %v1151_v21  ;;  %v1153_v25 = vpop.f32.mrb[9].mxu1 }
 0x12b   : > { %v954_v26 = vpop.f32.mrb[10].mxu0  ;;  %v1154_v27 = vpop.f32.mrb[10].mxu1 }
 0x12c   : > { %v1330_v28 = vmax.f32 %v952_v22, 0.0  ;;  %v955_v29 = vadd.f32 %v2136_v51, %v954_v26  ;;  %v956_v30 = vpop.f32.mrb[11].mxu0  ;;  %v1380_v31 = vmax.f32 %v1152_v24, 0.0  ;;  %v1155_v32 = vadd.f32 %v2136_v51, %v1154_v27  ;;  %v1156_v33 = vpop.f32.mrb[11].mxu1 }
 0x12e   : > { %1428 = vst [vmem:[%s2145_s5 + $0x20] sm:$0xff] %v1330_v28  ;;  %v1331_v34 = vmax.f32 %v955_v29, 0.0  ;;  %1478 = vst [vmem:[%s2145_s5 + $0x1b0] sm:$0xff] %v1380_v31  ;;  %v1381_v35 = vmax.f32 %v1155_v32, 0.0 }
 0x130   : > { %1429 = vst [vmem:[%s2145_s5 + $0x28] sm:$0xff] %v1331_v34  ;;  %1479 = vst [vmem:[%s2145_s5 + $0x1b8] sm:$0xff] %v1381_v35 }
 0x131   : > { %v959_v36 = vpop.f32.mrb[12].mxu0  ;;  %v1159_v37 = vpop.f32.mrb[12].mxu1 }
 0x132   : > { %v960_v38 = vadd.f32 %v2136_v51, %v959_v36  ;;  %v961_v39 = vpop.f32.mrb[13].mxu0  ;;  %v1160_v40 = vadd.f32 %v2136_v51, %v1159_v37  ;;  %v1161_v41 = vpop.f32.mrb[13].mxu1 }
 0x133   : > { %v962_v42 = vpop.f32.mrb[14].mxu0  ;;  %v1162_v43 = vpop.f32.mrb[14].mxu1 }
 0x134   : > { %v1332_v44 = vmax.f32 %v960_v38, 0.0  ;;  %v963_v45 = vadd.f32 %v2136_v51, %v962_v42  ;;  %v964_v46 = vpop.f32.mrb[15].mxu0  ;;  %v1382_v47 = vmax.f32 %v1160_v40, 0.0  ;;  %v1163_v48 = vadd.f32 %v2136_v51, %v1162_v43  ;;  %v1164_v49 = vpop.f32.mrb[15].mxu1 }
 0x136   : > { %1430 = vst [vmem:[%s2145_s5 + $0x30] sm:$0xff] %v1332_v44  ;;  %v1333_v50 = vmax.f32 %v963_v45, 0.0  ;;  %1480 = vst [vmem:[%s2145_s5 + $0x1c0] sm:$0xff] %v1382_v47  ;;  %v1383_v52 = vmax.f32 %v1163_v48, 0.0 }
 0x138   : > { %1431 = vst [vmem:[%s2145_s5 + $0x38] sm:$0xff] %v1333_v50  ;;  %1481 = vst [vmem:[%s2145_s5 + $0x1c8] sm:$0xff] %v1383_v52 }
 0x139   : > { %v967_v53 = vpop.f32.mrb[16].mxu0  ;;  %v1167_v54 = vpop.f32.mrb[16].mxu1 }
 0x13a   : > { %v968_v55 = vadd.f32 %v2136_v51, %v967_v53  ;;  %v969_v56 = vpop.f32.mrb[17].mxu0  ;;  %v1168_v57 = vadd.f32 %v2136_v51, %v1167_v54  ;;  %v1169_v58 = vpop.f32.mrb[17].mxu1 }
 0x13b   : > { %v970_v59 = vpop.f32.mrb[18].mxu0  ;;  %v1170_v60 = vpop.f32.mrb[18].mxu1 }
 0x13c   : > { %v1334_v61 = vmax.f32 %v968_v55, 0.0  ;;  %v971_v62 = vadd.f32 %v2136_v51, %v970_v59  ;;  %v972_v63 = vpop.f32.mrb[19].mxu0  ;;  %v1384_v0 = vmax.f32 %v1168_v57, 0.0  ;;  %v1171_v1 = vadd.f32 %v2136_v51, %v1170_v60  ;;  %v1172_v2 = vpop.f32.mrb[19].mxu1 }
 0x13e   : > { %1432 = vst [vmem:[%s2145_s5 + $0x40] sm:$0xff] %v1334_v61  ;;  %v1335_v3 = vmax.f32 %v971_v62, 0.0  ;;  %1482 = vst [vmem:[%s2145_s5 + $0x1d0] sm:$0xff] %v1384_v0  ;;  %v1385_v4 = vmax.f32 %v1171_v1, 0.0 }
 0x140   : > { %1433 = vst [vmem:[%s2145_s5 + $0x48] sm:$0xff] %v1335_v3  ;;  %1483 = vst [vmem:[%s2145_s5 + $0x1d8] sm:$0xff] %v1385_v4 }
 0x141   : > { %v975_v5 = vpop.f32.mrb[20].mxu0  ;;  %v1175_v6 = vpop.f32.mrb[20].mxu1 }
 0x142   : > { %v976_v7 = vadd.f32 %v2136_v51, %v975_v5  ;;  %v977_v8 = vpop.f32.mrb[21].mxu0  ;;  %v1176_v9 = vadd.f32 %v2136_v51, %v1175_v6  ;;  %v1177_v10 = vpop.f32.mrb[21].mxu1 }
 0x143   : > { %v978_v11 = vpop.f32.mrb[22].mxu0  ;;  %v1178_v12 = vpop.f32.mrb[22].mxu1 }
 0x144   : > { %v1336_v13 = vmax.f32 %v976_v7, 0.0  ;;  %v979_v14 = vadd.f32 %v2136_v51, %v978_v11  ;;  %v980_v15 = vpop.f32.mrb[23].mxu0  ;;  %v1386_v16 = vmax.f32 %v1176_v9, 0.0  ;;  %v1179_v17 = vadd.f32 %v2136_v51, %v1178_v12  ;;  %v1180_v18 = vpop.f32.mrb[23].mxu1 }
 0x146   : > { %1434 = vst [vmem:[%s2145_s5 + $0x50] sm:$0xff] %v1336_v13  ;;  %v1337_v19 = vmax.f32 %v979_v14, 0.0  ;;  %1484 = vst [vmem:[%s2145_s5 + $0x1e0] sm:$0xff] %v1386_v16  ;;  %v1387_v20 = vmax.f32 %v1179_v17, 0.0 }
 0x148   : > { %1435 = vst [vmem:[%s2145_s5 + $0x58] sm:$0xff] %v1337_v19  ;;  %1485 = vst [vmem:[%s2145_s5 + $0x1e8] sm:$0xff] %v1387_v20 }
 0x149   : > { %v983_v21 = vpop.f32.mrb[24].mxu0  ;;  %v1183_v22 = vpop.f32.mrb[24].mxu1 }
 0x14a   : > { %v984_v23 = vadd.f32 %v2136_v51, %v983_v21  ;;  %v985_v24 = vpop.f32.mrb[25].mxu0  ;;  %v1184_v25 = vadd.f32 %v2136_v51, %v1183_v22  ;;  %v1185_v26 = vpop.f32.mrb[25].mxu1 }
 0x14b   : > { %v986_v27 = vpop.f32.mrb[26].mxu0  ;;  %v1186_v28 = vpop.f32.mrb[26].mxu1 }
 0x14c   : > { %v1338_v29 = vmax.f32 %v984_v23, 0.0  ;;  %v987_v30 = vadd.f32 %v2136_v51, %v986_v27  ;;  %v988_v31 = vpop.f32.mrb[27].mxu0  ;;  %v1388_v32 = vmax.f32 %v1184_v25, 0.0  ;;  %v1187_v33 = vadd.f32 %v2136_v51, %v1186_v28  ;;  %v1188_v34 = vpop.f32.mrb[27].mxu1 }
 0x14e   : > { %1436 = vst [vmem:[%s2145_s5 + $0x60] sm:$0xff] %v1338_v29  ;;  %v1339_v35 = vmax.f32 %v987_v30, 0.0  ;;  %1486 = vst [vmem:[%s2145_s5 + $0x1f0] sm:$0xff] %v1388_v32  ;;  %v1389_v36 = vmax.f32 %v1187_v33, 0.0 }
 0x150   : > { %1437 = vst [vmem:[%s2145_s5 + $0x68] sm:$0xff] %v1339_v35  ;;  %1487 = vst [vmem:[%s2145_s5 + $0x1f8] sm:$0xff] %v1389_v36 }
 0x151   : > { %v991_v37 = vpop.f32.mrb[28].mxu0  ;;  %v1191_v38 = vpop.f32.mrb[28].mxu1 }
 0x152   : > { %v992_v39 = vadd.f32 %v2136_v51, %v991_v37  ;;  %v993_v40 = vpop.f32.mrb[29].mxu0  ;;  %v1192_v41 = vadd.f32 %v2136_v51, %v1191_v38  ;;  %v1193_v42 = vpop.f32.mrb[29].mxu1 }
 0x153   : > { %v994_v43 = vpop.f32.mrb[30].mxu0  ;;  %v1194_v44 = vpop.f32.mrb[30].mxu1 }
 0x154   : > { %v1340_v45 = vmax.f32 %v992_v39, 0.0  ;;  %v995_v46 = vadd.f32 %v2136_v51, %v994_v43  ;;  %v996_v47 = vpop.f32.mrb[31].mxu0  ;;  %v1390_v48 = vmax.f32 %v1192_v41, 0.0  ;;  %v1195_v49 = vadd.f32 %v2136_v51, %v1194_v44  ;;  %v1196_v50 = vpop.f32.mrb[31].mxu1 }
 0x156   : > { %1438 = vst [vmem:[%s2145_s5 + $0x70] sm:$0xff] %v1340_v45  ;;  %v1341_v52 = vmax.f32 %v995_v46, 0.0  ;;  %1488 = vst [vmem:[%s2145_s5 + $0x200] sm:$0xff] %v1390_v48  ;;  %v1391_v53 = vmax.f32 %v1195_v49, 0.0 }
 0x158   : > { %1439 = vst [vmem:[%s2145_s5 + $0x78] sm:$0xff] %v1341_v52  ;;  %1489 = vst [vmem:[%s2145_s5 + $0x208] sm:$0xff] %v1391_v53 }
 0x159   : > { %v999_v54 = vpop.f32.mrb[32].mxu0  ;;  %v1199_v55 = vpop.f32.mrb[32].mxu1 }
 0x15a   : > { %v1000_v56 = vadd.f32 %v2136_v51, %v999_v54  ;;  %v1001_v57 = vpop.f32.mrb[33].mxu0  ;;  %v1200_v58 = vadd.f32 %v2136_v51, %v1199_v55  ;;  %v1201_v59 = vpop.f32.mrb[33].mxu1 }
 0x15b   : > { %v1002_v60 = vpop.f32.mrb[34].mxu0  ;;  %v1202_v61 = vpop.f32.mrb[34].mxu1 }
 0x15c   : > { %v1342_v62 = vmax.f32 %v1000_v56, 0.0  ;;  %v1003_v63 = vadd.f32 %v2136_v51, %v1002_v60  ;;  %v1004_v0 = vpop.f32.mrb[35].mxu0  ;;  %v1392_v1 = vmax.f32 %v1200_v58, 0.0  ;;  %v1203_v2 = vadd.f32 %v2136_v51, %v1202_v61  ;;  %v1204_v3 = vpop.f32.mrb[35].mxu1 }
 0x15e   : > { %1440 = vst [vmem:[%s2145_s5 + $0x80] sm:$0xff] %v1342_v62  ;;  %v1343_v4 = vmax.f32 %v1003_v63, 0.0  ;;  %1490 = vst [vmem:[%s2145_s5 + $0x210] sm:$0xff] %v1392_v1  ;;  %v1393_v5 = vmax.f32 %v1203_v2, 0.0 }
 0x160   : > { %1441 = vst [vmem:[%s2145_s5 + $0x88] sm:$0xff] %v1343_v4  ;;  %1491 = vst [vmem:[%s2145_s5 + $0x218] sm:$0xff] %v1393_v5 }
 0x161   : > { %v1007_v6 = vpop.f32.mrb[36].mxu0  ;;  %v1207_v7 = vpop.f32.mrb[36].mxu1 }
 0x162   : > { %v1008_v8 = vadd.f32 %v2136_v51, %v1007_v6  ;;  %v1009_v9 = vpop.f32.mrb[37].mxu0  ;;  %v1208_v10 = vadd.f32 %v2136_v51, %v1207_v7  ;;  %v1209_v11 = vpop.f32.mrb[37].mxu1 }
 0x163   : > { %v1010_v12 = vpop.f32.mrb[38].mxu0  ;;  %v1210_v13 = vpop.f32.mrb[38].mxu1 }
 0x164   : > { %v1344_v14 = vmax.f32 %v1008_v8, 0.0  ;;  %v1011_v15 = vadd.f32 %v2136_v51, %v1010_v12  ;;  %v1012_v16 = vpop.f32.mrb[39].mxu0  ;;  %v1394_v17 = vmax.f32 %v1208_v10, 0.0  ;;  %v1211_v18 = vadd.f32 %v2136_v51, %v1210_v13  ;;  %v1212_v19 = vpop.f32.mrb[39].mxu1 }
 0x166   : > { %1442 = vst [vmem:[%s2145_s5 + $0x90] sm:$0xff] %v1344_v14  ;;  %v1345_v20 = vmax.f32 %v1011_v15, 0.0  ;;  %1492 = vst [vmem:[%s2145_s5 + $0x220] sm:$0xff] %v1394_v17  ;;  %v1395_v21 = vmax.f32 %v1211_v18, 0.0 }
 0x168   : > { %1443 = vst [vmem:[%s2145_s5 + $0x98] sm:$0xff] %v1345_v20  ;;  %1493 = vst [vmem:[%s2145_s5 + $0x228] sm:$0xff] %v1395_v21 }
 0x169   : > { %v1015_v22 = vpop.f32.mrb[40].mxu0  ;;  %v1215_v23 = vpop.f32.mrb[40].mxu1 }
 0x16a   : > { %v1016_v24 = vadd.f32 %v2136_v51, %v1015_v22  ;;  %v1017_v25 = vpop.f32.mrb[41].mxu0  ;;  %v1216_v26 = vadd.f32 %v2136_v51, %v1215_v23  ;;  %v1217_v27 = vpop.f32.mrb[41].mxu1 }
 0x16b   : > { %v1018_v28 = vpop.f32.mrb[42].mxu0  ;;  %v1218_v29 = vpop.f32.mrb[42].mxu1 }
 0x16c   : > { %v1346_v30 = vmax.f32 %v1016_v24, 0.0  ;;  %v1019_v31 = vadd.f32 %v2136_v51, %v1018_v28  ;;  %v1020_v32 = vpop.f32.mrb[43].mxu0  ;;  %v1396_v33 = vmax.f32 %v1216_v26, 0.0  ;;  %v1219_v34 = vadd.f32 %v2136_v51, %v1218_v29  ;;  %v1220_v35 = vpop.f32.mrb[43].mxu1 }
 0x16e   : > { %1444 = vst [vmem:[%s2145_s5 + $0xa0] sm:$0xff] %v1346_v30  ;;  %v1347_v36 = vmax.f32 %v1019_v31, 0.0  ;;  %1494 = vst [vmem:[%s2145_s5 + $0x230] sm:$0xff] %v1396_v33  ;;  %v1397_v37 = vmax.f32 %v1219_v34, 0.0 }
 0x170   : > { %1445 = vst [vmem:[%s2145_s5 + $0xa8] sm:$0xff] %v1347_v36  ;;  %1495 = vst [vmem:[%s2145_s5 + $0x238] sm:$0xff] %v1397_v37 }
 0x171   : > { %v1023_v38 = vpop.f32.mrb[44].mxu0  ;;  %v1223_v39 = vpop.f32.mrb[44].mxu1 }
 0x172   : > { %v1024_v40 = vadd.f32 %v2136_v51, %v1023_v38  ;;  %v1025_v41 = vpop.f32.mrb[45].mxu0  ;;  %v1224_v42 = vadd.f32 %v2136_v51, %v1223_v39  ;;  %v1225_v43 = vpop.f32.mrb[45].mxu1 }
 0x173   : > { %v1026_v44 = vpop.f32.mrb[46].mxu0  ;;  %v1226_v45 = vpop.f32.mrb[46].mxu1 }
 0x174   : > { %v1348_v46 = vmax.f32 %v1024_v40, 0.0  ;;  %v1027_v47 = vadd.f32 %v2136_v51, %v1026_v44  ;;  %v1028_v48 = vpop.f32.mrb[47].mxu0  ;;  %v1398_v49 = vmax.f32 %v1224_v42, 0.0  ;;  %v1227_v50 = vadd.f32 %v2136_v51, %v1226_v45  ;;  %v1228_v52 = vpop.f32.mrb[47].mxu1 }
 0x176   : > { %1446 = vst [vmem:[%s2145_s5 + $0xb0] sm:$0xff] %v1348_v46  ;;  %v1349_v53 = vmax.f32 %v1027_v47, 0.0  ;;  %1496 = vst [vmem:[%s2145_s5 + $0x240] sm:$0xff] %v1398_v49  ;;  %v1399_v54 = vmax.f32 %v1227_v50, 0.0 }
 0x178   : > { %1447 = vst [vmem:[%s2145_s5 + $0xb8] sm:$0xff] %v1349_v53  ;;  %1497 = vst [vmem:[%s2145_s5 + $0x248] sm:$0xff] %v1399_v54 }
 0x179   : > { %v1031_v55 = vpop.f32.mrb[48].mxu0  ;;  %v1231_v56 = vpop.f32.mrb[48].mxu1 }
 0x17a   : > { %v1032_v57 = vadd.f32 %v2136_v51, %v1031_v55  ;;  %v1033_v58 = vpop.f32.mrb[49].mxu0  ;;  %v1232_v59 = vadd.f32 %v2136_v51, %v1231_v56  ;;  %v1233_v60 = vpop.f32.mrb[49].mxu1 }
 0x17b   : > { %v1034_v61 = vpop.f32.mrb[50].mxu0  ;;  %v1234_v62 = vpop.f32.mrb[50].mxu1 }
 0x17c   : > { %v1350_v63 = vmax.f32 %v1032_v57, 0.0  ;;  %v1035_v0 = vadd.f32 %v2136_v51, %v1034_v61  ;;  %v1036_v1 = vpop.f32.mrb[51].mxu0  ;;  %v1400_v2 = vmax.f32 %v1232_v59, 0.0  ;;  %v1235_v3 = vadd.f32 %v2136_v51, %v1234_v62  ;;  %v1236_v4 = vpop.f32.mrb[51].mxu1 }
 0x17e   : > { %1448 = vst [vmem:[%s2145_s5 + $0xc0] sm:$0xff] %v1350_v63  ;;  %v1351_v5 = vmax.f32 %v1035_v0, 0.0  ;;  %1498 = vst [vmem:[%s2145_s5 + $0x250] sm:$0xff] %v1400_v2  ;;  %v1401_v6 = vmax.f32 %v1235_v3, 0.0 }
 0x180   : > { %1449 = vst [vmem:[%s2145_s5 + $0xc8] sm:$0xff] %v1351_v5  ;;  %1499 = vst [vmem:[%s2145_s5 + $0x258] sm:$0xff] %v1401_v6 }
 0x181   : > { %v1039_v7 = vpop.f32.mrb[52].mxu0  ;;  %v1239_v8 = vpop.f32.mrb[52].mxu1 }
 0x182   : > { %v1040_v9 = vadd.f32 %v2136_v51, %v1039_v7  ;;  %v1041_v10 = vpop.f32.mrb[53].mxu0  ;;  %v1240_v11 = vadd.f32 %v2136_v51, %v1239_v8  ;;  %v1241_v12 = vpop.f32.mrb[53].mxu1 }
 0x183   : > { %v1042_v13 = vpop.f32.mrb[54].mxu0  ;;  %v1242_v14 = vpop.f32.mrb[54].mxu1 }
 0x184   : > { %v1352_v15 = vmax.f32 %v1040_v9, 0.0  ;;  %v1043_v16 = vadd.f32 %v2136_v51, %v1042_v13  ;;  %v1044_v17 = vpop.f32.mrb[55].mxu0  ;;  %v1402_v18 = vmax.f32 %v1240_v11, 0.0  ;;  %v1243_v19 = vadd.f32 %v2136_v51, %v1242_v14  ;;  %v1244_v20 = vpop.f32.mrb[55].mxu1 }
 0x186   : > { %1450 = vst [vmem:[%s2145_s5 + $0xd0] sm:$0xff] %v1352_v15  ;;  %v1353_v21 = vmax.f32 %v1043_v16, 0.0  ;;  %1500 = vst [vmem:[%s2145_s5 + $0x260] sm:$0xff] %v1402_v18  ;;  %v1403_v22 = vmax.f32 %v1243_v19, 0.0 }
 0x188   : > { %1451 = vst [vmem:[%s2145_s5 + $0xd8] sm:$0xff] %v1353_v21  ;;  %1501 = vst [vmem:[%s2145_s5 + $0x268] sm:$0xff] %v1403_v22 }
 0x189   : > { %v1047_v23 = vpop.f32.mrb[56].mxu0  ;;  %v1247_v24 = vpop.f32.mrb[56].mxu1 }
 0x18a   : > { %v1048_v25 = vadd.f32 %v2136_v51, %v1047_v23  ;;  %v1049_v26 = vpop.f32.mrb[57].mxu0  ;;  %v1248_v27 = vadd.f32 %v2136_v51, %v1247_v24  ;;  %v1249_v28 = vpop.f32.mrb[57].mxu1 }
 0x18b   : > { %v1050_v29 = vpop.f32.mrb[58].mxu0  ;;  %v1250_v30 = vpop.f32.mrb[58].mxu1 }
 0x18c   : > { %v1354_v31 = vmax.f32 %v1048_v25, 0.0  ;;  %v1051_v32 = vadd.f32 %v2136_v51, %v1050_v29  ;;  %v1052_v33 = vpop.f32.mrb[59].mxu0  ;;  %v1404_v34 = vmax.f32 %v1248_v27, 0.0  ;;  %v1251_v35 = vadd.f32 %v2136_v51, %v1250_v30  ;;  %v1252_v36 = vpop.f32.mrb[59].mxu1 }
 0x18e   : > { %1452 = vst [vmem:[%s2145_s5 + $0xe0] sm:$0xff] %v1354_v31  ;;  %v1355_v37 = vmax.f32 %v1051_v32, 0.0  ;;  %1502 = vst [vmem:[%s2145_s5 + $0x270] sm:$0xff] %v1404_v34  ;;  %v1405_v38 = vmax.f32 %v1251_v35, 0.0 }
 0x190   : > { %1453 = vst [vmem:[%s2145_s5 + $0xe8] sm:$0xff] %v1355_v37  ;;  %1503 = vst [vmem:[%s2145_s5 + $0x278] sm:$0xff] %v1405_v38 }
 0x191   : > { %v1055_v39 = vpop.f32.mrb[60].mxu0  ;;  %v1255_v40 = vpop.f32.mrb[60].mxu1 }
 0x192   : > { %v1056_v41 = vadd.f32 %v2136_v51, %v1055_v39  ;;  %v1057_v42 = vpop.f32.mrb[61].mxu0  ;;  %v1256_v43 = vadd.f32 %v2136_v51, %v1255_v40  ;;  %v1257_v44 = vpop.f32.mrb[61].mxu1 }
 0x193   : > { %v1058_v45 = vpop.f32.mrb[62].mxu0  ;;  %v1258_v46 = vpop.f32.mrb[62].mxu1 }
 0x194   : > { %v1356_v47 = vmax.f32 %v1056_v41, 0.0  ;;  %v1059_v48 = vadd.f32 %v2136_v51, %v1058_v45  ;;  %v1060_v49 = vpop.f32.mrb[63].mxu0  ;;  %v1406_v50 = vmax.f32 %v1256_v43, 0.0  ;;  %v1259_v52 = vadd.f32 %v2136_v51, %v1258_v46  ;;  %v1260_v53 = vpop.f32.mrb[63].mxu1 }
 0x196   : > { %1454 = vst [vmem:[%s2145_s5 + $0xf0] sm:$0xff] %v1356_v47  ;;  %v1357_v54 = vmax.f32 %v1059_v48, 0.0  ;;  %1504 = vst [vmem:[%s2145_s5 + $0x280] sm:$0xff] %v1406_v50  ;;  %v1407_v55 = vmax.f32 %v1259_v52, 0.0 }
 0x198   : > { %1455 = vst [vmem:[%s2145_s5 + $0xf8] sm:$0xff] %v1357_v54  ;;  %1505 = vst [vmem:[%s2145_s5 + $0x288] sm:$0xff] %v1407_v55 }
 0x199   : > { %v1063_v56 = vpop.f32.mrb[64].mxu0  ;;  %v1263_v57 = vpop.f32.mrb[64].mxu1 }
 0x19a   : > { %v1064_v58 = vadd.f32 %v2136_v51, %v1063_v56  ;;  %v1065_v59 = vpop.f32.mrb[65].mxu0  ;;  %v1264_v60 = vadd.f32 %v2136_v51, %v1263_v57  ;;  %v1265_v61 = vpop.f32.mrb[65].mxu1 }
 0x19b   : > { %v1066_v62 = vpop.f32.mrb[66].mxu0  ;;  %v1266_v63 = vpop.f32.mrb[66].mxu1 }
 0x19c   : > { %v1358_v0 = vmax.f32 %v1064_v58, 0.0  ;;  %v1067_v1 = vadd.f32 %v2136_v51, %v1066_v62  ;;  %v1068_v2 = vpop.f32.mrb[67].mxu0  ;;  %v1408_v3 = vmax.f32 %v1264_v60, 0.0  ;;  %v1267_v4 = vadd.f32 %v2136_v51, %v1266_v63  ;;  %v1268_v5 = vpop.f32.mrb[67].mxu1 }
 0x19e   : > { %1456 = vst [vmem:[%s2145_s5 + $0x100] sm:$0xff] %v1358_v0  ;;  %v1359_v6 = vmax.f32 %v1067_v1, 0.0  ;;  %1506 = vst [vmem:[%s2145_s5 + $0x290] sm:$0xff] %v1408_v3  ;;  %v1409_v7 = vmax.f32 %v1267_v4, 0.0 }
 0x1a0   : > { %1457 = vst [vmem:[%s2145_s5 + $0x108] sm:$0xff] %v1359_v6  ;;  %1507 = vst [vmem:[%s2145_s5 + $0x298] sm:$0xff] %v1409_v7 }
 0x1a1   : > { %v1071_v8 = vpop.f32.mrb[68].mxu0  ;;  %v1271_v9 = vpop.f32.mrb[68].mxu1 }
 0x1a2   : > { %v1072_v10 = vadd.f32 %v2136_v51, %v1071_v8  ;;  %v1073_v11 = vpop.f32.mrb[69].mxu0  ;;  %v1272_v12 = vadd.f32 %v2136_v51, %v1271_v9  ;;  %v1273_v13 = vpop.f32.mrb[69].mxu1 }
 0x1a3   : > { %v1074_v14 = vpop.f32.mrb[70].mxu0  ;;  %v1274_v15 = vpop.f32.mrb[70].mxu1 }
 0x1a4   : > { %v1360_v16 = vmax.f32 %v1072_v10, 0.0  ;;  %v1075_v17 = vadd.f32 %v2136_v51, %v1074_v14  ;;  %v1076_v18 = vpop.f32.mrb[71].mxu0  ;;  %v1410_v19 = vmax.f32 %v1272_v12, 0.0  ;;  %v1275_v20 = vadd.f32 %v2136_v51, %v1274_v15  ;;  %v1276_v21 = vpop.f32.mrb[71].mxu1 }
 0x1a6   : > { %1458 = vst [vmem:[%s2145_s5 + $0x110] sm:$0xff] %v1360_v16  ;;  %v1361_v22 = vmax.f32 %v1075_v17, 0.0  ;;  %1508 = vst [vmem:[%s2145_s5 + $0x2a0] sm:$0xff] %v1410_v19  ;;  %v1411_v23 = vmax.f32 %v1275_v20, 0.0 }
 0x1a8   : > { %1459 = vst [vmem:[%s2145_s5 + $0x118] sm:$0xff] %v1361_v22  ;;  %1509 = vst [vmem:[%s2145_s5 + $0x2a8] sm:$0xff] %v1411_v23 }
 0x1a9   : > { %v1079_v24 = vpop.f32.mrb[72].mxu0  ;;  %v1279_v25 = vpop.f32.mrb[72].mxu1 }
 0x1aa   : > { %v1080_v26 = vadd.f32 %v2136_v51, %v1079_v24  ;;  %v1081_v27 = vpop.f32.mrb[73].mxu0  ;;  %v1280_v28 = vadd.f32 %v2136_v51, %v1279_v25  ;;  %v1281_v29 = vpop.f32.mrb[73].mxu1 }
 0x1ab   : > { %v1082_v30 = vpop.f32.mrb[74].mxu0  ;;  %v1282_v31 = vpop.f32.mrb[74].mxu1 }
 0x1ac   : > { %v1362_v32 = vmax.f32 %v1080_v26, 0.0  ;;  %v1083_v33 = vadd.f32 %v2136_v51, %v1082_v30  ;;  %v1084_v34 = vpop.f32.mrb[75].mxu0  ;;  %v1412_v35 = vmax.f32 %v1280_v28, 0.0  ;;  %v1283_v36 = vadd.f32 %v2136_v51, %v1282_v31  ;;  %v1284_v37 = vpop.f32.mrb[75].mxu1 }
 0x1ae   : > { %1460 = vst [vmem:[%s2145_s5 + $0x120] sm:$0xff] %v1362_v32  ;;  %v1363_v38 = vmax.f32 %v1083_v33, 0.0  ;;  %1510 = vst [vmem:[%s2145_s5 + $0x2b0] sm:$0xff] %v1412_v35  ;;  %v1413_v39 = vmax.f32 %v1283_v36, 0.0 }
 0x1b0   : > { %1461 = vst [vmem:[%s2145_s5 + $0x128] sm:$0xff] %v1363_v38  ;;  %1511 = vst [vmem:[%s2145_s5 + $0x2b8] sm:$0xff] %v1413_v39 }
 0x1b1   : > { %v1087_v40 = vpop.f32.mrb[76].mxu0  ;;  %v1287_v41 = vpop.f32.mrb[76].mxu1 }
 0x1b2   : > { %v1088_v42 = vadd.f32 %v2136_v51, %v1087_v40  ;;  %v1089_v43 = vpop.f32.mrb[77].mxu0  ;;  %v1288_v44 = vadd.f32 %v2136_v51, %v1287_v41  ;;  %v1289_v45 = vpop.f32.mrb[77].mxu1 }
 0x1b3   : > { %v1090_v46 = vpop.f32.mrb[78].mxu0  ;;  %v1290_v47 = vpop.f32.mrb[78].mxu1 }
 0x1b4   : > { %v1364_v48 = vmax.f32 %v1088_v42, 0.0  ;;  %v1091_v49 = vadd.f32 %v2136_v51, %v1090_v46  ;;  %v1092_v50 = vpop.f32.mrb[79].mxu0  ;;  %v1414_v52 = vmax.f32 %v1288_v44, 0.0  ;;  %v1291_v53 = vadd.f32 %v2136_v51, %v1290_v47  ;;  %v1292_v54 = vpop.f32.mrb[79].mxu1 }
 0x1b6   : > { %1462 = vst [vmem:[%s2145_s5 + $0x130] sm:$0xff] %v1364_v48  ;;  %v1365_v55 = vmax.f32 %v1091_v49, 0.0  ;;  %1512 = vst [vmem:[%s2145_s5 + $0x2c0] sm:$0xff] %v1414_v52  ;;  %v1415_v56 = vmax.f32 %v1291_v53, 0.0 }
 0x1b8   : > { %1463 = vst [vmem:[%s2145_s5 + $0x138] sm:$0xff] %v1365_v55  ;;  %1513 = vst [vmem:[%s2145_s5 + $0x2c8] sm:$0xff] %v1415_v56 }
 0x1b9   : > { %v1095_v57 = vpop.f32.mrb[80].mxu0  ;;  %v1295_v58 = vpop.f32.mrb[80].mxu1 }
 0x1ba   : > { %v1096_v59 = vadd.f32 %v2136_v51, %v1095_v57  ;;  %v1097_v60 = vpop.f32.mrb[81].mxu0  ;;  %v1296_v61 = vadd.f32 %v2136_v51, %v1295_v58  ;;  %v1297_v62 = vpop.f32.mrb[81].mxu1 }
 0x1bb   : > { %v1098_v63 = vpop.f32.mrb[82].mxu0  ;;  %v1298_v0 = vpop.f32.mrb[82].mxu1 }
 0x1bc   : > { %v1366_v1 = vmax.f32 %v1096_v59, 0.0  ;;  %v1099_v2 = vadd.f32 %v2136_v51, %v1098_v63  ;;  %v1100_v3 = vpop.f32.mrb[83].mxu0  ;;  %v1416_v4 = vmax.f32 %v1296_v61, 0.0  ;;  %v1299_v5 = vadd.f32 %v2136_v51, %v1298_v0  ;;  %v1300_v6 = vpop.f32.mrb[83].mxu1 }
 0x1be   : > { %1464 = vst [vmem:[%s2145_s5 + $0x140] sm:$0xff] %v1366_v1  ;;  %v1367_v7 = vmax.f32 %v1099_v2, 0.0  ;;  %1514 = vst [vmem:[%s2145_s5 + $0x2d0] sm:$0xff] %v1416_v4  ;;  %v1417_v8 = vmax.f32 %v1299_v5, 0.0 }
 0x1c0   : > { %1465 = vst [vmem:[%s2145_s5 + $0x148] sm:$0xff] %v1367_v7  ;;  %1515 = vst [vmem:[%s2145_s5 + $0x2d8] sm:$0xff] %v1417_v8 }
 0x1c1   : > { %v1103_v9 = vpop.f32.mrb[84].mxu0  ;;  %v1303_v10 = vpop.f32.mrb[84].mxu1 }
 0x1c2   : > { %v1104_v11 = vadd.f32 %v2136_v51, %v1103_v9  ;;  %v1105_v12 = vpop.f32.mrb[85].mxu0  ;;  %v1304_v13 = vadd.f32 %v2136_v51, %v1303_v10  ;;  %v1305_v14 = vpop.f32.mrb[85].mxu1 }
 0x1c3   : > { %v1106_v15 = vpop.f32.mrb[86].mxu0  ;;  %v1306_v16 = vpop.f32.mrb[86].mxu1 }
 0x1c4   : > { %v1368_v17 = vmax.f32 %v1104_v11, 0.0  ;;  %v1107_v18 = vadd.f32 %v2136_v51, %v1106_v15  ;;  %v1108_v19 = vpop.f32.mrb[87].mxu0  ;;  %v1418_v20 = vmax.f32 %v1304_v13, 0.0  ;;  %v1307_v21 = vadd.f32 %v2136_v51, %v1306_v16  ;;  %v1308_v22 = vpop.f32.mrb[87].mxu1 }
 0x1c6   : > { %1466 = vst [vmem:[%s2145_s5 + $0x150] sm:$0xff] %v1368_v17  ;;  %v1369_v23 = vmax.f32 %v1107_v18, 0.0  ;;  %1516 = vst [vmem:[%s2145_s5 + $0x2e0] sm:$0xff] %v1418_v20  ;;  %v1419_v24 = vmax.f32 %v1307_v21, 0.0 }
 0x1c8   : > { %1467 = vst [vmem:[%s2145_s5 + $0x158] sm:$0xff] %v1369_v23  ;;  %1517 = vst [vmem:[%s2145_s5 + $0x2e8] sm:$0xff] %v1419_v24 }
 0x1c9   : > { %v1111_v25 = vpop.f32.mrb[88].mxu0  ;;  %v1311_v26 = vpop.f32.mrb[88].mxu1 }
 0x1ca   : > { %v1112_v27 = vadd.f32 %v2136_v51, %v1111_v25  ;;  %v1113_v28 = vpop.f32.mrb[89].mxu0  ;;  %v1312_v29 = vadd.f32 %v2136_v51, %v1311_v26  ;;  %v1313_v30 = vpop.f32.mrb[89].mxu1 }
 0x1cb   : > { %v1114_v31 = vpop.f32.mrb[90].mxu0  ;;  %v1314_v32 = vpop.f32.mrb[90].mxu1 }
 0x1cc   : > { %v1370_v33 = vmax.f32 %v1112_v27, 0.0  ;;  %v1115_v34 = vadd.f32 %v2136_v51, %v1114_v31  ;;  %v1116_v35 = vpop.f32.mrb[91].mxu0  ;;  %v1420_v36 = vmax.f32 %v1312_v29, 0.0  ;;  %v1315_v37 = vadd.f32 %v2136_v51, %v1314_v32  ;;  %v1316_v38 = vpop.f32.mrb[91].mxu1 }
 0x1ce   : > { %1468 = vst [vmem:[%s2145_s5 + $0x160] sm:$0xff] %v1370_v33  ;;  %v1371_v39 = vmax.f32 %v1115_v34, 0.0  ;;  %1518 = vst [vmem:[%s2145_s5 + $0x2f0] sm:$0xff] %v1420_v36  ;;  %v1421_v40 = vmax.f32 %v1315_v37, 0.0 }
 0x1d0   : > { %1469 = vst [vmem:[%s2145_s5 + $0x168] sm:$0xff] %v1371_v39  ;;  %1519 = vst [vmem:[%s2145_s5 + $0x2f8] sm:$0xff] %v1421_v40 }
 0x1d1   : > { %v1119_v41 = vpop.f32.mrb[92].mxu0  ;;  %v1319_v42 = vpop.f32.mrb[92].mxu1 }
 0x1d2   : > { %v1120_v43 = vadd.f32 %v2136_v51, %v1119_v41  ;;  %v1121_v44 = vpop.f32.mrb[93].mxu0  ;;  %v1320_v45 = vadd.f32 %v2136_v51, %v1319_v42  ;;  %v1321_v46 = vpop.f32.mrb[93].mxu1 }
 0x1d3   : > { %v1122_v47 = vpop.f32.mrb[94].mxu0  ;;  %v1322_v48 = vpop.f32.mrb[94].mxu1 }
 0x1d4   : > { %v1372_v49 = vmax.f32 %v1120_v43, 0.0  ;;  %v1123_v50 = vadd.f32 %v2136_v51, %v1122_v47  ;;  %v1124_v52 = vpop.f32.mrb[95].mxu0  ;;  %v1422_v53 = vmax.f32 %v1320_v45, 0.0  ;;  %v1323_v54 = vadd.f32 %v2136_v51, %v1322_v48  ;;  %v1324_v55 = vpop.f32.mrb[95].mxu1 }
 0x1d6   : > { %1470 = vst [vmem:[%s2145_s5 + $0x170] sm:$0xff] %v1372_v49  ;;  %v1373_v56 = vmax.f32 %v1123_v50, 0.0  ;;  %1520 = vst [vmem:[%s2145_s5 + $0x300] sm:$0xff] %v1422_v53  ;;  %v1423_v57 = vmax.f32 %v1323_v54, 0.0 }
 0x1d8   : > { %1471 = vst [vmem:[%s2145_s5 + $0x178] sm:$0xff] %v1373_v56  ;;  %1521 = vst [vmem:[%s2145_s5 + $0x308] sm:$0xff] %v1423_v57 }
 0x1d9   : > { %v1127_v58 = vpop.f32.mrb[96].mxu0 }
 0x1da   : > { %v1128_v59 = vadd.f32 %v2136_v51, %v1127_v58  ;;  %v1129_v60 = vpop.f32.mrb[97].mxu0 }
 0x1db   : > { %v1130_v61 = vpop.f32.mrb[98].mxu0 }
 0x1dc   : > { %v1374_v62 = vmax.f32 %v1128_v59, 0.0  ;;  %v1131_v63 = vadd.f32 %v2136_v51, %v1130_v61  ;;  %v1132_v0 = vpop.f32.mrb[99].mxu0 }
 0x1de   : > { %1472 = vst [vmem:[%s2145_s5 + $0x180] sm:$0xff] %v1374_v62  ;;  %v1375_v1 = vmax.f32 %v1131_v63, 0.0 }
 0x1e0   : > { %1473 = vst [vmem:[%s2145_s5 + $0x188] sm:$0xff] %v1375_v1 }
 0x1e1 PF: > { %s13_s12 = sadd.s32 1, %s1914_s12  }
 0x1e2   : > { %p10_p4 = scmp.ge.s32.totalorder %s13_s12, 4  }
 0x1e4   :  { %12 = sbr.rel (!%p10_p4) target bundleno = 1 (0x1), region = 62 }

// kernel: densenet_forward.7
= control target key start
LH: loop header
LB: loop body
LE: loop exit
PB: predicated region body
PF: predicated region fallthrough
CT: control target
= control target key end

     0   :  { %s1172_s6 = smov 0   ;;  %s1505_s0 = inlined_call_operand.vmem [shape: f32[2,904,128], index: 0, kind: input, shape index: {}]   ;;  %s1506_s1 = inlined_call_operand.vmem [shape: f32[2,256,128], index: 1, kind: output, shape index: {}]  }
   0x1 LB: > { %s881_s7 = sadd.s32 4294967295, %s1159_s6   ;;  %p885_p0 = scmp.ge.s32.totalorder %s1159_s6, 1  ;;  %s1159_s6 = sphi %s1172_s6, %s11_s6  }
   0x2   : > { %p87_p1 = scmp.lt.s32.totalorder %s1159_s6, 3 }
   0x4   : > { %p88_p2 = pnand %p885_p0, %p87_p1 }
   0x5   : > { %p107_p3 = scmp.lt.s32.totalorder (!%p88_p2), %s881_s7, 1  ;;  %v1161_v0 = vmov (!%p88_p2), 0.0  }
   0x6   : > { %91 = sbr.rel (%p88_p2) target bundleno = 161 (0xa1), region = 24 }
   0xd   : > { %s1508_s7 = smov (!%p107_p3, %s881_s7), 1 }
   0xe   : > { %s1143_s8 = smul.u32 904, %s1508_s7  ;;  %s1142_s9 = sshll.u32 %s1508_s7, 8 }
   0xf   : > { %s1183_s12 = scalar_lea.vmem %s1506_s1, %s1142_s9 }
  0x10   : > { %s1188_s15 = scalar_lea.vmem %s1505_s0, %s1143_s8  ;;  %119 = vst [vmem:[%s1183_s12 + $0x10] sm:$0xff] %v1161_v0  ;;  %117 = vst [vmem:[%s1183_s12] sm:$0xff] %v1161_v0 }
  0x11   : > { %118 = vst [vmem:[%s1183_s12 + $0x8] sm:$0xff] %v1161_v0  ;;  %120 = vst [vmem:[%s1183_s12 + $0x18] sm:$0xff] %v1161_v0  ;;  %v149_v1 = vld [vmem:[%s1188_s15] ss:$2 sm:$0xff]  ;;  %v890_v2 = vld [vmem:[%s1188_s15 + $0x1] ss:$2 sm:$0xff] }
  0x12   : > { %121 = vst [vmem:[%s1183_s12 + $0x20] sm:$0xff] %v1161_v0  ;;  %122 = vst [vmem:[%s1183_s12 + $0x28] sm:$0xff] %v1161_v0  ;;  %v892_v3 = vld [vmem:[%s1188_s15 + $0x2] ss:$2 sm:$0xff]  ;;  %v156_v4 = vmax.f32 %v149_v1, %v890_v2  ;;  %v896_v9 = vld [vmem:[%s1188_s15 + $0x1f] ss:$2 sm:$0xff] }
  0x13   : > { %123 = vst [vmem:[%s1183_s12 + $0x30] sm:$0xff] %v1161_v0  ;;  %124 = vst [vmem:[%s1183_s12 + $0x38] sm:$0xff] %v1161_v0  ;;  %v894_v5 = vld [vmem:[%s1188_s15 + $0x1e] ss:$2 sm:$0xff]  ;;  %v908_v21 = vld [vmem:[%s1188_s15 + $0x3d] ss:$2 sm:$0xff] }
  0x14   : > { %125 = vst [vmem:[%s1183_s12 + $0x40] sm:$0xff] %v1161_v0  ;;  %126 = vst [vmem:[%s1183_s12 + $0x48] sm:$0xff] %v1161_v0  ;;  %v162_v6 = vmax.f32 %v156_v4, %v892_v3  ;;  %v889_v7 = vld [vmem:[%s1188_s15 + $0x10] ss:$2 sm:$0x3f] }
  0x15   : > { %127 = vst [vmem:[%s1183_s12 + $0x50] sm:$0xff] %v1161_v0  ;;  %128 = vst [vmem:[%s1183_s12 + $0x58] sm:$0xff] %v1161_v0  ;;  %v891_v8 = vld [vmem:[%s1188_s15 + $0x11] ss:$2 sm:$0x3f] }
  0x16   : > { %129 = vst [vmem:[%s1183_s12 + $0x60] sm:$0xff] %v1161_v0  ;;  %130 = vst [vmem:[%s1183_s12 + $0x68] sm:$0xff] %v1161_v0  ;;  %v157_v10 = vmax.f32 %v889_v7, %v891_v8  ;;  %v893_v11 = vld [vmem:[%s1188_s15 + $0x12] ss:$2 sm:$0x3f]  ;;  %v168_v12 = vmax.f32 %v162_v6, %v894_v5 }
  0x17   : > { %131 = vst [vmem:[%s1183_s12 + $0x70] sm:$0xff] %v1161_v0  ;;  %132 = vst [vmem:[%s1183_s12 + $0x78] sm:$0xff] %v1161_v0  ;;  %v895_v13 = vld [vmem:[%s1188_s15 + $0x2e] ss:$2 sm:$0x3f] }
  0x18   : > { %133 = vst [vmem:[%s1183_s12 + $0x80] sm:$0xff] %v1161_v0  ;;  %134 = vst [vmem:[%s1183_s12 + $0x88] sm:$0xff] %v1161_v0  ;;  %v898_v14 = vld [vmem:[%s1188_s15 + $0x20] ss:$2 sm:$0xff]  ;;  %v163_v15 = vmax.f32 %v157_v10, %v893_v11  ;;  %v174_v16 = vmax.f32 %v168_v12, %v896_v9  ;;  %v902_v24 = vld [vmem:[%s1188_s15 + $0x3d] ss:$2 sm:$0xff] }
  0x19   : > { %135 = vst [vmem:[%s1183_s12 + $0x90] sm:$0xff] %v1161_v0  ;;  %136 = vst [vmem:[%s1183_s12 + $0x98] sm:$0xff] %v1161_v0  ;;  %v897_v17 = vld [vmem:[%s1188_s15 + $0x2f] ss:$2 sm:$0x3f] }
  0x1a   : > { %137 = vst [vmem:[%s1183_s12 + $0xa0] sm:$0xff] %v1161_v0  ;;  %138 = vst [vmem:[%s1183_s12 + $0xa8] sm:$0xff] %v1161_v0  ;;  %v906_v18 = vld [vmem:[%s1188_s15 + $0x3c] ss:$2 sm:$0xff]  ;;  %v169_v20 = vmax.f32 %v163_v15, %v895_v13  ;;  %v180_v23 = vmax.f32 %v174_v16, %v898_v14  ;;  %v914_v37 = vld [vmem:[%s1188_s15 + $0x5b] ss:$2 sm:$0xff] }
  0x1b   : > { %139 = vst [vmem:[%s1183_s12 + $0xb0] sm:$0xff] %v1161_v0  ;;  %140 = vst [vmem:[%s1183_s12 + $0xb8] sm:$0xff] %v1161_v0  ;;  %v900_v19 = vld [vmem:[%s1188_s15 + $0x3c] ss:$2 sm:$0xff]  ;;  %v206_v26 = vmax.f32 %v906_v18, %v908_v21  ;;  %v926_v52 = vld [vmem:[%s1188_s15 + $0x79] ss:$2 sm:$0xff] }
  0x1c   : > { %141 = vst [vmem:[%s1183_s12 + $0xc0] sm:$0xff] %v1161_v0  ;;  %142 = vst [vmem:[%s1183_s12 + $0xc8] sm:$0xff] %v1161_v0  ;;  %v910_v22 = vld [vmem:[%s1188_s15 + $0x3e] ss:$2 sm:$0xff]  ;;  %v175_v28 = vmax.f32 %v169_v20, %v897_v17  ;;  %v186_v31 = vmax.f32 %v180_v23, %v900_v19  ;;  %v920_v54 = vld [vmem:[%s1188_s15 + $0x79] ss:$2 sm:$0xff] }
  0x1d   : > { %143 = vst [vmem:[%s1183_s12 + $0xd0] sm:$0xff] %v1161_v0  ;;  %144 = vst [vmem:[%s1183_s12 + $0xd8] sm:$0xff] %v1161_v0  ;;  %v899_v25 = vld [vmem:[%s1188_s15 + $0x30] ss:$2 sm:$0x3f]  ;;  %v210_v33 = vmax.f32 %v206_v26, %v910_v22 }
  0x1e   : > { %145 = vst [vmem:[%s1183_s12 + $0xe0] sm:$0xff] %v1161_v0  ;;  %146 = vst [vmem:[%s1183_s12 + $0xe8] sm:$0xff] %v1161_v0  ;;  %v904_v27 = vld [vmem:[%s1188_s15 + $0x3e] ss:$2 sm:$0xff]  ;;  %v181_v36 = vmax.f32 %v175_v28, %v899_v25  ;;  %v192_v40 = vmax.f32 %v186_v31, %v902_v24  ;;  %v932_v1 = vld [vmem:[%s1188_s15 + $0x97] ss:$2 sm:$0xff] }
  0x1f   : > { %147 = vst [vmem:[%s1183_s12 + $0xf0] sm:$0xff] %v1161_v0  ;;  %148 = vst [vmem:[%s1183_s12 + $0xf8] sm:$0xff] %v1161_v0  ;;  %v901_v29 = vld [vmem:[%s1188_s15 + $0x4c] ss:$2 sm:$0x3f] }
  0x20   : > { %v912_v30 = vld [vmem:[%s1188_s15 + $0x5a] ss:$2 sm:$0xff]  ;;  %v903_v32 = vld [vmem:[%s1188_s15 + $0x4d] ss:$2 sm:$0x3f]  ;;  %v187_v45 = vmax.f32 %v181_v36, %v901_v29  ;;  %v198_v49 = vmax.f32 %v192_v40, %v904_v27 }
  0x21   : > { %v907_v34 = vld [vmem:[%s1188_s15 + $0x4c] ss:$2 sm:$0x3f]  ;;  %v909_v35 = vld [vmem:[%s1188_s15 + $0x4d] ss:$2 sm:$0x3f]  ;;  %v216_v42 = vmax.f32 %v210_v33, %v912_v30 }
  0x22   : > { %v207_v38 = vmax.f32 %v907_v34, %v909_v35  ;;  %v911_v39 = vld [vmem:[%s1188_s15 + $0x4e] ss:$2 sm:$0x3f]  ;;  %v916_v46 = vld [vmem:[%s1188_s15 + $0x5c] ss:$2 sm:$0xff]  ;;  %v193_v53 = vmax.f32 %v187_v45, %v903_v32  ;;  %200 = vst [vmem:[%s1183_s12 + $0x11] sm:$0xff] %v198_v49 }
  0x23   : > { %v905_v41 = vld [vmem:[%s1188_s15 + $0x4e] ss:$2 sm:$0x3f]  ;;  %v222_v50 = vmax.f32 %v216_v42, %v914_v37  ;;  %v915_v51 = vld [vmem:[%s1188_s15 + $0x6b] ss:$2 sm:$0x3f] }
  0x24   : > { %v913_v43 = vld [vmem:[%s1188_s15 + $0x6a] ss:$2 sm:$0x3f]  ;;  %v924_v44 = vld [vmem:[%s1188_s15 + $0x78] ss:$2 sm:$0xff]  ;;  %v211_v48 = vmax.f32 %v207_v38, %v911_v39  ;;  %v199_v62 = vmax.f32 %v193_v53, %v905_v41 }
  0x25   : > { %v918_v47 = vld [vmem:[%s1188_s15 + $0x78] ss:$2 sm:$0xff]  ;;  %v917_v56 = vld [vmem:[%s1188_s15 + $0x6c] ss:$2 sm:$0x3f]  ;;  %v254_v57 = vmax.f32 %v924_v44, %v926_v52  ;;  %v228_v59 = vmax.f32 %v222_v50, %v916_v46 }
  0x26   : > { %v217_v55 = vmax.f32 %v211_v48, %v913_v43  ;;  %v928_v58 = vld [vmem:[%s1188_s15 + $0x7a] ss:$2 sm:$0xff]  ;;  %v927_v4 = vld [vmem:[%s1188_s15 + $0x89] ss:$2 sm:$0x3f] }
  0x27   : > { %v919_v60 = vld [vmem:[%s1188_s15 + $0x88] ss:$2 sm:$0x3f]  ;;  %v930_v61 = vld [vmem:[%s1188_s15 + $0x96] ss:$2 sm:$0xff]  ;;  %v258_v0 = vmax.f32 %v254_v57, %v928_v58  ;;  %v234_v3 = vmax.f32 %v228_v59, %v918_v47 }
  0x28   : > { %v223_v63 = vmax.f32 %v217_v55, %v915_v51  ;;  %v925_v2 = vld [vmem:[%s1188_s15 + $0x88] ss:$2 sm:$0x3f]  ;;  %201 = vst [vmem:[%s1183_s12 + $0x19] sm:$0x3f] %v199_v62 }
  0x29   : > { %v929_v5 = vld [vmem:[%s1188_s15 + $0x8a] ss:$2 sm:$0x3f]  ;;  %v922_v6 = vld [vmem:[%s1188_s15 + $0x7a] ss:$2 sm:$0xff]  ;;  %v264_v9 = vmax.f32 %v258_v0, %v930_v61  ;;  %v255_v10 = vmax.f32 %v925_v2, %v927_v4  ;;  %v240_v11 = vmax.f32 %v234_v3, %v920_v54 }
  0x2a   : > { %v229_v7 = vmax.f32 %v223_v63, %v917_v56  ;;  %v921_v8 = vld [vmem:[%s1188_s15 + $0x89] ss:$2 sm:$0x3f]  ;;  %v923_v12 = vld [vmem:[%s1188_s15 + $0x8a] ss:$2 sm:$0x3f] }
  0x2b   : > { %v934_v13 = vld [vmem:[%s1188_s15 + $0x98] ss:$2 sm:$0xff]  ;;  %v270_v16 = vmax.f32 %v264_v9, %v932_v1  ;;  %v259_v18 = vmax.f32 %v255_v10, %v929_v5  ;;  %v933_v19 = vld [vmem:[%s1188_s15 + $0xa7] ss:$2 sm:$0x3f]  ;;  %v246_v20 = vmax.f32 %v240_v11, %v922_v6 }
  0x2c   : > { %v931_v14 = vld [vmem:[%s1188_s15 + $0xa6] ss:$2 sm:$0x3f]  ;;  %v235_v15 = vmax.f32 %v229_v7, %v919_v60  ;;  %v936_v17 = vld [vmem:[%s1188_s15 + $0xb4] ss:$2 sm:$0xff] }
  0x2d   : > { %v942_v21 = vld [vmem:[%s1188_s15 + $0xb4] ss:$2 sm:$0xff]  ;;  %v944_v22 = vld [vmem:[%s1188_s15 + $0xb5] ss:$2 sm:$0xff]  ;;  %v276_v25 = vmax.f32 %v270_v16, %v934_v13  ;;  %v265_v27 = vmax.f32 %v259_v18, %v931_v14  ;;  %248 = vst [vmem:[%s1183_s12 + $0x21] sm:$0xff] %v246_v20 }
  0x2e   : > { %v946_v23 = vld [vmem:[%s1188_s15 + $0xb6] ss:$2 sm:$0xff]  ;;  %v241_v24 = vmax.f32 %v235_v15, %v921_v8  ;;  %v938_v26 = vld [vmem:[%s1188_s15 + $0xb5] ss:$2 sm:$0xff]  ;;  %v302_v29 = vmax.f32 %v942_v21, %v944_v22 }
  0x2f   : > { %v935_v28 = vld [vmem:[%s1188_s15 + $0xa8] ss:$2 sm:$0x3f]  ;;  %v940_v30 = vld [vmem:[%s1188_s15 + $0xb6] ss:$2 sm:$0xff]  ;;  %v282_v34 = vmax.f32 %v276_v25, %v936_v17  ;;  %v271_v35 = vmax.f32 %v265_v27, %v933_v19 }
  0x30   : > { %v937_v31 = vld [vmem:[%s1188_s15 + $0xc4] ss:$2 sm:$0x3f]  ;;  %v948_v32 = vld [vmem:[%s1188_s15 + $0xd2] ss:$2 sm:$0xff]  ;;  %v247_v33 = vmax.f32 %v241_v24, %v923_v12  ;;  %v306_v36 = vmax.f32 %v302_v29, %v946_v23 }
  0x31   : > { %v943_v37 = vld [vmem:[%s1188_s15 + $0xc4] ss:$2 sm:$0x3f]  ;;  %v945_v38 = vld [vmem:[%s1188_s15 + $0xc5] ss:$2 sm:$0x3f]  ;;  %v288_v42 = vmax.f32 %v282_v34, %v938_v26  ;;  %v277_v43 = vmax.f32 %v271_v35, %v935_v28 }
  0x32   : > { %v950_v39 = vld [vmem:[%s1188_s15 + $0xd3] ss:$2 sm:$0xff]  ;;  %v303_v40 = vmax.f32 %v943_v37, %v945_v38  ;;  %v947_v41 = vld [vmem:[%s1188_s15 + $0xc6] ss:$2 sm:$0x3f]  ;;  %v312_v45 = vmax.f32 %v306_v36, %v948_v32 }
  0x33   : > { %249 = vst [vmem:[%s1183_s12 + $0x29] sm:$0x3f] %v247_v33  ;;  %v939_v44 = vld [vmem:[%s1188_s15 + $0xc5] ss:$2 sm:$0x3f]  ;;  %v294_v50 = vmax.f32 %v288_v42, %v940_v30  ;;  %v283_v51 = vmax.f32 %v277_v43, %v937_v31 }
  0x34   : > { %v949_v46 = vld [vmem:[%s1188_s15 + $0xe2] ss:$2 sm:$0x3f]  ;;  %v307_v49 = vmax.f32 %v303_v40, %v947_v41  ;;  %v318_v52 = vmax.f32 %v312_v45, %v950_v39  ;;  %v951_v53 = vld [vmem:[%s1188_s15 + $0xe3] ss:$2 sm:$0x3f] }
  0x35   : > { %v941_v47 = vld [vmem:[%s1188_s15 + $0xc6] ss:$2 sm:$0x3f]  ;;  %v952_v48 = vld [vmem:[%s1188_s15 + $0xd4] ss:$2 sm:$0xff]  ;;  %296 = vst [vmem:[%s1183_s12 + $0x31] sm:$0xff] %v294_v50  ;;  %v289_v59 = vmax.f32 %v283_v51, %v939_v44 }
  0x36   : > { %v960_v54 = vld [vmem:[%s1188_s15 + $0xf0] ss:$2 sm:$0xff]  ;;  %v313_v56 = vmax.f32 %v307_v49, %v949_v46  ;;  %v962_v57 = vld [vmem:[%s1188_s15 + $0xf1] ss:$2 sm:$0xff]  ;;  %v324_v60 = vmax.f32 %v318_v52, %v952_v48 }
  0x37   : > { %v954_v55 = vld [vmem:[%s1188_s15 + $0xf0] ss:$2 sm:$0xff]  ;;  %v956_v61 = vld [vmem:[%s1188_s15 + $0xf1] ss:$2 sm:$0xff]  ;;  %v350_v63 = vmax.f32 %v960_v54, %v962_v57  ;;  %v295_v4 = vmax.f32 %v289_v59, %v941_v47 }
  0x38   : > { %v964_v58 = vld [vmem:[%s1188_s15 + $0xf2] ss:$2 sm:$0xff]  ;;  %v953_v62 = vld [vmem:[%s1188_s15 + $0xe4] ss:$2 sm:$0x3f]  ;;  %v319_v1 = vmax.f32 %v313_v56, %v951_v53  ;;  %v330_v5 = vmax.f32 %v324_v60, %v954_v55 }
  0x39   : > { %v958_v0 = vld [vmem:[%s1188_s15 + $0xf2] ss:$2 sm:$0xff]  ;;  %v957_v6 = vld [vmem:[%s1188_s15 + $0x101] ss:$2 sm:$0x3f]  ;;  %v354_v7 = vmax.f32 %v350_v63, %v964_v58 }
  0x3a   : > { %v955_v2 = vld [vmem:[%s1188_s15 + $0x100] ss:$2 sm:$0x3f]  ;;  %v966_v3 = vld [vmem:[%s1188_s15 + $0x10e] ss:$2 sm:$0xff]  ;;  %v325_v10 = vmax.f32 %v319_v1, %v953_v62  ;;  %v336_v14 = vmax.f32 %v330_v5, %v956_v61 }
  0x3b   : > { %v961_v8 = vld [vmem:[%s1188_s15 + $0x100] ss:$2 sm:$0x3f]  ;;  %v963_v9 = vld [vmem:[%s1188_s15 + $0x101] ss:$2 sm:$0x3f]  ;;  %v360_v16 = vmax.f32 %v354_v7, %v966_v3 }
  0x3c   : > { %v968_v11 = vld [vmem:[%s1188_s15 + $0x10f] ss:$2 sm:$0xff]  ;;  %v351_v12 = vmax.f32 %v961_v8, %v963_v9  ;;  %v965_v13 = vld [vmem:[%s1188_s15 + $0x102] ss:$2 sm:$0x3f]  ;;  %v331_v19 = vmax.f32 %v325_v10, %v955_v2  ;;  %v342_v23 = vmax.f32 %v336_v14, %v958_v0 }
  0x3d   : > { %297 = vst [vmem:[%s1183_s12 + $0x39] sm:$0x3f] %v295_v4  ;;  %v959_v15 = vld [vmem:[%s1188_s15 + $0x102] ss:$2 sm:$0x3f]  ;;  %v366_v24 = vmax.f32 %v360_v16, %v968_v11 }
  0x3e   : > { %v967_v17 = vld [vmem:[%s1188_s15 + $0x11e] ss:$2 sm:$0x3f]  ;;  %v978_v18 = vld [vmem:[%s1188_s15 + $0x12c] ss:$2 sm:$0xff]  ;;  %v355_v22 = vmax.f32 %v351_v12, %v965_v13  ;;  %v337_v27 = vmax.f32 %v331_v19, %v957_v6  ;;  %344 = vst [vmem:[%s1183_s12 + $0x41] sm:$0xff] %v342_v23 }
  0x3f   : > { %v970_v20 = vld [vmem:[%s1188_s15 + $0x110] ss:$2 sm:$0xff]  ;;  %v969_v25 = vld [vmem:[%s1188_s15 + $0x11f] ss:$2 sm:$0x3f] }
  0x40   : > { %v972_v21 = vld [vmem:[%s1188_s15 + $0x12c] ss:$2 sm:$0xff]  ;;  %v980_v26 = vld [vmem:[%s1188_s15 + $0x12d] ss:$2 sm:$0xff]  ;;  %v361_v29 = vmax.f32 %v355_v22, %v967_v17  ;;  %v372_v33 = vmax.f32 %v366_v24, %v970_v20  ;;  %v343_v36 = vmax.f32 %v337_v27, %v959_v15 }
  0x41   : > { %v974_v28 = vld [vmem:[%s1188_s15 + $0x12d] ss:$2 sm:$0xff]  ;;  %v971_v30 = vld [vmem:[%s1188_s15 + $0x120] ss:$2 sm:$0x3f]  ;;  %v398_v31 = vmax.f32 %v978_v18, %v980_v26 }
  0x42   : > { %v982_v32 = vld [vmem:[%s1188_s15 + $0x12e] ss:$2 sm:$0xff]  ;;  %v367_v37 = vmax.f32 %v361_v29, %v969_v25  ;;  %v986_v39 = vld [vmem:[%s1188_s15 + $0x14b] ss:$2 sm:$0xff]  ;;  %v378_v41 = vmax.f32 %v372_v33, %v972_v21  ;;  %345 = vst [vmem:[%s1183_s12 + $0x49] sm:$0x3f] %v343_v36 }
  0x43   : > { %v973_v34 = vld [vmem:[%s1188_s15 + $0x13c] ss:$2 sm:$0x3f]  ;;  %v984_v35 = vld [vmem:[%s1188_s15 + $0x14a] ss:$2 sm:$0xff]  ;;  %v402_v38 = vmax.f32 %v398_v31, %v982_v32 }
  0x44   : > { %v979_v40 = vld [vmem:[%s1188_s15 + $0x13c] ss:$2 sm:$0x3f]  ;;  %v981_v42 = vld [vmem:[%s1188_s15 + $0x13d] ss:$2 sm:$0x3f]  ;;  %v373_v45 = vmax.f32 %v367_v37, %v971_v30  ;;  %v384_v49 = vmax.f32 %v378_v41, %v974_v28 }
  0x45   : > { %v983_v43 = vld [vmem:[%s1188_s15 + $0x13e] ss:$2 sm:$0x3f]  ;;  %v976_v44 = vld [vmem:[%s1188_s15 + $0x12e] ss:$2 sm:$0xff]  ;;  %v408_v47 = vmax.f32 %v402_v38, %v984_v35  ;;  %v399_v48 = vmax.f32 %v979_v40, %v981_v42 }
  0x46   : > { %v975_v46 = vld [vmem:[%s1188_s15 + $0x13d] ss:$2 sm:$0x3f]  ;;  %v977_v50 = vld [vmem:[%s1188_s15 + $0x13e] ss:$2 sm:$0x3f]  ;;  %v379_v53 = vmax.f32 %v373_v45, %v973_v34  ;;  %v390_v58 = vmax.f32 %v384_v49, %v976_v44 }
  0x47   : > { %v988_v51 = vld [vmem:[%s1188_s15 + $0x14c] ss:$2 sm:$0xff]  ;;  %v414_v54 = vmax.f32 %v408_v47, %v986_v39  ;;  %v403_v56 = vmax.f32 %v399_v48, %v983_v43  ;;  %v987_v57 = vld [vmem:[%s1188_s15 + $0x15b] ss:$2 sm:$0x3f] }
  0x48   : > { %v985_v52 = vld [vmem:[%s1188_s15 + $0x15a] ss:$2 sm:$0x3f]  ;;  %v990_v55 = vld [vmem:[%s1188_s15 + $0x168] ss:$2 sm:$0xff]  ;;  %v385_v62 = vmax.f32 %v379_v53, %v975_v46  ;;  %392 = vst [vmem:[%s1183_s12 + $0x51] sm:$0xff] %v390_v58 }
  0x49   : > { %v996_v59 = vld [vmem:[%s1188_s15 + $0x168] ss:$2 sm:$0xff]  ;;  %v998_v60 = vld [vmem:[%s1188_s15 + $0x169] ss:$2 sm:$0xff]  ;;  %v420_v63 = vmax.f32 %v414_v54, %v988_v51  ;;  %v409_v1 = vmax.f32 %v403_v56, %v985_v52 }
  0x4a   : > { %v1000_v61 = vld [vmem:[%s1188_s15 + $0x16a] ss:$2 sm:$0xff]  ;;  %v992_v0 = vld [vmem:[%s1188_s15 + $0x169] ss:$2 sm:$0xff]  ;;  %v446_v3 = vmax.f32 %v996_v59, %v998_v60  ;;  %v391_v7 = vmax.f32 %v385_v62, %v977_v50 }
  0x4b   : > { %v989_v2 = vld [vmem:[%s1188_s15 + $0x15c] ss:$2 sm:$0x3f]  ;;  %v994_v4 = vld [vmem:[%s1188_s15 + $0x16a] ss:$2 sm:$0xff]  ;;  %v426_v8 = vmax.f32 %v420_v63, %v990_v55  ;;  %v415_v9 = vmax.f32 %v409_v1, %v987_v57 }
  0x4c   : > { %v991_v5 = vld [vmem:[%s1188_s15 + $0x178] ss:$2 sm:$0x3f]  ;;  %v1002_v6 = vld [vmem:[%s1188_s15 + $0x186] ss:$2 sm:$0xff]  ;;  %v450_v10 = vmax.f32 %v446_v3, %v1000_v61 }
  0x4d   : > { %v997_v11 = vld [vmem:[%s1188_s15 + $0x178] ss:$2 sm:$0x3f]  ;;  %v999_v12 = vld [vmem:[%s1188_s15 + $0x179] ss:$2 sm:$0x3f]  ;;  %v432_v16 = vmax.f32 %v426_v8, %v992_v0  ;;  %v421_v17 = vmax.f32 %v415_v9, %v989_v2 }
  0x4e   : > { %v1004_v13 = vld [vmem:[%s1188_s15 + $0x187] ss:$2 sm:$0xff]  ;;  %v447_v14 = vmax.f32 %v997_v11, %v999_v12  ;;  %v1001_v15 = vld [vmem:[%s1188_s15 + $0x17a] ss:$2 sm:$0x3f]  ;;  %v456_v19 = vmax.f32 %v450_v10, %v1002_v6 }
  0x4f   : > { %393 = vst [vmem:[%s1183_s12 + $0x59] sm:$0x3f] %v391_v7  ;;  %v993_v18 = vld [vmem:[%s1188_s15 + $0x179] ss:$2 sm:$0x3f]  ;;  %v438_v24 = vmax.f32 %v432_v16, %v994_v4  ;;  %v427_v25 = vmax.f32 %v421_v17, %v991_v5 }
  0x50   : > { %v1003_v20 = vld [vmem:[%s1188_s15 + $0x196] ss:$2 sm:$0x3f]  ;;  %v451_v23 = vmax.f32 %v447_v14, %v1001_v15  ;;  %v462_v26 = vmax.f32 %v456_v19, %v1004_v13  ;;  %v1005_v27 = vld [vmem:[%s1188_s15 + $0x197] ss:$2 sm:$0x3f] }
  0x51   : > { %v995_v21 = vld [vmem:[%s1188_s15 + $0x17a] ss:$2 sm:$0x3f]  ;;  %v1006_v22 = vld [vmem:[%s1188_s15 + $0x188] ss:$2 sm:$0xff]  ;;  %440 = vst [vmem:[%s1183_s12 + $0x61] sm:$0xff] %v438_v24  ;;  %v433_v33 = vmax.f32 %v427_v25, %v993_v18 }
  0x52   : > { %v1014_v28 = vld [vmem:[%s1188_s15 + $0x1a4] ss:$2 sm:$0xff]  ;;  %v457_v30 = vmax.f32 %v451_v23, %v1003_v20  ;;  %v1016_v31 = vld [vmem:[%s1188_s15 + $0x1a5] ss:$2 sm:$0xff]  ;;  %v468_v34 = vmax.f32 %v462_v26, %v1006_v22 }
  0x53   : > { %v1008_v29 = vld [vmem:[%s1188_s15 + $0x1a4] ss:$2 sm:$0xff]  ;;  %v1010_v35 = vld [vmem:[%s1188_s15 + $0x1a5] ss:$2 sm:$0xff]  ;;  %v494_v37 = vmax.f32 %v1014_v28, %v1016_v31  ;;  %v439_v42 = vmax.f32 %v433_v33, %v995_v21 }
  0x54   : > { %v1018_v32 = vld [vmem:[%s1188_s15 + $0x1a6] ss:$2 sm:$0xff]  ;;  %v1007_v36 = vld [vmem:[%s1188_s15 + $0x198] ss:$2 sm:$0x3f]  ;;  %v463_v39 = vmax.f32 %v457_v30, %v1005_v27  ;;  %v474_v43 = vmax.f32 %v468_v34, %v1008_v29 }
  0x55   : > { %v1012_v38 = vld [vmem:[%s1188_s15 + $0x1a6] ss:$2 sm:$0xff]  ;;  %v1011_v44 = vld [vmem:[%s1188_s15 + $0x1b5] ss:$2 sm:$0x3f]  ;;  %v498_v45 = vmax.f32 %v494_v37, %v1018_v32 }
  0x56   : > { %v1009_v40 = vld [vmem:[%s1188_s15 + $0x1b4] ss:$2 sm:$0x3f]  ;;  %v1020_v41 = vld [vmem:[%s1188_s15 + $0x1c2] ss:$2 sm:$0xff]  ;;  %v469_v48 = vmax.f32 %v463_v39, %v1007_v36  ;;  %v480_v52 = vmax.f32 %v474_v43, %v1010_v35 }
  0x57   : > { %v1015_v46 = vld [vmem:[%s1188_s15 + $0x1b4] ss:$2 sm:$0x3f]  ;;  %v1017_v47 = vld [vmem:[%s1188_s15 + $0x1b5] ss:$2 sm:$0x3f]  ;;  %v504_v54 = vmax.f32 %v498_v45, %v1020_v41 }
  0x58   : > { %v1022_v49 = vld [vmem:[%s1188_s15 + $0x1c3] ss:$2 sm:$0xff]  ;;  %v495_v50 = vmax.f32 %v1015_v46, %v1017_v47  ;;  %v1019_v51 = vld [vmem:[%s1188_s15 + $0x1b6] ss:$2 sm:$0x3f]  ;;  %v475_v57 = vmax.f32 %v469_v48, %v1009_v40  ;;  %v486_v61 = vmax.f32 %v480_v52, %v1012_v38 }
  0x59   : > { %441 = vst [vmem:[%s1183_s12 + $0x69] sm:$0x3f] %v439_v42  ;;  %v1013_v53 = vld [vmem:[%s1188_s15 + $0x1b6] ss:$2 sm:$0x3f]  ;;  %v510_v62 = vmax.f32 %v504_v54, %v1022_v49 }
  0x5a   : > { %v1021_v55 = vld [vmem:[%s1188_s15 + $0x1d2] ss:$2 sm:$0x3f]  ;;  %v1032_v56 = vld [vmem:[%s1188_s15 + $0x1e0] ss:$2 sm:$0xff]  ;;  %v499_v60 = vmax.f32 %v495_v50, %v1019_v51  ;;  %v481_v1 = vmax.f32 %v475_v57, %v1011_v44  ;;  %488 = vst [vmem:[%s1183_s12 + $0x71] sm:$0xff] %v486_v61 }
  0x5b   : > { %v1024_v58 = vld [vmem:[%s1188_s15 + $0x1c4] ss:$2 sm:$0xff]  ;;  %v1023_v63 = vld [vmem:[%s1188_s15 + $0x1d3] ss:$2 sm:$0x3f] }
  0x5c   : > { %v1026_v59 = vld [vmem:[%s1188_s15 + $0x1e0] ss:$2 sm:$0xff]  ;;  %v1034_v0 = vld [vmem:[%s1188_s15 + $0x1e1] ss:$2 sm:$0xff]  ;;  %v505_v3 = vmax.f32 %v499_v60, %v1021_v55  ;;  %v516_v7 = vmax.f32 %v510_v62, %v1024_v58  ;;  %v487_v10 = vmax.f32 %v481_v1, %v1013_v53 }
  0x5d   : > { %v1028_v2 = vld [vmem:[%s1188_s15 + $0x1e1] ss:$2 sm:$0xff]  ;;  %v1025_v4 = vld [vmem:[%s1188_s15 + $0x1d4] ss:$2 sm:$0x3f]  ;;  %v542_v5 = vmax.f32 %v1032_v56, %v1034_v0 }
  0x5e   : > { %v1036_v6 = vld [vmem:[%s1188_s15 + $0x1e2] ss:$2 sm:$0xff]  ;;  %v511_v11 = vmax.f32 %v505_v3, %v1023_v63  ;;  %v1040_v13 = vld [vmem:[%s1188_s15 + $0x1ff] ss:$2 sm:$0xff]  ;;  %v522_v15 = vmax.f32 %v516_v7, %v1026_v59  ;;  %489 = vst [vmem:[%s1183_s12 + $0x79] sm:$0x3f] %v487_v10 }
  0x5f   : > { %v1027_v8 = vld [vmem:[%s1188_s15 + $0x1f0] ss:$2 sm:$0x3f]  ;;  %v1038_v9 = vld [vmem:[%s1188_s15 + $0x1fe] ss:$2 sm:$0xff]  ;;  %v546_v12 = vmax.f32 %v542_v5, %v1036_v6 }
  0x60   : > { %v1033_v14 = vld [vmem:[%s1188_s15 + $0x1f0] ss:$2 sm:$0x3f]  ;;  %v1035_v16 = vld [vmem:[%s1188_s15 + $0x1f1] ss:$2 sm:$0x3f]  ;;  %v517_v19 = vmax.f32 %v511_v11, %v1025_v4  ;;  %v528_v23 = vmax.f32 %v522_v15, %v1028_v2 }
  0x61   : > { %v1037_v17 = vld [vmem:[%s1188_s15 + $0x1f2] ss:$2 sm:$0x3f]  ;;  %v1030_v18 = vld [vmem:[%s1188_s15 + $0x1e2] ss:$2 sm:$0xff]  ;;  %v552_v21 = vmax.f32 %v546_v12, %v1038_v9  ;;  %v543_v22 = vmax.f32 %v1033_v14, %v1035_v16 }
  0x62   : > { %v1029_v20 = vld [vmem:[%s1188_s15 + $0x1f1] ss:$2 sm:$0x3f]  ;;  %v1031_v24 = vld [vmem:[%s1188_s15 + $0x1f2] ss:$2 sm:$0x3f]  ;;  %v523_v27 = vmax.f32 %v517_v19, %v1027_v8  ;;  %v534_v32 = vmax.f32 %v528_v23, %v1030_v18 }
  0x63   : > { %v1042_v25 = vld [vmem:[%s1188_s15 + $0x200] ss:$2 sm:$0xff]  ;;  %v558_v28 = vmax.f32 %v552_v21, %v1040_v13  ;;  %v547_v30 = vmax.f32 %v543_v22, %v1037_v17  ;;  %v1041_v31 = vld [vmem:[%s1188_s15 + $0x20f] ss:$2 sm:$0x3f] }
  0x64   : > { %v1039_v26 = vld [vmem:[%s1188_s15 + $0x20e] ss:$2 sm:$0x3f]  ;;  %v1044_v29 = vld [vmem:[%s1188_s15 + $0x21c] ss:$2 sm:$0xff]  ;;  %v529_v36 = vmax.f32 %v523_v27, %v1029_v20  ;;  %536 = vst [vmem:[%s1183_s12 + $0x81] sm:$0xff] %v534_v32 }
  0x65   : > { %v1050_v33 = vld [vmem:[%s1188_s15 + $0x21c] ss:$2 sm:$0xff]  ;;  %v1052_v34 = vld [vmem:[%s1188_s15 + $0x21d] ss:$2 sm:$0xff]  ;;  %v564_v37 = vmax.f32 %v558_v28, %v1042_v25  ;;  %v553_v39 = vmax.f32 %v547_v30, %v1039_v26 }
  0x66   : > { %v1054_v35 = vld [vmem:[%s1188_s15 + $0x21e] ss:$2 sm:$0xff]  ;;  %v1046_v38 = vld [vmem:[%s1188_s15 + $0x21d] ss:$2 sm:$0xff]  ;;  %v590_v41 = vmax.f32 %v1050_v33, %v1052_v34  ;;  %v535_v45 = vmax.f32 %v529_v36, %v1031_v24 }
  0x67   : > { %v1043_v40 = vld [vmem:[%s1188_s15 + $0x210] ss:$2 sm:$0x3f]  ;;  %v1048_v42 = vld [vmem:[%s1188_s15 + $0x21e] ss:$2 sm:$0xff]  ;;  %v570_v46 = vmax.f32 %v564_v37, %v1044_v29  ;;  %v559_v47 = vmax.f32 %v553_v39, %v1041_v31 }
  0x68   : > { %v1045_v43 = vld [vmem:[%s1188_s15 + $0x22c] ss:$2 sm:$0x3f]  ;;  %v1056_v44 = vld [vmem:[%s1188_s15 + $0x23a] ss:$2 sm:$0xff]  ;;  %v594_v48 = vmax.f32 %v590_v41, %v1054_v35 }
  0x69   : > { %v1051_v49 = vld [vmem:[%s1188_s15 + $0x22c] ss:$2 sm:$0x3f]  ;;  %v1053_v50 = vld [vmem:[%s1188_s15 + $0x22d] ss:$2 sm:$0x3f]  ;;  %v576_v54 = vmax.f32 %v570_v46, %v1046_v38  ;;  %v565_v55 = vmax.f32 %v559_v47, %v1043_v40 }
  0x6a   : > { %v1058_v51 = vld [vmem:[%s1188_s15 + $0x23b] ss:$2 sm:$0xff]  ;;  %v591_v52 = vmax.f32 %v1051_v49, %v1053_v50  ;;  %v1055_v53 = vld [vmem:[%s1188_s15 + $0x22e] ss:$2 sm:$0x3f]  ;;  %v600_v57 = vmax.f32 %v594_v48, %v1056_v44 }
  0x6b   : > { %537 = vst [vmem:[%s1183_s12 + $0x89] sm:$0x3f] %v535_v45  ;;  %v1047_v56 = vld [vmem:[%s1188_s15 + $0x22d] ss:$2 sm:$0x3f]  ;;  %v582_v62 = vmax.f32 %v576_v54, %v1048_v42  ;;  %v571_v63 = vmax.f32 %v565_v55, %v1045_v43 }
  0x6c   : > { %v1057_v58 = vld [vmem:[%s1188_s15 + $0x24a] ss:$2 sm:$0x3f]  ;;  %v595_v61 = vmax.f32 %v591_v52, %v1055_v53  ;;  %v606_v0 = vmax.f32 %v600_v57, %v1058_v51  ;;  %v1059_v1 = vld [vmem:[%s1188_s15 + $0x24b] ss:$2 sm:$0x3f] }
  0x6d   : > { %v1049_v59 = vld [vmem:[%s1188_s15 + $0x22e] ss:$2 sm:$0x3f]  ;;  %v1060_v60 = vld [vmem:[%s1188_s15 + $0x23c] ss:$2 sm:$0xff]  ;;  %584 = vst [vmem:[%s1183_s12 + $0x91] sm:$0xff] %v582_v62  ;;  %v577_v7 = vmax.f32 %v571_v63, %v1047_v56 }
  0x6e   : > { %v1068_v2 = vld [vmem:[%s1188_s15 + $0x258] ss:$2 sm:$0xff]  ;;  %v601_v4 = vmax.f32 %v595_v61, %v1057_v58  ;;  %v1070_v5 = vld [vmem:[%s1188_s15 + $0x259] ss:$2 sm:$0xff]  ;;  %v612_v8 = vmax.f32 %v606_v0, %v1060_v60 }
  0x6f   : > { %v1062_v3 = vld [vmem:[%s1188_s15 + $0x258] ss:$2 sm:$0xff]  ;;  %v1064_v9 = vld [vmem:[%s1188_s15 + $0x259] ss:$2 sm:$0xff]  ;;  %v638_v11 = vmax.f32 %v1068_v2, %v1070_v5  ;;  %v583_v16 = vmax.f32 %v577_v7, %v1049_v59 }
  0x70   : > { %v1072_v6 = vld [vmem:[%s1188_s15 + $0x25a] ss:$2 sm:$0xff]  ;;  %v1061_v10 = vld [vmem:[%s1188_s15 + $0x24c] ss:$2 sm:$0x3f]  ;;  %v607_v13 = vmax.f32 %v601_v4, %v1059_v1  ;;  %v618_v17 = vmax.f32 %v612_v8, %v1062_v3 }
  0x71   : > { %v1066_v12 = vld [vmem:[%s1188_s15 + $0x25a] ss:$2 sm:$0xff]  ;;  %v1065_v18 = vld [vmem:[%s1188_s15 + $0x269] ss:$2 sm:$0x3f]  ;;  %v642_v19 = vmax.f32 %v638_v11, %v1072_v6 }
  0x72   : > { %v1063_v14 = vld [vmem:[%s1188_s15 + $0x268] ss:$2 sm:$0x3f]  ;;  %v1074_v15 = vld [vmem:[%s1188_s15 + $0x276] ss:$2 sm:$0xff]  ;;  %v613_v22 = vmax.f32 %v607_v13, %v1061_v10  ;;  %v624_v26 = vmax.f32 %v618_v17, %v1064_v9 }
  0x73   : > { %v1069_v20 = vld [vmem:[%s1188_s15 + $0x268] ss:$2 sm:$0x3f]  ;;  %v1071_v21 = vld [vmem:[%s1188_s15 + $0x269] ss:$2 sm:$0x3f]  ;;  %v648_v28 = vmax.f32 %v642_v19, %v1074_v15 }
  0x74   : > { %v1076_v23 = vld [vmem:[%s1188_s15 + $0x277] ss:$2 sm:$0xff]  ;;  %v639_v24 = vmax.f32 %v1069_v20, %v1071_v21  ;;  %v1073_v25 = vld [vmem:[%s1188_s15 + $0x26a] ss:$2 sm:$0x3f]  ;;  %v619_v31 = vmax.f32 %v613_v22, %v1063_v14  ;;  %v630_v35 = vmax.f32 %v624_v26, %v1066_v12 }
  0x75   : > { %585 = vst [vmem:[%s1183_s12 + $0x99] sm:$0x3f] %v583_v16  ;;  %v1067_v27 = vld [vmem:[%s1188_s15 + $0x26a] ss:$2 sm:$0x3f]  ;;  %v654_v36 = vmax.f32 %v648_v28, %v1076_v23 }
  0x76   : > { %v1075_v29 = vld [vmem:[%s1188_s15 + $0x286] ss:$2 sm:$0x3f]  ;;  %v1086_v30 = vld [vmem:[%s1188_s15 + $0x294] ss:$2 sm:$0xff]  ;;  %v643_v34 = vmax.f32 %v639_v24, %v1073_v25  ;;  %v625_v39 = vmax.f32 %v619_v31, %v1065_v18  ;;  %632 = vst [vmem:[%s1183_s12 + $0xa1] sm:$0xff] %v630_v35 }
  0x77   : > { %v1078_v32 = vld [vmem:[%s1188_s15 + $0x278] ss:$2 sm:$0xff]  ;;  %v1077_v37 = vld [vmem:[%s1188_s15 + $0x287] ss:$2 sm:$0x3f] }
  0x78   : > { %v1080_v33 = vld [vmem:[%s1188_s15 + $0x294] ss:$2 sm:$0xff]  ;;  %v1088_v38 = vld [vmem:[%s1188_s15 + $0x295] ss:$2 sm:$0xff]  ;;  %v649_v41 = vmax.f32 %v643_v34, %v1075_v29  ;;  %v660_v45 = vmax.f32 %v654_v36, %v1078_v32  ;;  %v631_v48 = vmax.f32 %v625_v39, %v1067_v27 }
  0x79   : > { %v1082_v40 = vld [vmem:[%s1188_s15 + $0x295] ss:$2 sm:$0xff]  ;;  %v1079_v42 = vld [vmem:[%s1188_s15 + $0x288] ss:$2 sm:$0x3f]  ;;  %v686_v43 = vmax.f32 %v1086_v30, %v1088_v38 }
  0x7a   : > { %v1090_v44 = vld [vmem:[%s1188_s15 + $0x296] ss:$2 sm:$0xff]  ;;  %v655_v49 = vmax.f32 %v649_v41, %v1077_v37  ;;  %v1094_v51 = vld [vmem:[%s1188_s15 + $0x2b3] ss:$2 sm:$0xff]  ;;  %v666_v53 = vmax.f32 %v660_v45, %v1080_v33  ;;  %633 = vst [vmem:[%s1183_s12 + $0xa9] sm:$0x3f] %v631_v48 }
  0x7b   : > { %v1081_v46 = vld [vmem:[%s1188_s15 + $0x2a4] ss:$2 sm:$0x3f]  ;;  %v1092_v47 = vld [vmem:[%s1188_s15 + $0x2b2] ss:$2 sm:$0xff]  ;;  %v690_v50 = vmax.f32 %v686_v43, %v1090_v44 }
  0x7c   : > { %v1087_v52 = vld [vmem:[%s1188_s15 + $0x2a4] ss:$2 sm:$0x3f]  ;;  %v1089_v54 = vld [vmem:[%s1188_s15 + $0x2a5] ss:$2 sm:$0x3f]  ;;  %v661_v57 = vmax.f32 %v655_v49, %v1079_v42  ;;  %v672_v61 = vmax.f32 %v666_v53, %v1082_v40 }
  0x7d   : > { %v1091_v55 = vld [vmem:[%s1188_s15 + $0x2a6] ss:$2 sm:$0x3f]  ;;  %v1084_v56 = vld [vmem:[%s1188_s15 + $0x296] ss:$2 sm:$0xff]  ;;  %v696_v59 = vmax.f32 %v690_v50, %v1092_v47  ;;  %v687_v60 = vmax.f32 %v1087_v52, %v1089_v54 }
  0x7e   : > { %v1083_v58 = vld [vmem:[%s1188_s15 + $0x2a5] ss:$2 sm:$0x3f]  ;;  %v1085_v62 = vld [vmem:[%s1188_s15 + $0x2a6] ss:$2 sm:$0x3f]  ;;  %v667_v1 = vmax.f32 %v661_v57, %v1081_v46  ;;  %v678_v6 = vmax.f32 %v672_v61, %v1084_v56 }
  0x7f   : > { %v1096_v63 = vld [vmem:[%s1188_s15 + $0x2b4] ss:$2 sm:$0xff]  ;;  %v702_v2 = vmax.f32 %v696_v59, %v1094_v51  ;;  %v691_v4 = vmax.f32 %v687_v60, %v1091_v55  ;;  %v1095_v5 = vld [vmem:[%s1188_s15 + $0x2c3] ss:$2 sm:$0x3f] }
  0x80   : > { %v1093_v0 = vld [vmem:[%s1188_s15 + $0x2c2] ss:$2 sm:$0x3f]  ;;  %v1098_v3 = vld [vmem:[%s1188_s15 + $0x2d0] ss:$2 sm:$0xff]  ;;  %v673_v10 = vmax.f32 %v667_v1, %v1083_v58  ;;  %680 = vst [vmem:[%s1183_s12 + $0xb1] sm:$0xff] %v678_v6 }
  0x81   : > { %v1104_v7 = vld [vmem:[%s1188_s15 + $0x2d0] ss:$2 sm:$0xff]  ;;  %v1106_v8 = vld [vmem:[%s1188_s15 + $0x2d1] ss:$2 sm:$0xff]  ;;  %v708_v11 = vmax.f32 %v702_v2, %v1096_v63  ;;  %v697_v13 = vmax.f32 %v691_v4, %v1093_v0 }
  0x82   : > { %v1108_v9 = vld [vmem:[%s1188_s15 + $0x2d2] ss:$2 sm:$0xff]  ;;  %v1100_v12 = vld [vmem:[%s1188_s15 + $0x2d1] ss:$2 sm:$0xff]  ;;  %v734_v15 = vmax.f32 %v1104_v7, %v1106_v8  ;;  %v679_v19 = vmax.f32 %v673_v10, %v1085_v62 }
  0x83   : > { %v1097_v14 = vld [vmem:[%s1188_s15 + $0x2c4] ss:$2 sm:$0x3f]  ;;  %v1102_v16 = vld [vmem:[%s1188_s15 + $0x2d2] ss:$2 sm:$0xff]  ;;  %v714_v20 = vmax.f32 %v708_v11, %v1098_v3  ;;  %v703_v21 = vmax.f32 %v697_v13, %v1095_v5 }
  0x84   : > { %v1099_v17 = vld [vmem:[%s1188_s15 + $0x2e0] ss:$2 sm:$0x3f]  ;;  %v1110_v18 = vld [vmem:[%s1188_s15 + $0x2ee] ss:$2 sm:$0xff]  ;;  %v738_v22 = vmax.f32 %v734_v15, %v1108_v9 }
  0x85   : > { %v1105_v23 = vld [vmem:[%s1188_s15 + $0x2e0] ss:$2 sm:$0x3f]  ;;  %v1107_v24 = vld [vmem:[%s1188_s15 + $0x2e1] ss:$2 sm:$0x3f]  ;;  %v720_v28 = vmax.f32 %v714_v20, %v1100_v12  ;;  %v709_v29 = vmax.f32 %v703_v21, %v1097_v14 }
  0x86   : > { %v1112_v25 = vld [vmem:[%s1188_s15 + $0x2ef] ss:$2 sm:$0xff]  ;;  %v735_v26 = vmax.f32 %v1105_v23, %v1107_v24  ;;  %v1109_v27 = vld [vmem:[%s1188_s15 + $0x2e2] ss:$2 sm:$0x3f]  ;;  %v744_v31 = vmax.f32 %v738_v22, %v1110_v18 }
  0x87   : > { %681 = vst [vmem:[%s1183_s12 + $0xb9] sm:$0x3f] %v679_v19  ;;  %v1101_v30 = vld [vmem:[%s1188_s15 + $0x2e1] ss:$2 sm:$0x3f]  ;;  %v726_v36 = vmax.f32 %v720_v28, %v1102_v16  ;;  %v715_v37 = vmax.f32 %v709_v29, %v1099_v17 }
  0x88   : > { %v1111_v32 = vld [vmem:[%s1188_s15 + $0x2fe] ss:$2 sm:$0x3f]  ;;  %v739_v35 = vmax.f32 %v735_v26, %v1109_v27  ;;  %v750_v38 = vmax.f32 %v744_v31, %v1112_v25  ;;  %v1113_v39 = vld [vmem:[%s1188_s15 + $0x2ff] ss:$2 sm:$0x3f] }
  0x89   : > { %v1103_v33 = vld [vmem:[%s1188_s15 + $0x2e2] ss:$2 sm:$0x3f]  ;;  %v1114_v34 = vld [vmem:[%s1188_s15 + $0x2f0] ss:$2 sm:$0xff]  ;;  %728 = vst [vmem:[%s1183_s12 + $0xc1] sm:$0xff] %v726_v36  ;;  %v721_v45 = vmax.f32 %v715_v37, %v1101_v30 }
  0x8a   : > { %v1122_v40 = vld [vmem:[%s1188_s15 + $0x30c] ss:$2 sm:$0xff]  ;;  %v745_v42 = vmax.f32 %v739_v35, %v1111_v32  ;;  %v1124_v43 = vld [vmem:[%s1188_s15 + $0x30d] ss:$2 sm:$0xff]  ;;  %v756_v46 = vmax.f32 %v750_v38, %v1114_v34 }
  0x8b   : > { %v1116_v41 = vld [vmem:[%s1188_s15 + $0x30c] ss:$2 sm:$0xff]  ;;  %v1118_v47 = vld [vmem:[%s1188_s15 + $0x30d] ss:$2 sm:$0xff]  ;;  %v782_v49 = vmax.f32 %v1122_v40, %v1124_v43  ;;  %v727_v54 = vmax.f32 %v721_v45, %v1103_v33 }
  0x8c   : > { %v1126_v44 = vld [vmem:[%s1188_s15 + $0x30e] ss:$2 sm:$0xff]  ;;  %v1115_v48 = vld [vmem:[%s1188_s15 + $0x300] ss:$2 sm:$0x3f]  ;;  %v751_v51 = vmax.f32 %v745_v42, %v1113_v39  ;;  %v762_v55 = vmax.f32 %v756_v46, %v1116_v41 }
  0x8d   : > { %v1120_v50 = vld [vmem:[%s1188_s15 + $0x30e] ss:$2 sm:$0xff]  ;;  %v786_v56 = vmax.f32 %v782_v49, %v1126_v44  ;;  %v1125_v58 = vld [vmem:[%s1188_s15 + $0x31d] ss:$2 sm:$0x3f] }
  0x8e   : > { %v1117_v52 = vld [vmem:[%s1188_s15 + $0x31c] ss:$2 sm:$0x3f]  ;;  %v1128_v53 = vld [vmem:[%s1188_s15 + $0x32a] ss:$2 sm:$0xff]  ;;  %v757_v59 = vmax.f32 %v751_v51, %v1115_v48  ;;  %v768_v63 = vmax.f32 %v762_v55, %v1118_v47 }
  0x8f   : > { %v1123_v57 = vld [vmem:[%s1188_s15 + $0x31c] ss:$2 sm:$0x3f]  ;;  %v1130_v60 = vld [vmem:[%s1188_s15 + $0x32b] ss:$2 sm:$0xff]  ;;  %v792_v1 = vmax.f32 %v786_v56, %v1128_v53 }
  0x90   : > { %v783_v61 = vmax.f32 %v1123_v57, %v1125_v58  ;;  %v1127_v62 = vld [vmem:[%s1188_s15 + $0x31e] ss:$2 sm:$0x3f]  ;;  %729 = vst [vmem:[%s1183_s12 + $0xc9] sm:$0x3f] %v727_v54  ;;  %v763_v3 = vmax.f32 %v757_v59, %v1117_v52  ;;  %v774_v6 = vmax.f32 %v768_v63, %v1120_v50 }
  0x91   : > { %v1119_v0 = vld [vmem:[%s1188_s15 + $0x31d] ss:$2 sm:$0x3f]  ;;  %v1129_v2 = vld [vmem:[%s1188_s15 + $0x33a] ss:$2 sm:$0x3f]  ;;  %v798_v8 = vmax.f32 %v792_v1, %v1130_v60 }
  0x92   : > { %v1132_v4 = vld [vmem:[%s1188_s15 + $0x32c] ss:$2 sm:$0xff]  ;;  %v787_v5 = vmax.f32 %v783_v61, %v1127_v62  ;;  %v1121_v7 = vld [vmem:[%s1188_s15 + $0x31e] ss:$2 sm:$0x3f]  ;;  %v769_v10 = vmax.f32 %v763_v3, %v1119_v0  ;;  %776 = vst [vmem:[%s1183_s12 + $0xd1] sm:$0xff] %v774_v6 }
  0x93   : > { %v1131_v9 = vld [vmem:[%s1188_s15 + $0x33b] ss:$2 sm:$0x3f]  ;;  %v1134_v11 = vld [vmem:[%s1188_s15 + $0x348] ss:$2 sm:$0xff]  ;;  %v804_v13 = vmax.f32 %v798_v8, %v1132_v4 }
  0x94   : > { %v793_v12 = vmax.f32 %v787_v5, %v1129_v2  ;;  %v1133_v14 = vld [vmem:[%s1188_s15 + $0x33c] ss:$2 sm:$0x3f]  ;;  %v775_v15 = vmax.f32 %v769_v10, %v1121_v7  ;;  %v1136_v16 = vld [vmem:[%s1188_s15 + $0x349] ss:$2 sm:$0xff] }
  0x95   : > { %v810_v18 = vmax.f32 %v804_v13, %v1134_v11  ;;  %v1135_v19 = vld [vmem:[%s1188_s15 + $0x358] ss:$2 sm:$0x3f]  ;;  %v1137_v23 = vld [vmem:[%s1188_s15 + $0x359] ss:$2 sm:$0x3f] }
  0x96   : > { %v799_v17 = vmax.f32 %v793_v12, %v1131_v9  ;;  %777 = vst [vmem:[%s1183_s12 + $0xd9] sm:$0x3f] %v775_v15  ;;  %v1138_v20 = vld [vmem:[%s1188_s15 + $0x34a] ss:$2 sm:$0xff] }
  0x97   : > { %v816_v22 = vmax.f32 %v810_v18, %v1136_v16  ;;  %v1139_v26 = vld [vmem:[%s1188_s15 + $0x35a] ss:$2 sm:$0x3f] }
  0x98   : > { %v805_v21 = vmax.f32 %v799_v17, %v1133_v14 }
  0x99   : > { %v822_v25 = vmax.f32 %v816_v22, %v1138_v20 }
  0x9a   : > { %v811_v24 = vmax.f32 %v805_v21, %v1135_v19 }
  0x9b   : > { %824 = vst [vmem:[%s1183_s12 + $0xe1] sm:$0xff] %v822_v25 }
  0x9c   : > { %v817_v27 = vmax.f32 %v811_v24, %v1137_v23 }
  0x9e   : > { %v823_v28 = vmax.f32 %v817_v27, %v1139_v26 }
  0xa0   : > { %825 = vst [vmem:[%s1183_s12 + $0xe9] sm:$0x3f] %v823_v28 }
  0xa1 PF: > { %s11_s6 = sadd.s32 1, %s1159_s6  }
  0xa2   : > { %p8_p4 = scmp.ge.s32.totalorder %s11_s6, 4  }
  0xa4   :  { %10 = sbr.rel (!%p8_p4) target bundleno = 1 (0x1), region = 227 }

// kernel: densenet_forward.9
= control target key start
LH: loop header
LB: loop body
LE: loop exit
PB: predicated region body
PF: predicated region fallthrough
CT: control target
= control target key end

     0   :  { %s908_s12 = smov 0   ;;  %s1024_s0 = inlined_call_operand.vmem [shape: bf16[2,256,128], index: 0, kind: input, shape index: {}]   ;;  %s1025_s1 = inlined_call_operand.vmem [shape: bf16[128,128], index: 1, kind: input, shape index: {}]   ;;  %s1026_s2 = inlined_call_operand.vmem [shape: f32[1,128], index: 2, kind: input, shape index: {}]   ;;  %s1027_s3 = inlined_call_operand.vmem [shape: f32[2,88,128], index: 3, kind: output, shape index: {}]  }
   0x1 LB: > { %s721_s13 = sadd.s32 4294967295, %s885_s12   ;;  %p725_p0 = scmp.ge.s32.totalorder %s885_s12, 1  ;;  %s885_s12 = sphi %s908_s12, %s13_s12  }
   0x2   : > { %p137_p1 = scmp.lt.s32.totalorder %s885_s12, 3 }
   0x4   : > { %p138_p2 = pnand %p725_p0, %p137_p1 }
   0x5   : > { %v855_v0 = vld [vmem:[%s1025_s1] sm:$0xff] (!%p138_p2)   ;;  %p161_p3 = scmp.lt.s32.totalorder (!%p138_p2), %s721_s13, 1  ;;  %v856_v1 = vld [vmem:[%s1025_s1 + $0x8] sm:$0xff] (!%p138_p2)   ;;  %v857_v2 = vld [vmem:[%s1025_s1 + $0x10] sm:$0xff] (!%p138_p2)   ;;  %v887_v24 = vmov (!%p138_p2), 0.0  }
   0x6   : > { %141 = sbr.rel (%p138_p2) target bundleno = 296 (0x128), region = 32  ;;  %781 = vmatprep.subr.bf16.mxu0 (!%p138_p2), %v855_v0  ;;  %829 = vmatprep.subr.bf16.mxu1 (!%p138_p2), %v855_v0  ;;  %v858_v3 = vld [vmem:[%s1025_s1 + $0x18] sm:$0xff] (!%p138_p2)   ;;  %v859_v6 = vld [vmem:[%s1025_s1 + $0x20] sm:$0xff] (!%p138_p2)   ;;  %v860_v7 = vld [vmem:[%s1025_s1 + $0x28] sm:$0xff] (!%p138_p2)  }
   0x7   : > { %782 = vmatpush3.bf16.msra.mxu0 (!%p138_p2), %v855_v0  ;;  %837 = vmatpush3.bf16.msra.mxu1 (!%p138_p2), %v855_v0  ;;  %v861_v8 = vld [vmem:[%s1025_s1 + $0x30] sm:$0xff] (!%p138_p2)   ;;  %v862_v9 = vld [vmem:[%s1025_s1 + $0x38] sm:$0xff] (!%p138_p2)   ;;  %v984_v25 = vld [vmem:[%s1026_s2] ss:$0 sm:$0xff] (!%p138_p2) }
   0x8   : > { %783 = vmatprep.subr.bf16.mxu0 (!%p138_p2), %v856_v1  ;;  %830 = vmatprep.subr.bf16.mxu1 (!%p138_p2), %v856_v1 }
   0xb   : > { %784 = vmatpush3.bf16.msra.mxu0 (!%p138_p2), %v856_v1  ;;  %838 = vmatpush3.bf16.msra.mxu1 (!%p138_p2), %v856_v1 }
   0xc   : > { %785 = vmatprep.subr.bf16.mxu0 (!%p138_p2), %v857_v2  ;;  %831 = vmatprep.subr.bf16.mxu1 (!%p138_p2), %v857_v2 }
   0xd   : > { %s1029_s13 = smov (!%p161_p3, %s721_s13), 1 }
   0xe   : > { %s756_s20 = sshll.u32 %s1029_s13, 7  ;;  %s845_s7 = smul.u32 88, %s1029_s13 }
   0xf   : > { %s931_s23 = scalar_lea.vmem %s1024_s0, %s756_s20  ;;  %786 = vmatpush3.bf16.msra.mxu0 %v857_v2  ;;  %839 = vmatpush3.bf16.msra.mxu1 %v857_v2 }
  0x10   : > { %v863_v4 = vld [vmem:[%s931_s23] sm:$0xff]   ;;  %787 = vmatprep.subr.bf16.mxu0 %v858_v3  ;;  %832 = vmatprep.subr.bf16.mxu1 %v858_v3  ;;  %v865_v10 = vld [vmem:[%s931_s23 + $0x8] sm:$0xff]   ;;  %v867_v12 = vld [vmem:[%s931_s23 + $0x10] sm:$0xff]   ;;  %s968_s10 = scalar_lea.vmem %s1027_s3, %s845_s7 }
  0x11   : > { %v864_v5 = vld [vmem:[%s931_s23 + $0x40] sm:$0xff]   ;;  %797 = vmatprep.mubr.bf16.mxu0 %v863_v4  ;;  %v866_v11 = vld [vmem:[%s931_s23 + $0x48] sm:$0xff]   ;;  %v868_v13 = vld [vmem:[%s931_s23 + $0x50] sm:$0xff]   ;;  %564 = vst [vmem:[%s968_s10] sm:$0xff] %v887_v24 }
  0x12   : > { %813 = vmatprep.mubr.bf16.mxu1 %v864_v5  ;;  %v869_v14 = vld [vmem:[%s931_s23 + $0x18] sm:$0xff]   ;;  %v871_v16 = vld [vmem:[%s931_s23 + $0x20] sm:$0xff]   ;;  %v873_v18 = vld [vmem:[%s931_s23 + $0x28] sm:$0xff]   ;;  %565 = vst [vmem:[%s968_s10 + $0x8] sm:$0xff] %v887_v24 }
  0x13   : > { %788 = vmatpush3.bf16.msra.mxu0 %v858_v3  ;;  %840 = vmatpush3.bf16.msra.mxu1 %v858_v3  ;;  %v870_v15 = vld [vmem:[%s931_s23 + $0x58] sm:$0xff]   ;;  %v872_v17 = vld [vmem:[%s931_s23 + $0x60] sm:$0xff]   ;;  %v874_v19 = vld [vmem:[%s931_s23 + $0x68] sm:$0xff]   ;;  %566 = vst [vmem:[%s968_s10 + $0x10] sm:$0xff] %v887_v24 }
  0x14   : > { %789 = vmatprep.subr.bf16.mxu0 %v859_v6  ;;  %833 = vmatprep.subr.bf16.mxu1 %v859_v6  ;;  %v875_v20 = vld [vmem:[%s931_s23 + $0x30] sm:$0xff]   ;;  %v877_v22 = vld [vmem:[%s931_s23 + $0x38] sm:$0xff]   ;;  %573 = vst [vmem:[%s968_s10 + $0x48] sm:$0xff] %v887_v24  ;;  %574 = vst [vmem:[%s968_s10 + $0x50] sm:$0xff] %v887_v24 }
  0x15   : > { %v876_v21 = vld [vmem:[%s931_s23 + $0x70] sm:$0xff]   ;;  %v878_v23 = vld [vmem:[%s931_s23 + $0x78] sm:$0xff]   ;;  %567 = vst [vmem:[%s968_s10 + $0x18] sm:$0xff] %v887_v24  ;;  %568 = vst [vmem:[%s968_s10 + $0x20] sm:$0xff] %v887_v24 }
  0x16   : > { %569 = vst [vmem:[%s968_s10 + $0x28] sm:$0xff] %v887_v24  ;;  %570 = vst [vmem:[%s968_s10 + $0x30] sm:$0xff] %v887_v24 }
  0x17   : > { %790 = vmatpush3.bf16.msra.mxu0 %v859_v6  ;;  %841 = vmatpush3.bf16.msra.mxu1 %v859_v6  ;;  %571 = vst [vmem:[%s968_s10 + $0x38] sm:$0xff] %v887_v24  ;;  %572 = vst [vmem:[%s968_s10 + $0x40] sm:$0xff] %v887_v24 }
  0x18   : > { %791 = vmatprep.subr.bf16.mxu0 %v860_v7  ;;  %834 = vmatprep.subr.bf16.mxu1 %v860_v7 }
  0x1b   : > { %792 = vmatpush3.bf16.msra.mxu0 %v860_v7  ;;  %842 = vmatpush3.bf16.msra.mxu1 %v860_v7 }
  0x1c   : > { %793 = vmatprep.subr.bf16.mxu0 %v861_v8  ;;  %835 = vmatprep.subr.bf16.mxu1 %v861_v8 }
  0x1f   : > { %794 = vmatpush3.bf16.msra.mxu0 %v861_v8  ;;  %843 = vmatpush3.bf16.msra.mxu1 %v861_v8 }
  0x20   : > { %795 = vmatprep.subr.bf16.mxu0 %v862_v9  ;;  %836 = vmatprep.subr.bf16.mxu1 %v862_v9 }
  0x23   : > { %796 = vmatpush3.bf16.msra.mxu0 %v862_v9  ;;  %844 = vmatpush3.bf16.msra.mxu1 %v862_v9 }
  0x26   : > { %798 = vmatmul.mubr.bf16.vlgmr.msra.gmra.mrb[0].mxu0 %v865_v10  ;;  %814 = vmatmul.mubr.bf16.vlgmr.msra.gmra.mrb[0].mxu1 %v866_v11 }
  0x27   : > { %801 = vmatprep.mubr.bf16.mxu0 %v867_v12  ;;  %817 = vmatprep.mubr.bf16.mxu1 %v868_v13 }
  0x2e   : > { %802 = vmatmul.mubr.bf16.gmra.mrb[4].mxu0 %v869_v14  ;;  %818 = vmatmul.mubr.bf16.gmra.mrb[4].mxu1 %v870_v15 }
  0x2f   : > { %805 = vmatprep.mubr.bf16.mxu0 %v871_v16  ;;  %821 = vmatprep.mubr.bf16.mxu1 %v872_v17 }
  0x36   : > { %806 = vmatmul.mubr.bf16.gmra.mrb[8].mxu0 %v873_v18  ;;  %822 = vmatmul.mubr.bf16.gmra.mrb[8].mxu1 %v874_v19 }
  0x37   : > { %809 = vmatprep.mubr.bf16.mxu0 %v875_v20  ;;  %825 = vmatprep.mubr.bf16.mxu1 %v876_v21 }
  0x3e   : > { %810 = vmatmul.mubr.bf16.gmra.mrb[12].mxu0 %v877_v22  ;;  %826 = vmatmul.mubr.bf16.gmra.mrb[12].mxu1 %v878_v23 }
  0xf9   : > { %v799_v26 = vpop.f32.mrb[0].mxu0  ;;  %v815_v27 = vpop.f32.mrb[0].mxu1 }
  0xfa   : > { %v414_v28 = vadd.f32 %v799_v26, %v984_v25  ;;  %v478_v29 = vadd.f32 %v815_v27, %v984_v25  ;;  %v405_v30 = vpop.f32.mrb[1].mxu0  ;;  %v469_v31 = vpop.f32.mrb[1].mxu1 }
  0xfb   : > { %v470_v32 = vadd.f32 %v984_v25, %v469_v31  ;;  %v800_v33 = vpop.f32.mrb[2].mxu0  ;;  %v816_v34 = vpop.f32.mrb[2].mxu1 }
  0xfc   : > { %534 = vst [vmem:[#allocation2 + $0x10] sm:$0xff] %v414_v28  ;;  %550 = vst [vmem:[#allocation2 + $0x90] sm:$0xff] %v478_v29  ;;  %v417_v35 = vadd.f32 %v800_v33, %v984_v25  ;;  %v481_v36 = vadd.f32 %v816_v34, %v984_v25  ;;  %v408_v37 = vpop.f32.mrb[3].mxu0  ;;  %v472_v38 = vpop.f32.mrb[3].mxu1 }
  0xfd   : > { %548 = vst [vmem:[#allocation2 + $0x80] sm:$0xff] %v470_v32  ;;  %v473_v39 = vadd.f32 %v984_v25, %v472_v38 }
  0xfe   : > { %535 = vst [vmem:[#allocation2 + $0x18] sm:$0xff] %v417_v35  ;;  %551 = vst [vmem:[#allocation2 + $0x98] sm:$0xff] %v481_v36 }
  0xff   : > { %549 = vst [vmem:[#allocation2 + $0x88] sm:$0xff] %v473_v39 }
 0x101   : > { %v803_v40 = vpop.f32.mrb[4].mxu0  ;;  %v819_v41 = vpop.f32.mrb[4].mxu1 }
 0x102   : > { %v430_v42 = vadd.f32 %v803_v40, %v984_v25  ;;  %v494_v43 = vadd.f32 %v819_v41, %v984_v25  ;;  %v421_v44 = vpop.f32.mrb[5].mxu0  ;;  %v485_v45 = vpop.f32.mrb[5].mxu1 }
 0x103   : > { %v422_v46 = vadd.f32 %v984_v25, %v421_v44  ;;  %v486_v47 = vadd.f32 %v984_v25, %v485_v45  ;;  %v804_v48 = vpop.f32.mrb[6].mxu0  ;;  %v820_v49 = vpop.f32.mrb[6].mxu1 }
 0x104   : > { %538 = vst [vmem:[#allocation2 + $0x30] sm:$0xff] %v430_v42  ;;  %554 = vst [vmem:[#allocation2 + $0xb0] sm:$0xff] %v494_v43  ;;  %v433_v50 = vadd.f32 %v804_v48, %v984_v25  ;;  %v497_v51 = vadd.f32 %v820_v49, %v984_v25  ;;  %v424_v52 = vpop.f32.mrb[7].mxu0  ;;  %v488_v53 = vpop.f32.mrb[7].mxu1 }
 0x105   : > { %536 = vst [vmem:[#allocation2 + $0x20] sm:$0xff] %v422_v46  ;;  %552 = vst [vmem:[#allocation2 + $0xa0] sm:$0xff] %v486_v47  ;;  %v425_v54 = vadd.f32 %v984_v25, %v424_v52  ;;  %v489_v55 = vadd.f32 %v984_v25, %v488_v53  ;;  %v576_v56 = vld [vmem:[#allocation2 + $0x11] ss:$2 sm:$0x7f] }
 0x106   : > { %539 = vst [vmem:[#allocation2 + $0x38] sm:$0xff] %v433_v50  ;;  %555 = vst [vmem:[#allocation2 + $0xb8] sm:$0xff] %v497_v51  ;;  %v578_v59 = vld [vmem:[#allocation2 + $0x12] ss:$2 sm:$0x7f] }
 0x107   : > { %537 = vst [vmem:[#allocation2 + $0x28] sm:$0xff] %v425_v54  ;;  %553 = vst [vmem:[#allocation2 + $0xa8] sm:$0xff] %v489_v55  ;;  %v628_v0 = vld [vmem:[#allocation2 + $0x91] ss:$2 sm:$0x7f]  ;;  %v579_v12 = vadd.f32 %v578_v59, %v576_v56 }
 0x108   : > { %v630_v5 = vld [vmem:[#allocation2 + $0x92] ss:$2 sm:$0x7f] }
 0x109   : > { %v807_v57 = vpop.f32.mrb[8].mxu0  ;;  %v823_v58 = vpop.f32.mrb[8].mxu1  ;;  %v631_v13 = vadd.f32 %v630_v5, %v628_v0 }
 0x10a   : > { %v446_v60 = vadd.f32 %v807_v57, %v984_v25  ;;  %v510_v61 = vadd.f32 %v823_v58, %v984_v25  ;;  %v437_v62 = vpop.f32.mrb[9].mxu0  ;;  %v501_v63 = vpop.f32.mrb[9].mxu1 }
 0x10b   : > { %v438_v1 = vadd.f32 %v984_v25, %v437_v62  ;;  %v502_v2 = vadd.f32 %v984_v25, %v501_v63  ;;  %v808_v3 = vpop.f32.mrb[10].mxu0  ;;  %v824_v4 = vpop.f32.mrb[10].mxu1 }
 0x10c   : > { %542 = vst [vmem:[#allocation2 + $0x50] sm:$0xff] %v446_v60  ;;  %558 = vst [vmem:[#allocation2 + $0xd0] sm:$0xff] %v510_v61  ;;  %v449_v6 = vadd.f32 %v808_v3, %v984_v25  ;;  %v513_v7 = vadd.f32 %v824_v4, %v984_v25  ;;  %v440_v8 = vpop.f32.mrb[11].mxu0  ;;  %v504_v9 = vpop.f32.mrb[11].mxu1 }
 0x10d   : > { %540 = vst [vmem:[#allocation2 + $0x40] sm:$0xff] %v438_v1  ;;  %556 = vst [vmem:[#allocation2 + $0xc0] sm:$0xff] %v502_v2  ;;  %v441_v10 = vadd.f32 %v984_v25, %v440_v8  ;;  %v505_v11 = vadd.f32 %v984_v25, %v504_v9  ;;  %v589_v17 = vld [vmem:[#allocation2 + $0x31] ss:$2 sm:$0x7f] }
 0x10e   : > { %543 = vst [vmem:[#allocation2 + $0x58] sm:$0xff] %v449_v6  ;;  %559 = vst [vmem:[#allocation2 + $0xd8] sm:$0xff] %v513_v7  ;;  %v581_v14 = vld [vmem:[#allocation2 + $0x21] ss:$2 sm:$0x7f] }
 0x10f   : > { %541 = vst [vmem:[#allocation2 + $0x48] sm:$0xff] %v441_v10  ;;  %557 = vst [vmem:[#allocation2 + $0xc8] sm:$0xff] %v505_v11  ;;  %v582_v15 = vadd.f32 %v581_v14, %v579_v12  ;;  %v633_v16 = vld [vmem:[#allocation2 + $0xa1] ss:$2 sm:$0x7f] }
 0x110   : > { %v591_v18 = vld [vmem:[#allocation2 + $0x32] ss:$2 sm:$0x7f]  ;;  %v584_v19 = vld [vmem:[#allocation2 + $0x22] ss:$2 sm:$0x7f]  ;;  %v634_v20 = vadd.f32 %v633_v16, %v631_v13 }
 0x111   : > { %v811_v21 = vpop.f32.mrb[12].mxu0  ;;  %v827_v22 = vpop.f32.mrb[12].mxu1  ;;  %v585_v23 = vadd.f32 %v584_v19, %v582_v15  ;;  %v636_v24 = vld [vmem:[#allocation2 + $0xa2] ss:$2 sm:$0x7f]  ;;  %v592_v43 = vadd.f32 %v591_v18, %v589_v17 }
 0x112   : > { %v462_v26 = vadd.f32 %v811_v21, %v984_v25  ;;  %v453_v27 = vpop.f32.mrb[13].mxu0  ;;  %v517_v28 = vpop.f32.mrb[13].mxu1  ;;  %v641_v29 = vld [vmem:[#allocation2 + $0xb1] ss:$2 sm:$0x7f]  ;;  %v637_v30 = vadd.f32 %v636_v24, %v634_v20 }
 0x113   : > { %v454_v31 = vadd.f32 %v984_v25, %v453_v27  ;;  %v518_v32 = vadd.f32 %v984_v25, %v517_v28  ;;  %v812_v33 = vpop.f32.mrb[14].mxu0  ;;  %v828_v34 = vpop.f32.mrb[14].mxu1  ;;  %v643_v35 = vld [vmem:[#allocation2 + $0xb2] ss:$2 sm:$0x7f]  ;;  %v586_v36 = vmul.f32 0.25, %v585_v23 }
 0x114   : > { %546 = vst [vmem:[#allocation2 + $0x70] sm:$0xff] %v462_v26  ;;  %v465_v37 = vadd.f32 %v812_v33, %v984_v25  ;;  %v456_v38 = vpop.f32.mrb[15].mxu0  ;;  %v520_v39 = vpop.f32.mrb[15].mxu1  ;;  %v638_v40 = vmul.f32 0.25, %v637_v30  ;;  %v644_v44 = vadd.f32 %v643_v35, %v641_v29 }
 0x115   : > { %544 = vst [vmem:[#allocation2 + $0x60] sm:$0xff] %v454_v31  ;;  %560 = vst [vmem:[#allocation2 + $0xe0] sm:$0xff] %v518_v32  ;;  %v457_v41 = vadd.f32 %v984_v25, %v456_v38  ;;  %v521_v42 = vadd.f32 %v984_v25, %v520_v39  ;;  %v602_v48 = vld [vmem:[#allocation2 + $0x51] ss:$2 sm:$0x7f] }
 0x116   : > { %587 = vst [vmem:[%s968_s10 + $0xa] sm:$0x7f] %v586_v36  ;;  %547 = vst [vmem:[#allocation2 + $0x78] sm:$0xff] %v465_v37  ;;  %v594_v45 = vld [vmem:[#allocation2 + $0x41] ss:$2 sm:$0x7f] }
 0x117   : > { %639 = vst [vmem:[%s968_s10 + $0x2e] sm:$0x7f] %v638_v40  ;;  %545 = vst [vmem:[#allocation2 + $0x68] sm:$0xff] %v457_v41  ;;  %v595_v46 = vadd.f32 %v594_v45, %v592_v43  ;;  %v646_v47 = vld [vmem:[#allocation2 + $0xc1] ss:$2 sm:$0x7f] }
 0x118   : > { %561 = vst [vmem:[#allocation2 + $0xe8] sm:$0xff] %v521_v42  ;;  %v597_v49 = vld [vmem:[#allocation2 + $0x42] ss:$2 sm:$0x7f]  ;;  %v647_v50 = vadd.f32 %v646_v47, %v644_v44 }
 0x119   : > { %v604_v51 = vld [vmem:[#allocation2 + $0x52] ss:$2 sm:$0x7f]  ;;  %v598_v52 = vadd.f32 %v597_v49, %v595_v46  ;;  %v649_v53 = vld [vmem:[#allocation2 + $0xc2] ss:$2 sm:$0x7f] }
 0x11a   : > { %v654_v54 = vld [vmem:[#allocation2 + $0xd1] ss:$2 sm:$0x7f]  ;;  %v656_v25 = vld [vmem:[#allocation2 + $0xd2] ss:$2 sm:$0x7f]  ;;  %v650_v55 = vadd.f32 %v649_v53, %v647_v50  ;;  %v605_v57 = vadd.f32 %v604_v51, %v602_v48 }
 0x11b   : > { %v599_v56 = vmul.f32 0.25, %v598_v52  ;;  %v657_v60 = vadd.f32 %v656_v25, %v654_v54  ;;  %v620_v2 = vld [vmem:[#allocation2 + $0x81] ss:$2 sm:$0x7f] }
 0x11c   : > { %v651_v58 = vmul.f32 0.25, %v650_v55  ;;  %v623_v8 = vld [vmem:[#allocation2 + $0x82] ss:$2 sm:$0x7f] }
 0x11d   : > { %v615_v59 = vld [vmem:[#allocation2 + $0x71] ss:$2 sm:$0x7f]  ;;  %600 = vst [vmem:[%s968_s10 + $0x13] sm:$0x7f] %v599_v56 }
 0x11e   : > { %v617_v61 = vld [vmem:[#allocation2 + $0x72] ss:$2 sm:$0x7f]  ;;  %v607_v62 = vld [vmem:[#allocation2 + $0x61] ss:$2 sm:$0x7f] }
 0x11f   : > { %652 = vst [vmem:[%s968_s10 + $0x37] sm:$0x7f] %v651_v58  ;;  %v618_v63 = vadd.f32 %v617_v61, %v615_v59  ;;  %v608_v0 = vadd.f32 %v607_v62, %v605_v57  ;;  %v659_v1 = vld [vmem:[#allocation2 + $0xe1] ss:$2 sm:$0x7f] }
 0x120   : > { %v610_v3 = vld [vmem:[#allocation2 + $0x62] ss:$2 sm:$0x7f]  ;;  %v660_v4 = vadd.f32 %v659_v1, %v657_v60 }
 0x121   : > { %v621_v5 = vadd.f32 %v620_v2, %v618_v63  ;;  %v611_v6 = vadd.f32 %v610_v3, %v608_v0  ;;  %v662_v7 = vld [vmem:[#allocation2 + $0xe2] ss:$2 sm:$0x7f] }
 0x122   : > { %v663_v9 = vadd.f32 %v662_v7, %v660_v4 }
 0x123   : > { %v624_v10 = vadd.f32 %v623_v8, %v621_v5  ;;  %v612_v11 = vmul.f32 0.25, %v611_v6 }
 0x124   : > { %v664_v12 = vmul.f32 0.25, %v663_v9 }
 0x125   : > { %v625_v13 = vmul.f32 0.25, %v624_v10  ;;  %613 = vst [vmem:[%s968_s10 + $0x1c] sm:$0x7f] %v612_v11 }
 0x126   : > { %665 = vst [vmem:[%s968_s10 + $0x40] sm:$0x7f] %v664_v12 }
 0x127   : > { %626 = vst [vmem:[%s968_s10 + $0x25] sm:$0x7f] %v625_v13 }
 0x128 PF: > { %s13_s12 = sadd.s32 1, %s885_s12  }
 0x129   : > { %p10_p4 = scmp.ge.s32.totalorder %s13_s12, 4  }
 0x12b   :  { %12 = sbr.rel (!%p10_p4) target bundleno = 1 (0x1), region = 90 }

// kernel: densenet_forward.11
= control target key start
LH: loop header
LB: loop body
LE: loop exit
PB: predicated region body
PF: predicated region fallthrough
CT: control target
= control target key end

     0   :  { %v539_v2 = vmov 0   ;;  %s750_s0 = inlined_call_operand.vmem [shape: bf16[2,88,128], index: 0, kind: input, shape index: {}]   ;;  %s751_s1 = inlined_call_operand.vmem [shape: f32[88,1], index: 1, kind: input, shape index: {}]   ;;  %s752_s2 = inlined_call_operand.vmem [shape: f32[1,1,128], index: 2, kind: input, shape index: {}]   ;;  %s753_s3 = inlined_call_operand.vmem [shape: f32[1,1,128], index: 3, kind: input, shape index: {}]   ;;  %s754_s4 = inlined_call_operand.vmem [shape: bf16[128,128], index: 4, kind: input, shape index: {}]   ;;  %s755_s5 = inlined_call_operand.vmem [shape: f32[1,128], index: 5, kind: input, shape index: {}]   ;;  %s756_s6 = inlined_call_operand.hbm [shape: f32[2,128], index: 6, kind: output, shape index: {}]  }
   0x1   :  { %v151_v0 = vld [vmem:[%s751_s1 + $0x10] sm:$0xff]  ;;  %v149_v1 = vld [vmem:[%s751_s1] sm:$0xff]  ;;  %506 = vset.pattern.permute.xlu1 %v539_v2  ;;  %505 = vset.pattern.permute.xlu0 %v539_v2  ;;  %v152_v3 = vld [vmem:[%s751_s1 + $0x18] sm:$0xff] }
   0x2   :  { %172 = vperm.xlu1 %506, %v151_v0   ;;  %162 = vperm.xlu0 %505, %v149_v1   ;;  %v150_v4 = vld [vmem:[%s751_s1 + $0x8] sm:$0xff]  ;;  %v153_v6 = vld [vmem:[%s751_s1 + $0x20] sm:$0xff]  ;;  %v156_v7 = vld [vmem:[%s751_s1 + $0x38] sm:$0xff] }
   0x3   :  { %v154_v5 = vld [vmem:[%s751_s1 + $0x28] sm:$0xff]  ;;  %v155_v8 = vld [vmem:[%s751_s1 + $0x30] sm:$0xff]  ;;  %v157_v10 = vld [vmem:[%s751_s1 + $0x40] sm:$0xff] }
   0x4   :  { %v158_v9 = vld [vmem:[%s751_s1 + $0x48] sm:$0xff] }
   0x6   :  { %177 = vperm.xlu1 %506, %v152_v3   ;;  %167 = vperm.xlu0 %505, %v150_v4  }
   0xa   :  { %187 = vperm.xlu1 %506, %v154_v5   ;;  %182 = vperm.xlu0 %505, %v153_v6  }
   0xe   :  { %197 = vperm.xlu1 %506, %v156_v7   ;;  %192 = vperm.xlu0 %505, %v155_v8  }
   0xf   :  { %11 = vsyncpa [#allocation3], 0  ;;  %v507_v11 = vld [vmem:[%s754_s4] sm:$0xff]   ;;  %v159_v12 = vld [vmem:[%s751_s1 + $0x50] sm:$0xff]  ;;  %v540_v13 = vmov 0.0   ;;  %vm541_vm0 = vmmov 0  }
  0x10   :  { %481 = vmatprep.subr.bf16.mxu0 %v540_v13  ;;  %v508_v14 = vld [vmem:[%s754_s4 + $0x8] sm:$0xff]   ;;  %v509_v15 = vld [vmem:[%s754_s4 + $0x10] sm:$0xff]   ;;  %v510_v16 = vld [vmem:[%s754_s4 + $0x18] sm:$0xff]   ;;  %497 = vmatprep.mubr.msk.bf16.mxu0 %vm541_vm0, %v540_v13  ;;  %vm300_vm1 = vcmask 1041409   ;;  %s542_s9 = smov [#allocation2]  }
  0x11   :  { %482 = vmatpush3.bf16.msra.mxu0 %v507_v11  ;;  %v511_v17 = vld [vmem:[%s754_s4 + $0x20] sm:$0xff]   ;;  %v512_v18 = vld [vmem:[%s754_s4 + $0x28] sm:$0xff]   ;;  %v513_v19 = vld [vmem:[%s754_s4 + $0x30] sm:$0xff]   ;;  %s399_s10 = sshll.u32 %s542_s9, 4  ;;  %s400_s10 = int_to_ptr.vmem [resolvable:$true] %s399_s10 }
  0x12   :  { %207 = vperm.xlu1 %506, %v158_v9   ;;  %202 = vperm.xlu0 %505, %v157_v10   ;;  %v514_v20 = vld [vmem:[%s754_s4 + $0x38] sm:$0xff]   ;;  %v462_v21 = vld [vmem:[%s750_s0 + $0x8] sm:$0xff]   ;;  %v467_v22 = vld [vmem:[%s750_s0 + $0x30] sm:$0xff]   ;;  %s515_s11 = scalar_lea.vmem %s400_s10, 32  ;;  %p520_p1 = scmp.lt.s32.totalorder %s400_s10, %s400_s10 }
  0x13   :  { %483 = vmatprep.subr.bf16.mxu0 %v540_v13  ;;  %v424_v23 = vunpack.c.l.bf16 %v462_v21  ;;  %v445_v24 = vunpack.c.h.bf16 %v467_v22  ;;  %v419_v25 = vld [vmem:[%s750_s0] sm:$0xff]   ;;  %v647_v26 = vld [vmem:[%s750_s0 + $0x28] sm:$0xff]   ;;  %v468_v27 = vld [vmem:[%s750_s0 + $0x38] sm:$0xff]   ;;  %v425_v29 = vunpack.c.h.bf16 %v462_v21  ;;  %v444_v30 = vunpack.c.l.bf16 %v467_v22  ;;  %p516_p0 = scmp.ne.s32.totalorder %s400_s10, %s515_s11  ;;  %p521_p2 = scmp.lt.s32.totalorder %s515_s11, %s515_s11 }
  0x14   :  { %v463_v28 = vld [vmem:[%s750_s0 + $0x10] sm:$0xff]   ;;  %v469_v31 = vld [vmem:[%s750_s0 + $0x40] sm:$0xff]   ;;  %v420_v33 = vunpack.c.l.bf16 %v419_v25  ;;  %v441_v34 = vunpack.c.h.bf16 %v647_v26  ;;  %v448_v35 = vunpack.c.l.bf16 %v468_v27  ;;  %v421_v36 = vunpack.c.h.bf16 %v419_v25  ;;  %v464_v42 = vld [vmem:[%s750_s0 + $0x18] sm:$0xff]  }
  0x15   :  { %484 = vmatpush3.bf16.msra.mxu0 %v508_v14  ;;  %v661_v32 = vld [vmem:[%s752_s2] ss:$0 sm:$0xff]  ;;  %v429_v39 = vunpack.c.h.bf16 %v463_v28  ;;  %v452_v40 = vunpack.c.l.bf16 %v469_v31  ;;  %v428_v41 = vunpack.c.l.bf16 %v463_v28  ;;  %v449_v45 = vunpack.c.h.bf16 %v468_v27  ;;  %v470_v46 = vld [vmem:[%s750_s0 + $0x48] sm:$0xff]   ;;  %p522_p3 = por %p521_p2, %p520_p1 }
  0x16   :  { %212 = vperm.xlu0 %505, %v159_v12   ;;  %485 = vmatprep.subr.bf16.mxu0 %v540_v13  ;;  %v78_v37 = vmul.f32 %v424_v23, %v661_v32  ;;  %v89_v38 = vmul.f32 %v445_v24, %v661_v32  ;;  %v79_v43 = vmul.f32 %v425_v29, %v661_v32  ;;  %v677_v47 = vld [vmem:[%s753_s3] ss:$0 sm:$0xff]  ;;  %v433_v55 = vunpack.c.h.bf16 %v464_v42  ;;  %v471_v23 = vld [vmem:[%s750_s0 + $0x50] sm:$0xff]  }
  0x17   :  { %v88_v44 = vmul.f32 %v444_v30, %v661_v32  ;;  %v76_v48 = vmul.f32 %v420_v33, %v661_v32  ;;  %v87_v49 = vmul.f32 %v441_v34, %v661_v32  ;;  %v90_v50 = vmul.f32 %v448_v35, %v661_v32  ;;  %v465_v12 = vld [vmem:[%s750_s0 + $0x20] sm:$0xff]   ;;  %p523_p4 = pnand %p522_p3, %p516_p0 }
  0x18   :  { %v77_v51 = vmul.f32 %v421_v36, %v661_v32  ;;  %v107_v52 = vadd.f32 %v677_v47, %v78_v37  ;;  %v118_v53 = vadd.f32 %v677_v47, %v89_v38  ;;  %v81_v54 = vmul.f32 %v429_v39, %v661_v32 }
  0x19   :  { %486 = vmatpush3.bf16.msra.mxu0 %v509_v15  ;;  %v92_v56 = vmul.f32 %v452_v40, %v661_v32  ;;  %v80_v57 = vmul.f32 %v428_v41, %v661_v32  ;;  %v456_v58 = vunpack.c.l.bf16 %v470_v46  ;;  %v432_v59 = vunpack.c.l.bf16 %v464_v42 }
  0x1a   :  { %487 = vmatprep.subr.bf16.mxu0 %v540_v13  ;;  %v108_v60 = vadd.f32 %v677_v47, %v79_v43  ;;  %v117_v61 = vadd.f32 %v677_v47, %v88_v44  ;;  %v91_v62 = vmul.f32 %v449_v45, %v661_v32  ;;  %v453_v63 = vunpack.c.h.bf16 %v469_v31 }
  0x1b   :  { %v105_v0 = vadd.f32 %v677_v47, %v76_v48  ;;  %v116_v1 = vadd.f32 %v677_v47, %v87_v49  ;;  %v119_v2 = vadd.f32 %v677_v47, %v90_v50  ;;  %v106_v3 = vadd.f32 %v677_v47, %v77_v51 }
  0x1c   :  { %v129_v4 = vmax.f32 %v107_v52, 0.0  ;;  %v140_v5 = vmax.f32 %v118_v53, 0.0  ;;  %v696_v6 = vadd.f32 %v677_v47, %v81_v54  ;;  %v83_v7 = vmul.f32 %v433_v55, %v661_v32 }
  0x1d   :  { %488 = vmatpush3.bf16.msra.mxu0 %v510_v16  ;;  %v700_v8 = vadd.f32 %v677_v47, %v92_v56  ;;  %v109_v9 = vadd.f32 %v677_v47, %v80_v57  ;;  %v94_v10 = vmul.f32 %v456_v58, %v661_v32  ;;  %v82_v11 = vmul.f32 %v432_v59, %v661_v32 }
  0x1e   :  { %489 = vmatprep.subr.bf16.mxu0 %v540_v13  ;;  %v130_v15 = vmax.f32 %v108_v60, 0.0  ;;  %v139_v16 = vmax.f32 %v117_v61, 0.0  ;;  %v141_v21 = vmax.f32 %v119_v2, 0.0  ;;  %v128_v22 = vmax.f32 %v106_v3, 0.0 }
  0x1f   :  { %v132_v24 = vmax.f32 %v696_v6, 0.0  ;;  %v715_v25 = vadd.f32 %v677_v47, %v83_v7  ;;  %v436_v27 = vunpack.c.l.bf16 %v465_v12  ;;  %v457_v28 = vunpack.c.h.bf16 %v470_v46 }
  0x20   :  { %v143_v29 = vmax.f32 %v700_v8, 0.0  ;;  %v131_v30 = vmax.f32 %v109_v9, 0.0  ;;  %v123_v31 = vadd.f32 %v677_v47, %v94_v10  ;;  %v111_v33 = vadd.f32 %v677_v47, %v82_v11 }
  0x21   :  { %490 = vmatpush3.bf16.msra.mxu0 %v511_v17  ;;  %v120_v17 = vadd.f32 %v677_v47, %v91_v62  ;;  %v437_v38 = vunpack.c.h.bf16 %v465_v12  ;;  %v460_v39 = vunpack.c.l.bf16 %v471_v23  ;;  %v84_v44 = vmul.f32 %v436_v27, %v661_v32 }
  0x22   :  { %491 = vmatprep.subr.bf16.mxu0 %v540_v13  ;;  %v95_v45 = vmul.f32 %v457_v28, %v661_v32  ;;  %v440_v46 = vunpack.c.l.bf16 %v647_v26  ;;  %v461_v48 = vunpack.c.h.bf16 %v471_v23  ;;  %v133_v55 = vmax.f32 %v111_v33, 0.0 }
  0x23   :  { %v142_v36 = vmax.f32 %v120_v17, 0.0  ;;  %v85_v57 = vmul.f32 %v437_v38, %v661_v32  ;;  %v96_v58 = vmul.f32 %v460_v39, %v661_v32  ;;  %v134_v7 = vmax.f32 %v715_v25, 0.0 }
  0x24   :  { %v124_v26 = vadd.f32 %v677_v47, %v95_v45  ;;  %v145_v8 = vmax.f32 %v123_v31, 0.0 }
  0x25   :  { %492 = vmatpush3.bf16.msra.mxu0 %v512_v18  ;;  %v93_v18 = vmul.f32 %v453_v63, %v661_v32  ;;  %v113_v63 = vadd.f32 %v677_v47, %v84_v44  ;;  %v114_v10 = vadd.f32 %v677_v47, %v85_v57  ;;  %v125_v11 = vadd.f32 %v677_v47, %v96_v58 }
  0x26   :  { %493 = vmatprep.subr.bf16.mxu0 %v540_v13  ;;  %v146_v17 = vmax.f32 %v124_v26, 0.0 }
  0x27   :  { %v122_v37 = vadd.f32 %v677_v47, %v93_v18  ;;  %v136_v23 = vmax.f32 %v114_v10, 0.0  ;;  %v147_v25 = vmax.f32 %v125_v11, 0.0 }
  0x29   :  { %494 = vmatpush3.bf16.msra.mxu0 %v513_v19  ;;  %v127_v19 = vmax.f32 %v105_v0, 0.0  ;;  %v144_v56 = vmax.f32 %v122_v37, 0.0  ;;  %v86_v0 = vmul.f32 %v440_v46, %v661_v32 }
  0x2a   :  { %495 = vmatprep.subr.bf16.mxu0 %v540_v13 }
  0x2d   :  { %496 = vmatpush3.bf16.msra.mxu0 %v514_v20  ;;  %v138_v20 = vmax.f32 %v116_v1, 0.0  ;;  %v97_v1 = vmul.f32 %v461_v48, %v661_v32  ;;  %v115_v32 = vadd.f32 %v677_v47, %v86_v0 }
  0x2f   :  { %v126_v18 = vadd.f32 %v677_v47, %v97_v1  ;;  %v137_v33 = vmax.f32 %v115_v32, 0.0 }
  0x81   :  { %v173_v13 = vpop.permute.xlu1 %172  ;;  %v163_v14 = vpop.permute.xlu0 %162 }
  0x82   :  { %v215_v40 = vmul.f32 %v163_v14, %v127_v19  ;;  %v226_v41 = vmul.f32 %v163_v14, %v138_v20  ;;  %v217_v49 = vmul.f32 %v173_v13, %v129_v4  ;;  %v228_v50 = vmul.f32 %v173_v13, %v140_v5 }
  0x85   :  { %v178_v34 = vpop.permute.xlu1 %177  ;;  %v168_v35 = vpop.permute.xlu0 %167 }
  0x86   :  { %v216_v42 = vmul.f32 %v168_v35, %v128_v22  ;;  %v227_v43 = vmul.f32 %v168_v35, %v139_v16  ;;  %v218_v59 = vmul.f32 %v178_v34, %v130_v15  ;;  %v229_v60 = vmul.f32 %v178_v34, %v141_v21 }
  0x87   :  { %v135_v16 = vmax.f32 %v113_v63, 0.0  ;;  %v148_v34 = vmax.f32 %v126_v18, 0.0 }
  0x88   :  { %v237_v51 = vadd.f32 %v216_v42, %v215_v40  ;;  %v253_v52 = vadd.f32 %v227_v43, %v226_v41 }
  0x89   :  { %v188_v53 = vpop.permute.xlu1 %187  ;;  %v183_v54 = vpop.permute.xlu0 %182 }
  0x8a   :  { %v238_v61 = vadd.f32 %v237_v51, %v217_v49  ;;  %v254_v62 = vadd.f32 %v253_v52, %v228_v50  ;;  %v219_v2 = vmul.f32 %v183_v54, %v131_v30  ;;  %v230_v3 = vmul.f32 %v183_v54, %v142_v36 }
  0x8b   :  { %v220_v12 = vmul.f32 %v188_v53, %v132_v24  ;;  %v231_v13 = vmul.f32 %v188_v53, %v143_v29 }
  0x8c   :  { %v239_v4 = vadd.f32 %v238_v61, %v218_v59  ;;  %v255_v5 = vadd.f32 %v254_v62, %v229_v60 }
  0x8d   :  { %v198_v6 = vpop.permute.xlu1 %197  ;;  %v193_v9 = vpop.permute.xlu0 %192 }
  0x8e   :  { %v240_v14 = vadd.f32 %v239_v4, %v219_v2  ;;  %v256_v15 = vadd.f32 %v255_v5, %v230_v3  ;;  %v221_v19 = vmul.f32 %v193_v9, %v133_v55  ;;  %v232_v20 = vmul.f32 %v193_v9, %v144_v56  ;;  %v409_v5 = vld [vmem:[%s755_s5] ss:$0 sm:$0xff] }
  0x8f   :  { %v222_v28 = vmul.f32 %v198_v6, %v134_v7  ;;  %v233_v30 = vmul.f32 %v198_v6, %v145_v8 }
  0x90   :  { %v241_v21 = vadd.f32 %v240_v14, %v220_v12  ;;  %v257_v22 = vadd.f32 %v256_v15, %v231_v13 }
  0x91   :  { %v203_v27 = vpop.permute.xlu0 %202  ;;  %v208_v29 = vpop.permute.xlu1 %207 }
  0x92   :  { %v242_v31 = vadd.f32 %v241_v21, %v221_v19  ;;  %v258_v24 = vadd.f32 %v257_v22, %v232_v20  ;;  %v223_v35 = vmul.f32 %v203_v27, %v135_v16  ;;  %v234_v36 = vmul.f32 %v203_v27, %v146_v17 }
  0x93   :  { %v224_v47 = vmul.f32 %v208_v29, %v136_v23  ;;  %v235_v40 = vmul.f32 %v208_v29, %v147_v25 }
  0x94   :  { %v243_v37 = vadd.f32 %v242_v31, %v222_v28  ;;  %v259_v38 = vadd.f32 %v258_v24, %v233_v30 }
  0x95   :  { %v213_v39 = vpop.permute.xlu0 %212 }
  0x96   :  { %v244_v41 = vadd.f32 %v243_v37, %v223_v35  ;;  %v260_v42 = vadd.f32 %v259_v38, %v234_v36  ;;  %v225_v43 = vmul.f32 %v213_v39, %v137_v33  ;;  %v236_v44 = vmul.f32 %v213_v39, %v148_v34 }
  0x98   :  { %v245_v45 = vadd.f32 %v244_v41, %v224_v47  ;;  %v261_v46 = vadd.f32 %v260_v42, %v235_v40 }
  0x9a   :  { %v246_v48 = vadd.f32 %v245_v45, %v225_v43  ;;  %v262_v49 = vadd.f32 %v261_v46, %v236_v44 }
  0x9c   :  { %v247_v50 = vrot.slane %v246_v48, 4  ;;  %v263_v51 = vrot.slane %v262_v49, 4 }
  0x9e   :  { %v248_v52 = vadd.f32 %v247_v50, %v246_v48  ;;  %v264_v53 = vadd.f32 %v263_v51, %v262_v49 }
  0xa0   :  { %v249_v54 = vrot.slane %v248_v52, 2  ;;  %v265_v55 = vrot.slane %v264_v53, 2 }
  0xa2   :  { %v250_v56 = vadd.f32 %v249_v54, %v248_v52  ;;  %v266_v57 = vadd.f32 %v265_v55, %v264_v53 }
  0xa4   :  { %v251_v58 = vrot.slane %v250_v56, 1  ;;  %v267_v59 = vrot.slane %v266_v57, 1 }
  0xa6   :  { %v252_v60 = vadd.f32 %v251_v58, %v250_v56  ;;  %v268_v61 = vadd.f32 %v267_v59, %v266_v57 }
  0xa8   :  { %v269_v62 = vmul.f32 0.020408163, %v252_v60  ;;  %v270_v63 = vmul.f32 0.020408163, %v268_v61 }
  0xaa   :  { %v271_v26 = vpack.c.bf16 %v269_v62, %v269_v62  ;;  %v272_v0 = vpack.c.bf16 %v270_v63, %v270_v63 }
  0xac   :  { %v298_v1 = vunpack.c.l.b16 %v271_v26  ;;  %v299_v2 = vunpack.c.l.b16 %v272_v0 }
  0xae   :  { %v301_v3 = vsel %vm300_vm1, %v299_v2, %v298_v1 }
  0xaf   :  { %v302_v4 = vpack.c.b16 %v301_v3, %v301_v3 }
  0xb1   :  { %498 = vmatmul.mubr.bf16.vlgmr.msra.gmra.mrb[0].mxu0 %v302_v4 }
 0x184   :  { %v386_v6 = vpop.f32.mrb[0].mxu0 }
 0x185   :  { %v387_v7 = vadd.f32 %v409_v5, %v386_v6  ;;  %v499_v8 = vpop.f32.mrb[1].mxu0 }
 0x186   :  { %v389_v9 = vpop.f32.mrb[2].mxu0 }
 0x187   :  { %392 = vst [vmem:[#allocation2] sm:$0x3] %v387_v7  ;;  %v500_v10 = vpop.f32.mrb[3].mxu0 }
 0x188   :  { %526 = shalt.err (!%p523_p4)
}
 0x189   :  { %s527_s5 = scalar_lea.hbm %s756_s6, 32 }
 0x18a   :  { %p528_p5 = scmp.ne.s32.totalorder %s756_s6, %s527_s5  ;;  %p531_p6 = scmp.lt.u32.totalorder %s527_s5, %s756_s6 }
 0x18c   :  { %p533_p7 = pnand %p531_p6, %p528_p5 }
 0x18e   :  { %536 = shalt.err (!%p533_p7)
}
 0x18f   :  { %402 = dma.vmem_to_hbm [thread:$0]  %s400_s10, 32, %s756_s6, [#allocation3]  }
 0x190   :  { %537 = dma.done.wait [#allocation3], 32  }
 0x191   :  { %538 = vsyncadd [#allocation3], 4294967264 }
 0x192   :  { %406 = vsyncpa [#allocation3], 1 }

// kernel: densenet_forward.8
= control target key start
LH: loop header
LB: loop body
LE: loop exit
PB: predicated region body
PF: predicated region fallthrough
CT: control target
= control target key end

     0   :  { %s6127_s24 = smov 0   ;;  %s6129_s25 = smov 0   ;;  %s7211_s0 = inlined_call_operand.vmem [shape: f32[2,256,128], index: 0, kind: input, shape index: {}]   ;;  %s7212_s1 = inlined_call_operand.vmem [shape: f32[256,1], index: 1, kind: input, shape index: {}]   ;;  %s7213_s2 = inlined_call_operand.vmem [shape: f32[2,1,128], index: 2, kind: input, shape index: {}]   ;;  %s7214_s3 = inlined_call_operand.vmem [shape: f32[2,1,128], index: 3, kind: input, shape index: {}]   ;;  %s7215_s4 = inlined_call_operand.vmem [shape: bf16[2,128,128], index: 4, kind: input, shape index: {}]   ;;  %s7216_s5 = inlined_call_operand.vmem [shape: f32[2,1,128], index: 5, kind: input, shape index: {}]   ;;  %s7217_s6 = inlined_call_operand.vmem [shape: bf16[2,9,128,128], index: 6, kind: input, shape index: {}]   ;;  %s7218_s7 = inlined_call_operand.vmem [shape: bf16[2,256,128], index: 7, kind: output, shape index: {}]  }
   0x1   :  { %7287 = sst [smem:[#allocation34_spill]] %s7211_s0  ;;  %s6131_s26 = smov 0  }
   0x2   :  { %s6133_s27 = smov 0   ;;  %s6135_s28 = smov 0  }
   0x3 LB: > { %s26_s29 = sadd.s32 1, %s6074_s26  ;;  %s29_s30 = sadd.s32 1, %s6078_s27  ;;  %s6082_s28 = sphi %s6135_s28, %s17_s28   ;;  %s6078_s27 = sphi %s6133_s27, %s7387_s27   ;;  %s6074_s26 = sphi %s6131_s26, %s7386_s26   ;;  %s6070_s25 = sphi %s6129_s25, %s7385_s25   ;;  %s6066_s24 = sphi %s6127_s24, %s7384_s24  }
   0x4   : > { %p27_p0 = scmp.ge.s32.totalorder %s26_s29, 2  ;;  %p4320_p1 = scmp.ge.s32.totalorder %s6082_s28, 1 }
   0x5   : > { %p293_p2 = scmp.lt.s32.totalorder %s6082_s28, 5 }
   0x6   : > { %s7389_s29 = smov (%p27_p0, %s26_s29), 0  ;;  %s7391_s30 = smov (!%p27_p0, %s29_s30), %s6078_s27 }
   0x7   : > { %p294_p3 = pnand %p4320_p1, %p293_p2  ;;  %p31_p4 = scmp.ge.s32.totalorder %s7391_s30, 2 }
   0x9   : > { %s7393_s30 = smov (%p31_p4, %s7391_s30), 0  ;;  %297 = sbr.rel (%p294_p3) target bundleno = 833 (0x341), region = 48 }
   0xa   : > { %7288 = sst [smem:[#allocation3_spill]] %s7393_s30 }
  0x10   : > { %p344_p5 = scmp.lt.s32.totalorder %s6070_s25, 1  ;;  %p349_p6 = scmp.lt.s32.totalorder %s6066_s24, 1 }
  0x11   : > { %s7289_s0 = sld [smem:[#allocation34_spill]]  ;;  %p4328_p7 = scmp.ne.s32.totalorder %s6066_s24, 0 }
  0x12   : > { %s7395_s25 = smov (!%p344_p5, %s6070_s25), 1 }
  0x13   : > { %s6161_s8 = scalar_select %p349_p6, %s6066_s24, 1 }
  0x14   : > { %s4606_s9 = sshll.u32 %s7395_s25, 8  ;;  %s4608_s10 = sshll.u32 %s7395_s25, 7 }
  0x15   : > { %s354_s19 = scalar_lea.vmem %s7214_s3, %s6161_s8  ;;  %s4607_s20 = sshll.u32 %s6161_s8, 6 }
  0x16   : > { %s6180_s23 = scalar_lea.vmem %s7215_s4, %s4607_s20  ;;  %s362_s11 = scalar_lea.vmem %s7216_s5, %s6161_s8 }
  0x17   : > { %s6166_s13 = scalar_lea.vmem %s7289_s0, %s4606_s9  ;;  %s5918_s9 = smul.u32 576, %s6161_s8 }
  0x18   : > { %s6190_s14 = scalar_lea.vmem %s7218_s7, %s4608_s10  ;;  %377 = sbr.rel (%p4328_p7) target bundleno = 39 (0x27), region = 52  ;;  %v378_v0 = vld [vmem:[%s6166_s13] sm:$0xff] (!%p4328_p7)  ;;  %v379_v1 = vld [vmem:[%s6166_s13 + $0x8] sm:$0xff] (!%p4328_p7)  ;;  %v380_v2 = vld [vmem:[%s6166_s13 + $0x10] sm:$0xff] (!%p4328_p7) }
  0x19   : > { %s6195_s17 = scalar_lea.vmem %s7217_s6, %s5918_s9  ;;  %v4676_v3 = vpack.c.bf16 (!%p4328_p7), %v379_v1, %v378_v0  ;;  %v381_v4 = vld [vmem:[%s6166_s13 + $0x18] sm:$0xff] (!%p4328_p7)  ;;  %v382_v5 = vld [vmem:[%s6166_s13 + $0x20] sm:$0xff] (!%p4328_p7)  ;;  %v383_v6 = vld [vmem:[%s6166_s13 + $0x28] sm:$0xff] (!%p4328_p7) }
  0x1a   : > { %v4681_v7 = vpack.c.bf16 (!%p4328_p7), %v381_v4, %v380_v2  ;;  %v4686_v8 = vpack.c.bf16 (!%p4328_p7), %v383_v6, %v382_v5  ;;  %v384_v9 = vld [vmem:[%s6166_s13 + $0x30] sm:$0xff] (!%p4328_p7)  ;;  %v385_v10 = vld [vmem:[%s6166_s13 + $0x38] sm:$0xff] (!%p4328_p7)  ;;  %v386_v11 = vld [vmem:[%s6166_s13 + $0x40] sm:$0xff] (!%p4328_p7) }
  0x1b   : > { %4677 = vst [vmem:[%s6190_s14] sm:$0xff] (!%p4328_p7), %v4676_v3   ;;  %v4691_v12 = vpack.c.bf16 (!%p4328_p7), %v385_v10, %v384_v9  ;;  %v387_v13 = vld [vmem:[%s6166_s13 + $0x48] sm:$0xff] (!%p4328_p7)  ;;  %v388_v14 = vld [vmem:[%s6166_s13 + $0x50] sm:$0xff] (!%p4328_p7)  ;;  %v389_v15 = vld [vmem:[%s6166_s13 + $0x58] sm:$0xff] (!%p4328_p7) }
  0x1c   : > { %4897 = vst [vmem:[%s6190_s14 + $0x8] sm:$0xff] (!%p4328_p7), %v4681_v7   ;;  %4898 = vst [vmem:[%s6190_s14 + $0x10] sm:$0xff] (!%p4328_p7), %v4686_v8   ;;  %v4696_v16 = vpack.c.bf16 (!%p4328_p7), %v387_v13, %v386_v11  ;;  %v4701_v17 = vpack.c.bf16 (!%p4328_p7), %v389_v15, %v388_v14  ;;  %v390_v18 = vld [vmem:[%s6166_s13 + $0x60] sm:$0xff] (!%p4328_p7)  ;;  %v391_v19 = vld [vmem:[%s6166_s13 + $0x68] sm:$0xff] (!%p4328_p7) }
  0x1d   : > { %v392_v20 = vld [vmem:[%s6166_s13 + $0x70] sm:$0xff] (!%p4328_p7)  ;;  %4899 = vst [vmem:[%s6190_s14 + $0x18] sm:$0xff] (!%p4328_p7), %v4691_v12   ;;  %v4706_v21 = vpack.c.bf16 (!%p4328_p7), %v391_v19, %v390_v18  ;;  %v393_v22 = vld [vmem:[%s6166_s13 + $0x78] sm:$0xff] (!%p4328_p7)  ;;  %v394_v23 = vld [vmem:[%s6166_s13 + $0x80] sm:$0xff] (!%p4328_p7) }
  0x1e   : > { %v395_v24 = vld [vmem:[%s6166_s13 + $0x88] sm:$0xff] (!%p4328_p7)  ;;  %4900 = vst [vmem:[%s6190_s14 + $0x20] sm:$0xff] (!%p4328_p7), %v4696_v16   ;;  %4901 = vst [vmem:[%s6190_s14 + $0x28] sm:$0xff] (!%p4328_p7), %v4701_v17   ;;  %v4711_v25 = vpack.c.bf16 (!%p4328_p7), %v393_v22, %v392_v20  ;;  %v396_v27 = vld [vmem:[%s6166_s13 + $0x90] sm:$0xff] (!%p4328_p7) }
  0x1f   : > { %v4716_v26 = vpack.c.bf16 %v395_v24, %v394_v23  ;;  %v397_v28 = vld [vmem:[%s6166_s13 + $0x98] sm:$0xff]  ;;  %v398_v29 = vld [vmem:[%s6166_s13 + $0xa0] sm:$0xff]  ;;  %4902 = vst [vmem:[%s6190_s14 + $0x30] sm:$0xff] %v4706_v21   ;;  %v399_v31 = vld [vmem:[%s6166_s13 + $0xa8] sm:$0xff] }
  0x20   : > { %v4721_v30 = vpack.c.bf16 %v397_v28, %v396_v27  ;;  %v400_v32 = vld [vmem:[%s6166_s13 + $0xb0] sm:$0xff]  ;;  %v401_v33 = vld [vmem:[%s6166_s13 + $0xb8] sm:$0xff]  ;;  %4903 = vst [vmem:[%s6190_s14 + $0x38] sm:$0xff] %v4711_v25   ;;  %v4726_v34 = vpack.c.bf16 %v399_v31, %v398_v29  ;;  %v402_v36 = vld [vmem:[%s6166_s13 + $0xc0] sm:$0xff] }
  0x21   : > { %4904 = vst [vmem:[%s6190_s14 + $0x40] sm:$0xff] %v4716_v26   ;;  %v4731_v35 = vpack.c.bf16 %v401_v33, %v400_v32  ;;  %v403_v37 = vld [vmem:[%s6166_s13 + $0xc8] sm:$0xff]  ;;  %v404_v38 = vld [vmem:[%s6166_s13 + $0xd0] sm:$0xff]  ;;  %v405_v40 = vld [vmem:[%s6166_s13 + $0xd8] sm:$0xff] }
  0x22   : > { %4905 = vst [vmem:[%s6190_s14 + $0x48] sm:$0xff] %v4721_v30   ;;  %v4736_v39 = vpack.c.bf16 %v403_v37, %v402_v36  ;;  %v406_v41 = vld [vmem:[%s6166_s13 + $0xe0] sm:$0xff]  ;;  %v407_v42 = vld [vmem:[%s6166_s13 + $0xe8] sm:$0xff]  ;;  %4906 = vst [vmem:[%s6190_s14 + $0x50] sm:$0xff] %v4726_v34   ;;  %v4741_v43 = vpack.c.bf16 %v405_v40, %v404_v38 }
  0x23   : > { %4907 = vst [vmem:[%s6190_s14 + $0x58] sm:$0xff] %v4731_v35   ;;  %v4746_v44 = vpack.c.bf16 %v407_v42, %v406_v41  ;;  %v408_v45 = vld [vmem:[%s6166_s13 + $0xf0] sm:$0xff]  ;;  %v409_v46 = vld [vmem:[%s6166_s13 + $0xf8] sm:$0xff] }
  0x24   : > { %4908 = vst [vmem:[%s6190_s14 + $0x60] sm:$0xff] %v4736_v39   ;;  %v4751_v47 = vpack.c.bf16 %v409_v46, %v408_v45  ;;  %4909 = vst [vmem:[%s6190_s14 + $0x68] sm:$0xff] %v4741_v43  }
  0x25   : > { %4910 = vst [vmem:[%s6190_s14 + $0x70] sm:$0xff] %v4746_v44  }
  0x26   : > { %4911 = vst [vmem:[%s6190_s14 + $0x78] sm:$0xff] %v4751_v47  }
  0x27 PF: > { %v5963_v48 = vld [vmem:[%s6180_s23] sm:$0xff]   ;;  %v5964_v49 = vld [vmem:[%s6180_s23 + $0x8] sm:$0xff]   ;;  %v6084_v50 = vmov 0   ;;  %v5965_v51 = vld [vmem:[%s6180_s23 + $0x10] sm:$0xff]   ;;  %s7290_s30 = scalar_lea.vmem %s7213_s2, %s6161_s8 }
  0x28   : > { %5961 = vset.pattern.permute.xlu0 %v6084_v50  ;;  %5962 = vset.pattern.permute.xlu1 %v6084_v50  ;;  %v5966_v52 = vld [vmem:[%s6180_s23 + $0x18] sm:$0xff]   ;;  %v6258_v54 = vld [vmem:[%s7290_s30] ss:$0 sm:$0xff]  ;;  %v572_v1 = vld [vmem:[%s7212_s1 + $0x10] sm:$0xff] }
  0x29   : > { %5182 = vmatprep.subr.bf16.mxu0 %v5963_v48  ;;  %v6270_v58 = vld [vmem:[%s354_s19] ss:$0 sm:$0xff]  ;;  %1068 = vperm.xlu1 %5962, %v572_v1   ;;  %v571_v9 = vld [vmem:[%s7212_s1 + $0x8] sm:$0xff]  ;;  %v573_v14 = vld [vmem:[%s7212_s1 + $0x18] sm:$0xff] }
  0x2a   : > { %5183 = vmatpush3.bf16.msra.mxu0 %v5963_v48  ;;  %v6251_v53 = vld [vmem:[%s6190_s14] sm:$0xff]   ;;  %v5968_v15 = vld [vmem:[%s6180_s23 + $0x28] sm:$0xff]   ;;  %v5969_v27 = vld [vmem:[%s6180_s23 + $0x30] sm:$0xff]  }
  0x2b   : > { %5184 = vmatprep.subr.bf16.mxu0 %v5964_v49  ;;  %v7248_v55 = vunpack.c.l.bf16 %v6251_v53  ;;  %v7247_v56 = vunpack.c.h.bf16 %v6251_v53  ;;  %v6263_v57 = vld [vmem:[%s6190_s14 + $0x8] sm:$0xff]   ;;  %v6273_v59 = vld [vmem:[%s6190_s14 + $0x10] sm:$0xff]   ;;  %v570_v0 = vld [vmem:[%s7212_s1] sm:$0xff] }
  0x2c   : > { %v7250_v62 = vunpack.c.l.bf16 %v6263_v57  ;;  %v6283_v63 = vld [vmem:[%s6190_s14 + $0x18] sm:$0xff]   ;;  %v5967_v2 = vld [vmem:[%s6180_s23 + $0x20] sm:$0xff]   ;;  %v7249_v5 = vunpack.c.h.bf16 %v6263_v57  ;;  %v7244_v6 = vunpack.c.l.bf16 %v6273_v59  ;;  %1058 = vperm.xlu0 %5961, %v570_v0   ;;  %v7243_v7 = vunpack.c.h.bf16 %v6273_v59  ;;  %v575_v26 = vld [vmem:[%s7212_s1 + $0x28] sm:$0xff] }
  0x2d   : > { %v673_v60 = vmul.f32 %v7248_v55, %v6258_v54  ;;  %v674_v61 = vmul.f32 %v7247_v56, %v6258_v54  ;;  %v7246_v8 = vunpack.c.l.bf16 %v6283_v63  ;;  %v7245_v13 = vunpack.c.h.bf16 %v6283_v63  ;;  %v6316_v19 = vld [vmem:[%s6190_s14 + $0x20] sm:$0xff]   ;;  %1073 = vperm.xlu1 %5962, %v573_v14   ;;  %v6332_v25 = vld [vmem:[%s6190_s14 + $0x28] sm:$0xff]   ;;  %v6341_v30 = vld [vmem:[%s6190_s14 + $0x30] sm:$0xff]  }
  0x2e   : > { %5185 = vmatpush3.bf16.msra.mxu0 %v5964_v49  ;;  %v675_v12 = vmul.f32 %v7250_v62, %v6258_v54  ;;  %v676_v17 = vmul.f32 %v7249_v5, %v6258_v54  ;;  %v677_v18 = vmul.f32 %v7244_v6, %v6258_v54  ;;  %v678_v20 = vmul.f32 %v7243_v7, %v6258_v54  ;;  %v574_v22 = vld [vmem:[%s7212_s1 + $0x20] sm:$0xff]  ;;  %v6346_v33 = vld [vmem:[%s6190_s14 + $0x38] sm:$0xff]   ;;  %v576_v39 = vld [vmem:[%s7212_s1 + $0x30] sm:$0xff] }
  0x2f   : > { %5186 = vmatprep.subr.bf16.mxu0 %v5965_v51  ;;  %v712_v3 = vadd.f32 %v6270_v58, %v673_v60  ;;  %v713_v4 = vadd.f32 %v6270_v58, %v674_v61  ;;  %v679_v21 = vmul.f32 %v7246_v8, %v6258_v54  ;;  %v680_v24 = vmul.f32 %v7245_v13, %v6258_v54  ;;  %v6355_v38 = vld [vmem:[%s6190_s14 + $0x40] sm:$0xff]   ;;  %v577_v43 = vld [vmem:[%s7212_s1 + $0x38] sm:$0xff]  ;;  %v6377_v49 = vld [vmem:[%s6190_s14 + $0x48] sm:$0xff]  }
  0x30   : > { %1063 = vperm.xlu0 %5961, %v571_v9   ;;  %v714_v23 = vadd.f32 %v6270_v58, %v675_v12  ;;  %v7235_v28 = vunpack.c.l.bf16 %v6316_v19  ;;  %v7234_v29 = vunpack.c.h.bf16 %v6316_v19  ;;  %7291 = vst [vmem:[#allocation4_spill] sm:$0xff] %v6341_v30  ;;  %v715_v31 = vadd.f32 %v6270_v58, %v676_v17  ;;  %7292 = vst [vmem:[#allocation5_spill] sm:$0xff] %v6346_v33  ;;  %v5970_v44 = vld [vmem:[%s6180_s23 + $0x38] sm:$0xff]   ;;  %v578_v50 = vld [vmem:[%s7212_s1 + $0x40] sm:$0xff] }
  0x31   : > { %v744_v10 = vmax.f32 %v712_v3, 0.0  ;;  %v745_v11 = vmax.f32 %v713_v4, 0.0  ;;  %v716_v32 = vadd.f32 %v6270_v58, %v677_v18  ;;  %v717_v34 = vadd.f32 %v6270_v58, %v678_v20  ;;  %7293 = vst [vmem:[#allocation6_spill] sm:$0xff] %v6355_v38  ;;  %1083 = vperm.xlu1 %5962, %v575_v26   ;;  %7294 = vst [vmem:[#allocation7_spill] sm:$0xff] %v6377_v49  ;;  %v6385_v0 = vld [vmem:[%s6190_s14 + $0x50] sm:$0xff]   ;;  %v579_v14 = vld [vmem:[%s7212_s1 + $0x48] sm:$0xff] }
  0x32   : > { %5187 = vmatpush3.bf16.msra.mxu0 %v5965_v51  ;;  %v6350_v35 = vadd.f32 %v6270_v58, %v679_v21  ;;  %v7238_v36 = vunpack.c.l.bf16 %v6332_v25  ;;  %v7237_v37 = vunpack.c.h.bf16 %v6332_v25  ;;  %v746_v40 = vmax.f32 %v714_v23, 0.0  ;;  %7295 = vst [vmem:[#allocation8_spill] sm:$0xff] %v6385_v0  ;;  %v6412_v20 = vld [vmem:[%s6190_s14 + $0x58] sm:$0xff]   ;;  %v580_v21 = vld [vmem:[%s7212_s1 + $0x50] sm:$0xff] }
  0x33   : > { %5188 = vmatprep.subr.bf16.mxu0 %v5966_v52  ;;  %v776_v16 = vpack.c.bf16 %v745_v11, %v744_v10  ;;  %v6361_v41 = vadd.f32 %v6270_v58, %v680_v24  ;;  %v7230_v42 = vunpack.c.l.bf16 %v6341_v30  ;;  %v681_v45 = vmul.f32 %v7235_v28, %v6258_v54  ;;  %7296 = vst [vmem:[#allocation9_spill] sm:$0xff] %v6412_v20  ;;  %v6002_v13 = vld [vmem:[%s6195_s17 + $0x38] sm:$0xff]  }
  0x34   : > { %1078 = vperm.xlu0 %5961, %v574_v22   ;;  %v682_v46 = vmul.f32 %v7234_v29, %v6258_v54  ;;  %v7229_v47 = vunpack.c.h.bf16 %v6341_v30  ;;  %v7233_v48 = vunpack.c.l.bf16 %v6346_v33  ;;  %v747_v51 = vmax.f32 %v715_v31, 0.0 }
  0x35   : > { %5198 = vmatprep.mubr.bf16.mxu0 %v776_v16  ;;  %v7231_v60 = vunpack.c.h.bf16 %v6346_v33  ;;  %v7223_v61 = vunpack.c.l.bf16 %v6355_v38  ;;  %v749_v1 = vmax.f32 %v717_v34, 0.0  ;;  %v683_v3 = vmul.f32 %v7238_v36, %v6258_v54  ;;  %1093 = vperm.xlu1 %5962, %v577_v43   ;;  %v581_v43 = vld [vmem:[%s7212_s1 + $0x58] sm:$0xff]  ;;  %v6025_v33 = vld [vmem:[%s6195_s17 + $0xc8] sm:$0xff]  }
  0x36   : > { %5189 = vmatpush3.bf16.msra.mxu0 %v5966_v52  ;;  %v748_v52 = vmax.f32 %v716_v32, 0.0  ;;  %v684_v4 = vmul.f32 %v7237_v37, %v6258_v54  ;;  %v751_v9 = vmax.f32 %v6361_v41, 0.0  ;;  %v685_v10 = vmul.f32 %v7230_v42, %v6258_v54 }
  0x37   : > { %5190 = vmatprep.subr.bf16.mxu0 %v5967_v2  ;;  %v7220_v11 = vunpack.c.h.bf16 %v6355_v38  ;;  %v7228_v12 = vunpack.c.l.bf16 %v6377_v49  ;;  %v721_v16 = vadd.f32 %v6270_v58, %v682_v46  ;;  %v686_v17 = vmul.f32 %v7229_v47, %v6258_v54 }
  0x38   : > { %1088 = vperm.xlu0 %5961, %v576_v39   ;;  %v687_v18 = vmul.f32 %v7233_v48, %v6258_v54  ;;  %v777_v22 = vpack.c.bf16 %v747_v51, %v746_v40  ;;  %v688_v23 = vmul.f32 %v7231_v60, %v6258_v54  ;;  %v689_v24 = vmul.f32 %v7223_v61, %v6258_v54  ;;  %v582_v51 = vld [vmem:[%s7212_s1 + $0x60] sm:$0xff] }
  0x39   : > { %v7224_v26 = vunpack.c.h.bf16 %v6377_v49  ;;  %v6428_v31 = vadd.f32 %v6270_v58, %v684_v4  ;;  %v7219_v32 = vunpack.c.l.bf16 %v6385_v0  ;;  %v7221_v34 = vunpack.c.h.bf16 %v6385_v0  ;;  %1103 = vperm.xlu1 %5962, %v579_v14   ;;  %v6467_v14 = vld [vmem:[%s6190_s14 + $0x70] sm:$0xff]   ;;  %v6546_v60 = vld [vmem:[%s6190_s14 + $0x60] sm:$0xff]  }
  0x3a   : > { %5191 = vmatpush3.bf16.msra.mxu0 %v5967_v2  ;;  %v750_v2 = vmax.f32 %v6350_v35, 0.0  ;;  %v778_v35 = vpack.c.bf16 %v749_v1, %v748_v52  ;;  %v6433_v39 = vadd.f32 %v6270_v58, %v685_v10  ;;  %v690_v40 = vmul.f32 %v7220_v11, %v6258_v54  ;;  %v583_v10 = vld [vmem:[%s7212_s1 + $0x68] sm:$0xff]  ;;  %7297 = vst [vmem:[#allocation10_spill] sm:$0xff] %v6467_v14 }
  0x3b   : > { %5192 = vmatprep.subr.bf16.mxu0 %v5968_v15  ;;  %v691_v41 = vmul.f32 %v7228_v12, %v6258_v54  ;;  %v753_v46 = vmax.f32 %v721_v16, 0.0  ;;  %v6454_v52 = vadd.f32 %v6270_v58, %v688_v23  ;;  %v6457_v1 = vadd.f32 %v6270_v58, %v689_v24  ;;  %7299 = vst [vmem:[#allocation12_spill] sm:$0xff] %v6546_v60 }
  0x3c   : > { %1098 = vperm.xlu0 %5961, %v578_v50   ;;  %v6448_v50 = vadd.f32 %v6270_v58, %v687_v18  ;;  %v7222_v4 = vunpack.c.l.bf16 %v6412_v20  ;;  %v755_v16 = vmax.f32 %v6428_v31, 0.0  ;;  %v694_v18 = vmul.f32 %v7221_v34, %v6258_v54 }
  0x3d   : > { %1113 = vperm.xlu1 %5962, %v581_v43   ;;  %v6479_v23 = vadd.f32 %v6270_v58, %v690_v40  ;;  %v7225_v24 = vunpack.c.h.bf16 %v6412_v20  ;;  %v779_v31 = vpack.c.bf16 %v751_v9, %v750_v2  ;;  %v760_v40 = vmax.f32 %v6457_v1, 0.0  ;;  %v585_v9 = vld [vmem:[%s7212_s1 + $0x78] sm:$0xff]  ;;  %v595_v1 = vld [vmem:[%s7212_s1 + $0xc8] sm:$0xff] }
  0x3e   : > { %5193 = vmatpush3.bf16.msra.mxu0 %v5968_v15  ;;  %v720_v15 = vadd.f32 %v6270_v58, %v681_v45  ;;  %v758_v34 = vmax.f32 %v6448_v50, 0.0  ;;  %v695_v2 = vmul.f32 %v7222_v4, %v6258_v54  ;;  %v7240_v36 = vunpack.c.l.bf16 %v6546_v60  ;;  %v5971_v50 = vld [vmem:[%s6195_s17 + $0x40] sm:$0xff]  }
  0x3f   : > { %5194 = vmatprep.subr.bf16.mxu0 %v5969_v27 }
  0x40   : > { %v752_v45 = vmax.f32 %v720_v15, 0.0  ;;  %1108 = vperm.xlu0 %5961, %v580_v21   ;;  %v756_v21 = vmax.f32 %v6433_v39, 0.0  ;;  %v759_v39 = vmax.f32 %v6454_v52, 0.0  ;;  %v5972_v52 = vld [vmem:[%s6195_s17 + $0x100] sm:$0xff]  }
  0x41   : > { %1123 = vperm.xlu1 %5962, %v583_v10   ;;  %5422 = vmatprep.subr.bf16.mxu1 %v5972_v52 }
  0x42   : > { %5195 = vmatpush3.bf16.msra.mxu0 %v5969_v27  ;;  %v6425_v27 = vadd.f32 %v6270_v58, %v683_v3  ;;  %v692_v3 = vmul.f32 %v7224_v26, %v6258_v54  ;;  %v6529_v26 = vadd.f32 %v6270_v58, %v695_v2  ;;  %5423 = vmatpush3.bf16.msra.mxu1 %v5972_v52  ;;  %v5991_v52 = vld [vmem:[%s6195_s17] sm:$0xff]  }
  0x43   : > { %5196 = vmatprep.subr.bf16.mxu0 %v5970_v44 }
  0x44   : > { %v754_v15 = vmax.f32 %v6425_v27, 0.0  ;;  %v6486_v27 = vld [vmem:[%s6190_s14 + $0x78] sm:$0xff]   ;;  %1118 = vperm.xlu0 %5961, %v582_v51   ;;  %v696_v51 = vmul.f32 %v7225_v24, %v6258_v54 }
  0x45   : > { %7298 = vst [vmem:[#allocation11_spill] sm:$0xff] %v6486_v27  ;;  %v7232_v61 = vunpack.c.l.bf16 %v6486_v27  ;;  %v7236_v24 = vunpack.c.h.bf16 %v6486_v27  ;;  %1133 = vperm.xlu1 %5962, %v585_v9  }
  0x46   : > { %5197 = vmatpush3.bf16.msra.mxu0 %v5970_v44  ;;  %v6445_v44 = vadd.f32 %v6270_v58, %v686_v17  ;;  %v693_v17 = vmul.f32 %v7219_v32, %v6258_v54  ;;  %v780_v32 = vpack.c.bf16 %v753_v46, %v752_v45  ;;  %v6508_v45 = vadd.f32 %v6270_v58, %v694_v18  ;;  %v586_v18 = vld [vmem:[%s7212_s1 + $0x80] sm:$0xff] }
  0x47   : > { %v7226_v46 = vunpack.c.l.bf16 %v6467_v14  ;;  %v781_v28 = vpack.c.bf16 %v755_v16, %v754_v15  ;;  %v593_v16 = vld [vmem:[%s7212_s1 + $0xb8] sm:$0xff]  ;;  %5230 = vmatprep.subr.bf16.mxu0 %v5971_v50 }
  0x48   : > { %v757_v11 = vmax.f32 %v6445_v44, 0.0  ;;  %v6505_v43 = vadd.f32 %v6270_v58, %v693_v17  ;;  %v7227_v44 = vunpack.c.h.bf16 %v6467_v14  ;;  %v765_v47 = vmax.f32 %v6508_v45, 0.0 }
  0x49   : > { %5199 = vmatmul.mubr.bf16.vlgmr.msra.gmra.mrb[0].mxu0 %v777_v22  ;;  %v6482_v22 = vadd.f32 %v6270_v58, %v691_v41  ;;  %v6496_v41 = vadd.f32 %v6270_v58, %v692_v3  ;;  %v761_v3 = vmax.f32 %v6479_v23, 0.0  ;;  %v701_v17 = vmul.f32 %v7226_v46, %v6258_v54 }
  0x4a   : > { %5202 = vmatprep.mubr.bf16.mxu0 %v778_v35  ;;  %v584_v35 = vld [vmem:[%s7212_s1 + $0x70] sm:$0xff]  ;;  %v702_v10 = vmul.f32 %v7227_v44, %v6258_v54  ;;  %v703_v46 = vmul.f32 %v7232_v61, %v6258_v54  ;;  %v587_v44 = vld [vmem:[%s7212_s1 + $0x88] sm:$0xff]  ;;  %v764_v12 = vmax.f32 %v6505_v43, 0.0  ;;  %5231 = vmatpush3.bf16.msra.mxu0 %v5971_v50  ;;  %v5987_v50 = vld [vmem:[%s6195_s17 + $0x140] sm:$0xff]  }
  0x4b   : > { %v762_v4 = vmax.f32 %v6482_v22, 0.0  ;;  %v763_v23 = vmax.f32 %v6496_v41, 0.0  ;;  %1128 = vperm.xlu0 %5961, %v584_v35   ;;  %v740_v42 = vadd.f32 %v6270_v58, %v701_v17  ;;  %v6543_v35 = vadd.f32 %v6270_v58, %v696_v51  ;;  %v588_v17 = vld [vmem:[%s7212_s1 + $0x90] sm:$0xff]  ;;  %1143 = vperm.xlu1 %5962, %v587_v44  }
  0x4c   : > { %v741_v2 = vadd.f32 %v6270_v58, %v702_v10  ;;  %v742_v61 = vadd.f32 %v6270_v58, %v703_v46  ;;  %v589_v10 = vld [vmem:[%s7212_s1 + $0x98] sm:$0xff]  ;;  %v784_v44 = vpack.c.bf16 %v761_v3, %v760_v40  ;;  %v5976_v22 = vld [vmem:[%s6195_s17 + $0x110] sm:$0xff]  }
  0x4d   : > { %v772_v48 = vmax.f32 %v740_v42, 0.0  ;;  %v782_v42 = vpack.c.bf16 %v757_v11, %v756_v21  ;;  %v767_v46 = vmax.f32 %v6543_v35, 0.0  ;;  %v783_v21 = vpack.c.bf16 %v759_v39, %v758_v34  ;;  %v594_v34 = vld [vmem:[%s7212_s1 + $0xc0] sm:$0xff] }
  0x4e   : > { %v773_v29 = vmax.f32 %v741_v2, 0.0  ;;  %v774_v51 = vmax.f32 %v742_v61, 0.0  ;;  %v6564_v2 = vld [vmem:[%s6190_s14 + $0x68] sm:$0xff]   ;;  %v590_v61 = vld [vmem:[%s7212_s1 + $0xa0] sm:$0xff] }
  0x4f   : > { %1138 = vperm.xlu0 %5961, %v586_v18   ;;  %7300 = vst [vmem:[#allocation13_spill] sm:$0xff] %v6564_v2  ;;  %1153 = vperm.xlu1 %5962, %v589_v10   ;;  %v7241_v15 = vunpack.c.h.bf16 %v6564_v2  ;;  %v5979_v35 = vld [vmem:[%s6195_s17 + $0x60] sm:$0xff]  }
  0x51   : > { %5203 = vmatmul.mubr.bf16.gmra.mrb[4].mxu0 %v779_v31  ;;  %v704_v31 = vmul.f32 %v7236_v24, %v6258_v54  ;;  %v6560_v24 = vpack.c.bf16 %v773_v29, %v772_v48  ;;  %v591_v29 = vld [vmem:[%s7212_s1 + $0xa8] sm:$0xff]  ;;  %v697_v48 = vmul.f32 %v7240_v36, %v6258_v54  ;;  %v700_v10 = vmul.f32 %v7241_v15, %v6258_v54 }
  0x52   : > { %5206 = vmatprep.mubr.bf16.mxu0 %v780_v32  ;;  %v766_v32 = vmax.f32 %v6529_v26, 0.0  ;;  %v5977_v26 = vld [vmem:[%s6195_s17 + $0x58] sm:$0xff]  }
  0x53   : > { %v743_v9 = vadd.f32 %v6270_v58, %v704_v31  ;;  %v7239_v31 = vunpack.c.h.bf16 %v6546_v60  ;;  %1148 = vperm.xlu0 %5961, %v588_v17   ;;  %1163 = vperm.xlu1 %5962, %v591_v29   ;;  %v736_v17 = vadd.f32 %v6270_v58, %v697_v48  ;;  %v739_v3 = vadd.f32 %v6270_v58, %v700_v10  ;;  %v5974_v29 = vld [vmem:[%s6195_s17 + $0x108] sm:$0xff]   ;;  %v597_v48 = vld [vmem:[%s7212_s1 + $0xd8] sm:$0xff] }
  0x54   : > { %5424 = vmatprep.subr.bf16.mxu1 %v5974_v29  ;;  %v787_v41 = vpack.c.bf16 %v767_v46, %v766_v32  ;;  %v5980_v32 = vld [vmem:[%s6195_s17 + $0x120] sm:$0xff]   ;;  %v5981_v46 = vld [vmem:[%s6195_s17 + $0x68] sm:$0xff]   ;;  %v6085_v10 = vmov 0.0  }
  0x55   : > { %v775_v37 = vmax.f32 %v743_v9, 0.0  ;;  %v698_v11 = vmul.f32 %v7239_v31, %v6258_v54  ;;  %v768_v39 = vmax.f32 %v736_v17, 0.0  ;;  %5425 = vmatpush3.bf16.msra.mxu1 %v5974_v29  ;;  %v5984_v17 = vld [vmem:[%s6195_s17 + $0x130] sm:$0xff]   ;;  %1249 = vst [vmem:[#allocation2 + $0x8] sm:$0xff] %v6085_v10  ;;  %1250 = vst [vmem:[#allocation2 + $0x10] sm:$0xff] %v6085_v10  ;;  %v5990_v31 = vld [vmem:[%s6195_s17 + $0x158] sm:$0xff]  }
  0x56   : > { %5426 = vmatprep.subr.bf16.mxu1 %v5976_v22  ;;  %1248 = vst [vmem:[#allocation2] sm:$0xff] %v6085_v10  ;;  %1283 = vst [vmem:[#allocation2 + $0x118] sm:$0xff] %v6085_v10 }
  0x57   : > { %v6571_v18 = vpack.c.bf16 %v775_v37, %v774_v51  ;;  %v7242_v37 = vunpack.c.l.bf16 %v6564_v2  ;;  %1158 = vperm.xlu0 %5961, %v590_v61   ;;  %v737_v9 = vadd.f32 %v6270_v58, %v698_v11  ;;  %1173 = vperm.xlu1 %5962, %v593_v16   ;;  %v5973_v61 = vld [vmem:[%s6195_s17 + $0x48] sm:$0xff]   ;;  %v786_v11 = vpack.c.bf16 %v765_v47, %v764_v12  ;;  %v600_v47 = vld [vmem:[%s7212_s1 + $0xf0] sm:$0xff]  ;;  %v601_v12 = vld [vmem:[%s7212_s1 + $0xf8] sm:$0xff] }
  0x58   : > { %5232 = vmatprep.subr.bf16.mxu0 %v5973_v61  ;;  %v771_v16 = vmax.f32 %v739_v3, 0.0  ;;  %1284 = vst [vmem:[#allocation2 + $0x120] sm:$0xff] %v6085_v10  ;;  %1285 = vst [vmem:[#allocation2 + $0x128] sm:$0xff] %v6085_v10 }
  0x59   : > { %5207 = vmatmul.mubr.bf16.gmra.mrb[8].mxu0 %v781_v28  ;;  %v592_v28 = vld [vmem:[%s7212_s1 + $0xb0] sm:$0xff]  ;;  %v699_v51 = vmul.f32 %v7242_v37, %v6258_v54  ;;  %v769_v40 = vmax.f32 %v737_v9, 0.0  ;;  %5427 = vmatpush3.bf16.msra.mxu1 %v5976_v22  ;;  %v5985_v9 = vld [vmem:[%s6195_s17 + $0x78] sm:$0xff]   ;;  %v5995_v37 = vld [vmem:[%s6195_s17 + $0x168] sm:$0xff]  }
  0x5a   : > { %5210 = vmatprep.mubr.bf16.mxu0 %v782_v42  ;;  %v596_v42 = vld [vmem:[%s7212_s1 + $0xd0] sm:$0xff]  ;;  %5233 = vmatpush3.bf16.msra.mxu0 %v5973_v61 }
  0x5b   : > { %1168 = vperm.xlu0 %5961, %v592_v28   ;;  %v738_v54 = vadd.f32 %v6270_v58, %v699_v51  ;;  %v785_v58 = vpack.c.bf16 %v763_v23, %v762_v4  ;;  %1183 = vperm.xlu1 %5962, %v595_v1   ;;  %v599_v4 = vld [vmem:[%s7212_s1 + $0xe8] sm:$0xff]  ;;  %v788_v43 = vpack.c.bf16 %v769_v40, %v768_v39  ;;  %v5978_v23 = vld [vmem:[%s6195_s17 + $0x118] sm:$0xff]  }
  0x5c   : > { %5428 = vmatprep.subr.bf16.mxu1 %v5978_v23  ;;  %v5986_v51 = vld [vmem:[%s6195_s17 + $0x138] sm:$0xff]  }
  0x5d   : > { %v770_v28 = vmax.f32 %v738_v54, 0.0  ;;  %5429 = vmatpush3.bf16.msra.mxu1 %v5978_v23 }
  0x5e   : > { %5430 = vmatprep.subr.bf16.mxu1 %v5980_v32 }
  0x5f   : > { %1178 = vperm.xlu0 %5961, %v594_v34   ;;  %1193 = vperm.xlu1 %5962, %v597_v48   ;;  %v789_v45 = vpack.c.bf16 %v771_v16, %v770_v28  ;;  %v6086_v34 = vmov 0.0|0.0  }
  0x61   : > { %5211 = vmatmul.mubr.bf16.gmra.mrb[12].mxu0 %v783_v21  ;;  %v598_v21 = vld [vmem:[%s7212_s1 + $0xe0] sm:$0xff]  ;;  %5431 = vmatpush3.bf16.msra.mxu1 %v5980_v32 }
  0x62   : > { %5214 = vmatprep.mubr.bf16.mxu0 %v784_v44  ;;  %v5975_v44 = vld [vmem:[%s6195_s17 + $0x50] sm:$0xff]  }
  0x63   : > { %1188 = vperm.xlu0 %5961, %v596_v42   ;;  %5234 = vmatprep.subr.bf16.mxu0 %v5975_v44 }
  0x64   : > { %5235 = vmatpush3.bf16.msra.mxu0 %v5975_v44  ;;  %1203 = vperm.xlu1 %5962, %v599_v4  }
  0x65   : > { %5236 = vmatprep.subr.bf16.mxu0 %v5977_v26 }
  0x67   : > { %1198 = vperm.xlu0 %5961, %v598_v21  }
  0x68   : > { %1213 = vperm.xlu1 %5962, %v601_v12   ;;  %5237 = vmatpush3.bf16.msra.mxu0 %v5977_v26 }
  0x69   : > { %5215 = vmatmul.mubr.bf16.gmra.mrb[16].mxu0 %v785_v58  ;;  %5238 = vmatprep.subr.bf16.mxu0 %v5979_v35 }
  0x6a   : > { %5218 = vmatprep.mubr.bf16.mxu0 %v786_v11  ;;  %v6687_v11 = vld [vmem:[%s362_s11] ss:$0 sm:$0xff] }
  0x6b   : > { %1208 = vperm.xlu0 %5961, %v600_v47  }
  0x6c   : > { %5239 = vmatpush3.bf16.msra.mxu0 %v5979_v35 }
  0x6d   : > { %5240 = vmatprep.subr.bf16.mxu0 %v5981_v46 }
  0x70   : > { %5241 = vmatpush3.bf16.msra.mxu0 %v5981_v46 }
  0x71   : > { %5219 = vmatmul.mubr.bf16.gmra.mrb[20].mxu0 %v787_v41 }
  0x72   : > { %5222 = vmatprep.mubr.bf16.mxu0 %v788_v43 }
  0x79   : > { %5223 = vmatmul.mubr.bf16.gmra.mrb[24].mxu0 %v789_v45 }
  0x7a   : > { %5226 = vmatprep.mubr.bf16.mxu0 %v6560_v24  ;;  %v5982_v24 = vld [vmem:[%s6195_s17 + $0x128] sm:$0xff]  }
  0x7b   : > { %5432 = vmatprep.subr.bf16.mxu1 %v5982_v24 }
  0x7c   : > { %5433 = vmatpush3.bf16.msra.mxu1 %v5982_v24 }
  0x7d   : > { %5434 = vmatprep.subr.bf16.mxu1 %v5984_v17 }
  0x80   : > { %5435 = vmatpush3.bf16.msra.mxu1 %v5984_v17 }
  0x81   : > { %5227 = vmatmul.mubr.bf16.gmra.mrb[28].mxu0 %v6571_v18  ;;  %v5983_v18 = vld [vmem:[%s6195_s17 + $0x70] sm:$0xff]   ;;  %5436 = vmatprep.subr.bf16.mxu1 %v5986_v51 }
  0x82   : > { %5242 = vmatprep.subr.bf16.mxu0 %v5983_v18  ;;  %5246 = vmatprep.mubr.bf16.mxu0 %v6086_v34 }
  0x83   : > { %5243 = vmatpush3.bf16.msra.mxu0 %v5983_v18 }
  0x84   : > { %5244 = vmatprep.subr.bf16.mxu0 %v5985_v9  ;;  %5437 = vmatpush3.bf16.msra.mxu1 %v5986_v51 }
  0x85   : > { %5470 = vmatprep.subr.bf16.mxu1 %v5987_v50 }
  0x87   : > { %5245 = vmatpush3.bf16.msra.mxu0 %v5985_v9 }
  0x88   : > { %5278 = vmatprep.subr.bf16.mxu0 %v5991_v52 }
  0xa8   : > { %v6664_v39 = vpop.permute.xlu1 %1068 }
  0xab   : > { %v6662_v1 = vpop.permute.xlu0 %1058 }
  0xac   : > { %v6668_v54 = vpop.permute.xlu1 %1073 }
  0xaf   : > { %v6666_v40 = vpop.permute.xlu0 %1063 }
  0xb0   : > { %v6672_v42 = vpop.permute.xlu1 %1083 }
  0xb3   : > { %v6670_v3 = vpop.permute.xlu0 %1078 }
  0xb4   : > { %v6676_v29 = vpop.permute.xlu1 %1093 }
  0xb7   : > { %v6674_v61 = vpop.permute.xlu0 %1088 }
  0xb8   : > { %v6680_v58 = vpop.permute.xlu1 %1103 }
  0xbb   : > { %v6678_v48 = vpop.permute.xlu0 %1098 }
  0xbc   : > { %v6692_v22 = vpop.permute.xlu1 %1113 }
  0xbf   : > { %v6689_v28 = vpop.permute.xlu0 %1108 }
  0xc0   : > { %v6702_v17 = vpop.permute.xlu1 %1123 }
  0xc3   : > { %v6698_v32 = vpop.permute.xlu0 %1118 }
 0x11c   : > { %v5200_v16 = vpop.f32.mrb[0].mxu0 }
 0x11d   : > { %v906_v21 = vadd.f32 %v5200_v16, %v6687_v11  ;;  %v897_v44 = vpop.f32.mrb[1].mxu0 }
 0x11e   : > { %v898_v4 = vadd.f32 %v6687_v11, %v897_v44  ;;  %v5201_v47 = vpop.f32.mrb[2].mxu0 }
 0x11f   : > { %v1026_v12 = vmax.f32 %v906_v21, 0.0  ;;  %v909_v41 = vadd.f32 %v5201_v47, %v6687_v11  ;;  %v900_v43 = vpop.f32.mrb[3].mxu0 }
 0x120   : > { %v1024_v45 = vmax.f32 %v898_v4, 0.0  ;;  %v901_v26 = vadd.f32 %v6687_v11, %v900_v43  ;;  %v5988_v43 = vld [vmem:[%s6195_s17 + $0x148] sm:$0xff]  }
 0x121   : > { %v1218_v23 = vmul.f32 %v6664_v39, %v1026_v12  ;;  %v1027_v35 = vmax.f32 %v909_v41, 0.0 }
 0x122   : > { %v1216_v46 = vmul.f32 %v6662_v1, %v1024_v45  ;;  %v1025_v24 = vmax.f32 %v901_v26, 0.0  ;;  %v5993_v45 = vld [vmem:[%s6195_s17 + $0x8] sm:$0xff]   ;;  %v6710_v26 = vpop.permute.xlu0 %1128 }
 0x123   : > { %1253 = vst [vmem:[#allocation2 + $0x28] sm:$0xff] %v1218_v23  ;;  %v1219_v18 = vmul.f32 %v6668_v54, %v1027_v35 }
 0x124   : > { %1251 = vst [vmem:[#allocation2 + $0x18] sm:$0xff] %v1216_v46  ;;  %v1217_v9 = vmul.f32 %v6666_v40, %v1025_v24  ;;  %v5204_v51 = vpop.f32.mrb[4].mxu0 }
 0x125   : > { %1254 = vst [vmem:[#allocation2 + $0x30] sm:$0xff] %v1219_v18  ;;  %v922_v10 = vadd.f32 %v5204_v51, %v6687_v11  ;;  %v913_v34 = vpop.f32.mrb[5].mxu0  ;;  %v1384_v16 = vpack.c.bf16 %v1219_v18, %v1218_v23 }
 0x126   : > { %1252 = vst [vmem:[#allocation2 + $0x20] sm:$0xff] %v1217_v9  ;;  %v914_v21 = vadd.f32 %v6687_v11, %v913_v34  ;;  %v5205_v44 = vpop.f32.mrb[6].mxu0  ;;  %v1383_v4 = vpack.c.bf16 %v1217_v9, %v1216_v46  ;;  %v6714_v46 = vpop.permute.xlu1 %1133  ;;  %v5989_v34 = vld [vmem:[%s6195_s17 + $0x150] sm:$0xff]  }
 0x127   : > { %v1030_v47 = vmax.f32 %v922_v10, 0.0  ;;  %v925_v12 = vadd.f32 %v5205_v44, %v6687_v11  ;;  %v916_v41 = vpop.f32.mrb[7].mxu0 }
 0x128   : > { %v1028_v35 = vmax.f32 %v914_v21, 0.0  ;;  %v917_v24 = vadd.f32 %v6687_v11, %v916_v41  ;;  %5247 = vmatmul.mubr.bf16.vlgmr.msra.gmra.mrb[32].mxu0 %v1383_v4  ;;  %5438 = vmatprep.mubr.bf16.mxu1 %v1383_v4  ;;  %v5994_v21 = vld [vmem:[%s6195_s17 + $0x10] sm:$0xff]  }
 0x129   : > { %v1222_v23 = vmul.f32 %v6674_v61, %v1030_v47  ;;  %v1031_v18 = vmax.f32 %v925_v12, 0.0  ;;  %5250 = vmatprep.mubr.bf16.mxu0 %v1384_v16  ;;  %5439 = vmatmul.mubr.bf16.vlgmr.msra.gmra.mrb[0].mxu1 %v1384_v16 }
 0x12a   : > { %v1220_v9 = vmul.f32 %v6670_v3, %v1028_v35  ;;  %v1029_v51 = vmax.f32 %v917_v24, 0.0  ;;  %5471 = vmatpush3.bf16.msra.mxu1 %v5987_v50  ;;  %5279 = vmatpush3.bf16.msra.mxu0 %v5991_v52  ;;  %v6722_v50 = vpop.permute.xlu0 %1138  ;;  %v6728_v36 = vpop.permute.xlu1 %1143 }
 0x12b   : > { %1257 = vst [vmem:[#allocation2 + $0x48] sm:$0xff] %v1222_v23  ;;  %v1223_v10 = vmul.f32 %v6676_v29, %v1031_v18  ;;  %5472 = vmatprep.subr.bf16.mxu1 %v5988_v43  ;;  %5280 = vmatprep.subr.bf16.mxu0 %v5993_v45  ;;  %7301 = vst [vmem:[#allocation14_spill] sm:$0xff] %v6722_v50 }
 0x12c   : > { %1255 = vst [vmem:[#allocation2 + $0x38] sm:$0xff] %v1220_v9  ;;  %v1221_v44 = vmul.f32 %v6672_v42, %v1029_v51  ;;  %v5208_v4 = vpop.f32.mrb[8].mxu0  ;;  %7302 = vst [vmem:[#allocation15_spill] sm:$0xff] %v6728_v36 }
 0x12d   : > { %1258 = vst [vmem:[#allocation2 + $0x50] sm:$0xff] %v1223_v10  ;;  %v938_v16 = vadd.f32 %v5208_v4, %v6687_v11  ;;  %v929_v47 = vpop.f32.mrb[9].mxu0  ;;  %v1386_v12 = vpack.c.bf16 %v1223_v10, %v1222_v23  ;;  %v5996_v4 = vld [vmem:[%s6195_s17 + $0x18] sm:$0xff]  }
 0x12e   : > { %1256 = vst [vmem:[#allocation2 + $0x40] sm:$0xff] %v1221_v44  ;;  %v930_v52 = vadd.f32 %v6687_v11, %v929_v47  ;;  %v5209_v41 = vpop.f32.mrb[10].mxu0  ;;  %v1385_v35 = vpack.c.bf16 %v1221_v44, %v1220_v9  ;;  %5473 = vmatpush3.bf16.msra.mxu1 %v5988_v43  ;;  %5281 = vmatpush3.bf16.msra.mxu0 %v5993_v45  ;;  %v5992_v47 = vld [vmem:[%s6195_s17 + $0x160] sm:$0xff]  }
 0x12f   : > { %v1034_v24 = vmax.f32 %v938_v16, 0.0  ;;  %v941_v18 = vadd.f32 %v5209_v41, %v6687_v11  ;;  %v932_v51 = vpop.f32.mrb[11].mxu0  ;;  %5474 = vmatprep.subr.bf16.mxu1 %v5989_v34  ;;  %5282 = vmatprep.subr.bf16.mxu0 %v5994_v21  ;;  %v6736_v41 = vpop.permute.xlu0 %1148 }
 0x130   : > { %v1032_v23 = vmax.f32 %v930_v52, 0.0  ;;  %v933_v10 = vadd.f32 %v6687_v11, %v932_v51  ;;  %5251 = vmatmul.mubr.bf16.gmra.mrb[36].mxu0 %v1385_v35  ;;  %5442 = vmatprep.mubr.bf16.mxu1 %v1385_v35  ;;  %v5997_v52 = vld [vmem:[%s6195_s17 + $0x20] sm:$0xff]   ;;  %7303 = vst [vmem:[#allocation16_spill] sm:$0xff] %v6736_v41 }
 0x131   : > { %v1226_v43 = vmul.f32 %v6689_v28, %v1034_v24  ;;  %v1035_v45 = vmax.f32 %v941_v18, 0.0  ;;  %5254 = vmatprep.mubr.bf16.mxu0 %v1386_v12  ;;  %5443 = vmatmul.mubr.bf16.gmra.mrb[4].mxu1 %v1386_v12  ;;  %v6740_v18 = vpop.permute.xlu1 %1153 }
 0x132   : > { %v1224_v9 = vmul.f32 %v6678_v48, %v1032_v23  ;;  %v1033_v44 = vmax.f32 %v933_v10, 0.0  ;;  %5475 = vmatpush3.bf16.msra.mxu1 %v5989_v34  ;;  %5283 = vmatpush3.bf16.msra.mxu0 %v5994_v21  ;;  %7304 = vst [vmem:[#allocation17_spill] sm:$0xff] %v6740_v18 }
 0x133   : > { %1261 = vst [vmem:[#allocation2 + $0x68] sm:$0xff] %v1226_v43  ;;  %v1227_v16 = vmul.f32 %v6692_v22, %v1035_v45  ;;  %5476 = vmatprep.subr.bf16.mxu1 %v5990_v31  ;;  %5284 = vmatprep.subr.bf16.mxu0 %v5996_v4 }
 0x134   : > { %1259 = vst [vmem:[#allocation2 + $0x58] sm:$0xff] %v1224_v9  ;;  %v1225_v35 = vmul.f32 %v6680_v58, %v1033_v44  ;;  %v5212_v24 = vpop.f32.mrb[12].mxu0 }
 0x135   : > { %1262 = vst [vmem:[#allocation2 + $0x70] sm:$0xff] %v1227_v16  ;;  %v954_v12 = vadd.f32 %v5212_v24, %v6687_v11  ;;  %v945_v34 = vpop.f32.mrb[13].mxu0  ;;  %v1388_v21 = vpack.c.bf16 %v1227_v16, %v1226_v43  ;;  %v5999_v24 = vld [vmem:[%s6195_s17 + $0x28] sm:$0xff]  }
 0x136   : > { %1260 = vst [vmem:[#allocation2 + $0x60] sm:$0xff] %v1225_v35  ;;  %v946_v51 = vadd.f32 %v6687_v11, %v945_v34  ;;  %v5213_v23 = vpop.f32.mrb[14].mxu0  ;;  %v1387_v10 = vpack.c.bf16 %v1225_v35, %v1224_v9  ;;  %5477 = vmatpush3.bf16.msra.mxu1 %v5990_v31  ;;  %5285 = vmatpush3.bf16.msra.mxu0 %v5996_v4  ;;  %v6748_v31 = vpop.permute.xlu0 %1158  ;;  %v6000_v34 = vld [vmem:[%s6195_s17 + $0x30] sm:$0xff]  }
 0x137   : > { %v1038_v45 = vmax.f32 %v954_v12, 0.0  ;;  %v957_v44 = vadd.f32 %v5213_v23, %v6687_v11  ;;  %v948_v15 = vpop.f32.mrb[15].mxu0  ;;  %5478 = vmatprep.subr.bf16.mxu1 %v5992_v47  ;;  %5286 = vmatprep.subr.bf16.mxu0 %v5997_v52  ;;  %7305 = vst [vmem:[#allocation18_spill] sm:$0xff] %v6748_v31 }
 0x138   : > { %v1036_v7 = vmax.f32 %v946_v51, 0.0  ;;  %v949_v43 = vadd.f32 %v6687_v11, %v948_v15  ;;  %5255 = vmatmul.mubr.bf16.gmra.mrb[40].mxu0 %v1387_v10  ;;  %5446 = vmatprep.mubr.bf16.mxu1 %v1387_v10  ;;  %v5998_v15 = vld [vmem:[%s6195_s17 + $0x170] sm:$0xff]   ;;  %v6754_v51 = vpop.permute.xlu1 %1163 }
 0x139   : > { %v1230_v16 = vmul.f32 %v6710_v26, %v1038_v45  ;;  %v1039_v9 = vmax.f32 %v957_v44, 0.0  ;;  %5258 = vmatprep.mubr.bf16.mxu0 %v1388_v21  ;;  %5447 = vmatmul.mubr.bf16.gmra.mrb[8].mxu1 %v1388_v21  ;;  %7306 = vst [vmem:[#allocation19_spill] sm:$0xff] %v6754_v51 }
 0x13a   : > { %v1228_v4 = vmul.f32 %v6698_v32, %v1036_v7  ;;  %v1037_v35 = vmax.f32 %v949_v43, 0.0  ;;  %5479 = vmatpush3.bf16.msra.mxu1 %v5992_v47  ;;  %5287 = vmatpush3.bf16.msra.mxu0 %v5997_v52  ;;  %v6762_v8 = vpop.permute.xlu0 %1168 }
 0x13b   : > { %1265 = vst [vmem:[#allocation2 + $0x88] sm:$0xff] %v1230_v16  ;;  %v1231_v12 = vmul.f32 %v6714_v46, %v1039_v9  ;;  %5480 = vmatprep.subr.bf16.mxu1 %v5995_v37  ;;  %5288 = vmatprep.subr.bf16.mxu0 %v5999_v24  ;;  %7307 = vst [vmem:[#allocation20_spill] sm:$0xff] %v6762_v8 }
 0x13c   : > { %1263 = vst [vmem:[#allocation2 + $0x78] sm:$0xff] %v1228_v4  ;;  %v1229_v23 = vmul.f32 %v6702_v17, %v1037_v35  ;;  %v5216_v21 = vpop.f32.mrb[16].mxu0  ;;  %v6001_v35 = vld [vmem:[%s6195_s17 + $0x178] sm:$0xff]   ;;  %v2761_v2 = vld [vmem:[#allocation2 + $0x69] sm:$0xff] }
 0x13d   : > { %1266 = vst [vmem:[#allocation2 + $0x90] sm:$0xff] %v1231_v12  ;;  %v970_v7 = vadd.f32 %v5216_v21, %v6687_v11  ;;  %v961_v47 = vpop.f32.mrb[17].mxu0  ;;  %v1390_v52 = vpack.c.bf16 %v1231_v12, %v1230_v16 }
 0x13e   : > { %1264 = vst [vmem:[#allocation2 + $0x80] sm:$0xff] %v1229_v23  ;;  %v962_v10 = vadd.f32 %v6687_v11, %v961_v47  ;;  %v5217_v45 = vpop.f32.mrb[18].mxu0  ;;  %v1389_v44 = vpack.c.bf16 %v1229_v23, %v1228_v4  ;;  %5481 = vmatpush3.bf16.msra.mxu1 %v5995_v37  ;;  %5289 = vmatpush3.bf16.msra.mxu0 %v5999_v24  ;;  %v6766_v4 = vpop.permute.xlu1 %1173  ;;  %v6774_v47 = vld [vmem:[%s6195_s17 + $0x80] sm:$0xff]  }
 0x13f   : > { %v1042_v43 = vmax.f32 %v970_v7, 0.0  ;;  %v973_v9 = vadd.f32 %v5217_v45, %v6687_v11  ;;  %v964_v6 = vpop.f32.mrb[19].mxu0  ;;  %5482 = vmatprep.subr.bf16.mxu1 %v5998_v15  ;;  %5290 = vmatprep.subr.bf16.mxu0 %v6000_v34  ;;  %7308 = vst [vmem:[#allocation21_spill] sm:$0xff] %v6766_v4 }
 0x140   : > { %v1040_v21 = vmax.f32 %v962_v10, 0.0  ;;  %v965_v16 = vadd.f32 %v6687_v11, %v964_v6  ;;  %5259 = vmatmul.mubr.bf16.gmra.mrb[44].mxu0 %v1389_v44  ;;  %5450 = vmatprep.mubr.bf16.mxu1 %v1389_v44  ;;  %v6771_v6 = vld [vmem:[%s6195_s17 + $0x180] sm:$0xff]  }
 0x141   : > { %v1234_v37 = vmul.f32 %v6736_v41, %v1042_v43  ;;  %v1043_v24 = vmax.f32 %v973_v9, 0.0  ;;  %5262 = vmatprep.mubr.bf16.mxu0 %v1390_v52  ;;  %5451 = vmatmul.mubr.bf16.gmra.mrb[12].mxu1 %v1390_v52 }
 0x142   : > { %v1232_v12 = vmul.f32 %v6722_v50, %v1040_v21  ;;  %v1041_v23 = vmax.f32 %v965_v16, 0.0  ;;  %5483 = vmatpush3.bf16.msra.mxu1 %v5998_v15  ;;  %5291 = vmatpush3.bf16.msra.mxu0 %v6000_v34  ;;  %v6778_v15 = vpop.permute.xlu0 %1178 }
 0x143   : > { %1269 = vst [vmem:[#allocation2 + $0xa8] sm:$0xff] %v1234_v37  ;;  %v1235_v7 = vmul.f32 %v6740_v18, %v1043_v24  ;;  %5484 = vmatprep.subr.bf16.mxu1 %v6001_v35  ;;  %5292 = vmatprep.subr.bf16.mxu0 %v6002_v13  ;;  %7309 = vst [vmem:[#allocation22_spill] sm:$0xff] %v6778_v15 }
 0x144   : > { %1267 = vst [vmem:[#allocation2 + $0x98] sm:$0xff] %v1232_v12  ;;  %v1233_v10 = vmul.f32 %v6728_v36, %v1041_v23  ;;  %v5220_v52 = vpop.f32.mrb[20].mxu0  ;;  %v6784_v23 = vpop.permute.xlu1 %1183 }
 0x145   : > { %1270 = vst [vmem:[#allocation2 + $0xb0] sm:$0xff] %v1235_v7  ;;  %v986_v45 = vadd.f32 %v5220_v52, %v6687_v11  ;;  %v977_v44 = vpop.f32.mrb[21].mxu0  ;;  %v1392_v43 = vpack.c.bf16 %v1235_v7, %v1234_v37  ;;  %7310 = vst [vmem:[#allocation23_spill] sm:$0xff] %v6784_v23 }
 0x146   : > { %1268 = vst [vmem:[#allocation2 + $0xa0] sm:$0xff] %v1233_v10  ;;  %v978_v34 = vadd.f32 %v6687_v11, %v977_v44  ;;  %v5221_v9 = vpop.f32.mrb[22].mxu0  ;;  %v1391_v21 = vpack.c.bf16 %v1233_v10, %v1232_v12  ;;  %5485 = vmatpush3.bf16.msra.mxu1 %v6001_v35  ;;  %5293 = vmatpush3.bf16.msra.mxu0 %v6002_v13 }
 0x147   : > { %v1046_v16 = vmax.f32 %v986_v45, 0.0  ;;  %v989_v24 = vadd.f32 %v5221_v9, %v6687_v11  ;;  %v980_v56 = vpop.f32.mrb[23].mxu0  ;;  %5518 = vmatprep.subr.bf16.mxu1 %v6771_v6  ;;  %5326 = vmatprep.subr.bf16.mxu0 %v6774_v47  ;;  %v6790_v45 = vpop.permute.xlu0 %1188 }
 0x148   : > { %v1044_v37 = vmax.f32 %v978_v34, 0.0  ;;  %v981_v7 = vadd.f32 %v6687_v11, %v980_v56  ;;  %5263 = vmatmul.mubr.bf16.gmra.mrb[48].mxu0 %v1391_v21  ;;  %5454 = vmatprep.mubr.bf16.mxu1 %v1391_v21  ;;  %7311 = vst [vmem:[#allocation24_spill] sm:$0xff] %v6790_v45 }
 0x149   : > { %v1238_v52 = vmul.f32 %v6762_v8, %v1046_v16  ;;  %v1047_v12 = vmax.f32 %v989_v24, 0.0  ;;  %5266 = vmatprep.mubr.bf16.mxu0 %v1392_v43  ;;  %5455 = vmatmul.mubr.bf16.gmra.mrb[16].mxu1 %v1392_v43  ;;  %v6794_v16 = vpop.permute.xlu1 %1193 }
 0x14a   : > { %v1236_v13 = vmul.f32 %v6748_v31, %v1044_v37  ;;  %v1045_v35 = vmax.f32 %v981_v7, 0.0  ;;  %7312 = vst [vmem:[#allocation25_spill] sm:$0xff] %v6794_v16 }
 0x14b   : > { %1273 = vst [vmem:[#allocation2 + $0xc8] sm:$0xff] %v1238_v52  ;;  %v1239_v10 = vmul.f32 %v6766_v4, %v1047_v12 }
 0x14c   : > { %1271 = vst [vmem:[#allocation2 + $0xb8] sm:$0xff] %v1236_v13  ;;  %v1237_v44 = vmul.f32 %v6754_v51, %v1045_v35  ;;  %v5224_v34 = vpop.f32.mrb[24].mxu0  ;;  %v6018_v51 = vld [vmem:[%s6195_s17 + $0xb8] sm:$0xff]   ;;  %v2769_v4 = vld [vmem:[#allocation2 + $0xa9] sm:$0xff] }
 0x14d   : > { %1274 = vst [vmem:[#allocation2 + $0xd0] sm:$0xff] %v1239_v10  ;;  %v1002_v56 = vadd.f32 %v5224_v34, %v6687_v11  ;;  %v993_v9 = vpop.f32.mrb[25].mxu0  ;;  %v1394_v21 = vpack.c.bf16 %v1239_v10, %v1238_v52  ;;  %v6800_v52 = vpop.permute.xlu0 %1198 }
 0x14e   : > { %1272 = vst [vmem:[#allocation2 + $0xc0] sm:$0xff] %v1237_v44  ;;  %v994_v43 = vadd.f32 %v6687_v11, %v993_v9  ;;  %v5225_v24 = vpop.f32.mrb[26].mxu0  ;;  %v1393_v37 = vpack.c.bf16 %v1237_v44, %v1236_v13  ;;  %7313 = vst [vmem:[#allocation26_spill] sm:$0xff] %v6800_v52  ;;  %v6804_v44 = vpop.permute.xlu1 %1203 }
 0x14f   : > { %v1050_v7 = vmax.f32 %v1002_v56, 0.0  ;;  %v1005_v12 = vadd.f32 %v5225_v24, %v6687_v11  ;;  %v996_v55 = vpop.f32.mrb[27].mxu0  ;;  %7314 = vst [vmem:[#allocation27_spill] sm:$0xff] %v6804_v44 }
 0x150   : > { %v1048_v5 = vmax.f32 %v994_v43, 0.0  ;;  %v997_v35 = vadd.f32 %v6687_v11, %v996_v55  ;;  %5267 = vmatmul.mubr.bf16.gmra.mrb[52].mxu0 %v1393_v37  ;;  %5458 = vmatprep.mubr.bf16.mxu1 %v1393_v37 }
 0x151   : > { %v1242_v34 = vmul.f32 %v6790_v45, %v1050_v7  ;;  %v1051_v62 = vmax.f32 %v1005_v12, 0.0  ;;  %5270 = vmatprep.mubr.bf16.mxu0 %v1394_v21  ;;  %5459 = vmatmul.mubr.bf16.gmra.mrb[20].mxu1 %v1394_v21  ;;  %v6810_v14 = vpop.permute.xlu0 %1208  ;;  %v2765_v45 = vld [vmem:[#allocation2 + $0x89] sm:$0xff] }
 0x152   : > { %v1240_v10 = vmul.f32 %v6778_v15, %v1048_v5  ;;  %v1049_v9 = vmax.f32 %v997_v35, 0.0  ;;  %7315 = vst [vmem:[#allocation28_spill] sm:$0xff] %v6810_v14  ;;  %v6015_v15 = vld [vmem:[%s6195_s17 + $0xa8] sm:$0xff]  }
 0x153   : > { %1277 = vst [vmem:[#allocation2 + $0xe8] sm:$0xff] %v1242_v34  ;;  %v1243_v13 = vmul.f32 %v6794_v16, %v1051_v62 }
 0x154   : > { %1275 = vst [vmem:[#allocation2 + $0xd8] sm:$0xff] %v1240_v10  ;;  %v1241_v55 = vmul.f32 %v6784_v23, %v1049_v9  ;;  %v5228_v56 = vpop.f32.mrb[28].mxu0  ;;  %v2773_v8 = vld [vmem:[#allocation2 + $0xc9] sm:$0xff] }
 0x155   : > { %1278 = vst [vmem:[#allocation2 + $0xf0] sm:$0xff] %v1243_v13  ;;  %v1018_v43 = vadd.f32 %v5228_v56, %v6687_v11  ;;  %v1009_v24 = vpop.f32.mrb[29].mxu0  ;;  %v1396_v37 = vpack.c.bf16 %v1243_v13, %v1242_v34  ;;  %v6814_v34 = vpop.permute.xlu1 %1213 }
 0x156   : > { %1276 = vst [vmem:[#allocation2 + $0xe0] sm:$0xff] %v1241_v55  ;;  %v1010_v21 = vadd.f32 %v6687_v11, %v1009_v24  ;;  %v5229_v7 = vpop.f32.mrb[30].mxu0  ;;  %v1395_v5 = vpack.c.bf16 %v1241_v55, %v1240_v10  ;;  %7316 = vst [vmem:[#allocation29_spill] sm:$0xff] %v6814_v34  ;;  %v1286_v55 = vld [vmem:[#allocation2 + $0x7] sm:$0xff] }
 0x157   : > { %v1054_v12 = vmax.f32 %v1018_v43, 0.0  ;;  %v1021_v35 = vadd.f32 %v5229_v7, %v6687_v11  ;;  %v1012_v62 = vpop.f32.mrb[31].mxu0  ;;  %v1287_v43 = vld [vmem:[#allocation2 + $0xf] sm:$0xff]  ;;  %v2751_v7 = vld [vmem:[#allocation2 + $0x19] sm:$0xff] }
 0x158   : > { %v1052_v27 = vmax.f32 %v1010_v21, 0.0  ;;  %v1013_v9 = vadd.f32 %v6687_v11, %v1012_v62  ;;  %5271 = vmatmul.mubr.bf16.gmra.mrb[56].mxu0 %v1395_v5  ;;  %5462 = vmatprep.mubr.bf16.mxu1 %v1395_v5  ;;  %v2752_v5 = vld [vmem:[#allocation2 + $0x21] sm:$0xff]  ;;  %v1291_v62 = vld [vmem:[#allocation2 + $0x2f] sm:$0xff] }
 0x159   : > { %v1246_v56 = vmul.f32 %v6810_v14, %v1054_v12  ;;  %v1055_v60 = vmax.f32 %v1021_v35, 0.0  ;;  %5274 = vmatprep.mubr.bf16.mxu0 %v1396_v37  ;;  %5463 = vmatmul.mubr.bf16.gmra.mrb[24].mxu1 %v1396_v37  ;;  %v1318_v12 = vpack.c.bf16 %v1287_v43, %v1286_v55  ;;  %v1290_v35 = vld [vmem:[#allocation2 + $0x27] sm:$0xff]  ;;  %v6012_v14 = vld [vmem:[%s6195_s17 + $0x98] sm:$0xff]  }
 0x15a   : > { %v1244_v10 = vmul.f32 %v6800_v52, %v1052_v27  ;;  %v1053_v13 = vmax.f32 %v1013_v9, 0.0  ;;  %v6819_v27 = vpack.c.bf16 %v2752_v5, %v2751_v7  ;;  %v2754_v9 = vld [vmem:[#allocation2 + $0x31] sm:$0xff]  ;;  %v2756_v55 = vld [vmem:[#allocation2 + $0x41] sm:$0xff] }
 0x15b   : > { %1281 = vst [vmem:[#allocation2 + $0x108] sm:$0xff] %v1246_v56  ;;  %v1247_v24 = vmul.f32 %v6814_v34, %v1055_v60  ;;  %v1289_v60 = vld [vmem:[#allocation2 + $0x1f] sm:$0xff]  ;;  %v6009_v5 = vld [vmem:[%s6195_s17 + $0x88] sm:$0xff]  }
 0x15c   : > { %1279 = vst [vmem:[#allocation2 + $0xf8] sm:$0xff] %v1244_v10  ;;  %v1245_v11 = vmul.f32 %v6804_v44, %v1053_v13  ;;  %v2755_v13 = vld [vmem:[#allocation2 + $0x39] sm:$0xff]  ;;  %v1315_v18 = vld [vmem:[#allocation2 + $0xef] sm:$0xff] }
 0x15d   : > { %1282 = vst [vmem:[#allocation2 + $0x110] sm:$0xff] %v1247_v24  ;;  %v2492_v21 = vpack.c.bf16 %v1247_v24, %v1246_v56  ;;  %v1288_v56 = vld [vmem:[#allocation2 + $0x17] sm:$0xff]  ;;  %v6824_v24 = vpack.c.bf16 %v1291_v62, %v1290_v35  ;;  %v6830_v7 = vpack.c.bf16 %v2756_v55, %v2755_v13  ;;  %v1294_v35 = vld [vmem:[#allocation2 + $0x47] sm:$0xff]  ;;  %v1295_v62 = vld [vmem:[#allocation2 + $0x4f] sm:$0xff] }
 0x15e   : > { %1280 = vst [vmem:[#allocation2 + $0x100] sm:$0xff] %v1245_v11  ;;  %v1397_v37 = vpack.c.bf16 %v1245_v11, %v1244_v10  ;;  %v6822_v43 = vpack.c.bf16 %v1289_v60, %v1288_v56  ;;  %v2753_v10 = vld [vmem:[#allocation2 + $0x29] sm:$0xff]  ;;  %v1292_v56 = vld [vmem:[#allocation2 + $0x37] sm:$0xff]  ;;  %v2760_v55 = vld [vmem:[#allocation2 + $0x61] sm:$0xff]  ;;  %v6842_v44 = vpack.c.bf16 %v1295_v62, %v1294_v35 }
 0x15f   : > { %v6826_v11 = vpack.c.bf16 %v2754_v9, %v2753_v10  ;;  %v6010_v60 = vld [vmem:[%s6195_s17 + $0x90] sm:$0xff]   ;;  %v2759_v13 = vld [vmem:[#allocation2 + $0x59] sm:$0xff]  ;;  %v1314_v36 = vld [vmem:[#allocation2 + $0xe7] sm:$0xff] }
 0x160   : > { %5275 = vmatmul.mubr.bf16.gmra.mrb[60].mxu0 %v1397_v37  ;;  %5466 = vmatprep.mubr.bf16.mxu1 %v1397_v37  ;;  %v6005_v37 = vld [vmem:[%s6195_s17 + $0x190] sm:$0xff]   ;;  %v6848_v52 = vpack.c.bf16 %v2760_v55, %v2759_v13  ;;  %v6013_v35 = vld [vmem:[%s6195_s17 + $0xa0] sm:$0xff]  }
 0x161   : > { %5467 = vmatmul.mubr.bf16.gmra.mrb[28].mxu1 %v2492_v21  ;;  %5294 = vmatprep.mubr.bf16.mxu0 %v1318_v12  ;;  %v6004_v21 = vld [vmem:[%s6195_s17 + $0x188] sm:$0xff]   ;;  %v1293_v12 = vld [vmem:[#allocation2 + $0x3f] sm:$0xff]  ;;  %v2758_v9 = vld [vmem:[#allocation2 + $0x51] sm:$0xff] }
 0x162   : > { %5486 = vmatprep.mubr.bf16.mxu1 %v6819_v27  ;;  %v6840_v10 = vpack.c.bf16 %v1293_v12, %v1292_v56  ;;  %v6008_v12 = vld [vmem:[%s6195_s17 + $0x1a0] sm:$0xff]   ;;  %v1299_v62 = vld [vmem:[#allocation2 + $0x6f] sm:$0xff]  ;;  %v1296_v56 = vld [vmem:[#allocation2 + $0x57] sm:$0xff] }
 0x163   : > { %v2763_v13 = vld [vmem:[#allocation2 + $0x79] sm:$0xff]  ;;  %v2764_v55 = vld [vmem:[#allocation2 + $0x81] sm:$0xff] }
 0x164   : > { %v6864_v16 = vpack.c.bf16 %v2764_v55, %v2763_v13  ;;  %v2768_v13 = vld [vmem:[#allocation2 + $0xa1] sm:$0xff]  ;;  %v2781_v30 = vld [vmem:[#allocation2 + $0x109] sm:$0xff] }
 0x165   : > { %v1313_v49 = vld [vmem:[#allocation2 + $0xdf] sm:$0xff] }
 0x166   : > { %v2779_v50 = vld [vmem:[#allocation2 + $0xf9] sm:$0xff] }
 0x167   : > { %v1317_v41 = vld [vmem:[#allocation2 + $0xff] sm:$0xff] }
 0x168   : > { %5295 = vmatmul.mubr.bf16.vlgmr.msra.gmra.mrb[32].mxu0 %v6822_v43 }
 0x169   : > { %5298 = vmatprep.mubr.bf16.mxu0 %v6824_v24  ;;  %5487 = vmatmul.mubr.bf16.vlgmr.msra.gmra.mrb[0].mxu1 %v6826_v11 }
 0x16a   : > { %5519 = vmatpush3.bf16.msra.mxu1 %v6771_v6  ;;  %5490 = vmatprep.mubr.bf16.mxu1 %v6830_v7  ;;  %v2757_v6 = vld [vmem:[#allocation2 + $0x49] sm:$0xff] }
 0x16b   : > { %5520 = vmatprep.subr.bf16.mxu1 %v6004_v21  ;;  %5327 = vmatpush3.bf16.msra.mxu0 %v6774_v47  ;;  %v6844_v34 = vpack.c.bf16 %v2758_v9, %v2757_v6  ;;  %v6006_v47 = vld [vmem:[%s6195_s17 + $0x198] sm:$0xff]  }
 0x16c   : > { %5328 = vmatprep.subr.bf16.mxu0 %v6009_v5  ;;  %v2762_v9 = vld [vmem:[#allocation2 + $0x71] sm:$0xff] }
 0x16d   : > { %v6860_v23 = vpack.c.bf16 %v2762_v9, %v2761_v2  ;;  %v6014_v2 = vld [vmem:[%s6195_s17 + $0x1b0] sm:$0xff]  }
 0x16e   : > { %5521 = vmatpush3.bf16.msra.mxu1 %v6004_v21  ;;  %v1297_v21 = vld [vmem:[#allocation2 + $0x5f] sm:$0xff]  ;;  %v1300_v9 = vld [vmem:[#allocation2 + $0x77] sm:$0xff] }
 0x16f   : > { %5522 = vmatprep.subr.bf16.mxu1 %v6005_v37  ;;  %5329 = vmatpush3.bf16.msra.mxu0 %v6009_v5  ;;  %v1298_v5 = vld [vmem:[#allocation2 + $0x67] sm:$0xff]  ;;  %v6856_v6 = vpack.c.bf16 %v1297_v21, %v1296_v56  ;;  %v6016_v21 = vld [vmem:[%s6195_s17 + $0xb0] sm:$0xff]   ;;  %v2767_v56 = vld [vmem:[#allocation2 + $0x99] sm:$0xff] }
 0x170   : > { %5299 = vmatmul.mubr.bf16.gmra.mrb[36].mxu0 %v6840_v10  ;;  %5330 = vmatprep.subr.bf16.mxu0 %v6010_v60  ;;  %v6880_v20 = vpack.c.bf16 %v2768_v13, %v2767_v56  ;;  %v2772_v56 = vld [vmem:[#allocation2 + $0xc1] sm:$0xff] }
 0x171   : > { %5302 = vmatprep.mubr.bf16.mxu0 %v6842_v44  ;;  %5491 = vmatmul.mubr.bf16.gmra.mrb[4].mxu1 %v6844_v34 }
 0x172   : > { %5494 = vmatprep.mubr.bf16.mxu1 %v6848_v52  ;;  %5523 = vmatpush3.bf16.msra.mxu1 %v6005_v37  ;;  %v6858_v37 = vpack.c.bf16 %v1299_v62, %v1298_v5  ;;  %v1303_v5 = vld [vmem:[#allocation2 + $0x8f] sm:$0xff] }
 0x173   : > { %5524 = vmatprep.subr.bf16.mxu1 %v6006_v47  ;;  %5331 = vmatpush3.bf16.msra.mxu0 %v6010_v60  ;;  %v6011_v60 = vld [vmem:[%s6195_s17 + $0x1a8] sm:$0xff]   ;;  %v2766_v62 = vld [vmem:[#allocation2 + $0x91] sm:$0xff] }
 0x174   : > { %5332 = vmatprep.subr.bf16.mxu0 %v6012_v14 }
 0x176   : > { %5525 = vmatpush3.bf16.msra.mxu1 %v6006_v47  ;;  %v1301_v47 = vld [vmem:[#allocation2 + $0x7f] sm:$0xff] }
 0x177   : > { %5526 = vmatprep.subr.bf16.mxu1 %v6008_v12  ;;  %5333 = vmatpush3.bf16.msra.mxu0 %v6012_v14  ;;  %v1302_v14 = vld [vmem:[#allocation2 + $0x87] sm:$0xff]  ;;  %v6872_v55 = vpack.c.bf16 %v1301_v47, %v1300_v9  ;;  %v2771_v9 = vld [vmem:[#allocation2 + $0xb9] sm:$0xff] }
 0x178   : > { %5303 = vmatmul.mubr.bf16.gmra.mrb[40].mxu0 %v6856_v6  ;;  %5334 = vmatprep.subr.bf16.mxu0 %v6013_v35  ;;  %v6874_v0 = vpack.c.bf16 %v1303_v5, %v1302_v14  ;;  %v1306_v47 = vld [vmem:[#allocation2 + $0xa7] sm:$0xff]  ;;  %v1307_v14 = vld [vmem:[#allocation2 + $0xaf] sm:$0xff] }
 0x179   : > { %5306 = vmatprep.mubr.bf16.mxu0 %v6858_v37  ;;  %5495 = vmatmul.mubr.bf16.gmra.mrb[8].mxu1 %v6860_v23  ;;  %v2770_v5 = vld [vmem:[#allocation2 + $0xb1] sm:$0xff]  ;;  %v6894_v31 = vpack.c.bf16 %v1307_v14, %v1306_v47 }
 0x17a   : > { %5498 = vmatprep.mubr.bf16.mxu1 %v6864_v16  ;;  %5527 = vmatpush3.bf16.msra.mxu1 %v6008_v12  ;;  %v6876_v12 = vpack.c.bf16 %v2766_v62, %v2765_v45  ;;  %v6887_v45 = vld [vmem:[%s6195_s17 + $0x1c0] sm:$0xff]   ;;  %v1304_v62 = vld [vmem:[#allocation2 + $0x97] sm:$0xff]  ;;  %v1311_v47 = vld [vmem:[#allocation2 + $0xcf] sm:$0xff] }
 0x17b   : > { %5528 = vmatprep.subr.bf16.mxu1 %v6011_v60  ;;  %5335 = vmatpush3.bf16.msra.mxu0 %v6013_v35  ;;  %v6017_v35 = vld [vmem:[%s6195_s17 + $0x1b8] sm:$0xff]  }
 0x17c   : > { %5336 = vmatprep.subr.bf16.mxu0 %v6015_v15  ;;  %v1308_v14 = vld [vmem:[#allocation2 + $0xb7] sm:$0xff] }
 0x17e   : > { %5529 = vmatpush3.bf16.msra.mxu1 %v6011_v60  ;;  %v1305_v60 = vld [vmem:[#allocation2 + $0x9f] sm:$0xff] }
 0x17f   : > { %5530 = vmatprep.subr.bf16.mxu1 %v6014_v2  ;;  %5337 = vmatpush3.bf16.msra.mxu0 %v6015_v15  ;;  %v6890_v15 = vld [vmem:[%s6195_s17 + $0xc0] sm:$0xff]   ;;  %v6892_v13 = vpack.c.bf16 %v1305_v60, %v1304_v62 }
 0x180   : > { %5307 = vmatmul.mubr.bf16.gmra.mrb[44].mxu0 %v6872_v55  ;;  %5338 = vmatprep.subr.bf16.mxu0 %v6016_v21  ;;  %v1310_v60 = vld [vmem:[#allocation2 + $0xc7] sm:$0xff] }
 0x181   : > { %5310 = vmatprep.mubr.bf16.mxu0 %v6874_v0  ;;  %5499 = vmatmul.mubr.bf16.gmra.mrb[12].mxu1 %v6876_v12 }
 0x182   : > { %5502 = vmatprep.mubr.bf16.mxu1 %v6880_v20  ;;  %5531 = vmatpush3.bf16.msra.mxu1 %v6014_v2  ;;  %v6896_v2 = vpack.c.bf16 %v2770_v5, %v2769_v4  ;;  %v2774_v4 = vld [vmem:[#allocation2 + $0xd1] sm:$0xff]  ;;  %v2776_v5 = vld [vmem:[#allocation2 + $0xe1] sm:$0xff] }
 0x183   : > { %5532 = vmatprep.subr.bf16.mxu1 %v6017_v35  ;;  %5339 = vmatpush3.bf16.msra.mxu0 %v6016_v21  ;;  %v6900_v21 = vpack.c.bf16 %v2772_v56, %v2771_v9  ;;  %v6908_v9 = vpack.c.bf16 %v1311_v47, %v1310_v60  ;;  %v6910_v56 = vpack.c.bf16 %v2774_v4, %v2773_v8  ;;  %v2780_v60 = vld [vmem:[#allocation2 + $0x101] sm:$0xff]  ;;  %v2777_v8 = vld [vmem:[#allocation2 + $0xe9] sm:$0xff] }
 0x184   : > { %5340 = vmatprep.subr.bf16.mxu0 %v6018_v51  ;;  %v6920_v4 = vpack.c.bf16 %v1315_v18, %v1314_v36  ;;  %v2782_v36 = vld [vmem:[#allocation2 + $0x111] sm:$0xff] }
 0x185   : > { %v1316_v18 = vld [vmem:[#allocation2 + $0xf7] sm:$0xff] }
 0x186   : > { %5533 = vmatpush3.bf16.msra.mxu1 %v6017_v35  ;;  %v1309_v35 = vld [vmem:[#allocation2 + $0xbf] sm:$0xff] }
 0x187   : > { %5341 = vmatpush3.bf16.msra.mxu0 %v6018_v51  ;;  %5566 = vmatprep.subr.bf16.mxu1 %v6887_v45  ;;  %v2775_v51 = vld [vmem:[#allocation2 + $0xd9] sm:$0xff]  ;;  %v6906_v62 = vpack.c.bf16 %v1309_v35, %v1308_v14  ;;  %v2778_v35 = vld [vmem:[#allocation2 + $0xf1] sm:$0xff] }
 0x188   : > { %5311 = vmatmul.mubr.bf16.gmra.mrb[48].mxu0 %v6892_v13  ;;  %5374 = vmatprep.subr.bf16.mxu0 %v6890_v15  ;;  %v6913_v38 = vpack.c.bf16 %v2776_v5, %v2775_v51  ;;  %v1312_v14 = vld [vmem:[#allocation2 + $0xd7] sm:$0xff]  ;;  %v6922_v51 = vpack.c.bf16 %v2778_v35, %v2777_v8  ;;  %v6925_v5 = vpack.c.bf16 %v2780_v60, %v2779_v50  ;;  %v6020_v60 = vld [vmem:[%s6195_s17 + $0x1c8] sm:$0xff]  }
 0x189   : > { %5314 = vmatprep.mubr.bf16.mxu0 %v6894_v31  ;;  %5503 = vmatmul.mubr.bf16.gmra.mrb[16].mxu1 %v6896_v2  ;;  %v6918_v47 = vpack.c.bf16 %v1313_v49, %v1312_v14  ;;  %v1833_v49 = vld [vmem:[#allocation2 + $0x9] sm:$0xff]  ;;  %v1834_v14 = vld [vmem:[#allocation2 + $0x11] sm:$0xff]  ;;  %v6930_v35 = vpack.c.bf16 %v1317_v41, %v1316_v18  ;;  %v6932_v50 = vpack.c.bf16 %v2782_v36, %v2781_v30  ;;  %v3088_v18 = vld [vmem:[#allocation2 + $0x11f] sm:$0xff] }
 0x18a   : > { %5506 = vmatprep.mubr.bf16.mxu1 %v6900_v21  ;;  %v1865_v8 = vpack.c.bf16 %v1834_v14, %v1833_v49  ;;  %v6021_v30 = vld [vmem:[%s6195_s17 + $0x1d0] sm:$0xff]   ;;  %v6034_v14 = vld [vmem:[%s6195_s17 + $0xf8] sm:$0xff]  }
 0x18b   : > { %v6026_v41 = vld [vmem:[%s6195_s17 + $0xd0] sm:$0xff]  }
 0x18c   : > { %v6032_v49 = vld [vmem:[%s6195_s17 + $0xf0] sm:$0xff]  }
 0x190   : > { %5315 = vmatmul.mubr.bf16.gmra.mrb[52].mxu0 %v6906_v62 }
 0x191   : > { %5318 = vmatprep.mubr.bf16.mxu0 %v6908_v9  ;;  %5507 = vmatmul.mubr.bf16.gmra.mrb[20].mxu1 %v6910_v56 }
 0x192   : > { %5510 = vmatprep.mubr.bf16.mxu1 %v6913_v38 }
 0x198   : > { %5319 = vmatmul.mubr.bf16.gmra.mrb[56].mxu0 %v6918_v47 }
 0x199   : > { %5322 = vmatprep.mubr.bf16.mxu0 %v6920_v4  ;;  %5511 = vmatmul.mubr.bf16.gmra.mrb[24].mxu1 %v6922_v51 }
 0x19a   : > { %5514 = vmatprep.mubr.bf16.mxu1 %v6925_v5 }
 0x1a0   : > { %5323 = vmatmul.mubr.bf16.gmra.mrb[60].mxu0 %v6930_v35 }
 0x1a1   : > { %5342 = vmatprep.mubr.bf16.mxu0 %v1865_v8  ;;  %5515 = vmatmul.mubr.bf16.gmra.mrb[28].mxu1 %v6932_v50  ;;  %v3364_v8 = vld [vmem:[#allocation2 + $0x30] sm:$0xff] }
 0x1a2   : > { %5534 = vmatprep.mubr.bf16.mxu1 %v6824_v24 }
 0x1a8   : > { %5343 = vmatmul.mubr.bf16.vlgmr.msra.gmra.mrb[32].mxu0 %v6819_v27  ;;  %v6022_v27 = vld [vmem:[%s6195_s17 + $0x1d8] sm:$0xff]  }
 0x1a9   : > { %5346 = vmatprep.mubr.bf16.mxu0 %v6826_v11  ;;  %5535 = vmatmul.mubr.bf16.vlgmr.msra.gmra.mrb[0].mxu1 %v6840_v10  ;;  %v6028_v11 = vld [vmem:[%s6195_s17 + $0xd8] sm:$0xff]  }
 0x1aa   : > { %5567 = vmatpush3.bf16.msra.mxu1 %v6887_v45  ;;  %5538 = vmatprep.mubr.bf16.mxu1 %v6842_v44  ;;  %v6024_v45 = vld [vmem:[%s6195_s17 + $0x1e0] sm:$0xff]  }
 0x1ab   : > { %5568 = vmatprep.subr.bf16.mxu1 %v6020_v60  ;;  %5375 = vmatpush3.bf16.msra.mxu0 %v6890_v15  ;;  %v6029_v15 = vld [vmem:[%s6195_s17 + $0xe0] sm:$0xff]  }
 0x1ac   : > { %5376 = vmatprep.subr.bf16.mxu0 %v6025_v33 }
 0x1ae   : > { %5569 = vmatpush3.bf16.msra.mxu1 %v6020_v60 }
 0x1af   : > { %5570 = vmatprep.subr.bf16.mxu1 %v6021_v30  ;;  %5377 = vmatpush3.bf16.msra.mxu0 %v6025_v33  ;;  %v6027_v33 = vld [vmem:[%s6195_s17 + $0x1e8] sm:$0xff]  }
 0x1b0   : > { %5347 = vmatmul.mubr.bf16.gmra.mrb[36].mxu0 %v6830_v7  ;;  %5378 = vmatprep.subr.bf16.mxu0 %v6026_v41  ;;  %v6030_v7 = vld [vmem:[%s6195_s17 + $0x1f0] sm:$0xff]  }
 0x1b1   : > { %5350 = vmatprep.mubr.bf16.mxu0 %v6844_v34  ;;  %5539 = vmatmul.mubr.bf16.gmra.mrb[4].mxu1 %v6856_v6  ;;  %v6031_v34 = vld [vmem:[%s6195_s17 + $0xe8] sm:$0xff]  }
 0x1b2   : > { %5542 = vmatprep.mubr.bf16.mxu1 %v6858_v37  ;;  %5571 = vmatpush3.bf16.msra.mxu1 %v6021_v30  ;;  %v3363_v30 = vld [vmem:[#allocation2 + $0x28] sm:$0xff] }
 0x1b3   : > { %5572 = vmatprep.subr.bf16.mxu1 %v6022_v27  ;;  %5379 = vmatpush3.bf16.msra.mxu0 %v6026_v41  ;;  %v3395_v41 = vpack.c.bf16 %v3364_v8, %v3363_v30  ;;  %v3373_v8 = vld [vmem:[#allocation2 + $0x78] sm:$0xff]  ;;  %v3375_v30 = vld [vmem:[#allocation2 + $0x88] sm:$0xff] }
 0x1b4   : > { %5380 = vmatprep.subr.bf16.mxu0 %v6028_v11 }
 0x1b6   : > { %5573 = vmatpush3.bf16.msra.mxu1 %v6022_v27  ;;  %v3366_v27 = vld [vmem:[#allocation2 + $0x40] sm:$0xff] }
 0x1b7   : > { %5574 = vmatprep.subr.bf16.mxu1 %v6024_v45  ;;  %5381 = vmatpush3.bf16.msra.mxu0 %v6028_v11  ;;  %v3368_v11 = vld [vmem:[#allocation2 + $0x50] sm:$0xff] }
 0x1b8   : > { %5351 = vmatmul.mubr.bf16.gmra.mrb[40].mxu0 %v6848_v52  ;;  %5382 = vmatprep.subr.bf16.mxu0 %v6029_v15  ;;  %v6033_v52 = vld [vmem:[%s6195_s17 + $0x1f8] sm:$0xff]  }
 0x1b9   : > { %5354 = vmatprep.mubr.bf16.mxu0 %v6860_v23  ;;  %5543 = vmatmul.mubr.bf16.gmra.mrb[8].mxu1 %v6872_v55  ;;  %v6035_v23 = vld [vmem:[%s6195_s17 + $0x200] sm:$0xff]  }
 0x1ba   : > { %5546 = vmatprep.mubr.bf16.mxu1 %v6874_v0  ;;  %5575 = vmatpush3.bf16.msra.mxu1 %v6024_v45  ;;  %v3365_v45 = vld [vmem:[#allocation2 + $0x38] sm:$0xff] }
 0x1bb   : > { %5576 = vmatprep.subr.bf16.mxu1 %v6027_v33  ;;  %5383 = vmatpush3.bf16.msra.mxu0 %v6029_v15  ;;  %v3396_v15 = vpack.c.bf16 %v3366_v27, %v3365_v45  ;;  %v3378_v27 = vld [vmem:[#allocation2 + $0xa0] sm:$0xff]  ;;  %v3377_v45 = vld [vmem:[#allocation2 + $0x98] sm:$0xff] }
 0x1bc   : > { %5384 = vmatprep.subr.bf16.mxu0 %v6031_v34 }
 0x1be   : > { %5577 = vmatpush3.bf16.msra.mxu1 %v6027_v33  ;;  %v3367_v33 = vld [vmem:[#allocation2 + $0x48] sm:$0xff] }
 0x1bf   : > { %5578 = vmatprep.subr.bf16.mxu1 %v6030_v7  ;;  %5385 = vmatpush3.bf16.msra.mxu0 %v6031_v34  ;;  %v6036_v34 = vld [vmem:[%s6195_s17 + $0x208] sm:$0xff]  }
 0x1c0   : > { %5355 = vmatmul.mubr.bf16.gmra.mrb[44].mxu0 %v6864_v16  ;;  %5386 = vmatprep.subr.bf16.mxu0 %v6032_v49  ;;  %v3085_v16 = vld [vmem:[#allocation2 + $0x107] sm:$0xff] }
 0x1c1   : > { %5358 = vmatprep.mubr.bf16.mxu0 %v6876_v12  ;;  %5547 = vmatmul.mubr.bf16.gmra.mrb[12].mxu1 %v6892_v13  ;;  %v3086_v12 = vld [vmem:[#allocation2 + $0x10f] sm:$0xff] }
 0x1c2   : > { %5550 = vmatprep.mubr.bf16.mxu1 %v6894_v31  ;;  %5579 = vmatpush3.bf16.msra.mxu1 %v6030_v7  ;;  %v6979_v36 = vpack.c.bf16 %v3086_v12, %v3085_v16  ;;  %v3397_v7 = vpack.c.bf16 %v3368_v11, %v3367_v33  ;;  %v3371_v12 = vld [vmem:[#allocation2 + $0x68] sm:$0xff]  ;;  %v3380_v11 = vld [vmem:[#allocation2 + $0xb0] sm:$0xff] }
 0x1c3   : > { %5580 = vmatprep.subr.bf16.mxu1 %v6033_v52  ;;  %5387 = vmatpush3.bf16.msra.mxu0 %v6032_v49  ;;  %v3370_v49 = vld [vmem:[#allocation2 + $0x60] sm:$0xff]  ;;  %v3379_v33 = vld [vmem:[#allocation2 + $0xa8] sm:$0xff] }
 0x1c4   : > { %5388 = vmatprep.subr.bf16.mxu0 %v6034_v14 }
 0x1c6   : > { %5581 = vmatpush3.bf16.msra.mxu1 %v6033_v52  ;;  %v3372_v52 = vld [vmem:[#allocation2 + $0x70] sm:$0xff] }
 0x1c7   : > { %5389 = vmatpush3.bf16.msra.mxu0 %v6034_v14  ;;  %5614 = vmatprep.subr.bf16.mxu1 %v6035_v23  ;;  %v3369_v14 = vld [vmem:[#allocation2 + $0x58] sm:$0xff] }
 0x1c8   : > { %5359 = vmatmul.mubr.bf16.gmra.mrb[48].mxu0 %v6880_v20  ;;  %v3087_v20 = vld [vmem:[#allocation2 + $0x117] sm:$0xff]  ;;  %v3398_v16 = vpack.c.bf16 %v3370_v49, %v3369_v14 }
 0x1c9   : > { %5362 = vmatprep.mubr.bf16.mxu0 %v6896_v2  ;;  %5551 = vmatmul.mubr.bf16.gmra.mrb[16].mxu1 %v6906_v62  ;;  %v3104_v60 = vpack.c.bf16 %v3088_v18, %v3087_v20  ;;  %v6038_v20 = vld [vmem:[%s6195_s17 + $0x218] sm:$0xff]   ;;  %v3376_v18 = vld [vmem:[#allocation2 + $0x90] sm:$0xff] }
 0x1ca   : > { %5554 = vmatprep.mubr.bf16.mxu1 %v6908_v9 }
 0x1d0   : > { %5363 = vmatmul.mubr.bf16.gmra.mrb[52].mxu0 %v6900_v21 }
 0x1d1   : > { %5366 = vmatprep.mubr.bf16.mxu0 %v6910_v56  ;;  %5555 = vmatmul.mubr.bf16.gmra.mrb[20].mxu1 %v6918_v47 }
 0x1d2   : > { %5558 = vmatprep.mubr.bf16.mxu1 %v6920_v4 }
 0x1d8   : > { %5367 = vmatmul.mubr.bf16.gmra.mrb[56].mxu0 %v6913_v38 }
 0x1d9   : > { %5370 = vmatprep.mubr.bf16.mxu0 %v6922_v51  ;;  %5559 = vmatmul.mubr.bf16.gmra.mrb[24].mxu1 %v6930_v35 }
 0x1da   : > { %5562 = vmatprep.mubr.bf16.mxu1 %v6979_v36 }
 0x1e0   : > { %5371 = vmatmul.mubr.bf16.gmra.mrb[60].mxu0 %v6925_v5 }
 0x1e1   : > { %5390 = vmatprep.mubr.bf16.mxu0 %v6822_v43  ;;  %5563 = vmatmul.mubr.bf16.gmra.mrb[28].mxu1 %v3104_v60  ;;  %v6037_v43 = vld [vmem:[%s6195_s17 + $0x210] sm:$0xff]  }
 0x1e2   : > { %5582 = vmatprep.mubr.bf16.mxu1 %v3395_v41  ;;  %v6040_v41 = vld [vmem:[%s6195_s17 + $0x228] sm:$0xff]  }
 0x1e8   : > { %5391 = vmatmul.mubr.bf16.vlgmr.msra.gmra.mrb[32].mxu0 %v6824_v24  ;;  %v3399_v24 = vpack.c.bf16 %v3372_v52, %v3371_v12  ;;  %v3383_v52 = vld [vmem:[#allocation2 + $0xc8] sm:$0xff] }
 0x1e9   : > { %5394 = vmatprep.mubr.bf16.mxu0 %v6840_v10  ;;  %5583 = vmatmul.mubr.bf16.vlgmr.msra.gmra.mrb[0].mxu1 %v3396_v15  ;;  %v6039_v10 = vld [vmem:[%s6195_s17 + $0x220] sm:$0xff]   ;;  %v3402_v15 = vpack.c.bf16 %v3378_v27, %v3377_v45  ;;  %v3674_v27 = vld [vmem:[#allocation2 + $0x51] sm:$0xff]  ;;  %v3673_v45 = vld [vmem:[#allocation2 + $0x49] sm:$0xff] }
 0x1ea   : > { %5615 = vmatpush3.bf16.msra.mxu1 %v6035_v23  ;;  %5586 = vmatprep.mubr.bf16.mxu1 %v3397_v7  ;;  %v3374_v23 = vld [vmem:[#allocation2 + $0x80] sm:$0xff]  ;;  %v3403_v7 = vpack.c.bf16 %v3380_v11, %v3379_v33  ;;  %v3678_v33 = vld [vmem:[#allocation2 + $0x71] sm:$0xff] }
 0x1eb   : > { %5616 = vmatprep.subr.bf16.mxu1 %v6036_v34  ;;  %v3400_v60 = vpack.c.bf16 %v3374_v23, %v3373_v8  ;;  %v3392_v23 = vld [vmem:[#allocation2 + $0x110] sm:$0xff]  ;;  %v3391_v8 = vld [vmem:[#allocation2 + $0x108] sm:$0xff] }
 0x1ee   : > { %5617 = vmatpush3.bf16.msra.mxu1 %v6036_v34  ;;  %v6042_v34 = vld [vmem:[%s6195_s17 + $0x238] sm:$0xff]  }
 0x1ef   : > { %5618 = vmatprep.subr.bf16.mxu1 %v6037_v43 }
 0x1f0   : > { %5395 = vmatmul.mubr.bf16.gmra.mrb[36].mxu0 %v6842_v44  ;;  %v3401_v44 = vpack.c.bf16 %v3376_v18, %v3375_v30 }
 0x1f1   : > { %5398 = vmatprep.mubr.bf16.mxu0 %v6856_v6  ;;  %5587 = vmatmul.mubr.bf16.gmra.mrb[4].mxu1 %v3398_v16  ;;  %v6041_v6 = vld [vmem:[%s6195_s17 + $0x230] sm:$0xff]  }
 0x1f2   : > { %5590 = vmatprep.mubr.bf16.mxu1 %v3399_v24  ;;  %5619 = vmatpush3.bf16.msra.mxu1 %v6037_v43  ;;  %v3381_v43 = vld [vmem:[#allocation2 + $0xb8] sm:$0xff]  ;;  %v3388_v16 = vld [vmem:[#allocation2 + $0xf0] sm:$0xff] }
 0x1f3   : > { %5620 = vmatprep.subr.bf16.mxu1 %v6038_v20 }
 0x1f6   : > { %5621 = vmatpush3.bf16.msra.mxu1 %v6038_v20  ;;  %v3387_v20 = vld [vmem:[#allocation2 + $0xe8] sm:$0xff] }
 0x1f7   : > { %5622 = vmatprep.subr.bf16.mxu1 %v6039_v10  ;;  %v3407_v24 = vpack.c.bf16 %v3388_v16, %v3387_v20  ;;  %v3684_v16 = vld [vmem:[#allocation2 + $0xa1] sm:$0xff] }
 0x1f8   : > { %5399 = vmatmul.mubr.bf16.gmra.mrb[40].mxu0 %v6858_v37  ;;  %v3382_v37 = vld [vmem:[#allocation2 + $0xc0] sm:$0xff] }
 0x1f9   : > { %5402 = vmatprep.mubr.bf16.mxu0 %v6872_v55  ;;  %5591 = vmatmul.mubr.bf16.gmra.mrb[8].mxu1 %v3400_v60  ;;  %v3384_v55 = vld [vmem:[#allocation2 + $0xd0] sm:$0xff]  ;;  %v3404_v49 = vpack.c.bf16 %v3382_v37, %v3381_v43  ;;  %v6043_v60 = vld [vmem:[#allocation2 + $0x8] sm:$0xff] }
 0x1fa   : > { %5594 = vmatprep.mubr.bf16.mxu1 %v3401_v44  ;;  %5623 = vmatpush3.bf16.msra.mxu1 %v6039_v10  ;;  %v3405_v14 = vpack.c.bf16 %v3384_v55, %v3383_v52  ;;  %v3390_v10 = vld [vmem:[#allocation2 + $0x100] sm:$0xff]  ;;  %v3410_v30 = vpack.c.bf16 %v6043_v60, %v6043_v60  ;;  %v3682_v43 = vld [vmem:[#allocation2 + $0x91] sm:$0xff]  ;;  %v3681_v52 = vld [vmem:[#allocation2 + $0x89] sm:$0xff] }
 0x1fb   : > { %5624 = vmatprep.subr.bf16.mxu1 %v6040_v41  ;;  %v3671_v44 = vld [vmem:[#allocation2 + $0x39] sm:$0xff]  ;;  %v3680_v55 = vld [vmem:[#allocation2 + $0x81] sm:$0xff] }
 0x1fc   : > { %v3700_v20 = vld [vmem:[#allocation2 + $0x121] sm:$0xff] }
 0x1fe   : > { %5625 = vmatpush3.bf16.msra.mxu1 %v6040_v41  ;;  %v3669_v41 = vld [vmem:[#allocation2 + $0x29] sm:$0xff] }
 0x1ff   : > { %5626 = vmatprep.subr.bf16.mxu1 %v6041_v6 }
 0x200   : > { %5403 = vmatmul.mubr.bf16.gmra.mrb[44].mxu0 %v6874_v0  ;;  %v3386_v0 = vld [vmem:[#allocation2 + $0xe0] sm:$0xff] }
 0x201   : > { %5406 = vmatprep.mubr.bf16.mxu0 %v6892_v13  ;;  %5595 = vmatmul.mubr.bf16.gmra.mrb[12].mxu1 %v3402_v15  ;;  %v3385_v13 = vld [vmem:[#allocation2 + $0xd8] sm:$0xff]  ;;  %v3676_v15 = vld [vmem:[#allocation2 + $0x61] sm:$0xff] }
 0x202   : > { %5598 = vmatprep.mubr.bf16.mxu1 %v3403_v7  ;;  %5627 = vmatpush3.bf16.msra.mxu1 %v6041_v6  ;;  %v3406_v12 = vpack.c.bf16 %v3386_v0, %v3385_v13  ;;  %v3672_v6 = vld [vmem:[#allocation2 + $0x41] sm:$0xff]  ;;  %v3677_v7 = vld [vmem:[#allocation2 + $0x69] sm:$0xff]  ;;  %v3683_v0 = vld [vmem:[#allocation2 + $0x99] sm:$0xff] }
 0x203   : > { %5628 = vmatprep.subr.bf16.mxu1 %v6042_v34  ;;  %v3702_v11 = vpack.c.bf16 %v3672_v6, %v3671_v44  ;;  %v3705_v37 = vpack.c.bf16 %v3678_v33, %v3677_v7  ;;  %v3708_v13 = vpack.c.bf16 %v3684_v16, %v3683_v0 }
 0x206   : > { %5629 = vmatpush3.bf16.msra.mxu1 %v6042_v34 }
 0x208   : > { %5407 = vmatmul.mubr.bf16.gmra.mrb[48].mxu0 %v6894_v31  ;;  %v3389_v31 = vld [vmem:[#allocation2 + $0xf8] sm:$0xff] }
 0x209   : > { %5410 = vmatprep.mubr.bf16.mxu0 %v6906_v62  ;;  %5599 = vmatmul.mubr.bf16.gmra.mrb[16].mxu1 %v3404_v49  ;;  %v3408_v18 = vpack.c.bf16 %v3390_v10, %v3389_v31  ;;  %v3409_v62 = vpack.c.bf16 %v3392_v23, %v3391_v8 }
 0x20a   : > { %5602 = vmatprep.mubr.bf16.mxu1 %v3405_v14  ;;  %v3707_v14 = vpack.c.bf16 %v3682_v43, %v3681_v52 }
 0x210   : > { %5411 = vmatmul.mubr.bf16.gmra.mrb[52].mxu0 %v6908_v9  ;;  %v3670_v9 = vld [vmem:[#allocation2 + $0x31] sm:$0xff] }
 0x211   : > { %5414 = vmatprep.mubr.bf16.mxu0 %v6918_v47  ;;  %5603 = vmatmul.mubr.bf16.gmra.mrb[20].mxu1 %v3406_v12  ;;  %v3701_v47 = vpack.c.bf16 %v3670_v9, %v3669_v41  ;;  %v3699_v12 = vld [vmem:[#allocation2 + $0x119] sm:$0xff] }
 0x212   : > { %5606 = vmatprep.mubr.bf16.mxu1 %v3407_v24  ;;  %v3716_v24 = vpack.c.bf16 %v3700_v20, %v3699_v12 }
 0x218   : > { %5415 = vmatmul.mubr.bf16.gmra.mrb[56].mxu0 %v6920_v4  ;;  %v3703_v4 = vpack.c.bf16 %v3674_v27, %v3673_v45 }
 0x219   : > { %5418 = vmatprep.mubr.bf16.mxu0 %v6930_v35  ;;  %5607 = vmatmul.mubr.bf16.gmra.mrb[24].mxu1 %v3408_v18  ;;  %v3675_v35 = vld [vmem:[#allocation2 + $0x59] sm:$0xff] }
 0x21a   : > { %5610 = vmatprep.mubr.bf16.mxu1 %v3409_v62  ;;  %v3704_v34 = vpack.c.bf16 %v3676_v15, %v3675_v35 }
 0x220   : > { %5419 = vmatmul.mubr.bf16.gmra.mrb[60].mxu0 %v6979_v36  ;;  %v3679_v36 = vld [vmem:[#allocation2 + $0x79] sm:$0xff] }
 0x221   : > { %5611 = vmatmul.mubr.bf16.gmra.mrb[28].mxu1 %v3410_v30  ;;  %v3706_v49 = vpack.c.bf16 %v3680_v55, %v3679_v36 }
 0x222   : > { %5630 = vmatprep.mubr.bf16.mxu1 %v3701_v47 }
 0x229   : > { %5631 = vmatmul.mubr.bf16.vlgmr.msra.gmra.mrb[0].mxu1 %v3702_v11 }
 0x22a   : > { %5634 = vmatprep.mubr.bf16.mxu1 %v3703_v4 }
 0x231   : > { %5635 = vmatmul.mubr.bf16.gmra.mrb[4].mxu1 %v3704_v34 }
 0x232   : > { %5638 = vmatprep.mubr.bf16.mxu1 %v3705_v37 }
 0x239   : > { %5639 = vmatmul.mubr.bf16.gmra.mrb[8].mxu1 %v3706_v49 }
 0x23a   : > { %5642 = vmatprep.mubr.bf16.mxu1 %v3707_v14 }
 0x241   : > { %5643 = vmatmul.mubr.bf16.gmra.mrb[12].mxu1 %v3708_v13 }
 0x242   : > { %5646 = vmatprep.mubr.bf16.mxu1 %v6896_v2 }
 0x249   : > { %5647 = vmatmul.mubr.bf16.gmra.mrb[16].mxu1 %v6900_v21 }
 0x24a   : > { %5650 = vmatprep.mubr.bf16.mxu1 %v6910_v56 }
 0x251   : > { %5651 = vmatmul.mubr.bf16.gmra.mrb[20].mxu1 %v6913_v38 }
 0x252   : > { %5654 = vmatprep.mubr.bf16.mxu1 %v6922_v51 }
 0x259   : > { %5655 = vmatmul.mubr.bf16.gmra.mrb[24].mxu1 %v6925_v5 }
 0x25a   : > { %5658 = vmatprep.mubr.bf16.mxu1 %v6932_v50 }
 0x261   : > { %5659 = vmatmul.mubr.bf16.gmra.mrb[28].mxu1 %v3716_v24 }
 0x2bb   : > { %v5392_v10 = vpop.f32.mrb[32].mxu0 }
 0x2bc   : > { %v2286_v23 = vpop.f32.mrb[33].mxu0 }
 0x2bd   : > { %v5393_v31 = vpop.f32.mrb[34].mxu0 }
 0x2be   : > { %v2289_v2 = vpop.f32.mrb[35].mxu0 }
 0x2c3   : > { %v5396_v18 = vpop.f32.mrb[36].mxu0 }
 0x2c4   : > { %v2302_v21 = vpop.f32.mrb[37].mxu0 }
 0x2c5   : > { %v5397_v8 = vpop.f32.mrb[38].mxu0 }
 0x2c6   : > { %v2305_v56 = vpop.f32.mrb[39].mxu0 }
 0x2cb   : > { %v5400_v62 = vpop.f32.mrb[40].mxu0 }
 0x2cc   : > { %v7015_v38 = vpop.f32.mrb[41].mxu0 }
 0x2cd   : > { %v7017_v51 = vpop.f32.mrb[42].mxu0 }
 0x2ce   : > { %v7019_v5 = vpop.f32.mrb[43].mxu0 }
 0x2d3   : > { %v7021_v50 = vpop.f32.mrb[44].mxu0 }
 0x2d4   : > { %v7023_v60 = vpop.f32.mrb[45].mxu0 }
 0x2d5   : > { %v7025_v30 = vpop.f32.mrb[46].mxu0 }
 0x2d6   : > { %v7027_v9 = vpop.f32.mrb[47].mxu0 }
 0x2db   : > { %v7029_v41 = vpop.f32.mrb[48].mxu0 }
 0x2dc   : > { %v7031_v47 = vpop.f32.mrb[49].mxu0 }
 0x2dd   : > { %v7033_v44 = vpop.f32.mrb[50].mxu0 }
 0x2de   : > { %v7035_v6 = vpop.f32.mrb[51].mxu0 }
 0x2e3   : > { %v7037_v27 = vpop.f32.mrb[52].mxu0 }
 0x2e4   : > { %v7039_v11 = vpop.f32.mrb[53].mxu0 }
 0x2e5   : > { %v7041_v45 = vpop.f32.mrb[54].mxu0 }
 0x2e6   : > { %v7043_v4 = vpop.f32.mrb[55].mxu0 }
 0x2eb   : > { %v7045_v35 = vpop.f32.mrb[56].mxu0 }
 0x2ec   : > { %v7047_v15 = vpop.f32.mrb[57].mxu0 }
 0x2ed   : > { %v7049_v33 = vpop.f32.mrb[58].mxu0 }
 0x2ee   : > { %v7051_v34 = vpop.f32.mrb[59].mxu0 }
 0x2f3   : > { %v7053_v7 = vpop.f32.mrb[60].mxu0 }
 0x2f4   : > { %7317 = vst [vmem:[#allocation30_spill] sm:$0xff] %v7053_v7  ;;  %v7055_v37 = vpop.f32.mrb[61].mxu0 }
 0x2f5   : > { %7318 = vst [vmem:[#allocation31_spill] sm:$0xff] %v7055_v37  ;;  %v7057_v36 = vpop.f32.mrb[62].mxu0 }
 0x2f6   : > { %7319 = vst [vmem:[#allocation32_spill] sm:$0xff] %v7057_v36  ;;  %v7059_v55 = vpop.f32.mrb[63].mxu0  ;;  %v7321_v36 = vunpack.c.l.bf16 %v6263_v57 }
 0x2f7   : > { %7320 = vst [vmem:[#allocation33_spill] sm:$0xff] %v7059_v55 }
 0x2fc   : > { %v5632_v43 = vpop.f32.mrb[0].mxu1 }
 0x2fd   : > { %v5662_v49 = vadd.f32 %v5632_v43, %v5392_v10  ;;  %v3816_v52 = vpop.f32.mrb[1].mxu1  ;;  %v7322_v10 = vunpack.c.h.bf16 %v6263_v57  ;;  %v7323_v43 = vunpack.c.l.bf16 %v6251_v53 }
 0x2fe   : > { %v5663_v14 = vadd.f32 %v3816_v52, %v2286_v23  ;;  %v5633_v0 = vpop.f32.mrb[2].mxu1 }
 0x2ff   : > { %v3977_v16 = vmul.f32 %v5662_v49, %v6664_v39  ;;  %v5664_v13 = vadd.f32 %v5633_v0, %v5393_v31  ;;  %v3819_v12 = vpop.f32.mrb[3].mxu1  ;;  %v7324_v31 = vunpack.c.h.bf16 %v6251_v53 }
 0x300   : > { %v3975_v20 = vmul.f32 %v5663_v14, %v6662_v1  ;;  %v5665_v24 = vadd.f32 %v3819_v12, %v2289_v2 }
 0x301   : > { %v3978_v7 = vmul.f32 %v5664_v13, %v6668_v54  ;;  %v4009_v55 = vadd.f32 %v7321_v36, %v3977_v16 }
 0x302   : > { %v3976_v37 = vmul.f32 %v5665_v24, %v6666_v40  ;;  %v4007_v39 = vadd.f32 %v7323_v43, %v3975_v20  ;;  %v7328_v20 = vunpack.c.h.bf16 %v6273_v59 }
 0x303   : > { %v4010_v23 = vadd.f32 %v7322_v10, %v3978_v7 }
 0x304   : > { %v4008_v49 = vadd.f32 %v7324_v31, %v3976_v37  ;;  %v5636_v52 = vpop.f32.mrb[4].mxu1 }
 0x305   : > { %v4825_v1 = vpack.c.bf16 %v4010_v23, %v4009_v55  ;;  %v5666_v2 = vadd.f32 %v5636_v52, %v5396_v18  ;;  %v3832_v14 = vpop.f32.mrb[5].mxu1  ;;  %v7325_v18 = vunpack.c.l.bf16 %v6283_v63 }
 0x306   : > { %v4820_v54 = vpack.c.bf16 %v4008_v49, %v4007_v39  ;;  %v5667_v0 = vadd.f32 %v3832_v14, %v2302_v21  ;;  %v5637_v40 = vpop.f32.mrb[6].mxu1  ;;  %v7326_v21 = vunpack.c.h.bf16 %v6283_v63 }
 0x307   : > { %4927 = vst [vmem:[%s6190_s14 + $0x8] sm:$0xff] %v4825_v1   ;;  %v3981_v13 = vmul.f32 %v5666_v2, %v6674_v61  ;;  %v5668_v36 = vadd.f32 %v5637_v40, %v5397_v8  ;;  %v3835_v16 = vpop.f32.mrb[7].mxu1  ;;  %v7327_v61 = vunpack.c.l.bf16 %v6273_v59  ;;  %v7329_v1 = vunpack.c.l.bf16 %v6332_v25 }
 0x308   : > { %4821 = vst [vmem:[%s6190_s14] sm:$0xff] %v4820_v54   ;;  %v3979_v57 = vmul.f32 %v5667_v0, %v6670_v3  ;;  %v5669_v7 = vadd.f32 %v3835_v16, %v2305_v56  ;;  %v7330_v2 = vunpack.c.h.bf16 %v6332_v25  ;;  %v7332_v54 = vunpack.c.h.bf16 %v6316_v19 }
 0x309   : > { %v3982_v53 = vmul.f32 %v5668_v36, %v6676_v29  ;;  %v4013_v55 = vadd.f32 %v7325_v18, %v3981_v13 }
 0x30a   : > { %v3980_v37 = vmul.f32 %v5669_v7, %v6672_v42  ;;  %v4011_v8 = vadd.f32 %v7327_v61, %v3979_v57 }
 0x30b   : > { %v4014_v12 = vadd.f32 %v7326_v21, %v3982_v53  ;;  %v7336_v21 = vld [vmem:[#allocation4_spill] sm:$0xff] }
 0x30c   : > { %v4012_v24 = vadd.f32 %v7328_v20, %v3980_v37  ;;  %v5640_v10 = vpop.f32.mrb[8].mxu1  ;;  %v7333_v37 = vld [vmem:[#allocation5_spill] sm:$0xff]  ;;  %v7338_v61 = vunpack.c.h.bf16 %v7336_v21 }
 0x30d   : > { %v4835_v3 = vpack.c.bf16 %v4014_v12, %v4013_v55  ;;  %v5670_v56 = vadd.f32 %v5640_v10, %v5400_v62  ;;  %v3848_v23 = vpop.f32.mrb[9].mxu1  ;;  %v7334_v18 = vunpack.c.l.bf16 %v7333_v37  ;;  %v7335_v55 = vunpack.c.h.bf16 %v7333_v37 }
 0x30e   : > { %v4830_v29 = vpack.c.bf16 %v4012_v24, %v4011_v8  ;;  %v5671_v42 = vadd.f32 %v3848_v23, %v7015_v38  ;;  %v5641_v43 = vpop.f32.mrb[10].mxu1 }
 0x30f   : > { %4929 = vst [vmem:[%s6190_s14 + $0x18] sm:$0xff] %v4835_v3   ;;  %v3985_v39 = vmul.f32 %v5670_v56, %v6689_v28  ;;  %v5672_v63 = vadd.f32 %v5641_v43, %v7017_v51  ;;  %v3851_v31 = vpop.f32.mrb[11].mxu1  ;;  %v7331_v51 = vunpack.c.l.bf16 %v6316_v19  ;;  %v7339_v3 = vld [vmem:[#allocation16_spill] sm:$0xff] }
 0x310   : > { %4928 = vst [vmem:[%s6190_s14 + $0x10] sm:$0xff] %v4830_v29   ;;  %v3983_v49 = vmul.f32 %v5671_v42, %v6678_v48  ;;  %v5673_v59 = vadd.f32 %v3851_v31, %v7019_v5  ;;  %v7340_v42 = vld [vmem:[#allocation14_spill] sm:$0xff] }
 0x311   : > { %v3986_v52 = vmul.f32 %v5672_v63, %v6692_v22  ;;  %v4017_v38 = vadd.f32 %v7329_v1, %v3985_v39  ;;  %v7341_v63 = vld [vmem:[#allocation17_spill] sm:$0xff] }
 0x312   : > { %v3984_v62 = vmul.f32 %v5673_v59, %v6680_v58  ;;  %v4015_v14 = vadd.f32 %v7331_v51, %v3983_v49  ;;  %v7343_v59 = vld [vmem:[#allocation7_spill] sm:$0xff] }
 0x313   : > { %v4018_v28 = vadd.f32 %v7330_v2, %v3986_v52  ;;  %v7344_v52 = vunpack.c.l.bf16 %v7343_v59 }
 0x314   : > { %v4016_v0 = vadd.f32 %v7332_v54, %v3984_v62  ;;  %v5644_v48 = vpop.f32.mrb[12].mxu1  ;;  %v7345_v62 = vunpack.c.h.bf16 %v7343_v59 }
 0x315   : > { %v4845_v40 = vpack.c.bf16 %v4018_v28, %v4017_v38  ;;  %v5674_v5 = vadd.f32 %v5644_v48, %v7021_v50  ;;  %v3864_v22 = vpop.f32.mrb[13].mxu1  ;;  %v7346_v38 = vld [vmem:[#allocation6_spill] sm:$0xff] }
 0x316   : > { %v4840_v13 = vpack.c.bf16 %v4016_v0, %v4015_v14  ;;  %v5675_v58 = vadd.f32 %v3864_v22, %v7023_v60  ;;  %v5645_v36 = vpop.f32.mrb[14].mxu1  ;;  %v7348_v28 = vunpack.c.h.bf16 %v7346_v38  ;;  %v7349_v22 = vld [vmem:[#allocation20_spill] sm:$0xff] }
 0x317   : > { %4931 = vst [vmem:[%s6190_s14 + $0x28] sm:$0xff] %v4845_v40   ;;  %v3989_v16 = vmul.f32 %v5674_v5, %v6710_v26  ;;  %v5676_v25 = vadd.f32 %v5645_v36, %v7025_v30  ;;  %v3867_v57 = vpop.f32.mrb[15].mxu1  ;;  %v7337_v30 = vunpack.c.l.bf16 %v7336_v21 }
 0x318   : > { %4930 = vst [vmem:[%s6190_s14 + $0x20] sm:$0xff] %v4840_v13   ;;  %v3987_v19 = vmul.f32 %v5675_v58, %v6698_v32  ;;  %v5677_v7 = vadd.f32 %v3867_v57, %v7027_v9 }
 0x319   : > { %v3990_v53 = vmul.f32 %v5676_v25, %v6714_v46  ;;  %v4021_v60 = vadd.f32 %v7334_v18, %v3989_v16  ;;  %v7350_v16 = vld [vmem:[#allocation18_spill] sm:$0xff] }
 0x31a   : > { %v3988_v50 = vmul.f32 %v5677_v7, %v6702_v17  ;;  %v4019_v12 = vadd.f32 %v7337_v30, %v3987_v19  ;;  %v7351_v19 = vld [vmem:[#allocation21_spill] sm:$0xff] }
 0x31b   : > { %v4022_v26 = vadd.f32 %v7335_v55, %v3990_v53  ;;  %v7356_v55 = vld [vmem:[#allocation8_spill] sm:$0xff] }
 0x31c   : > { %v4020_v8 = vadd.f32 %v7338_v61, %v3988_v50  ;;  %v5648_v32 = vpop.f32.mrb[16].mxu1  ;;  %v7353_v50 = vld [vmem:[#allocation9_spill] sm:$0xff]  ;;  %v7358_v21 = vunpack.c.h.bf16 %v7356_v55 }
 0x31d   : > { %v4855_v20 = vpack.c.bf16 %v4022_v26, %v4021_v60  ;;  %v5678_v9 = vadd.f32 %v5648_v32, %v7029_v41  ;;  %v3880_v46 = vpop.f32.mrb[17].mxu1  ;;  %v7342_v41 = vld [vmem:[#allocation15_spill] sm:$0xff]  ;;  %v7354_v37 = vunpack.c.l.bf16 %v7353_v50  ;;  %v7355_v18 = vunpack.c.h.bf16 %v7353_v50 }
 0x31e   : > { %v4850_v24 = vpack.c.bf16 %v4020_v8, %v4019_v12  ;;  %v5679_v17 = vadd.f32 %v3880_v46, %v7031_v47  ;;  %v5649_v10 = vpop.f32.mrb[18].mxu1  ;;  %v7359_v46 = vld [vmem:[#allocation24_spill] sm:$0xff] }
 0x31f   : > { %4933 = vst [vmem:[%s6190_s14 + $0x38] sm:$0xff] %v4855_v20   ;;  %v3993_v56 = vmul.f32 %v5678_v9, %v7339_v3  ;;  %v5680_v23 = vadd.f32 %v5649_v10, %v7033_v44  ;;  %v3883_v29 = vpop.f32.mrb[19].mxu1  ;;  %v7347_v44 = vunpack.c.l.bf16 %v7346_v38  ;;  %v7360_v3 = vld [vmem:[#allocation22_spill] sm:$0xff] }
 0x320   : > { %4932 = vst [vmem:[%s6190_s14 + $0x30] sm:$0xff] %v4850_v24   ;;  %v3991_v43 = vmul.f32 %v5679_v17, %v7340_v42  ;;  %v5681_v39 = vadd.f32 %v3883_v29, %v7035_v6  ;;  %v7361_v29 = vld [vmem:[#allocation25_spill] sm:$0xff] }
 0x321   : > { %v3994_v31 = vmul.f32 %v5680_v23, %v7341_v63  ;;  %v4025_v47 = vadd.f32 %v7344_v52, %v3993_v56 }
 0x322   : > { %v3992_v49 = vmul.f32 %v5681_v39, %v7342_v41  ;;  %v4023_v2 = vadd.f32 %v7347_v44, %v3991_v43  ;;  %v7363_v39 = vld [vmem:[#allocation13_spill] sm:$0xff] }
 0x323   : > { %v4026_v1 = vadd.f32 %v7345_v62, %v3994_v31  ;;  %v7364_v63 = vunpack.c.l.bf16 %v7363_v39  ;;  %v7365_v31 = vunpack.c.h.bf16 %v7363_v39 }
 0x324   : > { %v4024_v51 = vadd.f32 %v7348_v28, %v3992_v49  ;;  %v5652_v14 = vpop.f32.mrb[20].mxu1  ;;  %v7366_v49 = vld [vmem:[#allocation12_spill] sm:$0xff]  ;;  %v7370_v28 = vld [vmem:[#allocation31_spill] sm:$0xff] }
 0x325   : > { %v4865_v54 = vpack.c.bf16 %v4026_v1, %v4025_v47  ;;  %v5682_v6 = vadd.f32 %v5652_v14, %v7037_v27  ;;  %v3896_v0 = vpop.f32.mrb[21].mxu1  ;;  %v7352_v27 = vld [vmem:[#allocation19_spill] sm:$0xff]  ;;  %v7368_v52 = vunpack.c.h.bf16 %v7366_v49 }
 0x326   : > { %v4860_v48 = vpack.c.bf16 %v4024_v51, %v4023_v2  ;;  %v5683_v40 = vadd.f32 %v3896_v0, %v7039_v11  ;;  %v5653_v5 = vpop.f32.mrb[22].mxu1  ;;  %v7372_v0 = vld [vmem:[#allocation32_spill] sm:$0xff] }
 0x327   : > { %4935 = vst [vmem:[%s6190_s14 + $0x48] sm:$0xff] %v4865_v54   ;;  %v3997_v13 = vmul.f32 %v5682_v6, %v7349_v22  ;;  %v5684_v58 = vadd.f32 %v5653_v5, %v7041_v45  ;;  %v3899_v36 = vpop.f32.mrb[23].mxu1  ;;  %v7357_v45 = vunpack.c.l.bf16 %v7356_v55  ;;  %v7371_v54 = vld [vmem:[#allocation28_spill] sm:$0xff]  ;;  %v7373_v5 = vld [vmem:[#allocation26_spill] sm:$0xff] }
 0x328   : > { %4934 = vst [vmem:[%s6190_s14 + $0x40] sm:$0xff] %v4860_v48   ;;  %v3995_v25 = vmul.f32 %v5683_v40, %v7350_v16  ;;  %v5685_v57 = vadd.f32 %v3899_v36, %v7043_v4  ;;  %v7375_v36 = vld [vmem:[#allocation29_spill] sm:$0xff] }
 0x329   : > { %v3998_v7 = vmul.f32 %v5684_v58, %v7351_v19  ;;  %v4029_v11 = vadd.f32 %v7354_v37, %v3997_v13  ;;  %v7374_v13 = vld [vmem:[#allocation33_spill] sm:$0xff]  ;;  %v7377_v19 = vld [vmem:[#allocation11_spill] sm:$0xff]  ;;  %v7380_v37 = vld [vmem:[#allocation10_spill] sm:$0xff] }
 0x32a   : > { %v3996_v53 = vmul.f32 %v5685_v57, %v7352_v27  ;;  %v4027_v26 = vadd.f32 %v7357_v45, %v3995_v25  ;;  %v7376_v25 = vld [vmem:[#allocation27_spill] sm:$0xff] }
 0x32b   : > { %v4030_v60 = vadd.f32 %v7355_v18, %v3998_v7  ;;  %v7378_v7 = vunpack.c.l.bf16 %v7377_v19 }
 0x32c   : > { %v4028_v30 = vadd.f32 %v7358_v21, %v3996_v53  ;;  %v5656_v12 = vpop.f32.mrb[24].mxu1  ;;  %v7379_v53 = vunpack.c.h.bf16 %v7377_v19 }
 0x32d   : > { %v4875_v61 = vpack.c.bf16 %v4030_v60, %v4029_v11  ;;  %v5686_v4 = vadd.f32 %v5656_v12, %v7045_v35  ;;  %v3912_v8 = vpop.f32.mrb[25].mxu1  ;;  %v7362_v35 = vld [vmem:[#allocation23_spill] sm:$0xff]  ;;  %v7381_v11 = vunpack.c.l.bf16 %v7380_v37  ;;  %v7382_v60 = vunpack.c.h.bf16 %v7380_v37 }
 0x32e   : > { %v4870_v32 = vpack.c.bf16 %v4028_v30, %v4027_v26  ;;  %v5687_v20 = vadd.f32 %v3912_v8, %v7047_v15  ;;  %v5657_v9 = vpop.f32.mrb[26].mxu1 }
 0x32f   : > { %4937 = vst [vmem:[%s6190_s14 + $0x58] sm:$0xff] %v4875_v61   ;;  %v4001_v24 = vmul.f32 %v5686_v4, %v7359_v46  ;;  %v5688_v17 = vadd.f32 %v5657_v9, %v7049_v33  ;;  %v3915_v10 = vpop.f32.mrb[27].mxu1  ;;  %v7367_v33 = vunpack.c.l.bf16 %v7366_v49 }
 0x330   : > { %4936 = vst [vmem:[%s6190_s14 + $0x50] sm:$0xff] %v4870_v32   ;;  %v3999_v56 = vmul.f32 %v5687_v20, %v7360_v3  ;;  %v5689_v23 = vadd.f32 %v3915_v10, %v7051_v34  ;;  %v7369_v34 = vld [vmem:[#allocation30_spill] sm:$0xff] }
 0x331   : > { %v4002_v42 = vmul.f32 %v5688_v17, %v7361_v29  ;;  %v4033_v15 = vadd.f32 %v7364_v63, %v4001_v24 }
 0x332   : > { %v4000_v43 = vmul.f32 %v5689_v23, %v7362_v35  ;;  %v4031_v59 = vadd.f32 %v7367_v33, %v3999_v56 }
 0x333   : > { %v4034_v41 = vadd.f32 %v7365_v31, %v4002_v42 }
 0x334   : > { %v4032_v47 = vadd.f32 %v7368_v52, %v4000_v43  ;;  %v5660_v62 = vpop.f32.mrb[28].mxu1 }
 0x335   : > { %v4885_v1 = vpack.c.bf16 %v4034_v41, %v4033_v15  ;;  %v5690_v38 = vadd.f32 %v5660_v62, %v7369_v34  ;;  %v3928_v44 = vpop.f32.mrb[29].mxu1 }
 0x336   : > { %v4880_v2 = vpack.c.bf16 %v4032_v47, %v4031_v59  ;;  %v5691_v51 = vadd.f32 %v3928_v44, %v7370_v28  ;;  %v5661_v14 = vpop.f32.mrb[30].mxu1 }
 0x337   : > { %4939 = vst [vmem:[%s6190_s14 + $0x68] sm:$0xff] %v4885_v1   ;;  %v4005_v6 = vmul.f32 %v5690_v38, %v7371_v54  ;;  %v5692_v48 = vadd.f32 %v5661_v14, %v7372_v0  ;;  %v3931_v40 = vpop.f32.mrb[31].mxu1 }
 0x338   : > { %4938 = vst [vmem:[%s6190_s14 + $0x60] sm:$0xff] %v4880_v2   ;;  %v4003_v22 = vmul.f32 %v5691_v51, %v7373_v5  ;;  %v5693_v58 = vadd.f32 %v3931_v40, %v7374_v13 }
 0x339   : > { %v4006_v16 = vmul.f32 %v5692_v48, %v7375_v36  ;;  %v4037_v27 = vadd.f32 %v7378_v7, %v4005_v6 }
 0x33a   : > { %v4004_v57 = vmul.f32 %v5693_v58, %v7376_v25  ;;  %v4035_v18 = vadd.f32 %v7381_v11, %v4003_v22 }
 0x33b   : > { %v4038_v50 = vadd.f32 %v7379_v53, %v4006_v16 }
 0x33c   : > { %v4036_v55 = vadd.f32 %v7382_v60, %v4004_v57 }
 0x33d   : > { %v4895_v45 = vpack.c.bf16 %v4038_v50, %v4037_v27 }
 0x33e   : > { %v4890_v26 = vpack.c.bf16 %v4036_v55, %v4035_v18 }
 0x33f   : > { %4941 = vst [vmem:[%s6190_s14 + $0x78] sm:$0xff] %v4895_v45  }
 0x340   : > { %4940 = vst [vmem:[%s6190_s14 + $0x70] sm:$0xff] %v4890_v26  }
 0x341 PF: > { %s17_s28 = sadd.s32 1, %s6082_s28   ;;  %s7383_s8 = sld [smem:[#allocation3_spill]] }
 0x342   : > { %p14_p8 = scmp.ge.s32.totalorder %s17_s28, 6   ;;  %s7384_s24 = smov %s6074_s26 }
 0x343   : > { %s7385_s25 = smov %s6078_s27  ;;  %s7386_s26 = smov %s7389_s29 }
 0x344   :  { %16 = sbr.rel (!%p14_p8) target bundleno = 3 (0x3), region = 105 }
 0x347   : > { %s7387_s27 = smov %s7383_s8 }

// kernel: densenet_forward.10
= control target key start
LH: loop header
LB: loop body
LE: loop exit
PB: predicated region body
PF: predicated region fallthrough
CT: control target
= control target key end

     0   :  { %s3579_s24 = smov 0   ;;  %s3581_s25 = smov 0   ;;  %s4105_s0 = inlined_call_operand.vmem [shape: f32[2,88,128], index: 0, kind: input, shape index: {}]   ;;  %s4106_s1 = inlined_call_operand.vmem [shape: f32[88,1], index: 1, kind: input, shape index: {}]   ;;  %s4107_s2 = inlined_call_operand.vmem [shape: f32[2,1,128], index: 2, kind: input, shape index: {}]   ;;  %s4108_s3 = inlined_call_operand.vmem [shape: f32[2,1,128], index: 3, kind: input, shape index: {}]   ;;  %s4109_s4 = inlined_call_operand.vmem [shape: bf16[2,128,128], index: 4, kind: input, shape index: {}]   ;;  %s4110_s5 = inlined_call_operand.vmem [shape: f32[2,1,128], index: 5, kind: input, shape index: {}]   ;;  %s4111_s6 = inlined_call_operand.vmem [shape: bf16[2,9,128,128], index: 6, kind: input, shape index: {}]   ;;  %s4112_s7 = inlined_call_operand.vmem [shape: bf16[2,88,128], index: 7, kind: output, shape index: {}]  }
   0x1   :  { %s3583_s26 = smov 0   ;;  %s3585_s27 = smov 0  }
   0x2   :  { %s3587_s28 = smov 0  }
   0x3 LB: > { %4125 = sst [smem:[#allocation3_spill]] %s3530_s27  ;;  %s26_s29 = sadd.s32 1, %s3526_s26  ;;  %s3534_s28 = sphi %s3587_s28, %s17_s28   ;;  %s3530_s27 = sphi %s3585_s27, %s4143_s27   ;;  %s3526_s26 = sphi %s3583_s26, %s4145_s26   ;;  %s3522_s25 = sphi %s3581_s25, %s4141_s25   ;;  %s3518_s24 = sphi %s3579_s24, %s4144_s24  }
   0x4   : > { %s29_s30 = sadd.s32 1, %s3530_s27  ;;  %p27_p0 = scmp.ge.s32.totalorder %s26_s29, 2 }
   0x5   : > { %p2507_p1 = scmp.ge.s32.totalorder %s3534_s28, 1  ;;  %p293_p2 = scmp.lt.s32.totalorder %s3534_s28, 5 }
   0x6   : > { %s4147_s29 = smov (%p27_p0, %s26_s29), 0  ;;  %s4149_s30 = smov (!%p27_p0, %s29_s30), %s3530_s27 }
   0x7   : > { %4126 = sst [smem:[#allocation4_spill]] %s4147_s29  ;;  %p294_p3 = pnand %p2507_p1, %p293_p2 }
   0x8   : > { %p31_p4 = scmp.ge.s32.totalorder %s4149_s30, 2  ;;  %p344_p5 = scmp.lt.s32.totalorder (!%p294_p3), %s3522_s25, 1 }
   0x9   : > { %297 = sbr.rel (%p294_p3) target bundleno = 657 (0x291), region = 48  ;;  %p349_p6 = scmp.lt.s32.totalorder (!%p294_p3), %s3518_s24, 1 }
   0xa   : > { %s4151_s30 = smov (%p31_p4, %s4149_s30), 0  ;;  %p2513_p7 = scmp.ne.s32.totalorder (!%p294_p3), %s3518_s24, 0 }
   0xb   : > { %4127 = sst [smem:[#allocation5_spill]] %s4151_s30 }
  0x10   : > { %s4153_s25 = smov (!%p344_p5, %s3522_s25), 1 }
  0x11   : > { %s3613_s8 = scalar_select %p349_p6, %s3518_s24, 1 }
  0x12   : > { %s3369_s9 = smul.u32 88, %s4153_s25 }
  0x13   : > { %s354_s15 = scalar_lea.vmem %s4108_s3, %s3613_s8  ;;  %s2749_s19 = sshll.u32 %s3613_s8, 6 }
  0x14   : > { %s348_s18 = scalar_lea.vmem %s4105_s0, %s3369_s9  ;;  %s3630_s22 = scalar_lea.vmem %s4109_s4, %s2749_s19 }
  0x15   : > { %s362_s29 = scalar_lea.vmem %s4110_s5, %s3613_s8  ;;  %s3370_s10 = smul.u32 576, %s3613_s8  ;;  %v378_v0 = vld [vmem:[%s348_s18] sm:$0xff] (!%p2513_p7)  ;;  %v379_v1 = vld [vmem:[%s348_s18 + $0x8] sm:$0xff] (!%p2513_p7)  ;;  %v380_v2 = vld [vmem:[%s348_s18 + $0x10] sm:$0xff] (!%p2513_p7) }
  0x16   : > { %s3371_s11 = smul.u32 44, %s4153_s25  ;;  %v2775_v3 = vpack.c.bf16 (!%p2513_p7), %v379_v1, %v378_v0  ;;  %v381_v4 = vld [vmem:[%s348_s18 + $0x18] sm:$0xff] (!%p2513_p7)  ;;  %v382_v5 = vld [vmem:[%s348_s18 + $0x20] sm:$0xff] (!%p2513_p7)  ;;  %v383_v6 = vld [vmem:[%s348_s18 + $0x28] sm:$0xff] (!%p2513_p7) }
  0x17   : > { %s3640_s13 = scalar_lea.vmem %s4111_s6, %s3370_s10  ;;  %377 = sbr.rel (%p2513_p7) target bundleno = 30 (0x1e), region = 52  ;;  %v2780_v7 = vpack.c.bf16 (!%p2513_p7), %v381_v4, %v380_v2  ;;  %v2785_v8 = vpack.c.bf16 (!%p2513_p7), %v383_v6, %v382_v5  ;;  %v384_v9 = vld [vmem:[%s348_s18 + $0x30] sm:$0xff] (!%p2513_p7)  ;;  %v385_v10 = vld [vmem:[%s348_s18 + $0x38] sm:$0xff] (!%p2513_p7)  ;;  %v386_v11 = vld [vmem:[%s348_s18 + $0x40] sm:$0xff] (!%p2513_p7) }
  0x18   : > { %s3645_s9 = scalar_lea.vmem %s4112_s7, %s3371_s11  ;;  %v2790_v12 = vpack.c.bf16 (!%p2513_p7), %v385_v10, %v384_v9  ;;  %v387_v13 = vld [vmem:[%s348_s18 + $0x48] sm:$0xff] (!%p2513_p7)  ;;  %v388_v14 = vld [vmem:[%s348_s18 + $0x50] sm:$0xff] (!%p2513_p7) }
  0x19   : > { %2776 = vst [vmem:[%s3645_s9] sm:$0xff] (!%p2513_p7), %v2775_v3   ;;  %2842 = vst [vmem:[%s3645_s9 + $0x8] sm:$0xff] (!%p2513_p7), %v2780_v7   ;;  %v2795_v15 = vpack.c.bf16 (!%p2513_p7), %v387_v13, %v386_v11  ;;  %v2760_v16 = vpack.c.bf16 (!%p2513_p7), %v388_v14, %v388_v14 }
  0x1a   : > { %2843 = vst [vmem:[%s3645_s9 + $0x10] sm:$0xff] (!%p2513_p7), %v2785_v8   ;;  %2844 = vst [vmem:[%s3645_s9 + $0x18] sm:$0xff] (!%p2513_p7), %v2790_v12  }
  0x1b   : > { %2845 = vst [vmem:[%s3645_s9 + $0x20] sm:$0xff] (!%p2513_p7), %v2795_v15   ;;  %444 = vst [vmem:[%s3645_s9 + $0x28] sm:$0xf] (!%p2513_p7), %v2760_v16 }
  0x1e PF: > { %v3416_v17 = vld [vmem:[%s3630_s22] sm:$0xff]   ;;  %v3417_v18 = vld [vmem:[%s3630_s22 + $0x8] sm:$0xff]   ;;  %v3536_v19 = vmov 0   ;;  %v3418_v20 = vld [vmem:[%s3630_s22 + $0x10] sm:$0xff]   ;;  %s4128_s27 = scalar_lea.vmem %s4107_s2, %s3613_s8 }
  0x1f   : > { %3414 = vset.pattern.permute.xlu0 %v3536_v19  ;;  %3415 = vset.pattern.permute.xlu1 %v3536_v19  ;;  %v3419_v21 = vld [vmem:[%s3630_s22 + $0x18] sm:$0xff]   ;;  %v3666_v23 = vld [vmem:[%s4128_s27] ss:$0 sm:$0xff]  ;;  %v447_v39 = vld [vmem:[%s4106_s1 + $0x10] sm:$0xff] }
  0x20   : > { %2994 = vmatprep.subr.bf16.mxu0 %v3416_v17  ;;  %v3659_v22 = vld [vmem:[%s3645_s9] sm:$0xff]   ;;  %v3671_v26 = vld [vmem:[%s3645_s9 + $0x8] sm:$0xff]   ;;  %705 = vperm.xlu1 %3415, %v447_v39   ;;  %v448_v52 = vld [vmem:[%s4106_s1 + $0x18] sm:$0xff] }
  0x21   : > { %2995 = vmatpush3.bf16.msra.mxu0 %v3416_v17  ;;  %v4122_v24 = vunpack.c.l.bf16 %v3659_v22  ;;  %v4121_v25 = vunpack.c.h.bf16 %v3659_v22  ;;  %v3674_v27 = vld [vmem:[%s3645_s9 + $0x10] sm:$0xff]   ;;  %v3677_v28 = vld [vmem:[%s3645_s9 + $0x18] sm:$0xff]   ;;  %v3684_v29 = vld [vmem:[%s354_s15] ss:$0 sm:$0xff]  ;;  %v4124_v30 = vunpack.c.l.bf16 %v3671_v26  ;;  %v4123_v31 = vunpack.c.h.bf16 %v3671_v26 }
  0x22   : > { %2996 = vmatprep.subr.bf16.mxu0 %v3417_v18  ;;  %v4118_v32 = vunpack.c.l.bf16 %v3674_v27  ;;  %v4117_v33 = vunpack.c.h.bf16 %v3674_v27  ;;  %v445_v34 = vld [vmem:[%s4106_s1] sm:$0xff]  ;;  %v4120_v37 = vunpack.c.l.bf16 %v3677_v28  ;;  %v4119_v38 = vunpack.c.h.bf16 %v3677_v28  ;;  %v446_v45 = vld [vmem:[%s4106_s1 + $0x8] sm:$0xff]  ;;  %v3422_v0 = vld [vmem:[%s3630_s22 + $0x30] sm:$0xff]  }
  0x23   : > { %v485_v35 = vmul.f32 %v4122_v24, %v3666_v23  ;;  %v486_v36 = vmul.f32 %v4121_v25, %v3666_v23  ;;  %695 = vperm.xlu0 %3414, %v445_v34   ;;  %v3420_v40 = vld [vmem:[%s3630_s22 + $0x20] sm:$0xff]   ;;  %v487_v41 = vmul.f32 %v4124_v30, %v3666_v23  ;;  %v488_v42 = vmul.f32 %v4123_v31, %v3666_v23  ;;  %v3726_v49 = vld [vmem:[%s3645_s9 + $0x28] sm:$0xf]  ;;  %v451_v9 = vld [vmem:[%s4106_s1 + $0x30] sm:$0xff] }
  0x24   : > { %v489_v43 = vmul.f32 %v4118_v32, %v3666_v23  ;;  %v490_v44 = vmul.f32 %v4117_v33, %v3666_v23  ;;  %v3723_v48 = vld [vmem:[%s3645_s9 + $0x20] sm:$0xff]   ;;  %v491_v51 = vmul.f32 %v4120_v37, %v3666_v23  ;;  %v492_v56 = vmul.f32 %v4119_v38, %v3666_v23  ;;  %v3421_v58 = vld [vmem:[%s3630_s22 + $0x28] sm:$0xff]   ;;  %710 = vperm.xlu1 %3415, %v448_v52   ;;  %v452_v15 = vld [vmem:[%s4106_s1 + $0x38] sm:$0xff] }
  0x25   : > { %2997 = vmatpush3.bf16.msra.mxu0 %v3417_v18  ;;  %v503_v46 = vadd.f32 %v3684_v29, %v485_v35  ;;  %v504_v47 = vadd.f32 %v3684_v29, %v486_v36  ;;  %v3729_v50 = vadd.f32 %v3684_v29, %v487_v41  ;;  %v506_v55 = vadd.f32 %v3684_v29, %v488_v42  ;;  %v3425_v57 = vld [vmem:[%s3640_s13 + $0x100] sm:$0xff]   ;;  %v450_v4 = vld [vmem:[%s4106_s1 + $0x28] sm:$0xff]  ;;  %v3423_v17 = vld [vmem:[%s3630_s22 + $0x38] sm:$0xff]  }
  0x26   : > { %2998 = vmatprep.subr.bf16.mxu0 %v3418_v20  ;;  %v507_v59 = vadd.f32 %v3684_v29, %v489_v43  ;;  %v508_v60 = vadd.f32 %v3684_v29, %v490_v44  ;;  %v4115_v62 = vunpack.c.l.bf16 %v3723_v48  ;;  %v449_v63 = vld [vmem:[%s4106_s1 + $0x20] sm:$0xff]  ;;  %3134 = vmatprep.subr.bf16.mxu1 %v3425_v57  ;;  %v4114_v2 = vunpack.c.h.bf16 %v3723_v48  ;;  %v3427_v10 = vld [vmem:[%s3640_s13 + $0x108] sm:$0xff]   ;;  %v3429_v35 = vld [vmem:[%s3640_s13 + $0x110] sm:$0xff]  }
  0x27   : > { %v514_v53 = vmax.f32 %v503_v46, 0.0  ;;  %v515_v54 = vmax.f32 %v504_v47, 0.0  ;;  %700 = vperm.xlu0 %3414, %v446_v45   ;;  %v516_v1 = vmax.f32 %v3729_v50, 0.0  ;;  %v4116_v3 = vunpack.c.l.bf16 %v3726_v49  ;;  %3135 = vmatpush3.bf16.msra.mxu1 %v3425_v57  ;;  %v453_v34 = vld [vmem:[%s4106_s1 + $0x40] sm:$0xff]  ;;  %v455_v41 = vld [vmem:[%s4106_s1 + $0x50] sm:$0xff]  ;;  %v3426_v43 = vld [vmem:[%s3640_s13 + $0x48] sm:$0xff]  }
  0x28   : > { %v517_v5 = vmax.f32 %v506_v55, 0.0  ;;  %v509_v6 = vadd.f32 %v3684_v29, %v491_v51  ;;  %v510_v7 = vadd.f32 %v3684_v29, %v492_v56  ;;  %v493_v8 = vmul.f32 %v4115_v62, %v3666_v23  ;;  %720 = vperm.xlu1 %3415, %v450_v4   ;;  %3136 = vmatprep.subr.bf16.mxu1 %v3427_v10  ;;  %v3428_v45 = vld [vmem:[%s3640_s13 + $0x50] sm:$0xff]   ;;  %v3430_v47 = vld [vmem:[%s3640_s13 + $0x58] sm:$0xff]   ;;  %v3432_v55 = vld [vmem:[%s3640_s13 + $0x60] sm:$0xff]  }
  0x29   : > { %2999 = vmatpush3.bf16.msra.mxu0 %v3418_v20  ;;  %v525_v61 = vpack.c.bf16 %v515_v54, %v514_v53  ;;  %v518_v11 = vmax.f32 %v507_v59, 0.0  ;;  %v519_v12 = vmax.f32 %v508_v60, 0.0  ;;  %v494_v13 = vmul.f32 %v4114_v2, %v3666_v23  ;;  %v3431_v52 = vld [vmem:[%s3640_s13 + $0x118] sm:$0xff]   ;;  %v3433_v53 = vld [vmem:[%s3640_s13 + $0x120] sm:$0xff]   ;;  %v3435_v54 = vld [vmem:[%s3640_s13 + $0x128] sm:$0xff]  }
  0x2a   : > { %3000 = vmatprep.subr.bf16.mxu0 %v3419_v21  ;;  %v495_v14 = vmul.f32 %v3666_v23, %v4116_v3  ;;  %v511_v16 = vadd.f32 %v3684_v29, %v493_v8  ;;  %v520_v20 = vmax.f32 %v509_v6, 0.0  ;;  %v526_v42 = vpack.c.bf16 %v517_v5, %v516_v1  ;;  %v3437_v56 = vld [vmem:[%s3640_s13 + $0x130] sm:$0xff]   ;;  %v3434_v57 = vld [vmem:[%s3640_s13 + $0x68] sm:$0xff]   ;;  %v3821_v6 = vld [vmem:[%s362_s29] ss:$0 sm:$0xff] }
  0x2b   : > { %3010 = vmatprep.mubr.bf16.mxu0 %v525_v61  ;;  %715 = vperm.xlu0 %3414, %v449_v63   ;;  %v512_v18 = vadd.f32 %v3684_v29, %v494_v13  ;;  %v527_v44 = vpack.c.bf16 %v519_v12, %v518_v11  ;;  %v3537_v59 = vmov 0.0   ;;  %v3436_v60 = vld [vmem:[%s3640_s13 + $0x70] sm:$0xff]   ;;  %v3441_v61 = vld [vmem:[%s3640_s13 + $0x140] sm:$0xff]   ;;  %v3438_v63 = vld [vmem:[%s3640_s13 + $0x78] sm:$0xff]  }
  0x2c   : > { %v513_v19 = vadd.f32 %v3684_v29, %v495_v14  ;;  %3137 = vmatpush3.bf16.msra.mxu1 %v3427_v10  ;;  %v522_v23 = vmax.f32 %v511_v16, 0.0  ;;  %730 = vperm.xlu1 %3415, %v452_v15   ;;  %v3424_v29 = vld [vmem:[%s3640_s13 + $0x40] sm:$0xff]   ;;  %759 = vst [vmem:[#allocation2] sm:$0xff] %v3537_v59  ;;  %760 = vst [vmem:[#allocation2 + $0x8] sm:$0xff] %v3537_v59  ;;  %v3454_v62 = vld [vmem:[%s3640_s13 + $0x38] sm:$0xff]  }
  0x2d   : > { %3001 = vmatpush3.bf16.msra.mxu0 %v3419_v21  ;;  %v521_v21 = vmax.f32 %v510_v7, 0.0  ;;  %v523_v36 = vmax.f32 %v512_v18, 0.0  ;;  %3138 = vmatprep.subr.bf16.mxu1 %v3429_v35  ;;  %772 = vst [vmem:[#allocation2 + $0x68] sm:$0xff] %v3537_v59  ;;  %773 = vst [vmem:[#allocation2 + $0x70] sm:$0xff] %v3537_v59  ;;  %v3461_v33 = vld [vmem:[%s3640_s13 + $0x190] sm:$0xff]   ;;  %v3458_v32 = vld [vmem:[%s3640_s13 + $0x88] sm:$0xff]  }
  0x2e   : > { %3002 = vmatprep.subr.bf16.mxu0 %v3420_v40  ;;  %v524_v39 = vmax.f32 %v513_v19, 0.0  ;;  %v3462_v30 = vld [vmem:[%s3640_s13 + $0x98] sm:$0xff]  }
  0x2f   : > { %725 = vperm.xlu0 %3414, %v451_v9   ;;  %v528_v46 = vpack.c.bf16 %v521_v21, %v520_v20  ;;  %v529_v50 = vpack.c.bf16 %v523_v36, %v522_v23 }
  0x30   : > { %3139 = vmatpush3.bf16.msra.mxu1 %v3429_v35  ;;  %v530_v51 = vpack.c.bf16 %v524_v39, %v524_v39 }
  0x31   : > { %3003 = vmatpush3.bf16.msra.mxu0 %v3420_v40  ;;  %v454_v40 = vld [vmem:[%s4106_s1 + $0x48] sm:$0xff]  ;;  %3140 = vmatprep.subr.bf16.mxu1 %v3431_v52 }
  0x32   : > { %3004 = vmatprep.subr.bf16.mxu0 %v3421_v58  ;;  %740 = vperm.xlu1 %3415, %v454_v40  }
  0x33   : > { %735 = vperm.xlu0 %3414, %v453_v34  }
  0x34   : > { %3141 = vmatpush3.bf16.msra.mxu1 %v3431_v52  ;;  %v3443_v52 = vld [vmem:[%s3640_s13 + $0x148] sm:$0xff]  }
  0x35   : > { %3005 = vmatpush3.bf16.msra.mxu0 %v3421_v58  ;;  %3142 = vmatprep.subr.bf16.mxu1 %v3433_v53  ;;  %v3439_v58 = vld [vmem:[%s3640_s13 + $0x138] sm:$0xff]  }
  0x36   : > { %3006 = vmatprep.subr.bf16.mxu0 %v3422_v0 }
  0x37   : > { %745 = vperm.xlu0 %3414, %v455_v41  }
  0x38   : > { %3143 = vmatpush3.bf16.msra.mxu1 %v3433_v53 }
  0x39   : > { %3007 = vmatpush3.bf16.msra.mxu0 %v3422_v0  ;;  %3144 = vmatprep.subr.bf16.mxu1 %v3435_v54  ;;  %v3807_v0 = vld [vmem:[%s3640_s13] sm:$0xff]  }
  0x3a   : > { %3008 = vmatprep.subr.bf16.mxu0 %v3423_v17 }
  0x3c   : > { %3145 = vmatpush3.bf16.msra.mxu1 %v3435_v54 }
  0x3d   : > { %3009 = vmatpush3.bf16.msra.mxu0 %v3423_v17  ;;  %3146 = vmatprep.subr.bf16.mxu1 %v3437_v56 }
  0x3e   : > { %3022 = vmatprep.subr.bf16.mxu0 %v3424_v29 }
  0x40   : > { %3011 = vmatmul.mubr.bf16.vlgmr.msra.gmra.mrb[0].mxu0 %v526_v42  ;;  %3147 = vmatpush3.bf16.msra.mxu1 %v3437_v56 }
  0x41   : > { %3014 = vmatprep.mubr.bf16.mxu0 %v527_v44  ;;  %3023 = vmatpush3.bf16.msra.mxu0 %v3424_v29 }
  0x42   : > { %3024 = vmatprep.subr.bf16.mxu0 %v3426_v43  ;;  %3148 = vmatprep.subr.bf16.mxu1 %v3439_v58 }
  0x44   : > { %3149 = vmatpush3.bf16.msra.mxu1 %v3439_v58 }
  0x45   : > { %3025 = vmatpush3.bf16.msra.mxu0 %v3426_v43  ;;  %3162 = vmatprep.subr.bf16.mxu1 %v3441_v61 }
  0x46   : > { %3026 = vmatprep.subr.bf16.mxu0 %v3428_v45 }
  0x48   : > { %3015 = vmatmul.mubr.bf16.gmra.mrb[4].mxu0 %v528_v46 }
  0x49   : > { %3018 = vmatprep.mubr.bf16.mxu0 %v529_v50  ;;  %3027 = vmatpush3.bf16.msra.mxu0 %v3428_v45 }
  0x4a   : > { %3028 = vmatprep.subr.bf16.mxu0 %v3430_v47 }
  0x4d   : > { %3029 = vmatpush3.bf16.msra.mxu0 %v3430_v47 }
  0x4e   : > { %3030 = vmatprep.subr.bf16.mxu0 %v3432_v55 }
  0x50   : > { %3019 = vmatmul.mubr.bf16.gmra.mrb[8].mxu0 %v530_v51 }
  0x51   : > { %3031 = vmatpush3.bf16.msra.mxu0 %v3432_v55 }
  0x52   : > { %3032 = vmatprep.subr.bf16.mxu0 %v3434_v57 }
  0x55   : > { %3033 = vmatpush3.bf16.msra.mxu0 %v3434_v57  ;;  %v807_v57 = vld [vmem:[#allocation2 + $0x7] sm:$0xff] }
  0x56   : > { %3034 = vmatprep.subr.bf16.mxu0 %v3436_v60 }
  0x59   : > { %3035 = vmatpush3.bf16.msra.mxu0 %v3436_v60 }
  0x5a   : > { %3036 = vmatprep.subr.bf16.mxu0 %v3438_v63 }
  0x5d   : > { %3037 = vmatpush3.bf16.msra.mxu0 %v3438_v63 }
  0x5e   : > { %3050 = vmatprep.subr.bf16.mxu0 %v3807_v0 }
  0x9f   : > { %v3812_v4 = vpop.permute.xlu1 %705 }
  0xa2   : > { %v3810_v1 = vpop.permute.xlu0 %695 }
  0xa3   : > { %v3823_v8 = vpop.permute.xlu1 %710 }
  0xa6   : > { %v3814_v5 = vpop.permute.xlu0 %700 }
  0xa7   : > { %v3835_v34 = vpop.permute.xlu1 %720 }
  0xaa   : > { %v3826_v11 = vpop.permute.xlu0 %715 }
  0xab   : > { %v3853_v60 = vpop.permute.xlu1 %730 }
  0xae   : > { %v3838_v36 = vpop.permute.xlu0 %725 }
  0xb2   : > { %v3851_v58 = vpop.permute.xlu0 %735 }
 0x113   : > { %v3012_v7 = vpop.f32.mrb[0].mxu0 }
 0x114   : > { %v645_v9 = vadd.f32 %v3012_v7, %v3821_v6  ;;  %v636_v10 = vpop.f32.mrb[1].mxu0 }
 0x115   : > { %v637_v12 = vadd.f32 %v3821_v6, %v636_v10  ;;  %v3013_v13 = vpop.f32.mrb[2].mxu0 }
 0x116   : > { %v684_v14 = vmax.f32 %v645_v9, 0.0  ;;  %v648_v15 = vadd.f32 %v3013_v13, %v3821_v6  ;;  %v639_v16 = vpop.f32.mrb[3].mxu0 }
 0x117   : > { %v682_v17 = vmax.f32 %v637_v12, 0.0  ;;  %v640_v18 = vadd.f32 %v3821_v6, %v639_v16  ;;  %v3445_v12 = vld [vmem:[%s3640_s13 + $0x150] sm:$0xff]  }
 0x118   : > { %v750_v19 = vmul.f32 %v3812_v4, %v684_v14  ;;  %v685_v20 = vmax.f32 %v648_v15, 0.0 }
 0x119   : > { %v3833_v21 = vmul.f32 %v3810_v1, %v682_v17  ;;  %v683_v23 = vmax.f32 %v640_v18, 0.0 }
 0x11a   : > { %763 = vst [vmem:[#allocation2 + $0x20] sm:$0xff] %v750_v19  ;;  %v751_v35 = vmul.f32 %v3823_v8, %v685_v20 }
 0x11b   : > { %761 = vst [vmem:[#allocation2 + $0x10] sm:$0xff] %v3833_v21  ;;  %v749_v39 = vmul.f32 %v3814_v5, %v683_v23  ;;  %v3016_v40 = vpop.f32.mrb[4].mxu0 }
 0x11c   : > { %764 = vst [vmem:[#allocation2 + $0x28] sm:$0xff] %v751_v35  ;;  %v661_v29 = vadd.f32 %v3016_v40, %v3821_v6  ;;  %v652_v41 = vpop.f32.mrb[5].mxu0  ;;  %v1455_v42 = vpack.c.bf16 %v751_v35, %v750_v19 }
 0x11d   : > { %762 = vst [vmem:[#allocation2 + $0x18] sm:$0xff] %v749_v39  ;;  %v653_v43 = vadd.f32 %v3821_v6, %v652_v41  ;;  %v3017_v44 = vpop.f32.mrb[6].mxu0  ;;  %v1454_v45 = vpack.c.bf16 %v749_v39, %v3833_v21  ;;  %v3845_v46 = vpack.c.bf16 %v750_v19, %v749_v39 }
 0x11e   : > { %v688_v47 = vmax.f32 %v661_v29, 0.0  ;;  %v664_v50 = vadd.f32 %v3017_v44, %v3821_v6  ;;  %v655_v51 = vpop.f32.mrb[7].mxu0  ;;  %v3447_v44 = vld [vmem:[%s3640_s13 + $0x158] sm:$0xff]  }
 0x11f   : > { %v686_v53 = vmax.f32 %v653_v43, 0.0  ;;  %v656_v54 = vadd.f32 %v3821_v6, %v655_v51  ;;  %3150 = vmatprep.mubr.bf16.mxu1 %v1454_v45 }
 0x120   : > { %v754_v55 = vmul.f32 %v3838_v36, %v688_v47  ;;  %v689_v56 = vmax.f32 %v664_v50, 0.0  ;;  %3151 = vmatmul.mubr.bf16.vlgmr.msra.gmra.mrb[0].mxu1 %v1455_v42  ;;  %v3878_v47 = vpop.permute.xlu0 %745 }
 0x121   : > { %v752_v63 = vmul.f32 %v3826_v11, %v686_v53  ;;  %v687_v7 = vmax.f32 %v656_v54, 0.0  ;;  %3163 = vmatpush3.bf16.msra.mxu1 %v3441_v61 }
 0x122   : > { %767 = vst [vmem:[#allocation2 + $0x40] sm:$0xff] %v754_v55  ;;  %v755_v9 = vmul.f32 %v3853_v60, %v689_v56  ;;  %v3857_v10 = vld [vmem:[#allocation2 + $0xf] sm:$0xff]  ;;  %3164 = vmatprep.subr.bf16.mxu1 %v3443_v52 }
 0x123   : > { %765 = vst [vmem:[#allocation2 + $0x30] sm:$0xff] %v752_v63  ;;  %v753_v13 = vmul.f32 %v3835_v34, %v687_v7  ;;  %v3020_v14 = vpop.f32.mrb[8].mxu0  ;;  %v818_v15 = vpack.c.bf16 %v3857_v10, %v807_v57  ;;  %v3862_v16 = vpack.c.bf16 %v752_v63, %v751_v35  ;;  %v3442_v35 = vld [vmem:[%s3640_s13 + $0x8] sm:$0xff]   ;;  %v3891_v57 = vpop.permute.xlu1 %740 }
 0x124   : > { %768 = vst [vmem:[#allocation2 + $0x48] sm:$0xff] %v755_v9  ;;  %v677_v17 = vadd.f32 %v3020_v14, %v3821_v6  ;;  %v668_v61 = vpop.f32.mrb[9].mxu0  ;;  %v3865_v18 = vld [vmem:[#allocation2 + $0x17] sm:$0xff]  ;;  %v3867_v19 = vld [vmem:[#allocation2 + $0x1f] sm:$0xff]  ;;  %v1457_v20 = vpack.c.bf16 %v755_v9, %v754_v55  ;;  %v3873_v29 = vld [vmem:[#allocation2 + $0x27] sm:$0xff] }
 0x125   : > { %766 = vst [vmem:[#allocation2 + $0x38] sm:$0xff] %v753_v13  ;;  %v669_v23 = vadd.f32 %v3821_v6, %v668_v61  ;;  %v3021_v39 = vpop.f32.mrb[10].mxu0  ;;  %3038 = vmatprep.mubr.bf16.mxu0 %v818_v15  ;;  %v819_v40 = vpack.c.bf16 %v3867_v19, %v3865_v18  ;;  %3165 = vmatpush3.bf16.msra.mxu1 %v3443_v52 }
 0x126   : > { %v1456_v41 = vpack.c.bf16 %v753_v13, %v752_v63  ;;  %v692_v42 = vmax.f32 %v677_v17, 0.0  ;;  %v671_v43 = vpop.f32.mrb[11].mxu0  ;;  %3166 = vmatprep.subr.bf16.mxu1 %v3445_v12  ;;  %v3876_v45 = vpack.c.bf16 %v754_v55, %v753_v13  ;;  %v1281_v52 = vpack.c.bf16 %v3865_v18, %v3857_v10  ;;  %v3449_v13 = vld [vmem:[%s3640_s13 + $0x160] sm:$0xff]   ;;  %v1616_v39 = vld [vmem:[#allocation2 + $0x11] sm:$0xff] }
 0x127   : > { %v690_v50 = vmax.f32 %v669_v23, 0.0  ;;  %v672_v51 = vadd.f32 %v3821_v6, %v671_v43  ;;  %3039 = vmatmul.mubr.bf16.vlgmr.msra.gmra.mrb[12].mxu0 %v819_v40  ;;  %v1282_v54 = vpack.c.bf16 %v3873_v29, %v3867_v19  ;;  %v3444_v6 = vld [vmem:[%s3640_s13 + $0x10] sm:$0xff]   ;;  %v3915_v40 = vld [vmem:[#allocation2 + $0x19] sm:$0xff] }
 0x128   : > { %3154 = vmatprep.mubr.bf16.mxu1 %v1456_v41  ;;  %v3884_v53 = vmul.f32 %v3878_v47, %v692_v42  ;;  %3051 = vmatpush3.bf16.msra.mxu0 %v3807_v0  ;;  %v3451_v42 = vld [vmem:[%s3640_s13 + $0x168] sm:$0xff]   ;;  %v3490_v18 = vld [vmem:[%s3640_s13 + $0x210] sm:$0xff]   ;;  %v3492_v19 = vld [vmem:[%s3640_s13 + $0x220] sm:$0xff]  }
 0x129   : > { %3155 = vmatmul.mubr.bf16.gmra.mrb[4].mxu1 %v1457_v20  ;;  %v756_v55 = vmul.f32 %v3851_v58, %v690_v50  ;;  %v691_v56 = vmax.f32 %v672_v51, 0.0  ;;  %3052 = vmatprep.subr.bf16.mxu0 %v3442_v35  ;;  %v3446_v20 = vld [vmem:[%s3640_s13 + $0x18] sm:$0xff]   ;;  %v1627_v50 = vpack.c.bf16 %v3915_v40, %v1616_v39 }
 0x12a   : > { %3167 = vmatpush3.bf16.msra.mxu1 %v3445_v12  ;;  %771 = vst [vmem:[#allocation2 + $0x60] sm:$0xff] %v3884_v53  ;;  %v3894_v63 = vld [vmem:[#allocation2 + $0x2f] sm:$0xff]  ;;  %v1459_v41 = vpack.c.bf16 %v3884_v53, %v3884_v53 }
 0x12b   : > { %3168 = vmatprep.subr.bf16.mxu1 %v3447_v44  ;;  %769 = vst [vmem:[#allocation2 + $0x50] sm:$0xff] %v756_v55  ;;  %v3897_v0 = vmul.f32 %v3891_v57, %v691_v56  ;;  %v820_v7 = vpack.c.bf16 %v3894_v63, %v3873_v29  ;;  %v3906_v15 = vld [vmem:[#allocation2 + $0x47] sm:$0xff]  ;;  %v3908_v17 = vpack.c.bf16 %v756_v55, %v755_v9 }
 0x12c   : > { %3053 = vmatpush3.bf16.msra.mxu0 %v3442_v35  ;;  %v3902_v14 = vld [vmem:[#allocation2 + $0x37] sm:$0xff]  ;;  %v3904_v12 = vld [vmem:[#allocation2 + $0x3f] sm:$0xff]  ;;  %v3943_v2 = vld [vmem:[#allocation2 + $0x29] sm:$0xff] }
 0x12d   : > { %770 = vst [vmem:[#allocation2 + $0x58] sm:$0xff] %v3897_v0  ;;  %3042 = vmatprep.mubr.bf16.mxu0 %v820_v7  ;;  %3054 = vmatprep.subr.bf16.mxu0 %v3444_v6  ;;  %v821_v61 = vpack.c.bf16 %v3904_v12, %v3902_v14  ;;  %v1458_v23 = vpack.c.bf16 %v3897_v0, %v756_v55  ;;  %v774_v56 = vld [vmem:[#allocation2 + $0x6] sm:$0xff]  ;;  %v775_v7 = vld [vmem:[#allocation2 + $0xe] sm:$0xff] }
 0x12e   : > { %v1804_v35 = vpack.c.bf16 %v3884_v53, %v3897_v0  ;;  %3169 = vmatpush3.bf16.msra.mxu1 %v3447_v44  ;;  %v1283_v9 = vpack.c.bf16 %v3902_v14, %v3894_v63  ;;  %v1284_v43 = vpack.c.bf16 %v3906_v15, %v3904_v12  ;;  %v3448_v44 = vld [vmem:[%s3640_s13 + $0x20] sm:$0xff]   ;;  %v3946_v3 = vld [vmem:[#allocation2 + $0x31] sm:$0xff] }
 0x12f   : > { %3043 = vmatmul.mubr.bf16.gmra.mrb[16].mxu0 %v821_v61  ;;  %3158 = vmatprep.mubr.bf16.mxu1 %v1458_v23  ;;  %v3453_v61 = vld [vmem:[%s3640_s13 + $0x170] sm:$0xff]   ;;  %v3495_v12 = vld [vmem:[%s3640_s13 + $0x238] sm:$0xff]  }
 0x130   : > { %3055 = vmatpush3.bf16.msra.mxu0 %v3444_v6  ;;  %3170 = vmatprep.subr.bf16.mxu1 %v3449_v13  ;;  %v3494_v14 = vld [vmem:[%s3640_s13 + $0x230] sm:$0xff]  }
 0x131   : > { %3056 = vmatprep.subr.bf16.mxu0 %v3446_v20  ;;  %3159 = vmatmul.mubr.bf16.gmra.mrb[8].mxu1 %v1459_v41  ;;  %v785_v41 = vpack.c.bf16 %v775_v7, %v774_v56  ;;  %v3459_v7 = vld [vmem:[%s3640_s13 + $0x188] sm:$0xff]  }
 0x132   : > { %v3928_v51 = vld [vmem:[#allocation2 + $0x4f] sm:$0xff]  ;;  %3171 = vmatpush3.bf16.msra.mxu1 %v3449_v13  ;;  %3178 = vmatprep.mubr.bf16.mxu1 %v1627_v50  ;;  %v3455_v50 = vld [vmem:[%s3640_s13 + $0x178] sm:$0xff]   ;;  %v3975_v31 = vld [vmem:[#allocation2 + $0x61] sm:$0xff] }
 0x133   : > { %v822_v55 = vpack.c.bf16 %v3928_v51, %v3906_v15  ;;  %3172 = vmatprep.subr.bf16.mxu1 %v3451_v42  ;;  %v3450_v13 = vld [vmem:[%s3640_s13 + $0x28] sm:$0xff]   ;;  %v2138_v15 = vld [vmem:[#allocation2 + $0x32] sm:$0xff] }
 0x134   : > { %3057 = vmatpush3.bf16.msra.mxu0 %v3446_v20  ;;  %v3933_v6 = vld [vmem:[#allocation2 + $0x57] sm:$0xff]  ;;  %v3960_v38 = vld [vmem:[#allocation2 + $0x49] sm:$0xff]  ;;  %v1280_v63 = vld [vmem:[#allocation2 + $0x5f] sm:$0xff] }
 0x135   : > { %3046 = vmatprep.mubr.bf16.mxu0 %v822_v55  ;;  %3058 = vmatprep.subr.bf16.mxu0 %v3448_v44  ;;  %v823_v23 = vpack.c.bf16 %v3933_v6, %v3933_v6  ;;  %v3452_v20 = vld [vmem:[%s3640_s13 + $0x30] sm:$0xff]   ;;  %v3457_v55 = vld [vmem:[%s3640_s13 + $0x180] sm:$0xff]  }
 0x136   : > { %3173 = vmatpush3.bf16.msra.mxu1 %v3451_v42  ;;  %v3948_v42 = vld [vmem:[#allocation2 + $0x39] sm:$0xff]  ;;  %v3962_v25 = vld [vmem:[#allocation2 + $0x51] sm:$0xff] }
 0x137   : > { %3047 = vmatmul.mubr.bf16.gmra.mrb[20].mxu0 %v823_v23  ;;  %3174 = vmatprep.subr.bf16.mxu1 %v3453_v61  ;;  %v3456_v23 = vld [vmem:[%s3640_s13 + $0x80] sm:$0xff]  }
 0x138   : > { %3059 = vmatpush3.bf16.msra.mxu0 %v3448_v44  ;;  %3066 = vmatprep.mubr.bf16.mxu0 %v785_v41  ;;  %v3950_v44 = vld [vmem:[#allocation2 + $0x21] sm:$0xff]  ;;  %v3964_v24 = vld [vmem:[#allocation2 + $0x59] sm:$0xff] }
 0x139   : > { %3060 = vmatprep.subr.bf16.mxu0 %v3450_v13  ;;  %v1628_v56 = vpack.c.bf16 %v3943_v2, %v3950_v44  ;;  %v777_v41 = vld [vmem:[#allocation2 + $0x1e] sm:$0xff]  ;;  %v1973_v53 = vpack.c.bf16 %v3950_v44, %v3915_v40  ;;  %v3484_v44 = vld [vmem:[%s3640_s13 + $0xf0] sm:$0xff]  }
 0x13a   : > { %3175 = vmatpush3.bf16.msra.mxu1 %v3453_v61  ;;  %v1629_v61 = vpack.c.bf16 %v3948_v42, %v3946_v3  ;;  %v3487_v40 = vld [vmem:[%s3640_s13 + $0x1f8] sm:$0xff]  }
 0x13b   : > { %3176 = vmatprep.subr.bf16.mxu1 %v3455_v50 }
 0x13c   : > { %3061 = vmatpush3.bf16.msra.mxu0 %v3450_v13  ;;  %v776_v13 = vld [vmem:[#allocation2 + $0x16] sm:$0xff] }
 0x13d   : > { %3062 = vmatprep.subr.bf16.mxu0 %v3452_v20  ;;  %v786_v37 = vpack.c.bf16 %v777_v41, %v776_v13  ;;  %v1631_v13 = vpack.c.bf16 %v3964_v24, %v3962_v25  ;;  %v3460_v41 = vld [vmem:[%s3640_s13 + $0x90] sm:$0xff]  }
 0x13e   : > { %3177 = vmatpush3.bf16.msra.mxu1 %v3455_v50  ;;  %v779_v50 = vld [vmem:[#allocation2 + $0x2e] sm:$0xff] }
 0x13f   : > { %3190 = vmatprep.subr.bf16.mxu1 %v3457_v55 }
 0x140   : > { %3063 = vmatpush3.bf16.msra.mxu0 %v3452_v20  ;;  %v778_v20 = vld [vmem:[#allocation2 + $0x26] sm:$0xff] }
 0x141   : > { %3064 = vmatprep.subr.bf16.mxu0 %v3454_v62  ;;  %3179 = vmatmul.mubr.bf16.vlgmr.msra.gmra.mrb[0].mxu1 %v1628_v56  ;;  %v787_v56 = vpack.c.bf16 %v779_v50, %v778_v20  ;;  %v780_v50 = vld [vmem:[#allocation2 + $0x36] sm:$0xff]  ;;  %v3465_v20 = vld [vmem:[%s3640_s13 + $0x1a0] sm:$0xff]  }
 0x142   : > { %3182 = vmatprep.mubr.bf16.mxu1 %v1629_v61  ;;  %3191 = vmatpush3.bf16.msra.mxu1 %v3457_v55  ;;  %v3966_v61 = vld [vmem:[#allocation2 + $0x41] sm:$0xff]  ;;  %v3463_v55 = vld [vmem:[%s3640_s13 + $0x198] sm:$0xff]  }
 0x143   : > { %3192 = vmatprep.subr.bf16.mxu1 %v3459_v7  ;;  %v1975_v10 = vpack.c.bf16 %v3966_v61, %v3948_v42  ;;  %v1972_v42 = vld [vmem:[#allocation2 + $0x69] sm:$0xff] }
 0x144   : > { %3065 = vmatpush3.bf16.msra.mxu0 %v3454_v62  ;;  %v1630_v62 = vpack.c.bf16 %v3960_v38, %v3966_v61  ;;  %v1978_v29 = vpack.c.bf16 %v1972_v42, %v1972_v42  ;;  %v2140_v61 = vld [vmem:[#allocation2 + $0x42] sm:$0xff] }
 0x145   : > { %3078 = vmatprep.subr.bf16.mxu0 %v3456_v23 }
 0x146   : > { %3193 = vmatpush3.bf16.msra.mxu1 %v3459_v7  ;;  %v781_v7 = vld [vmem:[#allocation2 + $0x3e] sm:$0xff] }
 0x147   : > { %3067 = vmatmul.mubr.bf16.vlgmr.msra.gmra.mrb[12].mxu0 %v786_v37  ;;  %3194 = vmatprep.subr.bf16.mxu1 %v3461_v33  ;;  %v783_v37 = vld [vmem:[#allocation2 + $0x4e] sm:$0xff] }
 0x148   : > { %3070 = vmatprep.mubr.bf16.mxu0 %v787_v56  ;;  %3079 = vmatpush3.bf16.msra.mxu0 %v3456_v23  ;;  %v788_v23 = vpack.c.bf16 %v781_v7, %v780_v50  ;;  %v782_v56 = vld [vmem:[#allocation2 + $0x46] sm:$0xff] }
 0x149   : > { %3080 = vmatprep.subr.bf16.mxu0 %v3458_v32  ;;  %3183 = vmatmul.mubr.bf16.gmra.mrb[4].mxu1 %v1630_v62  ;;  %v789_v39 = vpack.c.bf16 %v783_v37, %v782_v56  ;;  %v1632_v62 = vpack.c.bf16 %v3975_v31, %v3975_v31  ;;  %v3466_v7 = vld [vmem:[%s3640_s13 + $0xa8] sm:$0xff]   ;;  %v3468_v37 = vld [vmem:[%s3640_s13 + $0xb0] sm:$0xff]  }
 0x14a   : > { %3186 = vmatprep.mubr.bf16.mxu1 %v1631_v13  ;;  %3195 = vmatpush3.bf16.msra.mxu1 %v3461_v33  ;;  %v3467_v33 = vld [vmem:[%s3640_s13 + $0x1a8] sm:$0xff]   ;;  %v784_v13 = vld [vmem:[#allocation2 + $0x56] sm:$0xff] }
 0x14b   : > { %3196 = vmatprep.subr.bf16.mxu1 %v3463_v55  ;;  %v790_v50 = vpack.c.bf16 %v784_v13, %v784_v13  ;;  %v3474_v56 = vld [vmem:[%s3640_s13 + $0xc8] sm:$0xff]   ;;  %v3538_v13 = vmov 0.0|0.0  }
 0x14c   : > { %3081 = vmatpush3.bf16.msra.mxu0 %v3458_v32  ;;  %v3464_v32 = vld [vmem:[%s3640_s13 + $0xa0] sm:$0xff]  }
 0x14d   : > { %3082 = vmatprep.subr.bf16.mxu0 %v3460_v41 }
 0x14e   : > { %3197 = vmatpush3.bf16.msra.mxu1 %v3463_v55  ;;  %v3469_v55 = vld [vmem:[%s3640_s13 + $0x1b0] sm:$0xff]  }
 0x14f   : > { %3071 = vmatmul.mubr.bf16.gmra.mrb[16].mxu0 %v788_v23  ;;  %3198 = vmatprep.subr.bf16.mxu1 %v3465_v20  ;;  %v3477_v23 = vld [vmem:[%s3640_s13 + $0x1d0] sm:$0xff]  }
 0x150   : > { %3074 = vmatprep.mubr.bf16.mxu0 %v789_v39  ;;  %3083 = vmatpush3.bf16.msra.mxu0 %v3460_v41  ;;  %v1108_v39 = vpack.c.bf16 %v3833_v21, %v3537_v59  ;;  %v3471_v41 = vld [vmem:[%s3640_s13 + $0x1b8] sm:$0xff]   ;;  %v3475_v59 = vld [vmem:[%s3640_s13 + $0x1c8] sm:$0xff]   ;;  %v3472_v21 = vld [vmem:[%s3640_s13 + $0xc0] sm:$0xff]  }
 0x151   : > { %3084 = vmatprep.subr.bf16.mxu0 %v3462_v30  ;;  %3187 = vmatmul.mubr.bf16.gmra.mrb[8].mxu1 %v1632_v62  ;;  %v3479_v62 = vld [vmem:[%s3640_s13 + $0x1d8] sm:$0xff]  }
 0x152   : > { %3199 = vmatpush3.bf16.msra.mxu1 %v3465_v20  ;;  %3206 = vmatprep.mubr.bf16.mxu1 %v3845_v46  ;;  %v3470_v20 = vld [vmem:[%s3640_s13 + $0xb8] sm:$0xff]  }
 0x153   : > { %3200 = vmatprep.subr.bf16.mxu1 %v3467_v33 }
 0x154   : > { %3085 = vmatpush3.bf16.msra.mxu0 %v3462_v30  ;;  %v3473_v30 = vld [vmem:[%s3640_s13 + $0x1c0] sm:$0xff]  }
 0x155   : > { %3086 = vmatprep.subr.bf16.mxu0 %v3464_v32 }
 0x156   : > { %3201 = vmatpush3.bf16.msra.mxu1 %v3467_v33  ;;  %v3476_v33 = vld [vmem:[%s3640_s13 + $0xd0] sm:$0xff]  }
 0x157   : > { %3075 = vmatmul.mubr.bf16.gmra.mrb[20].mxu0 %v790_v50  ;;  %3202 = vmatprep.subr.bf16.mxu1 %v3469_v55  ;;  %v3488_v50 = vld [vmem:[%s3640_s13 + $0x200] sm:$0xff]  }
 0x158   : > { %3087 = vmatpush3.bf16.msra.mxu0 %v3464_v32  ;;  %3094 = vmatprep.mubr.bf16.mxu0 %v1108_v39  ;;  %v3481_v32 = vld [vmem:[%s3640_s13 + $0x1e0] sm:$0xff]   ;;  %v3489_v39 = vld [vmem:[%s3640_s13 + $0x208] sm:$0xff]  }
 0x159   : > { %3088 = vmatprep.subr.bf16.mxu0 %v3466_v7 }
 0x15a   : > { %3203 = vmatpush3.bf16.msra.mxu1 %v3469_v55  ;;  %v1113_v55 = vpack.c.bf16 %v3897_v0, %v3897_v0  ;;  %v3486_v0 = vld [vmem:[%s3640_s13 + $0xf8] sm:$0xff]  }
 0x15b   : > { %3204 = vmatprep.subr.bf16.mxu1 %v3471_v41 }
 0x15c   : > { %3089 = vmatpush3.bf16.msra.mxu0 %v3466_v7  ;;  %v1974_v7 = vpack.c.bf16 %v3946_v3, %v3943_v2  ;;  %v1976_v2 = vpack.c.bf16 %v3962_v25, %v3960_v38  ;;  %v3491_v3 = vld [vmem:[%s3640_s13 + $0x218] sm:$0xff]   ;;  %v2136_v25 = vld [vmem:[#allocation2 + $0x22] sm:$0xff] }
 0x15d   : > { %3090 = vmatprep.subr.bf16.mxu0 %v3468_v37  ;;  %v3493_v38 = vld [vmem:[%s3640_s13 + $0x228] sm:$0xff]  }
 0x15e   : > { %3205 = vmatpush3.bf16.msra.mxu1 %v3471_v41 }
 0x15f   : > { %3218 = vmatprep.subr.bf16.mxu1 %v3473_v30 }
 0x160   : > { %3091 = vmatpush3.bf16.msra.mxu0 %v3468_v37  ;;  %v2142_v37 = vld [vmem:[#allocation2 + $0x52] sm:$0xff] }
 0x161   : > { %3092 = vmatprep.subr.bf16.mxu0 %v3470_v20  ;;  %3207 = vmatmul.mubr.bf16.vlgmr.msra.gmra.mrb[0].mxu1 %v3862_v16 }
 0x162   : > { %3210 = vmatprep.mubr.bf16.mxu1 %v3876_v45  ;;  %3219 = vmatpush3.bf16.msra.mxu1 %v3473_v30  ;;  %v2143_v30 = vld [vmem:[#allocation2 + $0x5a] sm:$0xff] }
 0x163   : > { %3220 = vmatprep.subr.bf16.mxu1 %v3475_v59 }
 0x164   : > { %3093 = vmatpush3.bf16.msra.mxu0 %v3470_v20  ;;  %v2141_v20 = vld [vmem:[#allocation2 + $0x4a] sm:$0xff] }
 0x165   : > { %3106 = vmatprep.subr.bf16.mxu0 %v3472_v21 }
 0x166   : > { %3221 = vmatpush3.bf16.msra.mxu1 %v3475_v59  ;;  %v2149_v59 = vpack.c.bf16 %v2142_v37, %v2141_v20 }
 0x167   : > { %3095 = vmatmul.mubr.bf16.vlgmr.msra.gmra.mrb[12].mxu0 %v3845_v46  ;;  %3222 = vmatprep.subr.bf16.mxu1 %v3477_v23  ;;  %v3478_v46 = vld [vmem:[%s3640_s13 + $0xd8] sm:$0xff]  }
 0x168   : > { %3098 = vmatprep.mubr.bf16.mxu0 %v3862_v16  ;;  %3107 = vmatpush3.bf16.msra.mxu0 %v3472_v21  ;;  %v3483_v16 = vld [vmem:[%s3640_s13 + $0x1e8] sm:$0xff]  }
 0x169   : > { %3108 = vmatprep.subr.bf16.mxu0 %v3474_v56  ;;  %3211 = vmatmul.mubr.bf16.gmra.mrb[4].mxu1 %v3908_v17  ;;  %v2144_v21 = vld [vmem:[#allocation2 + $0x62] sm:$0xff] }
 0x16a   : > { %3214 = vmatprep.mubr.bf16.mxu1 %v1804_v35  ;;  %3223 = vmatpush3.bf16.msra.mxu1 %v3477_v23  ;;  %v3480_v35 = vld [vmem:[%s3640_s13 + $0xe0] sm:$0xff]   ;;  %v2150_v23 = vpack.c.bf16 %v2144_v21, %v2143_v30  ;;  %v4134_v30 = vunpack.c.l.bf16 %v3677_v28 }
 0x16b   : > { %3224 = vmatprep.subr.bf16.mxu1 %v3479_v62 }
 0x16c   : > { %3109 = vmatpush3.bf16.msra.mxu0 %v3474_v56  ;;  %v2145_v56 = vld [vmem:[#allocation2 + $0x6a] sm:$0xff] }
 0x16d   : > { %3110 = vmatprep.subr.bf16.mxu0 %v3476_v33 }
 0x16e   : > { %3225 = vmatpush3.bf16.msra.mxu1 %v3479_v62  ;;  %v2151_v62 = vpack.c.bf16 %v2145_v56, %v2145_v56  ;;  %v4137_v56 = vunpack.c.h.bf16 %v3674_v27 }
 0x16f   : > { %3099 = vmatmul.mubr.bf16.gmra.mrb[16].mxu0 %v3876_v45  ;;  %3226 = vmatprep.subr.bf16.mxu1 %v3481_v32  ;;  %v3485_v45 = vld [vmem:[%s3640_s13 + $0x1f0] sm:$0xff]  }
 0x170   : > { %3102 = vmatprep.mubr.bf16.mxu0 %v3908_v17  ;;  %3111 = vmatpush3.bf16.msra.mxu0 %v3476_v33  ;;  %v3482_v17 = vld [vmem:[%s3640_s13 + $0xe8] sm:$0xff]  }
 0x171   : > { %3112 = vmatprep.subr.bf16.mxu0 %v3478_v46  ;;  %3215 = vmatmul.mubr.bf16.gmra.mrb[8].mxu1 %v3538_v13 }
 0x172   : > { %3227 = vmatpush3.bf16.msra.mxu1 %v3481_v32  ;;  %3234 = vmatprep.mubr.bf16.mxu1 %v1973_v53 }
 0x173   : > { %3228 = vmatprep.subr.bf16.mxu1 %v3483_v16 }
 0x174   : > { %3113 = vmatpush3.bf16.msra.mxu0 %v3478_v46 }
 0x175   : > { %3114 = vmatprep.subr.bf16.mxu0 %v3480_v35 }
 0x176   : > { %3229 = vmatpush3.bf16.msra.mxu1 %v3483_v16 }
 0x177   : > { %3103 = vmatmul.mubr.bf16.gmra.mrb[20].mxu0 %v1113_v55  ;;  %3230 = vmatprep.subr.bf16.mxu1 %v3485_v45 }
 0x178   : > { %3115 = vmatpush3.bf16.msra.mxu0 %v3480_v35  ;;  %3122 = vmatprep.mubr.bf16.mxu0 %v1281_v52  ;;  %v1977_v52 = vpack.c.bf16 %v3975_v31, %v3964_v24  ;;  %v4129_v24 = vpack.c.bf16 %v3933_v6, %v3928_v51  ;;  %v2137_v51 = vld [vmem:[#allocation2 + $0x2a] sm:$0xff] }
 0x179   : > { %3116 = vmatprep.subr.bf16.mxu0 %v3482_v17  ;;  %v2147_v6 = vpack.c.bf16 %v2138_v15, %v2137_v51 }
 0x17a   : > { %3231 = vmatpush3.bf16.msra.mxu1 %v3485_v45 }
 0x17b   : > { %3232 = vmatprep.subr.bf16.mxu1 %v3487_v40 }
 0x17c   : > { %3117 = vmatpush3.bf16.msra.mxu0 %v3482_v17 }
 0x17d   : > { %3118 = vmatprep.subr.bf16.mxu0 %v3484_v44 }
 0x17e   : > { %3233 = vmatpush3.bf16.msra.mxu1 %v3487_v40 }
 0x17f   : > { %3246 = vmatprep.subr.bf16.mxu1 %v3488_v50 }
 0x180   : > { %3119 = vmatpush3.bf16.msra.mxu0 %v3484_v44 }
 0x181   : > { %3120 = vmatprep.subr.bf16.mxu0 %v3486_v0  ;;  %3235 = vmatmul.mubr.bf16.vlgmr.msra.gmra.mrb[0].mxu1 %v1974_v7 }
 0x182   : > { %3238 = vmatprep.mubr.bf16.mxu1 %v1975_v10  ;;  %3247 = vmatpush3.bf16.msra.mxu1 %v3488_v50 }
 0x183   : > { %3248 = vmatprep.subr.bf16.mxu1 %v3489_v39 }
 0x184   : > { %3121 = vmatpush3.bf16.msra.mxu0 %v3486_v0 }
 0x186   : > { %3249 = vmatpush3.bf16.msra.mxu1 %v3489_v39 }
 0x187   : > { %3123 = vmatmul.mubr.bf16.vlgmr.msra.gmra.mrb[12].mxu0 %v1282_v54  ;;  %3250 = vmatprep.subr.bf16.mxu1 %v3490_v18  ;;  %v2135_v54 = vld [vmem:[#allocation2 + $0x1a] sm:$0xff] }
 0x188   : > { %3126 = vmatprep.mubr.bf16.mxu0 %v1283_v9  ;;  %v2146_v31 = vpack.c.bf16 %v2136_v25, %v2135_v54  ;;  %v1286_v9 = vpack.c.bf16 %v1280_v63, %v1280_v63  ;;  %v4130_v54 = vunpack.c.l.bf16 %v3671_v26  ;;  %v4133_v63 = vunpack.c.h.bf16 %v3659_v22 }
 0x189   : > { %3239 = vmatmul.mubr.bf16.gmra.mrb[4].mxu1 %v1976_v2 }
 0x18a   : > { %3242 = vmatprep.mubr.bf16.mxu1 %v1977_v52  ;;  %3251 = vmatpush3.bf16.msra.mxu1 %v3490_v18 }
 0x18b   : > { %3252 = vmatprep.subr.bf16.mxu1 %v3491_v3 }
 0x18e   : > { %3253 = vmatpush3.bf16.msra.mxu1 %v3491_v3 }
 0x18f   : > { %3127 = vmatmul.mubr.bf16.gmra.mrb[16].mxu0 %v1284_v43  ;;  %3254 = vmatprep.subr.bf16.mxu1 %v3492_v19  ;;  %v2139_v43 = vld [vmem:[#allocation2 + $0x3a] sm:$0xff] }
 0x190   : > { %3130 = vmatprep.mubr.bf16.mxu0 %v4129_v24  ;;  %v2148_v41 = vpack.c.bf16 %v2140_v61, %v2139_v43 }
 0x191   : > { %3243 = vmatmul.mubr.bf16.gmra.mrb[8].mxu1 %v1978_v29 }
 0x192   : > { %3255 = vmatpush3.bf16.msra.mxu1 %v3492_v19  ;;  %3262 = vmatprep.mubr.bf16.mxu1 %v2146_v31  ;;  %v4132_v31 = vunpack.c.l.bf16 %v3659_v22 }
 0x193   : > { %3256 = vmatprep.subr.bf16.mxu1 %v3493_v38 }
 0x196   : > { %3257 = vmatpush3.bf16.msra.mxu1 %v3493_v38  ;;  %v4131_v38 = vunpack.c.h.bf16 %v3671_v26 }
 0x197   : > { %3131 = vmatmul.mubr.bf16.gmra.mrb[20].mxu0 %v1286_v9  ;;  %3258 = vmatprep.subr.bf16.mxu1 %v3494_v14 }
 0x19a   : > { %3259 = vmatpush3.bf16.msra.mxu1 %v3494_v14 }
 0x19b   : > { %3260 = vmatprep.subr.bf16.mxu1 %v3495_v12 }
 0x19e   : > { %3261 = vmatpush3.bf16.msra.mxu1 %v3495_v12 }
 0x1a1   : > { %3263 = vmatmul.mubr.bf16.vlgmr.msra.gmra.mrb[0].mxu1 %v2147_v6 }
 0x1a2   : > { %3266 = vmatprep.mubr.bf16.mxu1 %v2148_v41 }
 0x1a9   : > { %3267 = vmatmul.mubr.bf16.gmra.mrb[4].mxu1 %v2149_v59  ;;  %v4135_v59 = vunpack.c.h.bf16 %v3677_v28 }
 0x1aa   : > { %3270 = vmatprep.mubr.bf16.mxu1 %v2150_v23 }
 0x1b1   : > { %3271 = vmatmul.mubr.bf16.gmra.mrb[8].mxu1 %v2151_v62 }
 0x25a   : > { %v3124_v33 = vpop.f32.mrb[12].mxu0 }
 0x25b   : > { %v1386_v32 = vpop.f32.mrb[13].mxu0 }
 0x25c   : > { %v3125_v46 = vpop.f32.mrb[14].mxu0 }
 0x25d   : > { %v1389_v16 = vpop.f32.mrb[15].mxu0 }
 0x262   : > { %v3128_v53 = vpop.f32.mrb[16].mxu0 }
 0x263   : > { %v1402_v35 = vpop.f32.mrb[17].mxu0 }
 0x264   : > { %v3129_v13 = vpop.f32.mrb[18].mxu0 }
 0x265   : > { %v1405_v45 = vpop.f32.mrb[19].mxu0 }
 0x26a   : > { %v3132_v55 = vpop.f32.mrb[20].mxu0 }
 0x26b   : > { %v1418_v17 = vpop.f32.mrb[21].mxu0 }
 0x26c   : > { %v3133_v40 = vpop.f32.mrb[22].mxu0 }
 0x26d   : > { %v1421_v44 = vpop.f32.mrb[23].mxu0 }
 0x274   : > { %v3264_v50 = vpop.f32.mrb[0].mxu1 }
 0x275   : > { %v3274_v0 = vadd.f32 %v3264_v50, %v3124_v33  ;;  %v2251_v7 = vpop.f32.mrb[1].mxu1  ;;  %v4139_v50 = vunpack.c.l.bf16 %v3723_v48 }
 0x276   : > { %v3275_v39 = vadd.f32 %v2251_v7, %v1386_v32  ;;  %v3265_v10 = vpop.f32.mrb[2].mxu1 }
 0x277   : > { %v2310_v18 = vmul.f32 %v3274_v0, %v3812_v4  ;;  %v3276_v2 = vadd.f32 %v3265_v10, %v3125_v46  ;;  %v2254_v3 = vpop.f32.mrb[3].mxu1 }
 0x278   : > { %v2308_v52 = vmul.f32 %v3275_v39, %v3810_v1  ;;  %v3277_v42 = vadd.f32 %v2254_v3, %v1389_v16 }
 0x279   : > { %v2311_v19 = vmul.f32 %v3276_v2, %v3823_v8  ;;  %v2321_v25 = vadd.f32 %v4130_v54, %v2310_v18 }
 0x27a   : > { %v2309_v29 = vmul.f32 %v3277_v42, %v3814_v5  ;;  %v2319_v4 = vadd.f32 %v4132_v31, %v2308_v52 }
 0x27b   : > { %v2322_v24 = vadd.f32 %v4131_v38, %v2311_v19 }
 0x27c   : > { %v2320_v14 = vadd.f32 %v4133_v63, %v2309_v29  ;;  %v3268_v9 = vpop.f32.mrb[4].mxu1 }
 0x27d   : > { %v2825_v1 = vpack.c.bf16 %v2322_v24, %v2321_v25  ;;  %v3278_v12 = vadd.f32 %v3268_v9, %v3128_v53  ;;  %v2267_v15 = vpop.f32.mrb[5].mxu1 }
 0x27e   : > { %v2820_v8 = vpack.c.bf16 %v2320_v14, %v2319_v4  ;;  %v3279_v43 = vadd.f32 %v2267_v15, %v1402_v35  ;;  %v3269_v5 = vpop.f32.mrb[6].mxu1 }
 0x27f   : > { %2850 = vst [vmem:[%s3645_s9 + $0x8] sm:$0xff] %v2825_v1   ;;  %v2314_v61 = vmul.f32 %v3278_v12, %v3838_v36  ;;  %v3280_v51 = vadd.f32 %v3269_v5, %v3129_v13  ;;  %v2270_v6 = vpop.f32.mrb[7].mxu1  ;;  %v4136_v36 = vunpack.c.l.bf16 %v3674_v27  ;;  %v4138_v27 = vunpack.c.l.bf16 %v3726_v49 }
 0x280   : > { %2821 = vst [vmem:[%s3645_s9] sm:$0xff] %v2820_v8   ;;  %v2312_v26 = vmul.f32 %v3279_v43, %v3826_v11  ;;  %v3281_v41 = vadd.f32 %v2270_v6, %v1405_v45 }
 0x281   : > { %v2315_v22 = vmul.f32 %v3280_v51, %v3853_v60  ;;  %v2325_v20 = vadd.f32 %v4134_v30, %v2314_v61 }
 0x282   : > { %v2313_v37 = vmul.f32 %v3281_v41, %v3835_v34  ;;  %v2323_v23 = vadd.f32 %v4136_v36, %v2312_v26 }
 0x283   : > { %v2326_v21 = vadd.f32 %v4135_v59, %v2315_v22 }
 0x284   : > { %v2324_v62 = vadd.f32 %v4137_v56, %v2313_v37  ;;  %v3272_v33 = vpop.f32.mrb[8].mxu1 }
 0x285   : > { %v2835_v11 = vpack.c.bf16 %v2326_v21, %v2325_v20  ;;  %v3282_v32 = vadd.f32 %v3272_v33, %v3132_v55  ;;  %v2283_v60 = vpop.f32.mrb[9].mxu1 }
 0x286   : > { %v2830_v46 = vpack.c.bf16 %v2324_v62, %v2323_v23  ;;  %v3283_v34 = vadd.f32 %v2283_v60, %v1418_v17  ;;  %v3273_v16 = vpop.f32.mrb[10].mxu1  ;;  %v4140_v17 = vunpack.c.h.bf16 %v3723_v48 }
 0x287   : > { %2852 = vst [vmem:[%s3645_s9 + $0x18] sm:$0xff] %v2835_v11   ;;  %v2318_v53 = vmul.f32 %v3282_v32, %v3878_v47  ;;  %v2286_v28 = vpop.f32.mrb[11].mxu1 }
 0x288   : > { %2851 = vst [vmem:[%s3645_s9 + $0x10] sm:$0xff] %v2830_v46   ;;  %v2316_v35 = vmul.f32 %v3283_v34, %v3851_v58  ;;  %v3284_v13 = vadd.f32 %v2286_v28, %v1421_v44 }
 0x289   : > { %v2329_v45 = vadd.f32 %v2318_v53, %v4138_v27 }
 0x28a   : > { %v2317_v40 = vmul.f32 %v3284_v13, %v3891_v57  ;;  %v2327_v0 = vadd.f32 %v4139_v50, %v2316_v35 }
 0x28b   : > { %v2771_v55 = vpack.c.bf16 %v2329_v45, %v2329_v45 }
 0x28c   : > { %v2328_v7 = vadd.f32 %v4140_v17, %v2317_v40 }
 0x28d   : > { %2385 = vst [vmem:[%s3645_s9 + $0x28] sm:$0xf] %v2771_v55 }
 0x28e   : > { %v2840_v39 = vpack.c.bf16 %v2328_v7, %v2327_v0 }
 0x290   : > { %2853 = vst [vmem:[%s3645_s9 + $0x20] sm:$0xff] %v2840_v39  }
 0x291 PF: > { %s17_s28 = sadd.s32 1, %s3534_s28   ;;  %s4141_s25 = sld [smem:[#allocation3_spill]] }
 0x292   : > { %p14_p8 = scmp.ge.s32.totalorder %s17_s28, 6   ;;  %s4142_s29 = sld [smem:[#allocation4_spill]] }
 0x293   : > { %s4143_s27 = sld [smem:[#allocation5_spill]]  ;;  %s4144_s24 = smov %s3526_s26 }
 0x294   :  { %16 = sbr.rel (!%p14_p8) target bundleno = 3 (0x3), region = 105 }
 0x298   : > { %s4145_s26 = smov %s4142_s29 }

</bundles_post_ra>
